<compile_context>
chip_gen: v5e
topology: v5e:2x2
jax: 0.10.0
libtpu: 0.0.40
codegen_flags: <defaults>
</compile_context>

<pallas_src>
import jax
import jax.numpy as jnp
from jax.experimental import pallas as pl
from jax.experimental.pallas import tpu as pltpu

LATENT_DIM = 100
K_PAD = 128                       # latent dim zero-padded to a tile-aligned 128
IMG_SHAPE = (3, 32, 32)
IMG_FLAT = IMG_SHAPE[0] * IMG_SHAPE[1] * IMG_SHAPE[2]      # 3072
DIMS = (LATENT_DIM, 128, 256, 512, 1024, IMG_FLAT)
BN_EPS = 0.8                      # intentional: eps, see note above
LRELU_SLOPE = 0.2
TN = 512                          # final-layer output tile width -> grid of 6 steps


def _leaky_relu(x):
    return jnp.where(x >= 0, x, LRELU_SLOPE * x)


def generator_kernel(z_ref,
                     w1, b1,
                     w2, b2, g2, be2,
                     w3, b3, g3, be3,
                     w4, b4, g4, be4,
                     w5_tile, b5_tile,
                     out_ref,
                     h_scratch):
    """One grid step = one 512-wide column tile of the final Linear + Tanh.

    Layers 1-4 (including full-batch BatchNorm) run once, at grid step 0, and
    their bf16 result is kept in a VMEM scratch that persists across steps;
    the streamed w5 tiles for later steps are prefetched by the pipeline
    underneath that compute.
    """

    @pl.when(pl.program_id(0) == 0)
    def _():
        x = z_ref[...].astype(jnp.bfloat16)
        h = jnp.dot(x, w1[...], preferred_element_type=jnp.float32) + b1[...]
        h = _leaky_relu(h)

        def lin_bn_lrelu(h, w_ref, b_ref, g_ref, be_ref):
            y = jnp.dot(h.astype(jnp.bfloat16), w_ref[...],
                        preferred_element_type=jnp.float32) + b_ref[...]
            # BatchNorm1d, training mode: full-batch mean / biased variance (f32).
            mu = jnp.mean(y, axis=0, keepdims=True)
            var = jnp.mean(jnp.square(y - mu), axis=0, keepdims=True)
            y_hat = (y - mu) * jax.lax.rsqrt(var + BN_EPS)
            return _leaky_relu(y_hat * g_ref[...] + be_ref[...])

        h = lin_bn_lrelu(h, w2, b2, g2, be2)    # 128  -> 256
        h = lin_bn_lrelu(h, w3, b3, g3, be3)    # 256  -> 512
        h = lin_bn_lrelu(h, w4, b4, g4, be4)    # 512  -> 1024
        h_scratch[...] = h.astype(jnp.bfloat16)

    # Final Linear(1024 -> 3072) + Tanh, one 512-wide tile per grid step.
    out = jnp.dot(h_scratch[...], w5_tile[...],
                  preferred_element_type=jnp.float32) + b5_tile[...]
    out_ref[...] = jnp.tanh(out).astype(out_ref.dtype)


def init_params(key):
    """PyTorch-style Linear init (uniform +-1/sqrt(fan_in)), f32, faithful shapes."""
    params = []
    keys = jax.random.split(key, 2 * (len(DIMS) - 1))
    ki = 0
    for layer in range(len(DIMS) - 1):
        fan_in, fan_out = DIMS[layer], DIMS[layer + 1]
        bound = 1.0 / jnp.sqrt(jnp.float32(fan_in))
        w = jax.random.uniform(keys[ki], (fan_in, fan_out), jnp.float32, -bound, bound)
        ki += 1
        b = jax.random.uniform(keys[ki], (1, fan_out), jnp.float32, -bound, bound)
        ki += 1
        params.append(w)
        params.append(b)
        if layer in (1, 2, 3):                      # BN affine params for blocks 2..4
            params.append(jnp.ones((1, fan_out), jnp.float32))    # gamma
            params.append(jnp.zeros((1, fan_out), jnp.float32))   # beta
    return params  # [w1,b1, w2,b2,g2,be2, w3,b3,g3,be3, w4,b4,g4,be4, w5,b5]


def prepare_params(params):
    """One-time, out-of-forward prep: pad K of w1 to 128 and cast weights to bf16."""
    (w1, b1, w2, b2, g2, be2, w3, b3, g3, be3, w4, b4, g4, be4, w5, b5) = params
    w1p = jnp.pad(w1, ((0, K_PAD - LATENT_DIM), (0, 0))).astype(jnp.bfloat16)
    return (w1p, b1,
            w2.astype(jnp.bfloat16), b2, g2, be2,
            w3.astype(jnp.bfloat16), b3, g3, be3,
            w4.astype(jnp.bfloat16), b4, g4, be4,
            w5.astype(jnp.bfloat16), b5)


@jax.jit
def generator_forward(z, *prepped):
    batch = z.shape[0]
    zp = jnp.pad(z, ((0, 0), (0, K_PAD - LATENT_DIM)))        # tiny, per-call
    n_tiles = IMG_FLAT // TN

    flat_inputs = (zp,) + prepped
    resident = flat_inputs[:-2]                # z, w1..w4 (+biases, BN params): loaded once
    # Resident arrays: full-array blocks with a constant index map -> DMA'd once.
    in_specs = [pl.BlockSpec(a.shape, lambda j: (0, 0)) for a in resident]
    # Streamed arrays: w5 / b5 column tiles advance with the grid (double-buffered).
    in_specs += [pl.BlockSpec((1024, TN), lambda j: (0, j)),
                 pl.BlockSpec((1, TN), lambda j: (0, j))]

    flops = 2 * batch * (K_PAD * 128 + 128 * 256 + 256 * 512 + 512 * 1024
                         + 1024 * IMG_FLAT)
    transcendentals = batch * IMG_FLAT + (256 + 512 + 1024)   # tanh + BN rsqrt
    bytes_accessed = (sum(int(a.size) * a.dtype.itemsize for a in flat_inputs)
                      + batch * IMG_FLAT * 4)

    out_flat = pl.pallas_call(
        generator_kernel,
        out_shape=jax.ShapeDtypeStruct((batch, IMG_FLAT), jnp.float32),
        grid_spec=pltpu.PrefetchScalarGridSpec(
            num_scalar_prefetch=0,
            grid=(n_tiles,),
            in_specs=in_specs,
            out_specs=pl.BlockSpec((batch, TN), lambda j: (0, j)),
            scratch_shapes=[pltpu.VMEM((batch, 1024), jnp.bfloat16)],
        ),
        compiler_params=pltpu.CompilerParams(
            # Scratch carries the layer-4 output from step 0 to later steps,
            # so this grid axis is sequential ("arbitrary"), not parallel.
            dimension_semantics=("arbitrary",),
            vmem_limit_bytes=32 * 1024 * 1024,   # fits v7x's 64 MiB VMEM with headroom
        ),
        cost_estimate=pl.CostEstimate(flops=flops,
                                      transcendentals=transcendentals,
                                      bytes_accessed=bytes_accessed),
    )(*flat_inputs)

    # img.view(B, 3, 32, 32)  (NCHW), as in the PyTorch forward
    return out_flat.reshape(batch, *IMG_SHAPE)


def reference_forward(z, params, *, weight_dtype=jnp.float32):
    """Pure-JAX reference mirroring the PyTorch forward.

    weight_dtype=jnp.float32  -> faithful PyTorch numerics.
    weight_dtype=jnp.bfloat16 -> same mixed-precision scheme as the kernel.
    """
    (w1, b1, w2, b2, g2, be2, w3, b3, g3, be3, w4, b4, g4, be4, w5, b5) = params

    def lrelu(x):
        return jnp.where(x >= 0, x, LRELU_SLOPE * x)

    def bn(y, g, be):
        mu = jnp.mean(y, axis=0, keepdims=True)
        var = jnp.mean(jnp.square(y - mu), axis=0, keepdims=True)
        return (y - mu) * jax.lax.rsqrt(var + BN_EPS) * g + be

    def dot(a, w):
        return jnp.dot(a.astype(weight_dtype), w.astype(weight_dtype),
                       preferred_element_type=jnp.float32)

    h = lrelu(dot(z, w1) + b1)
    h = lrelu(bn(dot(h, w2) + b2, g2, be2))
    h = lrelu(bn(dot(h, w3) + b3, g3, be3))
    h = lrelu(bn(dot(h, w4) + b4, g4, be4))
    out = jnp.tanh(dot(h, w5) + b5)
    return out.reshape(z.shape[0], *IMG_SHAPE)


if __name__ == "__main__":
    key = jax.random.PRNGKey(0)
    k_params, k_z = jax.random.split(key)

    params = init_params(k_params)          # f32, PyTorch-faithful
    prepped = prepare_params(params)        # bf16 weights, padded w1 (one-time)

    batch = 64                              # multiple of 8 sublanes; BN is full-batch
    z = jax.random.normal(k_z, (batch, LATENT_DIM), jnp.float32)

    img = generator_forward(z, *prepped)
    img = jax.block_until_ready(img)

    assert img.shape == (batch, *IMG_SHAPE), img.shape
    assert img.dtype == jnp.float32

    # (1) Kernel vs a pure-JAX reference using the SAME bf16-weight numerics (tight).
    ref_bf16 = reference_forward(z, params, weight_dtype=jnp.bfloat16)
    err_kernel = float(jnp.max(jnp.abs(img - ref_bf16)))
    assert err_kernel < 5e-3, f"kernel vs bf16 reference: max abs err = {err_kernel}"

    # (2) Kernel vs the full-f32 PyTorch-faithful reference (looser: bf16 weights).
    ref_f32 = reference_forward(z, params, weight_dtype=jnp.float32)
    err_f32 = float(jnp.max(jnp.abs(img - ref_f32)))
    assert err_f32 < 1e-1, f"kernel vs f32 reference: max abs err = {err_f32}"

    print("KERNEL_OK")
</pallas_src>

<mosaic_0001>
module attributes {stable_mosaic.version = 11 : i64} {
  func.func @generator_kernel(%arg0: i32, %arg1: memref<64x128xf32, #tpu.memory_space<vmem>>, %arg2: memref<128x128xbf16, #tpu.memory_space<vmem>>, %arg3: memref<1x128xf32, #tpu.memory_space<vmem>>, %arg4: memref<128x256xbf16, #tpu.memory_space<vmem>>, %arg5: memref<1x256xf32, #tpu.memory_space<vmem>>, %arg6: memref<1x256xf32, #tpu.memory_space<vmem>>, %arg7: memref<1x256xf32, #tpu.memory_space<vmem>>, %arg8: memref<256x512xbf16, #tpu.memory_space<vmem>>, %arg9: memref<1x512xf32, #tpu.memory_space<vmem>>, %arg10: memref<1x512xf32, #tpu.memory_space<vmem>>, %arg11: memref<1x512xf32, #tpu.memory_space<vmem>>, %arg12: memref<512x1024xbf16, #tpu.memory_space<vmem>>, %arg13: memref<1x1024xf32, #tpu.memory_space<vmem>>, %arg14: memref<1x1024xf32, #tpu.memory_space<vmem>>, %arg15: memref<1x1024xf32, #tpu.memory_space<vmem>>, %arg16: memref<1024x512xbf16, #tpu.memory_space<vmem>>, %arg17: memref<1x512xf32, #tpu.memory_space<vmem>>, %arg18: memref<64x512xf32, #tpu.memory_space<vmem>>, %arg19: memref<64x1024xbf16, #tpu.memory_space<vmem>>) attributes {dimension_semantics = [#tpu.dimension_semantics<arbitrary>], iteration_bounds = array<i64: 6>, scalar_prefetch = 0 : i64, scratch_operands = 1 : i64, tpu.core_type = #tpu.core_type<tc>, window_params = [{pipeline_mode = #tpu.pipeline_mode<synchronous>, transform_indices = @transform_0, window_bounds = array<i64: 64, 128>}, {pipeline_mode = #tpu.pipeline_mode<synchronous>, transform_indices = @transform_1, window_bounds = array<i64: 128, 128>}, {pipeline_mode = #tpu.pipeline_mode<synchronous>, transform_indices = @transform_2, window_bounds = array<i64: 1, 128>}, {pipeline_mode = #tpu.pipeline_mode<synchronous>, transform_indices = @transform_3, window_bounds = array<i64: 128, 256>}, {pipeline_mode = #tpu.pipeline_mode<synchronous>, transform_indices = @transform_4, window_bounds = array<i64: 1, 256>}, {pipeline_mode = #tpu.pipeline_mode<synchronous>, transform_indices = @transform_5, window_bounds = array<i64: 1, 256>}, {pipeline_mode = #tpu.pipeline_mode<synchronous>, transform_indices = @transform_6, window_bounds = array<i64: 1, 256>}, {pipeline_mode = #tpu.pipeline_mode<synchronous>, transform_indices = @transform_7, window_bounds = array<i64: 256, 512>}, {pipeline_mode = #tpu.pipeline_mode<synchronous>, transform_indices = @transform_8, window_bounds = array<i64: 1, 512>}, {pipeline_mode = #tpu.pipeline_mode<synchronous>, transform_indices = @transform_9, window_bounds = array<i64: 1, 512>}, {pipeline_mode = #tpu.pipeline_mode<synchronous>, transform_indices = @transform_10, window_bounds = array<i64: 1, 512>}, {pipeline_mode = #tpu.pipeline_mode<synchronous>, transform_indices = @transform_11, window_bounds = array<i64: 512, 1024>}, {pipeline_mode = #tpu.pipeline_mode<synchronous>, transform_indices = @transform_12, window_bounds = array<i64: 1, 1024>}, {pipeline_mode = #tpu.pipeline_mode<synchronous>, transform_indices = @transform_13, window_bounds = array<i64: 1, 1024>}, {pipeline_mode = #tpu.pipeline_mode<synchronous>, transform_indices = @transform_14, window_bounds = array<i64: 1, 1024>}, {transform_indices = @transform_15, window_bounds = array<i64: 1024, 512>}, {transform_indices = @transform_16, window_bounds = array<i64: 1, 512>}, {transform_indices = @transform_17, window_bounds = array<i64: 64, 512>}]} {
    %c0_i32 = arith.constant 0 : i32
    %0 = arith.cmpi eq, %arg0, %c0_i32 : i32
    %1 = arith.extui %0 : i1 to i32
    %c0_i32_0 = arith.constant 0 : i32
    %2 = arith.cmpi ne, %1, %c0_i32_0 : i32
    scf.if %2 {
      %c0_8 = arith.constant 0 : index
      %c0_9 = arith.constant 0 : index
      %11 = vector.load %arg1[%c0_8, %c0_9] : memref<64x128xf32, #tpu.memory_space<vmem>>, vector<64x128xf32>
      %12 = arith.truncf %11 : vector<64x128xf32> to vector<64x128xbf16>
      %c0_10 = arith.constant 0 : index
      %c0_11 = arith.constant 0 : index
      %13 = vector.load %arg2[%c0_10, %c0_11] : memref<128x128xbf16, #tpu.memory_space<vmem>>, vector<128x128xbf16>
      %cst_12 = arith.constant dense<0.000000e+00> : vector<64x128xf32>
      %14 = tpu.matmul %12, %13, %cst_12 {dimension_numbers = #tpu.dot_dimension_numbers<[1], [0], [0], [1], [0, 0, 1, 1], [], []>} : vector<64x128xbf16>, vector<128x128xbf16>, vector<64x128xf32> -> vector<64x128xf32>
      %c0_13 = arith.constant 0 : index
      %c0_14 = arith.constant 0 : index
      %15 = vector.load %arg3[%c0_13, %c0_14] : memref<1x128xf32, #tpu.memory_space<vmem>>, vector<1x128xf32>
      %16 = vector.broadcast %15 : vector<1x128xf32> to vector<64x128xf32>
      %17 = arith.addf %14, %16 : vector<64x128xf32>
      %cst_15 = arith.constant 0.000000e+00 : f32
      %18 = vector.broadcast %cst_15 : f32 to vector<64x128xf32>
      %19 = arith.cmpf oge, %17, %18 : vector<64x128xf32>
      %cst_16 = arith.constant 2.000000e-01 : f32
      %20 = vector.broadcast %cst_16 : f32 to vector<64x128xf32>
      %21 = arith.mulf %20, %17 : vector<64x128xf32>
      %22 = arith.select %19, %17, %21 : vector<64x128xi1>, vector<64x128xf32>
      %23 = arith.truncf %22 : vector<64x128xf32> to vector<64x128xbf16>
      %c0_17 = arith.constant 0 : index
      %c0_18 = arith.constant 0 : index
      %24 = vector.load %arg4[%c0_17, %c0_18] : memref<128x256xbf16, #tpu.memory_space<vmem>>, vector<128x256xbf16>
      %cst_19 = arith.constant dense<0.000000e+00> : vector<64x256xf32>
      %25 = tpu.matmul %23, %24, %cst_19 {dimension_numbers = #tpu.dot_dimension_numbers<[1], [0], [0], [1], [0, 0, 1, 1], [], []>} : vector<64x128xbf16>, vector<128x256xbf16>, vector<64x256xf32> -> vector<64x256xf32>
      %c0_20 = arith.constant 0 : index
      %c0_21 = arith.constant 0 : index
      %26 = vector.load %arg5[%c0_20, %c0_21] : memref<1x256xf32, #tpu.memory_space<vmem>>, vector<1x256xf32>
      %27 = vector.broadcast %26 : vector<1x256xf32> to vector<64x256xf32>
      %28 = arith.addf %25, %27 : vector<64x256xf32>
      %cst_22 = arith.constant dense<0.000000e+00> : vector<256xf32>
      %29 = vector.multi_reduction <add>, %28, %cst_22 [0] : vector<64x256xf32> to vector<256xf32>
      %30 = vector.shape_cast %29 : vector<256xf32> to vector<1x256xf32>
      %cst_23 = arith.constant 6.400000e+01 : f32
      %31 = vector.broadcast %cst_23 : f32 to vector<1x256xf32>
      %32 = arith.divf %30, %31 : vector<1x256xf32>
      %33 = vector.broadcast %32 : vector<1x256xf32> to vector<64x256xf32>
      %34 = arith.subf %28, %33 : vector<64x256xf32>
      %35 = arith.mulf %34, %34 : vector<64x256xf32>
      %cst_24 = arith.constant dense<0.000000e+00> : vector<256xf32>
      %36 = vector.multi_reduction <add>, %35, %cst_24 [0] : vector<64x256xf32> to vector<256xf32>
      %37 = vector.shape_cast %36 : vector<256xf32> to vector<1x256xf32>
      %cst_25 = arith.constant 6.400000e+01 : f32
      %38 = vector.broadcast %cst_25 : f32 to vector<1x256xf32>
      %39 = arith.divf %37, %38 : vector<1x256xf32>
      %40 = vector.broadcast %32 : vector<1x256xf32> to vector<64x256xf32>
      %41 = arith.subf %28, %40 : vector<64x256xf32>
      %cst_26 = arith.constant 8.000000e-01 : f32
      %42 = vector.broadcast %cst_26 : f32 to vector<1x256xf32>
      %43 = arith.addf %39, %42 : vector<1x256xf32>
      %44 = math.rsqrt %43 : vector<1x256xf32>
      %45 = vector.broadcast %44 : vector<1x256xf32> to vector<64x256xf32>
      %46 = arith.mulf %41, %45 : vector<64x256xf32>
      %c0_27 = arith.constant 0 : index
      %c0_28 = arith.constant 0 : index
      %47 = vector.load %arg6[%c0_27, %c0_28] : memref<1x256xf32, #tpu.memory_space<vmem>>, vector<1x256xf32>
      %48 = vector.broadcast %47 : vector<1x256xf32> to vector<64x256xf32>
      %49 = arith.mulf %46, %48 : vector<64x256xf32>
      %c0_29 = arith.constant 0 : index
      %c0_30 = arith.constant 0 : index
      %50 = vector.load %arg7[%c0_29, %c0_30] : memref<1x256xf32, #tpu.memory_space<vmem>>, vector<1x256xf32>
      %51 = vector.broadcast %50 : vector<1x256xf32> to vector<64x256xf32>
      %52 = arith.addf %49, %51 : vector<64x256xf32>
      %cst_31 = arith.constant 0.000000e+00 : f32
      %53 = vector.broadcast %cst_31 : f32 to vector<64x256xf32>
      %54 = arith.cmpf oge, %52, %53 : vector<64x256xf32>
      %cst_32 = arith.constant 2.000000e-01 : f32
      %55 = vector.broadcast %cst_32 : f32 to vector<64x256xf32>
      %56 = arith.mulf %55, %52 : vector<64x256xf32>
      %57 = arith.select %54, %52, %56 : vector<64x256xi1>, vector<64x256xf32>
      %58 = arith.truncf %57 : vector<64x256xf32> to vector<64x256xbf16>
      %c0_33 = arith.constant 0 : index
      %c0_34 = arith.constant 0 : index
      %59 = vector.load %arg8[%c0_33, %c0_34] : memref<256x512xbf16, #tpu.memory_space<vmem>>, vector<256x512xbf16>
      %cst_35 = arith.constant dense<0.000000e+00> : vector<64x512xf32>
      %60 = tpu.matmul %58, %59, %cst_35 {dimension_numbers = #tpu.dot_dimension_numbers<[1], [0], [0], [1], [0, 0, 1, 1], [], []>} : vector<64x256xbf16>, vector<256x512xbf16>, vector<64x512xf32> -> vector<64x512xf32>
      %c0_36 = arith.constant 0 : index
      %c0_37 = arith.constant 0 : index
      %61 = vector.load %arg9[%c0_36, %c0_37] : memref<1x512xf32, #tpu.memory_space<vmem>>, vector<1x512xf32>
      %62 = vector.broadcast %61 : vector<1x512xf32> to vector<64x512xf32>
      %63 = arith.addf %60, %62 : vector<64x512xf32>
      %cst_38 = arith.constant dense<0.000000e+00> : vector<512xf32>
      %64 = vector.multi_reduction <add>, %63, %cst_38 [0] : vector<64x512xf32> to vector<512xf32>
      %65 = vector.shape_cast %64 : vector<512xf32> to vector<1x512xf32>
      %cst_39 = arith.constant 6.400000e+01 : f32
      %66 = vector.broadcast %cst_39 : f32 to vector<1x512xf32>
      %67 = arith.divf %65, %66 : vector<1x512xf32>
      %68 = vector.broadcast %67 : vector<1x512xf32> to vector<64x512xf32>
      %69 = arith.subf %63, %68 : vector<64x512xf32>
      %70 = arith.mulf %69, %69 : vector<64x512xf32>
      %cst_40 = arith.constant dense<0.000000e+00> : vector<512xf32>
      %71 = vector.multi_reduction <add>, %70, %cst_40 [0] : vector<64x512xf32> to vector<512xf32>
      %72 = vector.shape_cast %71 : vector<512xf32> to vector<1x512xf32>
      %cst_41 = arith.constant 6.400000e+01 : f32
      %73 = vector.broadcast %cst_41 : f32 to vector<1x512xf32>
      %74 = arith.divf %72, %73 : vector<1x512xf32>
      %75 = vector.broadcast %67 : vector<1x512xf32> to vector<64x512xf32>
      %76 = arith.subf %63, %75 : vector<64x512xf32>
      %cst_42 = arith.constant 8.000000e-01 : f32
      %77 = vector.broadcast %cst_42 : f32 to vector<1x512xf32>
      %78 = arith.addf %74, %77 : vector<1x512xf32>
      %79 = math.rsqrt %78 : vector<1x512xf32>
      %80 = vector.broadcast %79 : vector<1x512xf32> to vector<64x512xf32>
      %81 = arith.mulf %76, %80 : vector<64x512xf32>
      %c0_43 = arith.constant 0 : index
      %c0_44 = arith.constant 0 : index
      %82 = vector.load %arg10[%c0_43, %c0_44] : memref<1x512xf32, #tpu.memory_space<vmem>>, vector<1x512xf32>
      %83 = vector.broadcast %82 : vector<1x512xf32> to vector<64x512xf32>
      %84 = arith.mulf %81, %83 : vector<64x512xf32>
      %c0_45 = arith.constant 0 : index
      %c0_46 = arith.constant 0 : index
      %85 = vector.load %arg11[%c0_45, %c0_46] : memref<1x512xf32, #tpu.memory_space<vmem>>, vector<1x512xf32>
      %86 = vector.broadcast %85 : vector<1x512xf32> to vector<64x512xf32>
      %87 = arith.addf %84, %86 : vector<64x512xf32>
      %cst_47 = arith.constant 0.000000e+00 : f32
      %88 = vector.broadcast %cst_47 : f32 to vector<64x512xf32>
      %89 = arith.cmpf oge, %87, %88 : vector<64x512xf32>
      %cst_48 = arith.constant 2.000000e-01 : f32
      %90 = vector.broadcast %cst_48 : f32 to vector<64x512xf32>
      %91 = arith.mulf %90, %87 : vector<64x512xf32>
      %92 = arith.select %89, %87, %91 : vector<64x512xi1>, vector<64x512xf32>
      %93 = arith.truncf %92 : vector<64x512xf32> to vector<64x512xbf16>
      %c0_49 = arith.constant 0 : index
      %c0_50 = arith.constant 0 : index
      %94 = vector.load %arg12[%c0_49, %c0_50] : memref<512x1024xbf16, #tpu.memory_space<vmem>>, vector<512x1024xbf16>
      %cst_51 = arith.constant dense<0.000000e+00> : vector<64x1024xf32>
      %95 = tpu.matmul %93, %94, %cst_51 {dimension_numbers = #tpu.dot_dimension_numbers<[1], [0], [0], [1], [0, 0, 1, 1], [], []>} : vector<64x512xbf16>, vector<512x1024xbf16>, vector<64x1024xf32> -> vector<64x1024xf32>
      %c0_52 = arith.constant 0 : index
      %c0_53 = arith.constant 0 : index
      %96 = vector.load %arg13[%c0_52, %c0_53] : memref<1x1024xf32, #tpu.memory_space<vmem>>, vector<1x1024xf32>
      %97 = vector.broadcast %96 : vector<1x1024xf32> to vector<64x1024xf32>
      %98 = arith.addf %95, %97 : vector<64x1024xf32>
      %cst_54 = arith.constant dense<0.000000e+00> : vector<1024xf32>
      %99 = vector.multi_reduction <add>, %98, %cst_54 [0] : vector<64x1024xf32> to vector<1024xf32>
      %100 = vector.shape_cast %99 : vector<1024xf32> to vector<1x1024xf32>
      %cst_55 = arith.constant 6.400000e+01 : f32
      %101 = vector.broadcast %cst_55 : f32 to vector<1x1024xf32>
      %102 = arith.divf %100, %101 : vector<1x1024xf32>
      %103 = vector.broadcast %102 : vector<1x1024xf32> to vector<64x1024xf32>
      %104 = arith.subf %98, %103 : vector<64x1024xf32>
      %105 = arith.mulf %104, %104 : vector<64x1024xf32>
      %cst_56 = arith.constant dense<0.000000e+00> : vector<1024xf32>
      %106 = vector.multi_reduction <add>, %105, %cst_56 [0] : vector<64x1024xf32> to vector<1024xf32>
      %107 = vector.shape_cast %106 : vector<1024xf32> to vector<1x1024xf32>
      %cst_57 = arith.constant 6.400000e+01 : f32
      %108 = vector.broadcast %cst_57 : f32 to vector<1x1024xf32>
      %109 = arith.divf %107, %108 : vector<1x1024xf32>
      %110 = vector.broadcast %102 : vector<1x1024xf32> to vector<64x1024xf32>
      %111 = arith.subf %98, %110 : vector<64x1024xf32>
      %cst_58 = arith.constant 8.000000e-01 : f32
      %112 = vector.broadcast %cst_58 : f32 to vector<1x1024xf32>
      %113 = arith.addf %109, %112 : vector<1x1024xf32>
      %114 = math.rsqrt %113 : vector<1x1024xf32>
      %115 = vector.broadcast %114 : vector<1x1024xf32> to vector<64x1024xf32>
      %116 = arith.mulf %111, %115 : vector<64x1024xf32>
      %c0_59 = arith.constant 0 : index
      %c0_60 = arith.constant 0 : index
      %117 = vector.load %arg14[%c0_59, %c0_60] : memref<1x1024xf32, #tpu.memory_space<vmem>>, vector<1x1024xf32>
      %118 = vector.broadcast %117 : vector<1x1024xf32> to vector<64x1024xf32>
      %119 = arith.mulf %116, %118 : vector<64x1024xf32>
      %c0_61 = arith.constant 0 : index
      %c0_62 = arith.constant 0 : index
      %120 = vector.load %arg15[%c0_61, %c0_62] : memref<1x1024xf32, #tpu.memory_space<vmem>>, vector<1x1024xf32>
      %121 = vector.broadcast %120 : vector<1x1024xf32> to vector<64x1024xf32>
      %122 = arith.addf %119, %121 : vector<64x1024xf32>
      %cst_63 = arith.constant 0.000000e+00 : f32
      %123 = vector.broadcast %cst_63 : f32 to vector<64x1024xf32>
      %124 = arith.cmpf oge, %122, %123 : vector<64x1024xf32>
      %cst_64 = arith.constant 2.000000e-01 : f32
      %125 = vector.broadcast %cst_64 : f32 to vector<64x1024xf32>
      %126 = arith.mulf %125, %122 : vector<64x1024xf32>
      %127 = arith.select %124, %122, %126 : vector<64x1024xi1>, vector<64x1024xf32>
      %128 = arith.truncf %127 : vector<64x1024xf32> to vector<64x1024xbf16>
      %c0_65 = arith.constant 0 : index
      %c0_66 = arith.constant 0 : index
      %129 = vector.load %arg19[%c0_65, %c0_66] : memref<64x1024xbf16, #tpu.memory_space<vmem>>, vector<64x1024xbf16>
      tpu.vector_store %arg19[%c0_65, %c0_66], %128 {strides = array<i32>} : memref<64x1024xbf16, #tpu.memory_space<vmem>>, vector<64x1024xbf16>,
    } else {
    }
    %c0 = arith.constant 0 : index
    %c0_1 = arith.constant 0 : index
    %3 = vector.load %arg19[%c0, %c0_1] : memref<64x1024xbf16, #tpu.memory_space<vmem>>, vector<64x1024xbf16>
    %c0_2 = arith.constant 0 : index
    %c0_3 = arith.constant 0 : index
    %4 = vector.load %arg16[%c0_2, %c0_3] : memref<1024x512xbf16, #tpu.memory_space<vmem>>, vector<1024x512xbf16>
    %cst = arith.constant dense<0.000000e+00> : vector<64x512xf32>
    %5 = tpu.matmul %3, %4, %cst {dimension_numbers = #tpu.dot_dimension_numbers<[1], [0], [0], [1], [0, 0, 1, 1], [], []>} : vector<64x1024xbf16>, vector<1024x512xbf16>, vector<64x512xf32> -> vector<64x512xf32>
    %c0_4 = arith.constant 0 : index
    %c0_5 = arith.constant 0 : index
    %6 = vector.load %arg17[%c0_4, %c0_5] : memref<1x512xf32, #tpu.memory_space<vmem>>, vector<1x512xf32>
    %7 = vector.broadcast %6 : vector<1x512xf32> to vector<64x512xf32>
    %8 = arith.addf %5, %7 : vector<64x512xf32>
    %9 = math.tanh %8 : vector<64x512xf32>
    %c0_6 = arith.constant 0 : index
    %c0_7 = arith.constant 0 : index
    %10 = vector.load %arg18[%c0_6, %c0_7] : memref<64x512xf32, #tpu.memory_space<vmem>>, vector<64x512xf32>
    tpu.vector_store %arg18[%c0_6, %c0_7], %9 {strides = array<i32>} : memref<64x512xf32, #tpu.memory_space<vmem>>, vector<64x512xf32>,
    return
  }
  func.func @transform_0(%arg0: i32) -> (i32, i32) {
    %c0_i32 = arith.constant 0 : i32
    %c0_i32_0 = arith.constant 0 : i32
    %c0_i32_1 = arith.constant 0 : i32
    return %c0_i32, %c0_i32_0 : i32, i32
  }
  func.func @transform_1(%arg0: i32) -> (i32, i32) {
    %c0_i32 = arith.constant 0 : i32
    %c0_i32_0 = arith.constant 0 : i32
    %c0_i32_1 = arith.constant 0 : i32
    return %c0_i32, %c0_i32_0 : i32, i32
  }
  func.func @transform_2(%arg0: i32) -> (i32, i32) {
    %c0_i32 = arith.constant 0 : i32
    %c0_i32_0 = arith.constant 0 : i32
    %c0_i32_1 = arith.constant 0 : i32
    return %c0_i32, %c0_i32_0 : i32, i32
  }
  func.func @transform_3(%arg0: i32) -> (i32, i32) {
    %c0_i32 = arith.constant 0 : i32
    %c0_i32_0 = arith.constant 0 : i32
    %c0_i32_1 = arith.constant 0 : i32
    return %c0_i32, %c0_i32_0 : i32, i32
  }
  func.func @transform_4(%arg0: i32) -> (i32, i32) {
    %c0_i32 = arith.constant 0 : i32
    %c0_i32_0 = arith.constant 0 : i32
    %c0_i32_1 = arith.constant 0 : i32
    return %c0_i32, %c0_i32_0 : i32, i32
  }
  func.func @transform_5(%arg0: i32) -> (i32, i32) {
    %c0_i32 = arith.constant 0 : i32
    %c0_i32_0 = arith.constant 0 : i32
    %c0_i32_1 = arith.constant 0 : i32
    return %c0_i32, %c0_i32_0 : i32, i32
  }
  func.func @transform_6(%arg0: i32) -> (i32, i32) {
    %c0_i32 = arith.constant 0 : i32
    %c0_i32_0 = arith.constant 0 : i32
    %c0_i32_1 = arith.constant 0 : i32
    return %c0_i32, %c0_i32_0 : i32, i32
  }
  func.func @transform_7(%arg0: i32) -> (i32, i32) {
    %c0_i32 = arith.constant 0 : i32
    %c0_i32_0 = arith.constant 0 : i32
    %c0_i32_1 = arith.constant 0 : i32
    return %c0_i32, %c0_i32_0 : i32, i32
  }
  func.func @transform_8(%arg0: i32) -> (i32, i32) {
    %c0_i32 = arith.constant 0 : i32
    %c0_i32_0 = arith.constant 0 : i32
    %c0_i32_1 = arith.constant 0 : i32
    return %c0_i32, %c0_i32_0 : i32, i32
  }
  func.func @transform_9(%arg0: i32) -> (i32, i32) {
    %c0_i32 = arith.constant 0 : i32
    %c0_i32_0 = arith.constant 0 : i32
    %c0_i32_1 = arith.constant 0 : i32
    return %c0_i32, %c0_i32_0 : i32, i32
  }
  func.func @transform_10(%arg0: i32) -> (i32, i32) {
    %c0_i32 = arith.constant 0 : i32
    %c0_i32_0 = arith.constant 0 : i32
    %c0_i32_1 = arith.constant 0 : i32
    return %c0_i32, %c0_i32_0 : i32, i32
  }
  func.func @transform_11(%arg0: i32) -> (i32, i32) {
    %c0_i32 = arith.constant 0 : i32
    %c0_i32_0 = arith.constant 0 : i32
    %c0_i32_1 = arith.constant 0 : i32
    return %c0_i32, %c0_i32_0 : i32, i32
  }
  func.func @transform_12(%arg0: i32) -> (i32, i32) {
    %c0_i32 = arith.constant 0 : i32
    %c0_i32_0 = arith.constant 0 : i32
    %c0_i32_1 = arith.constant 0 : i32
    return %c0_i32, %c0_i32_0 : i32, i32
  }
  func.func @transform_13(%arg0: i32) -> (i32, i32) {
    %c0_i32 = arith.constant 0 : i32
    %c0_i32_0 = arith.constant 0 : i32
    %c0_i32_1 = arith.constant 0 : i32
    return %c0_i32, %c0_i32_0 : i32, i32
  }
  func.func @transform_14(%arg0: i32) -> (i32, i32) {
    %c0_i32 = arith.constant 0 : i32
    %c0_i32_0 = arith.constant 0 : i32
    %c0_i32_1 = arith.constant 0 : i32
    return %c0_i32, %c0_i32_0 : i32, i32
  }
  func.func @transform_15(%arg0: i32) -> (i32, i32) {
    %c0_i32 = arith.constant 0 : i32
    %c0_i32_0 = arith.constant 0 : i32
    return %c0_i32, %arg0 : i32, i32
  }
  func.func @transform_16(%arg0: i32) -> (i32, i32) {
    %c0_i32 = arith.constant 0 : i32
    %c0_i32_0 = arith.constant 0 : i32
    return %c0_i32, %arg0 : i32, i32
  }
  func.func @transform_17(%arg0: i32) -> (i32, i32) {
    %c0_i32 = arith.constant 0 : i32
    %c0_i32_0 = arith.constant 0 : i32
    return %c0_i32, %arg0 : i32, i32
  }
}

</mosaic_0001>

<bundles_post_ra>
// kernel: generator_forward.1
= control target key start
LH: loop header
LB: loop body
LE: loop exit
PB: predicated region body
PF: predicated region fallthrough
CT: control target
= control target key end

     0   :  { %s16884_s0 = inlined_call_operand.vmem [shape: f32[64,128], index: 0, kind: input, shape index: {}]   ;;  %s16885_s1 = inlined_call_operand.hbm [shape: bf16[128,128], index: 1, kind: input, shape index: {}]   ;;  %s16886_s2 = inlined_call_operand.hbm [shape: f32[1,128], index: 2, kind: input, shape index: {}]   ;;  %s16887_s3 = inlined_call_operand.hbm [shape: bf16[128,256], index: 3, kind: input, shape index: {}]   ;;  %s16888_s4 = inlined_call_operand.hbm [shape: f32[1,256], index: 4, kind: input, shape index: {}]   ;;  %s16889_s5 = inlined_call_operand.hbm [shape: f32[1,256], index: 5, kind: input, shape index: {}]   ;;  %s16890_s6 = inlined_call_operand.hbm [shape: f32[1,256], index: 6, kind: input, shape index: {}]   ;;  %s16891_s7 = inlined_call_operand.hbm [shape: bf16[256,512], index: 7, kind: input, shape index: {}]   ;;  %s16892_s8 = inlined_call_operand.hbm [shape: f32[1,512], index: 8, kind: input, shape index: {}]   ;;  %s16893_s9 = inlined_call_operand.hbm [shape: f32[1,512], index: 9, kind: input, shape index: {}]   ;;  %s16894_s10 = inlined_call_operand.hbm [shape: f32[1,512], index: 10, kind: input, shape index: {}]   ;;  %s16895_s11 = inlined_call_operand.hbm [shape: bf16[512,1024], index: 11, kind: input, shape index: {}]   ;;  %s16896_s12 = inlined_call_operand.hbm [shape: f32[1,1024], index: 12, kind: input, shape index: {}]   ;;  %s16897_s13 = inlined_call_operand.hbm [shape: f32[1,1024], index: 13, kind: input, shape index: {}]   ;;  %s16898_s14 = inlined_call_operand.hbm [shape: f32[1,1024], index: 14, kind: input, shape index: {}]   ;;  %s16899_s15 = inlined_call_operand.hbm [shape: bf16[1024,3072], index: 15, kind: input, shape index: {}]   ;;  %s16900_s16 = inlined_call_operand.hbm [shape: f32[1,3072], index: 16, kind: input, shape index: {}]   ;;  %s16901_s17 = inlined_call_operand.vmem [shape: f32[64,3072], index: 17, kind: output, shape index: {}]  }
   0x1   :  { %16982 = sst [smem:[#allocation84_spill]] %s16884_s0 }
   0x2   :  { %16983 = sst [smem:[#allocation85_spill]] %s16885_s1 }
   0x3   :  { %16984 = sst [smem:[#allocation86_spill]] %s16886_s2 }
   0x4   :  { %16985 = sst [smem:[#allocation87_spill]] %s16887_s3 }
   0x5   :  { %16986 = sst [smem:[#allocation88_spill]] %s16888_s4 }
   0x6   :  { %16987 = sst [smem:[#allocation89_spill]] %s16890_s6 }
   0x7   :  { %16988 = sst [smem:[#allocation90_spill]] %s16892_s8 }
   0x8   :  { %16989 = sst [smem:[#allocation91_spill]] %s16894_s10 }
   0x9   :  { %16990 = sst [smem:[#allocation92_spill]] %s16895_s11 }
   0xa   :  { %16991 = sst [smem:[#allocation93_spill]] %s16896_s12 }
   0xb   :  { %16992 = sst [smem:[#allocation94_spill]] %s16897_s13 }
   0xc   :  { %16993 = sst [smem:[#allocation95_spill]] %s16898_s14 }
   0xd   :  { %16994 = sst [smem:[#allocation96_spill]] %s16899_s15 }
   0xe   :  { %16995 = sst [smem:[#allocation97_spill]] %s16900_s16 }
   0xf   :  { %16996 = sst [smem:[#allocation98_spill]] %s16901_s17 }
  0x10   :  { %22 = vsyncpa [#allocation4], 0 }
  0x11   :  { %23 = vsyncpa [#allocation6], 0 }
  0x12   :  { %24 = vsyncpa [#allocation9], 0 }
  0x13   :  { %25 = vsyncpa [#allocation12], 0 }
  0x14   :  { %26 = vsyncpa [#allocation15], 0 }
  0x15   :  { %27 = vsyncpa [#allocation18], 0 }
  0x16   :  { %28 = vsyncpa [#allocation21], 0 }
  0x17   :  { %29 = vsyncpa [#allocation24], 0  ;;  %s13053_s24 = smov 0   ;;  %s13055_s25 = smov 0  }
  0x18   :  { %s13057_s26 = smov 0   ;;  %s13059_s27 = smov 0  }
  0x19 LB: > { %s16997_s0 = sld [smem:[#allocation85_spill]]  ;;  %s13077_s18 = sadd.s32 4294967295, %s12937_s27   ;;  %s12937_s27 = sphi %s13059_s27, %s17203_s27   ;;  %s12933_s26 = sphi %s13057_s26, %s17202_s26   ;;  %s12929_s25 = sphi %s13055_s25, %s17201_s25   ;;  %s12925_s24 = sphi %s13053_s24, %s17200_s24  }
  0x1a   : > { %p8862_p0 = scmp.ge.s32.totalorder %s12937_s27, 1  ;;  %p371_p1 = scmp.eq.s32.totalorder %s13077_s18, 0 }
  0x1b   : > { %p433_p2 = scmp.lt.s32.totalorder %s12937_s27, 7  ;;  %s12939_s1 = smov [#allocation3]  }
  0x1c   : > { %s449_s20 = sshll.u32 %s12939_s1, 4  ;;  %s17000_s2 = sld [smem:[#allocation86_spill]]  ;;  %s450_s20 = int_to_ptr.vmem [resolvable:$true] %s449_s20 }
  0x1d   : > { %p13083_p4 = pnand %p8862_p0, %p433_p2  ;;  %s17002_s4 = sld [smem:[#allocation88_spill]] }
  0x1e   : > { %s12940_s17 = smov [#allocation5]   ;;  %s12941_s16 = smov 64  }
  0x1f   : > { %s447_s30 = sshll.u32 %s16997_s0, 4  ;;  %p12153_p5 = pneg %p13083_p4  ;;  %s448_s30 = int_to_ptr.hbm [resolvable:$true] %s447_s30 }
  0x20   : > { %s16998_s19 = scalar_select %p13083_p4, 1, 0 }
  0x21   : > { %p13094_p6 = pnand %p12153_p5, %p371_p1  ;;  %s12942_s14 = smov 4  }
  0x22   : > { %16999 = sst [smem:[#allocation37_spill]] %s16998_s19  ;;  %s462_s23 = sshll.u32 %s17000_s2, 4  ;;  %s463_s23 = int_to_ptr.hbm [resolvable:$true] %s462_s23 }
  0x23   : > { %s488_s1 = sshll.u32 %s17002_s4, 4  ;;  %s464_s19 = sshll.u32 %s12940_s17, 4  ;;  %s465_s19 = int_to_ptr.vmem [resolvable:$true] %s464_s19  ;;  %s489_s1 = int_to_ptr.hbm [resolvable:$true] %s488_s1 }
  0x24   : > { %12156 = dma.hbm_to_vmem [thread:$0]  (!%p13094_p6), %s448_s30, 1024, %s450_s20, [#allocation4], %s12941_s16, %s12941_s16, %s12942_s14  }
  0x25   : > { %12159 = dma.hbm_to_vmem [thread:$0]  (!%p13094_p6), %s463_s23, 16, %s465_s19, [#allocation6]  }
  0x26   : > { %s17003_s6 = sld [smem:[#allocation89_spill]]  ;;  %s12943_s13 = smov [#allocation8]  }
  0x27   : > { %s490_s11 = sshll.u32 %s12943_s13, 4  ;;  %s12944_s17 = smov [#allocation11]   ;;  %s491_s11 = int_to_ptr.vmem [resolvable:$true] %s490_s11 }
  0x28   : > { %12165 = dma.hbm_to_vmem [thread:$0]  (!%p13094_p6), %s489_s1, 32, %s491_s11, [#allocation9]  }
  0x29   : > { %s514_s29 = sshll.u32 %s12944_s17, 4  ;;  %s17004_s8 = sld [smem:[#allocation90_spill]]  ;;  %s515_s29 = int_to_ptr.vmem [resolvable:$true] %s514_s29 }
  0x2a   : > { %s17005_s10 = sld [smem:[#allocation91_spill]]  ;;  %s12945_s19 = smov [#allocation14]  }
  0x2b   : > { %s540_s11 = sshll.u32 %s12945_s19, 4  ;;  %s12946_s4 = smov [#allocation17]   ;;  %s541_s11 = int_to_ptr.vmem [resolvable:$true] %s540_s11 }
  0x2c   : > { %s512_s2 = sshll.u32 %s17003_s6, 4  ;;  %s17006_s12 = sld [smem:[#allocation93_spill]]  ;;  %s513_s2 = int_to_ptr.hbm [resolvable:$true] %s512_s2 }
  0x2d   : > { %12171 = dma.hbm_to_vmem [thread:$0]  (!%p13094_p6), %s513_s2, 32, %s515_s29, [#allocation12]  }
  0x2e   : > { %s564_s2 = sshll.u32 %s12946_s4, 4  ;;  %s12947_s21 = smov [#allocation20]   ;;  %s565_s2 = int_to_ptr.vmem [resolvable:$true] %s564_s2 }
  0x2f   : > { %s538_s14 = sshll.u32 %s17004_s8, 4  ;;  %s590_s22 = sshll.u32 %s12947_s21, 4  ;;  %s539_s14 = int_to_ptr.hbm [resolvable:$true] %s538_s14  ;;  %s591_s22 = int_to_ptr.vmem [resolvable:$true] %s590_s22 }
  0x30   : > { %s562_s13 = sshll.u32 %s17005_s10, 4  ;;  %s13128_s17 = sadd.s32 1, %s12937_s27   ;;  %s563_s13 = int_to_ptr.hbm [resolvable:$true] %s562_s13 }
  0x31   : > { %12177 = dma.hbm_to_vmem [thread:$0]  (!%p13094_p6), %s539_s14, 64, %s541_s11, [#allocation15]  }
  0x32   : > { %s588_s1 = sshll.u32 %s17006_s12, 4  ;;  %s354_s29 = ssub.s32 %s12937_s27, %s13128_s17  ;;  %s589_s1 = int_to_ptr.hbm [resolvable:$true] %s588_s1 }
  0x33   : > { %12183 = dma.hbm_to_vmem [thread:$0]  (!%p13094_p6), %s563_s13, 64, %s565_s2, [#allocation18]  }
  0x34   : > { %12189 = dma.hbm_to_vmem [thread:$0]  (!%p13094_p6), %s589_s1, 128, %s591_s22, [#allocation21]  }
  0x35   : > { %s357_s0 = sadd.s32 1, %s12933_s26  ;;  %p355_p7 = scmp.eq.s32.totalorder %s354_s29, 0 }
  0x36   : > { %p364_p8 = scmp.ne.s32.totalorder %s12933_s26, %s12929_s25  ;;  %p365_p9 = scmp.eq.s32.totalorder %s12937_s27, 0 }
  0x37   : > { %p370_p10 = scmp.ne.s32.totalorder %s12929_s25, %s12925_s24  ;;  %p420_p13 = scmp.eq.s32.totalorder %s13077_s18, 5 }
  0x38   : > { %s13139_s14 = scalar_select %p355_p7, %s12933_s26, %s357_s0  }
  0x39   : > { %p13141_p11 = por %p365_p9, %p364_p8  ;;  %p13147_p12 = por %p371_p1, %p370_p10 }
  0x3a   : > { %p12217_p0 = scmp.lt.s32.totalorder %s12937_s27, 6  ;;  %p13153_p2 = por %p420_p13, %p364_p8 }
  0x3b   : > { %s625_s19 = sand.u32 1, %s12937_s27   ;;  %s16905_s24 = sand.u32 1, %s12933_s26  }
  0x3c   : > { %s8878_s11 = sshll.u32 %s16905_s24, 11  ;;  %s11435_s4 = sshll.u32 %s12937_s27, 4 }
  0x3d   : > { %s17010_s15 = sld [smem:[#allocation96_spill]]  ;;  %s629_s21 = scalar_lea.vmem [#allocation25], %s8878_s11 }
  0x3e   : > { %s637_s22 = sshll.u32 %s629_s21, 4  ;;  %p13167_p5 = pnand %p12217_p0, %p13141_p11  ;;  %s638_s22 = int_to_ptr.vmem [resolvable:$true] %s637_s22 }
  0x3f   : > { %s17012_s3 = sld [smem:[#allocation87_spill]]  ;;  %s13174_s8 = scalar_lea.sflag [#allocation4], %s625_s19 }
  0x40   : > { %p12605_p8 = pneg %p13167_p5 }
  0x43   : > { %s634_s23 = scalar_lea.hbm %s17010_s15, %s11435_s4  ;;  %s12608_s6 = scalar_lea.hbm %s17010_s15, 12288 }
  0x44   : > { %s635_s1 = sshll.u32 %s634_s23, 4  ;;  %s636_s1 = int_to_ptr.hbm [resolvable:$true] %s635_s1 }
  0x45   : > { %s473_s24 = sshll.u32 %s17012_s3, 4  ;;  %s12601_s4 = sshra.s32 %s636_s1, 4  ;;  %s474_s24 = int_to_ptr.hbm [resolvable:$true] %s473_s24  ;;  %s12602_s4 = int_to_ptr.hbm [resolvable:$true] %s12601_s4 }
  0x46   : > { %s12603_s11 = scalar_lea.hbm %s12602_s4, 2048  ;;  %p12609_p11 = scmp.lt.s32.totalorder %s12602_s4, %s17010_s15 }
  0x47   : > { %p12604_p7 = scmp.ne.s32.totalorder %s12602_s4, %s12603_s11  ;;  %p12610_p13 = scmp.lt.s32.totalorder %s12608_s6, %s12603_s11 }
  0x49   : > { %p12606_p9 = pnand %p12605_p8, %p12604_p7  ;;  %p12611_p0 = por %p12610_p13, %p12609_p11 }
  0x4b   : > { %p12607_p10 = pneg %p12606_p9 }
  0x4d   : > { %p12612_p3 = pnand %p12611_p0, %p12607_p10 }
  0x4f   : > { %12615 = shalt.err (!%p12612_p3)
}
  0x50   : > { %s12948_s19 = smov 1536   ;;  %s12949_s21 = smov 256  }
  0x51   : > { %s12950_s0 = smov 16   ;;  %s12951_s3 = smov [#allocation7]  }
  0x52   : > { %12199 = dma.hbm_to_vmem [thread:$0]  (!%p13167_p5), %s636_s1, 32768, %s638_s22, %s13174_s8, %s12948_s19, %s12949_s21, %s12950_s0  }
  0x53   : > { %s475_s16 = sshll.u32 %s12951_s3, 4  ;;  %s12952_s2 = smov 128   ;;  %s476_s16 = int_to_ptr.vmem [resolvable:$true] %s475_s16 }
  0x54   : > { %s12953_s20 = smov 8   ;;  %s500_s6 = sshll.u32 %s16889_s5, 4  ;;  %s501_s6 = int_to_ptr.hbm [resolvable:$true] %s500_s6 }
  0x55   : > { %12162 = dma.hbm_to_vmem [thread:$0]  (!%p13094_p6), %s474_s24, 2048, %s476_s16, [#allocation6], %s12952_s2, %s12952_s2, %s12953_s20  }
  0x56   : > { %s12954_s23 = smov [#allocation10]   ;;  %s523_s1 = sshll.u32 %s16891_s7, 4  ;;  %s524_s1 = int_to_ptr.hbm [resolvable:$true] %s523_s1 }
  0x57   : > { %s502_s10 = sshll.u32 %s12954_s23, 4  ;;  %s12955_s3 = smov [#allocation13]   ;;  %s503_s10 = int_to_ptr.vmem [resolvable:$true] %s502_s10 }
  0x58   : > { %12168 = dma.hbm_to_vmem [thread:$0]  (!%p13094_p6), %s501_s6, 32, %s503_s10, [#allocation9]  }
  0x59   : > { %s525_s22 = sshll.u32 %s12955_s3, 4  ;;  %s550_s16 = sshll.u32 %s16893_s9, 4  ;;  %s526_s22 = int_to_ptr.vmem [resolvable:$true] %s525_s22  ;;  %s551_s16 = int_to_ptr.hbm [resolvable:$true] %s550_s16 }
  0x5a   : > { %12174 = dma.hbm_to_vmem [thread:$0]  (!%p13094_p6), %s524_s1, 8192, %s526_s22, [#allocation12], %s12949_s21, %s12949_s21, %s12950_s0  }
  0x5b   : > { %s17013_s4 = sld [smem:[#allocation92_spill]]  ;;  %s12956_s12 = smov [#allocation16]  }
  0x5c   : > { %s552_s15 = sshll.u32 %s12956_s12, 4  ;;  %s12957_s10 = smov [#allocation19]   ;;  %s553_s15 = int_to_ptr.vmem [resolvable:$true] %s552_s15 }
  0x5d   : > { %12180 = dma.hbm_to_vmem [thread:$0]  (!%p13094_p6), %s551_s16, 64, %s553_s15, [#allocation15]  }
  0x5e   : > { %s575_s6 = sshll.u32 %s12957_s10, 4  ;;  %s12958_s23 = smov 512   ;;  %s576_s6 = int_to_ptr.vmem [resolvable:$true] %s575_s6 }
  0x5f   : > { %s12959_s3 = smov 32   ;;  %s17014_s1 = sld [smem:[#allocation94_spill]] }
  0x60   : > { %s12960_s19 = smov [#allocation22]   ;;  %s17015_s20 = sld [smem:[#allocation95_spill]] }
  0x61   : > { %s573_s11 = sshll.u32 %s17013_s4, 4  ;;  %s602_s24 = sshll.u32 %s12960_s19, 4  ;;  %s574_s11 = int_to_ptr.hbm [resolvable:$true] %s573_s11  ;;  %s603_s24 = int_to_ptr.vmem [resolvable:$true] %s602_s24 }
  0x62   : > { %12186 = dma.hbm_to_vmem [thread:$0]  (!%p13094_p6), %s574_s11, 32768, %s576_s6, [#allocation18], %s12958_s23, %s12958_s23, %s12959_s3  }
  0x63   : > { %s12961_s12 = smov [#allocation23]   ;;  %s17016_s10 = sand.u32 1, %s12933_s26  }
  0x64   : > { %s614_s15 = sshll.u32 %s12961_s12, 4  ;;  %s8881_s11 = sshll.u32 %s17016_s10, 2  ;;  %s615_s15 = int_to_ptr.vmem [resolvable:$true] %s614_s15 }
  0x65   : > { %s600_s22 = sshll.u32 %s17014_s1, 4  ;;  %s8882_s6 = sshll.u32 %s12937_s27, 2  ;;  %s601_s22 = int_to_ptr.hbm [resolvable:$true] %s600_s22 }
  0x66   : > { %s612_s4 = sshll.u32 %s17015_s20, 4  ;;  %s651_s23 = scalar_lea.vmem [#allocation26], %s8881_s11  ;;  %s613_s4 = int_to_ptr.hbm [resolvable:$true] %s612_s4 }
  0x67   : > { %12192 = dma.hbm_to_vmem [thread:$0]  (!%p13094_p6), %s601_s22, 128, %s603_s24, [#allocation21]  }
  0x68   : > { %12195 = dma.hbm_to_vmem [thread:$0]  (!%p13094_p6), %s613_s4, 128, %s615_s15, [#allocation24]  }
  0x69   : > { %s659_s3 = sshll.u32 %s651_s23, 4  ;;  %s17017_s1 = sld [smem:[#allocation97_spill]]  ;;  %s660_s3 = int_to_ptr.vmem [resolvable:$true] %s659_s3 }
  0x6f   : > { %s655_s19 = scalar_lea.hbm %s17017_s1, %s8882_s6  ;;  %s12848_s27 = scalar_lea.hbm %s17017_s1, 24 }
  0x70   : > { %s657_s2 = sshll.u32 %s655_s19, 4  ;;  %s658_s2 = int_to_ptr.hbm [resolvable:$true] %s657_s2 }
  0x71   : > { %s12841_s22 = sshra.s32 %s658_s2, 4  ;;  %s12842_s22 = int_to_ptr.hbm [resolvable:$true] %s12841_s22 }
  0x72   : > { %s12843_s24 = scalar_lea.hbm %s12842_s22, 4  ;;  %p12849_p6 = scmp.lt.s32.totalorder %s12842_s22, %s17017_s1 }
  0x73   : > { %p12844_p3 = scmp.ne.s32.totalorder %s12842_s22, %s12843_s24  ;;  %p12850_p10 = scmp.lt.s32.totalorder %s12848_s27, %s12843_s24 }
  0x75   : > { %p12846_p7 = pnand %p12844_p3, %p12605_p8  ;;  %p12851_p11 = por %p12850_p10, %p12849_p6 }
  0x77   : > { %p12847_p9 = pneg %p12846_p7 }
  0x79   : > { %p12852_p13 = pnand %p12851_p11, %p12847_p9 }
  0x7b   : > { %12855 = shalt.err (!%p12852_p13)
}
  0x7c   : > { %12202 = dma.hbm_to_vmem [thread:$0]  (!%p13167_p5), %s658_s2, 64, %s660_s3, %s13174_s8  }
  0x7d   : > { %668 = sbr.rel (%p13083_p4) target bundleno = 2374 (0x946), region = 88 }
  0x82   : > { %12888 = dma.done.wait (%p371_p1), [#allocation4], 1024  }
  0x83   : > { %12890 = vsyncadd (%p371_p1), [#allocation4], 4294966272 }
  0x84   : > { %12892 = dma.done.wait (%p371_p1), [#allocation6], 2064  }
  0x85   : > { %12894 = vsyncadd (%p371_p1), [#allocation6], 4294965232 }
  0x86   : > { %12896 = dma.done.wait (%p371_p1), [#allocation9], 64  }
  0x87   : > { %12898 = vsyncadd (%p371_p1), [#allocation9], 4294967232 }
  0x88   : > { %12900 = dma.done.wait (%p371_p1), [#allocation12], 8224  }
  0x89   : > { %12902 = vsyncadd (%p371_p1), [#allocation12], 4294959072 }
  0x8a   : > { %12904 = dma.done.wait (%p371_p1), [#allocation15], 128  }
  0x8b   : > { %12906 = vsyncadd (%p371_p1), [#allocation15], 4294967168 }
  0x8c   : > { %12908 = dma.done.wait (%p371_p1), [#allocation18], 32832  }
  0x8d   : > { %12910 = vsyncadd (%p371_p1), [#allocation18], 4294934464 }
  0x8e   : > { %12912 = dma.done.wait (%p371_p1), [#allocation21], 256  }
  0x8f   : > { %12914 = vsyncadd (%p371_p1), [#allocation21], 4294967040 }
  0x90   : > { %12916 = dma.done.wait (%p371_p1), [#allocation24], 128  }
  0x91   : > { %12918 = vsyncadd (%p371_p1), [#allocation24], 4294967168  ;;  %s740_s8 = sand.u32 1, %s13077_s18   ;;  %s742_s29 = sand.u32 1, %s12929_s25  }
  0x92   : > { %s8898_s15 = sshll.u32 %s742_s29, 11  ;;  %s741_s10 = scalar_lea.sflag [#allocation4], %s740_s8 }
  0x93   : > { %s13276_s11 = scalar_lea.vmem [#allocation25], %s8898_s15 }
  0x94   : > { %12920 = dma.done.wait (%p13147_p12), %s741_s10, 32832  }
  0x95   : > { %12922 = vsyncadd (%p13147_p12), %s741_s10, 4294934464  ;;  %s8899_s6 = sshll.u32 %s742_s29, 2  ;;  %s8900_s23 = sshll.u32 %s742_s29, 8 }
  0x96   : > { %s13282_s3 = scalar_lea.vmem [#allocation26], %s8899_s6  ;;  %s13284_s21 = scalar_lea.vmem [#allocation27], %s8900_s23 }
  0x97   : > { %p17019_p1 = scmp.ne.s32.totalorder %s13077_s18, 0 }
  0x99   : > { %816 = sbr.rel (%p17019_p1) target bundleno = 1680 (0x690), region = 156 }
  0x9e   : > { %v11443_v0 = vld [vmem:[#allocation3 + $0x38] sm:$0xff]  ;;  %v11442_v1 = vld [vmem:[#allocation3 + $0x30] sm:$0xff]  ;;  %v11441_v2 = vld [vmem:[#allocation3 + $0x28] sm:$0xff]  ;;  %s17020_s19 = sld [smem:[#allocation84_spill]] }
  0x9f   : > { %897 = vmatpush.bf16.msra.mxu0 %v11443_v0  ;;  %12069 = vmatpush.bf16.msra.mxu3 %v11443_v0  ;;  %v11440_v3 = vld [vmem:[#allocation3 + $0x20] sm:$0xff]  ;;  %v11439_v4 = vld [vmem:[#allocation3 + $0x18] sm:$0xff]  ;;  %v11438_v5 = vld [vmem:[#allocation3 + $0x10] sm:$0xff] }
  0xa0   : > { %v8992_v6 = vld [vmem:[#allocation7 + $0x70] sm:$0xf]  ;;  %v11459_v7 = vld [vmem:[#allocation7 + $0x74] sm:$0xf0]  ;;  %v11458_v8 = vld [vmem:[#allocation7 + $0x74] sm:$0xf] }
  0xa1   : > { %v8994_v9 = vld [vmem:[#allocation7 + $0x78] sm:$0xf0]  ;;  %v8993_v10 = vor.u32 %v11459_v7, %v8992_v6  ;;  %v8984_v12 = vld [vmem:[#allocation7 + $0x60] sm:$0xf]  ;;  %v11457_v13 = vld [vmem:[#allocation7 + $0x64] sm:$0xf0] }
  0xa2   : > { %v8997_v11 = vor.u32 %v11458_v8, %v8994_v9  ;;  %v11456_v14 = vld [vmem:[#allocation7 + $0x64] sm:$0xf]  ;;  %v8986_v15 = vld [vmem:[#allocation7 + $0x68] sm:$0xf0]  ;;  %v8985_v17 = vor.u32 %v11457_v13, %v8984_v12  ;;  %v8976_v19 = vld [vmem:[#allocation7 + $0x50] sm:$0xf] }
  0xa3   : > { %898 = vmatpush.bf16.msra.mxu0 %v11442_v1  ;;  %12070 = vmatpush.bf16.msra.mxu3 %v11442_v1  ;;  %v11437_v16 = vld [vmem:[#allocation3 + $0x8] sm:$0xff]  ;;  %v8989_v18 = vor.u32 %v11456_v14, %v8986_v15  ;;  %v11455_v20 = vld [vmem:[#allocation7 + $0x54] sm:$0xf0]  ;;  %v11454_v21 = vld [vmem:[#allocation7 + $0x54] sm:$0xf] }
  0xa4   : > { %1056 = vmatpush.bf16.msra.mxu1 %v8993_v10  ;;  %1085 = vmatpush.bf16.msra.mxu2 %v8997_v11  ;;  %v8978_v22 = vld [vmem:[#allocation7 + $0x58] sm:$0xf0]  ;;  %v818_v25 = vld [vmem:[%s17020_s19 + $0x8] sm:$0xff]  ;;  %v8977_v26 = vor.u32 %v11455_v20, %v8976_v19  ;;  %v8968_v30 = vld [vmem:[#allocation7 + $0x40] sm:$0xf] }
  0xa5   : > { %v11436_v23 = vld [vmem:[#allocation3] sm:$0xff]  ;;  %v8981_v27 = vor.u32 %v11454_v21, %v8978_v22  ;;  %v822_v29 = vld [vmem:[%s17020_s19 + $0x28] sm:$0xff]  ;;  %v819_v38 = vld [vmem:[%s17020_s19 + $0x10] sm:$0xff] }
  0xa6   : > { %v817_v24 = vld [vmem:[%s17020_s19] sm:$0xff]  ;;  %v11453_v31 = vld [vmem:[#allocation7 + $0x44] sm:$0xf0]  ;;  %v8970_v33 = vld [vmem:[#allocation7 + $0x48] sm:$0xf0] }
  0xa7   : > { %899 = vmatpush.bf16.msra.mxu0 %v11441_v2  ;;  %12071 = vmatpush.bf16.msra.mxu3 %v11441_v2  ;;  %v821_v28 = vld [vmem:[%s17020_s19 + $0x20] sm:$0xff]  ;;  %v825_v34 = vpack.c.bf16 %v818_v25, %v817_v24  ;;  %v8969_v36 = vor.u32 %v11453_v31, %v8968_v30  ;;  %v820_v39 = vld [vmem:[%s17020_s19 + $0x18] sm:$0xff]  ;;  %v823_v40 = vld [vmem:[%s17020_s19 + $0x30] sm:$0xff] }
  0xa8   : > { %1057 = vmatpush.bf16.msra.mxu1 %v8985_v17  ;;  %1086 = vmatpush.bf16.msra.mxu2 %v8989_v18  ;;  %v11452_v32 = vld [vmem:[#allocation7 + $0x44] sm:$0xf]  ;;  %v827_v35 = vpack.c.bf16 %v822_v29, %v821_v28  ;;  %v824_v41 = vld [vmem:[%s17020_s19 + $0x38] sm:$0xff]  ;;  %v826_v42 = vpack.c.bf16 %v820_v39, %v819_v38  ;;  %v8960_v44 = vld [vmem:[#allocation7 + $0x30] sm:$0xf] }
  0xa9   : > { %v8973_v37 = vor.u32 %v11452_v32, %v8970_v33  ;;  %v828_v43 = vpack.c.bf16 %v824_v41, %v823_v40  ;;  %v11451_v45 = vld [vmem:[#allocation7 + $0x34] sm:$0xf0]  ;;  %v11450_v46 = vld [vmem:[#allocation7 + $0x34] sm:$0xf]  ;;  %v8962_v48 = vld [vmem:[#allocation7 + $0x38] sm:$0xf0] }
  0xaa   : > { %v8961_v47 = vor.u32 %v11451_v45, %v8960_v44  ;;  %v8965_v49 = vor.u32 %v11450_v46, %v8962_v48  ;;  %v8952_v50 = vld [vmem:[#allocation7 + $0x20] sm:$0xf]  ;;  %v11449_v51 = vld [vmem:[#allocation7 + $0x24] sm:$0xf0]  ;;  %v11448_v52 = vld [vmem:[#allocation7 + $0x24] sm:$0xf] }
  0xab   : > { %900 = vmatpush.bf16.msra.mxu0 %v11440_v3  ;;  %12072 = vmatpush.bf16.msra.mxu3 %v11440_v3  ;;  %v8953_v53 = vor.u32 %v11449_v51, %v8952_v50  ;;  %v8954_v54 = vld [vmem:[#allocation7 + $0x28] sm:$0xf0]  ;;  %v8944_v56 = vld [vmem:[#allocation7 + $0x10] sm:$0xf]  ;;  %v11447_v57 = vld [vmem:[#allocation7 + $0x14] sm:$0xf0] }
  0xac   : > { %1058 = vmatpush.bf16.msra.mxu1 %v8977_v26  ;;  %1087 = vmatpush.bf16.msra.mxu2 %v8981_v27  ;;  %v8957_v55 = vor.u32 %v11448_v52, %v8954_v54  ;;  %v11446_v58 = vld [vmem:[#allocation7 + $0x14] sm:$0xf]  ;;  %v8945_v59 = vor.u32 %v11447_v57, %v8944_v56  ;;  %v8946_v60 = vld [vmem:[#allocation7 + $0x18] sm:$0xf0]  ;;  %v8936_v62 = vld [vmem:[#allocation7] sm:$0xf] }
  0xad   : > { %v8949_v61 = vor.u32 %v11446_v58, %v8946_v60  ;;  %v11445_v63 = vld [vmem:[#allocation7 + $0x4] sm:$0xf0]  ;;  %v11444_v0 = vld [vmem:[#allocation7 + $0x4] sm:$0xf]  ;;  %v8938_v2 = vld [vmem:[#allocation7 + $0x8] sm:$0xf0] }
  0xae   : > { %v8937_v1 = vor.u32 %v11445_v63, %v8936_v62  ;;  %v8941_v3 = vor.u32 %v11444_v0, %v8938_v2  ;;  %v970_v50 = vld [vmem:[#allocation8] sm:$0x3]  ;;  %v12962_v57 = vmov 64.0  }
  0xaf   : > { %901 = vmatpush.bf16.msra.mxu0 %v11439_v4  ;;  %12073 = vmatpush.bf16.msra.mxu3 %v11439_v4  ;;  %12289 = vrcp.f32 %v12962_v57 }
  0xb0   : > { %1059 = vmatpush.bf16.msra.mxu1 %v8969_v36  ;;  %1088 = vmatpush.bf16.msra.mxu2 %v8973_v37 }
  0xb3   : > { %902 = vmatpush.bf16.msra.mxu0 %v11438_v5  ;;  %12074 = vmatpush.bf16.msra.mxu3 %v11438_v5  ;;  %v12288_v5 = vld [vmem:[#allocation5] ss:$0 sm:$0xff] }
  0xb4   : > { %1060 = vmatpush.bf16.msra.mxu1 %v8961_v47  ;;  %1089 = vmatpush.bf16.msra.mxu2 %v8965_v49 }
  0xb5   : > { %v12290_v2 = vpop.eup %12289 }
  0xb6   : > { %vm1145_vm8 = vweird.f32 %v12290_v2 }
  0xb7   : > { %903 = vmatpush.bf16.msra.mxu0 %v11437_v16  ;;  %12075 = vmatpush.bf16.msra.mxu3 %v11437_v16 }
  0xb8   : > { %1061 = vmatpush.bf16.msra.mxu1 %v8953_v53  ;;  %1090 = vmatpush.bf16.msra.mxu2 %v8957_v55  ;;  %v972_v53 = vperm.slane %v970_v50, 0 }
  0xbb   : > { %904 = vmatpush.bf16.msra.mxu0 %v11436_v23  ;;  %12076 = vmatpush.bf16.msra.mxu3 %v11436_v23 }
  0xbc   : > { %1062 = vmatpush.bf16.msra.mxu1 %v8945_v59  ;;  %1091 = vmatpush.bf16.msra.mxu2 %v8949_v61  ;;  %v973_v59 = vperm.slane %v970_v50, 1 }
  0xbe   : > { %905 = vmatmul.bf16.vlgmr.msra.gmra.mxu0 %v825_v34  ;;  %915 = vmatmul.bf16.vlgmr.msra.gmra.mxu3 %v827_v35 }
  0xc0   : > { %1063 = vmatpush.bf16.msra.mxu1 %v8937_v1  ;;  %1092 = vmatpush.bf16.msra.mxu2 %v8941_v3 }
  0xce   : > { %910 = vmatmul.bf16.gmra.mxu0 %v826_v42  ;;  %920 = vmatmul.bf16.gmra.mxu3 %v828_v43 }
 0x13b   : > { %v906_v4 = vpop.f32.mrf.mxu0 }
 0x13c   : > { %v907_v6 = vadd.f32 %v12288_v5, %v906_v4 }
 0x13e   : > { %v934_v8 = vmul.f32 0.2, %v907_v6  ;;  %vm926_vm0 = vcmp.ge.f32.partialorder %v907_v6, 0.0 }
 0x140   : > { %v942_v11 = vsel %vm926_vm0, %v907_v6, %v934_v8 }
 0x141   : > { %v916_v15 = vpop.f32.mrf.mxu3 }
 0x142   : > { %v917_v25 = vadd.f32 %v12288_v5, %v916_v15 }
 0x143   : > { %v908_v7 = vpop.f32.mrf.mxu0 }
 0x144   : > { %v909_v9 = vadd.f32 %v12288_v5, %v908_v7  ;;  %v938_v28 = vmul.f32 0.2, %v917_v25  ;;  %vm930_vm4 = vcmp.ge.f32.partialorder %v917_v25, 0.0 }
 0x146   : > { %v935_v10 = vmul.f32 0.2, %v909_v9  ;;  %vm927_vm1 = vcmp.ge.f32.partialorder %v909_v9, 0.0  ;;  %v946_v30 = vsel %vm930_vm4, %v917_v25, %v938_v28 }
 0x148   : > { %v943_v12 = vsel %vm927_vm1, %v909_v9, %v935_v10 }
 0x149   : > { %v950_v13 = vpack.c.bf16 %v943_v12, %v942_v11  ;;  %v918_v21 = vpop.f32.mrf.mxu3  ;;  %v1141_v12 = vmul.f32 64.0, %v12290_v2 }
 0x14a   : > { %v919_v26 = vadd.f32 %v12288_v5, %v918_v21 }
 0x14b   : > { %v911_v14 = vpop.f32.mrf.mxu0  ;;  %1064 = vmatmul.bf16.vlgmr.msra.gmra.mxu1 %v950_v13  ;;  %1093 = vmatmul.bf16.vlgmr.msra.gmra.mxu2 %v950_v13  ;;  %v1142_v21 = vsub.f32 1.0, %v1141_v12 }
 0x14c   : > { %v912_v16 = vadd.f32 %v12288_v5, %v911_v14  ;;  %v939_v29 = vmul.f32 0.2, %v919_v26  ;;  %vm931_vm5 = vcmp.ge.f32.partialorder %v919_v26, 0.0 }
 0x14e   : > { %v936_v18 = vmul.f32 0.2, %v912_v16  ;;  %vm928_vm2 = vcmp.ge.f32.partialorder %v912_v16, 0.0  ;;  %v947_v31 = vsel %vm931_vm5, %v919_v26, %v939_v29 }
 0x14f   : > { %v952_v32 = vpack.c.bf16 %v947_v31, %v946_v30 }
 0x150   : > { %v944_v22 = vsel %vm928_vm2, %v912_v16, %v936_v18 }
 0x151   : > { %v921_v27 = vpop.f32.mrf.mxu3 }
 0x152   : > { %v922_v34 = vadd.f32 %v12288_v5, %v921_v27  ;;  %v1143_v27 = vmul.f32 %v12290_v2, %v1142_v21 }
 0x153   : > { %v913_v17 = vpop.f32.mrf.mxu0 }
 0x154   : > { %v914_v19 = vadd.f32 %v12288_v5, %v913_v17  ;;  %v940_v36 = vmul.f32 0.2, %v922_v34  ;;  %vm932_vm6 = vcmp.ge.f32.partialorder %v922_v34, 0.0 }
 0x156   : > { %v937_v20 = vmul.f32 0.2, %v914_v19  ;;  %vm929_vm3 = vcmp.ge.f32.partialorder %v914_v19, 0.0  ;;  %v948_v38 = vsel %vm932_vm6, %v922_v34, %v940_v36  ;;  %v1144_v34 = vadd.f32 %v12290_v2, %v1143_v27 }
 0x158   : > { %v945_v23 = vsel %vm929_vm3, %v914_v19, %v937_v20 }
 0x159   : > { %v951_v24 = vpack.c.bf16 %v945_v23, %v944_v22  ;;  %v923_v33 = vpop.f32.mrf.mxu3 }
 0x15a   : > { %v924_v35 = vadd.f32 %v12288_v5, %v923_v33 }
 0x15b   : > { %1069 = vmatmul.bf16.gmra.mxu1 %v951_v24  ;;  %1098 = vmatmul.bf16.gmra.mxu2 %v951_v24 }
 0x15c   : > { %v941_v37 = vmul.f32 0.2, %v924_v35  ;;  %vm933_vm7 = vcmp.ge.f32.partialorder %v924_v35, 0.0 }
 0x15e   : > { %v949_v39 = vsel %vm933_vm7, %v924_v35, %v941_v37 }
 0x15f   : > { %v953_v40 = vpack.c.bf16 %v949_v39, %v948_v38  ;;  %v13336_v39 = vsel %vm1145_vm8, %v12290_v2, %v1144_v34  ;;  %v11484_v2 = vld [vmem:[#allocation13 + $0xc4] sm:$0xf] }
 0x160   : > { %17021 = vst [vmem:[#allocation38_spill] sm:$0xff] %v13336_v39  ;;  %v11516_v34 = vld [vmem:[#allocation13 + $0x1c4] sm:$0xf] }
 0x16b   : > { %1074 = vmatmul.bf16.gmra.mxu1 %v952_v32  ;;  %1103 = vmatmul.bf16.gmra.mxu2 %v952_v32 }
 0x17b   : > { %1079 = vmatmul.bf16.gmra.mxu1 %v953_v40  ;;  %1108 = vmatmul.bf16.gmra.mxu2 %v953_v40 }
 0x1c8   : > { %v1065_v41 = vpop.f32.mrf.mxu1 }
 0x1c9   : > { %v1066_v55 = vadd.f32 %v1065_v41, %v972_v53 }
 0x1ce   : > { %v1094_v42 = vpop.f32.mrf.mxu2 }
 0x1cf   : > { %v13314_v3 = vadd.f32 %v1094_v42, %v973_v59 }
 0x1d0   : > { %v1067_v43 = vpop.f32.mrf.mxu1 }
 0x1d1   : > { %v1068_v54 = vadd.f32 %v1067_v43, %v972_v53 }
 0x1d3   : > { %v1114_v60 = vadd.f32 %v1068_v54, %v1066_v55 }
 0x1d6   : > { %v1096_v44 = vpop.f32.mrf.mxu2 }
 0x1d7   : > { %v13312_v63 = vadd.f32 %v1096_v44, %v973_v59 }
 0x1d8   : > { %v1070_v45 = vpop.f32.mrf.mxu1 }
 0x1d9   : > { %v1071_v56 = vadd.f32 %v1070_v45, %v972_v53  ;;  %v1127_v7 = vadd.f32 %v13312_v63, %v13314_v3 }
 0x1db   : > { %v1115_v0 = vadd.f32 %v1114_v60, %v1071_v56 }
 0x1de   : > { %v1099_v46 = vpop.f32.mrf.mxu2 }
 0x1df   : > { %v13316_v4 = vadd.f32 %v1099_v46, %v973_v59 }
 0x1e0   : > { %v1072_v47 = vpop.f32.mrf.mxu1 }
 0x1e1   : > { %v1073_v61 = vadd.f32 %v1072_v47, %v972_v53  ;;  %v1128_v13 = vadd.f32 %v1127_v7, %v13316_v4  ;;  %v9096_v7 = vld [vmem:[#allocation13 + $0xc0] sm:$0xf] }
 0x1e3   : > { %v1116_v5 = vadd.f32 %v1115_v0, %v1073_v61 }
 0x1e6   : > { %v1101_v48 = vpop.f32.mrf.mxu2 }
 0x1e7   : > { %v13320_v8 = vadd.f32 %v1101_v48, %v973_v59 }
 0x1e8   : > { %v1075_v49 = vpop.f32.mrf.mxu1 }
 0x1e9   : > { %v1076_v1 = vadd.f32 %v1075_v49, %v972_v53  ;;  %v1129_v17 = vadd.f32 %v1128_v13, %v13320_v8  ;;  %v11486_v13 = vld [vmem:[#allocation13 + $0xcc] sm:$0xf0] }
 0x1eb   : > { %v1117_v9 = vadd.f32 %v1116_v5, %v1076_v1  ;;  %v9098_v5 = vld [vmem:[#allocation13 + $0xd0] sm:$0xf0] }
 0x1ec   : > { %v9101_v12 = vor.u32 %v11484_v2, %v9098_v5 }
 0x1ee   : > { %v1104_v51 = vpop.f32.mrf.mxu2 }
 0x1ef   : > { %v13323_v14 = vadd.f32 %v1104_v51, %v973_v59  ;;  %v11488_v51 = vld [vmem:[#allocation13 + $0xe4] sm:$0xf] }
 0x1f0   : > { %v1077_v52 = vpop.f32.mrf.mxu1 }
 0x1f1   : > { %v1078_v6 = vadd.f32 %v1077_v52, %v972_v53  ;;  %v1130_v22 = vadd.f32 %v1129_v17, %v13323_v14  ;;  %v9114_v52 = vld [vmem:[#allocation13 + $0xf0] sm:$0xf0] }
 0x1f2   : > { %v9117_v57 = vor.u32 %v11488_v51, %v9114_v52  ;;  %v11476_v51 = vld [vmem:[#allocation13 + $0x84] sm:$0xf]  ;;  %v9066_v52 = vld [vmem:[#allocation13 + $0x90] sm:$0xf0] }
 0x1f3   : > { %v1118_v15 = vadd.f32 %v1117_v9, %v1078_v6 }
 0x1f4   : > { %1799 = vmatpush.bf16.msrb.mxu1 %v9117_v57 }
 0x1f6   : > { %v1106_v58 = vpop.f32.mrf.mxu2 }
 0x1f7   : > { %v13326_v18 = vadd.f32 %v1106_v58, %v973_v59  ;;  %v11490_v58 = vld [vmem:[#allocation13 + $0xec] sm:$0xf0] }
 0x1f8   : > { %v1080_v62 = vpop.f32.mrf.mxu1  ;;  %1800 = vmatpush.bf16.msrb.mxu1 %v9101_v12  ;;  %v11514_v12 = vld [vmem:[#allocation13 + $0x1ac] sm:$0xf0] }
 0x1f9   : > { %v1081_v10 = vadd.f32 %v1080_v62, %v972_v53  ;;  %v1131_v25 = vadd.f32 %v1130_v22, %v13326_v18 }
 0x1fb   : > { %v1119_v19 = vadd.f32 %v1118_v15, %v1081_v10 }
 0x1fe   : > { %v1109_v11 = vpop.f32.mrf.mxu2 }
 0x1ff   : > { %v13329_v23 = vadd.f32 %v1109_v11, %v973_v59 }
 0x200   : > { %v1082_v16 = vpop.f32.mrf.mxu1 }
 0x201   : > { %v1083_v20 = vadd.f32 %v1082_v16, %v972_v53  ;;  %v1132_v29 = vadd.f32 %v1131_v25, %v13329_v23  ;;  %v9112_v53 = vld [vmem:[#allocation13 + $0xe0] sm:$0xf]  ;;  %v9242_v25 = vld [vmem:[#allocation13 + $0x1f0] sm:$0xf0] }
 0x202   : > { %v9113_v60 = vor.u32 %v11490_v58, %v9112_v53  ;;  %v11478_v58 = vld [vmem:[#allocation13 + $0x8c] sm:$0xf0] }
 0x203   : > { %v1120_v24 = vadd.f32 %v1119_v19, %v1083_v20 }
 0x204   : > { %1741 = vmatpush.bf16.msrb.mxu3 %v9113_v60 }
 0x205   : > { %v1121_v26 = vrot.slane %v1120_v24, 4 }
 0x206   : > { %v1111_v28 = vpop.f32.mrf.mxu2 }
 0x207   : > { %v1122_v30 = vadd.f32 %v1121_v26, %v1120_v24  ;;  %v13333_v31 = vadd.f32 %v1111_v28, %v973_v59  ;;  %v11520_v24 = vld [vmem:[#allocation13 + $0x1e4] sm:$0xf]  ;;  %v9240_v26 = vld [vmem:[#allocation13 + $0x1e0] sm:$0xf] }
 0x208   : > { %v11480_v28 = vld [vmem:[#allocation13 + $0xa4] sm:$0xf] }
 0x209   : > { %v1123_v32 = vrot.slane %v1122_v30, 2  ;;  %v1133_v33 = vadd.f32 %v1132_v29, %v13333_v31  ;;  %v9082_v29 = vld [vmem:[#allocation13 + $0xb0] sm:$0xf0] }
 0x20b   : > { %v1124_v35 = vadd.f32 %v1123_v32, %v1122_v30  ;;  %v1134_v36 = vrot.slane %v1133_v33, 4  ;;  %v11522_v30 = vld [vmem:[#allocation13 + $0x1ec] sm:$0xf0] }
 0x20c   : > { %v9241_v53 = vor.u32 %v11522_v30, %v9240_v26  ;;  %v11474_v26 = vld [vmem:[#allocation13 + $0x6c] sm:$0xf0]  ;;  %v11508_v30 = vld [vmem:[#allocation13 + $0x184] sm:$0xf] }
 0x20d   : > { %v1125_v37 = vrot.slane %v1124_v35, 1  ;;  %v1135_v38 = vadd.f32 %v1134_v36, %v1133_v33 }
 0x20e   : > { %1770 = vmatpush.bf16.msrb.mxu0 %v9241_v53 }
 0x20f   : > { %v1126_v40 = vadd.f32 %v1125_v37, %v1124_v35  ;;  %v1136_v41 = vrot.slane %v1135_v38, 2  ;;  %v9080_v35 = vld [vmem:[#allocation13 + $0xa0] sm:$0xf] }
 0x211   : > { %v1147_v42 = vmul.f32 %v13336_v39, %v1126_v40  ;;  %v1137_v46 = vadd.f32 %v1136_v41, %v1135_v38  ;;  %v9226_v41 = vld [vmem:[#allocation13 + $0x1d0] sm:$0xf0] }
 0x213   : > { %v13339_v43 = vsub.f32 %v1066_v55, %v1147_v42  ;;  %v13341_v44 = vsub.f32 %v1068_v54, %v1147_v42  ;;  %v13343_v45 = vsub.f32 %v1071_v56, %v1147_v42  ;;  %v13345_v47 = vsub.f32 %v1073_v61, %v1147_v42 }
 0x214   : > { %v13351_v50 = vsub.f32 %v1076_v1, %v1147_v42  ;;  %v1138_v56 = vrot.slane %v1137_v46, 1  ;;  %v13355_v59 = vsub.f32 %v1078_v6, %v1147_v42  ;;  %v13359_v1 = vsub.f32 %v1081_v10, %v1147_v42 }
 0x215   : > { %v1165_v48 = vmul.f32 %v13339_v43, %v13339_v43  ;;  %v1167_v49 = vmul.f32 %v13341_v44, %v13341_v44  ;;  %v1169_v54 = vmul.f32 %v13343_v45, %v13343_v45  ;;  %v1171_v61 = vmul.f32 %v13345_v47, %v13345_v47 }
 0x216   : > { %v1139_v0 = vadd.f32 %v1138_v56, %v1137_v46  ;;  %v1173_v9 = vmul.f32 %v13351_v50, %v13351_v50  ;;  %v13366_v15 = vsub.f32 %v1083_v20, %v1147_v42  ;;  %v1175_v16 = vmul.f32 %v13355_v59, %v13355_v59  ;;  %v9224_v42 = vld [vmem:[#allocation13 + $0x1c0] sm:$0xf]  ;;  %v11518_v46 = vld [vmem:[#allocation13 + $0x1cc] sm:$0xf0] }
 0x217   : > { %v1181_v55 = vadd.f32 %v1167_v49, %v1165_v48  ;;  %v9097_v10 = vor.u32 %v11486_v13, %v9096_v7  ;;  %v1177_v20 = vmul.f32 %v13359_v1, %v13359_v1  ;;  %v9085_v49 = vor.u32 %v11480_v28, %v9082_v29  ;;  %v11472_v13 = vld [vmem:[#allocation13 + $0x64] sm:$0xf] }
 0x218   : > { %v13364_v6 = vmul.f32 %v13336_v39, %v1139_v0  ;;  %v1179_v32 = vmul.f32 %v13366_v15, %v13366_v15  ;;  %v9069_v0 = vor.u32 %v11476_v51, %v9066_v52  ;;  %v9225_v7 = vor.u32 %v11518_v46, %v9224_v42  ;;  %v9032_v42 = vld [vmem:[#allocation13 + $0x40] sm:$0xf]  ;;  %v11470_v46 = vld [vmem:[#allocation13 + $0x4c] sm:$0xf0]  ;;  %v9178_v51 = vld [vmem:[#allocation13 + $0x170] sm:$0xf0] }
 0x219   : > { %v1182_v62 = vadd.f32 %v1181_v55, %v1169_v54  ;;  %1742 = vmatpush.bf16.msrb.mxu3 %v9097_v10  ;;  %v9064_v54 = vld [vmem:[#allocation13 + $0x80] sm:$0xf]  ;;  %1801 = vmatpush.bf16.msrb.mxu1 %v9085_v49  ;;  %v11504_v49 = vld [vmem:[#allocation13 + $0x164] sm:$0xf] }
 0x21a   : > { %v13372_v19 = vsub.f32 %v13314_v3, %v13364_v6  ;;  %v13376_v21 = vsub.f32 %v13312_v63, %v13364_v6  ;;  %v13380_v22 = vsub.f32 %v13316_v4, %v13364_v6  ;;  %v13386_v3 = vsub.f32 %v13320_v8, %v13364_v6  ;;  %v11482_v8 = vld [vmem:[#allocation13 + $0xac] sm:$0xf0]  ;;  %v9048_v10 = vld [vmem:[#allocation13 + $0x60] sm:$0xf]  ;;  %1771 = vmatpush.bf16.msrb.mxu0 %v9225_v7 }
 0x21b   : > { %v1183_v11 = vadd.f32 %v1182_v62, %v1171_v61  ;;  %v13396_v33 = vsub.f32 %v13323_v14, %v13364_v6  ;;  %v13400_v37 = vsub.f32 %v13326_v18, %v13364_v6  ;;  %v13406_v48 = vsub.f32 %v13329_v23, %v13364_v6  ;;  %v11512_v23 = vld [vmem:[#allocation13 + $0x1a4] sm:$0xf]  ;;  %v9210_v62 = vld [vmem:[#allocation13 + $0x1b0] sm:$0xf0] }
 0x21c   : > { %v1166_v63 = vmul.f32 %v13372_v19, %v13372_v19  ;;  %v1168_v4 = vmul.f32 %v13376_v21, %v13376_v21  ;;  %v1170_v38 = vmul.f32 %v13380_v22, %v13380_v22  ;;  %v9245_v14 = vor.u32 %v11520_v24, %v9242_v25 }
 0x21d   : > { %v1184_v17 = vadd.f32 %v1183_v11, %v1173_v9  ;;  %v1172_v18 = vmul.f32 %v13386_v3, %v13386_v3  ;;  %v9081_v57 = vor.u32 %v11482_v8, %v9080_v35  ;;  %v1174_v60 = vmul.f32 %v13396_v33, %v13396_v33  ;;  %v9208_v11 = vld [vmem:[#allocation13 + $0x1a0] sm:$0xf]  ;;  %1802 = vmatpush.bf16.msrb.mxu1 %v9069_v0  ;;  %v9034_v35 = vld [vmem:[#allocation13 + $0x50] sm:$0xf0] }
 0x21e   : > { %v1194_v40 = vadd.f32 %v1168_v4, %v1166_v63  ;;  %1828 = vmatpush.bf16.msrb.mxu2 %v9245_v14  ;;  %v9229_v61 = vor.u32 %v11516_v34, %v9226_v41  ;;  %v9065_v9 = vor.u32 %v11478_v58, %v9064_v54  ;;  %v1176_v24 = vmul.f32 %v13400_v37, %v13400_v37  ;;  %v11468_v34 = vld [vmem:[#allocation13 + $0x44] sm:$0xf]  ;;  %v9192_v8 = vld [vmem:[#allocation13 + $0x180] sm:$0xf]  ;;  %v11510_v41 = vld [vmem:[#allocation13 + $0x18c] sm:$0xf0] }
 0x21f   : > { %v1185_v27 = vadd.f32 %v1184_v17, %v1175_v16  ;;  %1743 = vmatpush.bf16.msrb.mxu3 %v9081_v57  ;;  %v9050_v16 = vld [vmem:[#allocation13 + $0x70] sm:$0xf0]  ;;  %v9213_v63 = vor.u32 %v11512_v23, %v9210_v62  ;;  %v9037_v52 = vor.u32 %v11468_v34, %v9034_v35  ;;  %v11506_v57 = vld [vmem:[#allocation13 + $0x16c] sm:$0xf0]  ;;  %v9016_v58 = vld [vmem:[#allocation13 + $0x20] sm:$0xf] }
 0x220   : > { %v1195_v56 = vadd.f32 %v1194_v40, %v1170_v38  ;;  %v9053_v4 = vor.u32 %v11472_v13, %v9050_v16  ;;  %v9018_v0 = vld [vmem:[#allocation13 + $0x30] sm:$0xf0]  ;;  %v9144_v35 = vld [vmem:[#allocation13 + $0x120] sm:$0xf] }
 0x221   : > { %v1186_v36 = vadd.f32 %v1185_v27, %v1177_v20  ;;  %v13414_v20 = vsub.f32 %v13333_v31, %v13364_v6  ;;  %v1178_v27 = vmul.f32 %v13406_v48, %v13406_v48  ;;  %v9209_v31 = vor.u32 %v11514_v12, %v9208_v11  ;;  %v9162_v13 = vld [vmem:[#allocation13 + $0x150] sm:$0xf0] }
 0x222   : > { %v1196_v5 = vadd.f32 %v1195_v56, %v1172_v18  ;;  %1829 = vmatpush.bf16.msrb.mxu2 %v9229_v61  ;;  %v9049_v6 = vor.u32 %v11474_v26, %v9048_v10  ;;  %1803 = vmatpush.bf16.msrb.mxu1 %v9053_v4  ;;  %v9033_v18 = vor.u32 %v11470_v46, %v9032_v42  ;;  %v9176_v56 = vld [vmem:[#allocation13 + $0x160] sm:$0xf]  ;;  %v11464_v61 = vld [vmem:[#allocation13 + $0x24] sm:$0xf]  ;;  %v9002_v4 = vld [vmem:[#allocation13 + $0x10] sm:$0xf0] }
 0x223   : > { %v1187_v55 = vadd.f32 %v1186_v36, %v1179_v32  ;;  %v9194_v32 = vld [vmem:[#allocation13 + $0x190] sm:$0xf0]  ;;  %1744 = vmatpush.bf16.msrb.mxu3 %v9065_v9  ;;  %v1180_v38 = vmul.f32 %v13414_v20, %v13414_v20  ;;  %1772 = vmatpush.bf16.msrb.mxu0 %v9209_v31  ;;  %v9177_v7 = vor.u32 %v11506_v57, %v9176_v56  ;;  %v9160_v10 = vld [vmem:[#allocation13 + $0x140] sm:$0xf]  ;;  %v11460_v26 = vld [vmem:[#allocation13 + $0x4] sm:$0xf] }
 0x224   : > { %v1197_v25 = vadd.f32 %v1196_v5, %v1174_v60  ;;  %v9197_v14 = vor.u32 %v11508_v30, %v9194_v32  ;;  %v11466_v60 = vld [vmem:[#allocation13 + $0x2c] sm:$0xf0]  ;;  %v11500_v5 = vld [vmem:[#allocation13 + $0x144] sm:$0xf]  ;;  %v9021_v9 = vor.u32 %v11464_v61, %v9018_v0  ;;  %v9146_v31 = vld [vmem:[#allocation13 + $0x130] sm:$0xf0] }
 0x225   : > { %v1188_v2 = vrot.slane %v1187_v55, 4  ;;  %v9017_v16 = vor.u32 %v11466_v60, %v9016_v58  ;;  %v11496_v32 = vld [vmem:[#allocation13 + $0x124] sm:$0xf]  ;;  %v9130_v42 = vld [vmem:[#allocation13 + $0x110] sm:$0xf0] }
 0x226   : > { %v1198_v29 = vadd.f32 %v1197_v25, %v1176_v24  ;;  %1830 = vmatpush.bf16.msrb.mxu2 %v9213_v63  ;;  %1804 = vmatpush.bf16.msrb.mxu1 %v9037_v52  ;;  %v9000_v24 = vld [vmem:[#allocation13] sm:$0xf]  ;;  %v11462_v25 = vld [vmem:[#allocation13 + $0xc] sm:$0xf0]  ;;  %v11489_v56 = vld [vmem:[#allocation13 + $0xec] sm:$0xf] }
 0x227   : > { %v1189_v17 = vadd.f32 %v1188_v2, %v1187_v55  ;;  %1745 = vmatpush.bf16.msrb.mxu3 %v9049_v6  ;;  %v9193_v55 = vor.u32 %v11510_v41, %v9192_v8  ;;  %v9181_v2 = vor.u32 %v11504_v49, %v9178_v51  ;;  %v9001_v34 = vor.u32 %v11462_v25, %v9000_v24  ;;  %v11498_v8 = vld [vmem:[#allocation13 + $0x12c] sm:$0xf0]  ;;  %v11492_v41 = vld [vmem:[#allocation13 + $0x104] sm:$0xf]  ;;  %v9122_v61 = vld [vmem:[#allocation13 + $0xf8] sm:$0xf0] }
 0x228   : > { %v1199_v40 = vadd.f32 %v1198_v29, %v1178_v27  ;;  %v9005_v29 = vor.u32 %v11460_v26, %v9002_v4  ;;  %v9145_v46 = vor.u32 %v11498_v8, %v9144_v35  ;;  %v11494_v49 = vld [vmem:[#allocation13 + $0x10c] sm:$0xf0]  ;;  %v9125_v0 = vor.u32 %v11489_v56, %v9122_v61  ;;  %v9104_v25 = vld [vmem:[#allocation13 + $0xc8] sm:$0xf]  ;;  %v11487_v26 = vld [vmem:[#allocation13 + $0xd4] sm:$0xf0] }
 0x229   : > { %v1190_v28 = vrot.slane %v1189_v17, 2  ;;  %1773 = vmatpush.bf16.msrb.mxu0 %v9193_v55  ;;  %v11521_v55 = vld [vmem:[#allocation13 + $0x1ec] sm:$0xf] }
 0x22a   : > { %v1200_v54 = vadd.f32 %v1199_v40, %v1180_v38  ;;  %1831 = vmatpush.bf16.msrb.mxu2 %v9197_v14  ;;  %1805 = vmatpush.bf16.msrb.mxu1 %v9021_v9  ;;  %v9149_v38 = vor.u32 %v11496_v32, %v9146_v31  ;;  %v9128_v14 = vld [vmem:[#allocation13 + $0x100] sm:$0xf]  ;;  %v11513_v56 = vld [vmem:[#allocation13 + $0x1ac] sm:$0xf] }
 0x22b   : > { %v1191_v36 = vadd.f32 %v1190_v28, %v1189_v17  ;;  %1746 = vmatpush.bf16.msrb.mxu3 %v9033_v18  ;;  %v11502_v17 = vld [vmem:[#allocation13 + $0x14c] sm:$0xf0]  ;;  %v9165_v28 = vor.u32 %v11500_v5, %v9162_v13  ;;  %v9250_v18 = vld [vmem:[#allocation13 + $0x1f8] sm:$0xf0]  ;;  %v9129_v58 = vor.u32 %v11494_v49, %v9128_v14  ;;  %v11517_v5 = vld [vmem:[#allocation13 + $0x1cc] sm:$0xf] }
 0x22c   : > { %v1201_v62 = vrot.slane %v1200_v54, 4  ;;  %v9161_v6 = vor.u32 %v11502_v17, %v9160_v10  ;;  %v9253_v60 = vor.u32 %v11521_v55, %v9250_v18  ;;  %v11485_v10 = vld [vmem:[#allocation13 + $0xcc] sm:$0xf]  ;;  %v9106_v17 = vld [vmem:[#allocation13 + $0xd8] sm:$0xf0] }
 0x22d   : > { %v1192_v53 = vrot.slane %v1191_v36, 1  ;;  %1774 = vmatpush.bf16.msrb.mxu0 %v9177_v7  ;;  %v9234_v7 = vld [vmem:[#allocation13 + $0x1d8] sm:$0xf0]  ;;  %v9109_v24 = vor.u32 %v11485_v10, %v9106_v17  ;;  %v9088_v10 = vld [vmem:[#allocation13 + $0xa8] sm:$0xf] }
 0x22e   : > { %v1202_v12 = vadd.f32 %v1201_v62, %v1200_v54  ;;  %1832 = vmatpush.bf16.msrb.mxu2 %v9181_v2  ;;  %1806 = vmatpush.bf16.msrb.mxu1 %v9005_v29  ;;  %v9133_v54 = vor.u32 %v11492_v41, %v9130_v42  ;;  %v11491_v2 = vld [vmem:[#allocation13 + $0xf4] sm:$0xf0]  ;;  %v9237_v13 = vor.u32 %v11517_v5, %v9234_v7 }
 0x22f   : > { %v1193_v23 = vadd.f32 %v1192_v53, %v1191_v36  ;;  %1747 = vmatpush.bf16.msrb.mxu3 %v9017_v16  ;;  %v9105_v29 = vor.u32 %v11487_v26, %v9104_v25  ;;  %v9232_v25 = vld [vmem:[#allocation13 + $0x1c8] sm:$0xf]  ;;  %v11519_v26 = vld [vmem:[#allocation13 + $0x1d4] sm:$0xf0] }
 0x230   : > { %v1203_v63 = vrot.slane %v1202_v12, 2 }
 0x231   : > { %v1207_v11 = vmul.f32 %v1193_v23, %v13336_v39  ;;  %1775 = vmatpush.bf16.msrb.mxu0 %v9161_v6  ;;  %v9120_v23 = vld [vmem:[#allocation13 + $0xe8] sm:$0xf] }
 0x232   : > { %v1204_v30 = vadd.f32 %v1203_v63, %v1202_v12  ;;  %1833 = vmatpush.bf16.msrb.mxu2 %v9165_v28  ;;  %v9121_v9 = vor.u32 %v11491_v2, %v9120_v23  ;;  %1915 = vmatpush.bf16.msra.mxu1 %v9125_v0  ;;  %v1247_v12 = vld [vmem:[#allocation10] sm:$0x3]  ;;  %v9248_v63 = vld [vmem:[#allocation13 + $0x1e8] sm:$0xf]  ;;  %v1269_v28 = vld [vmem:[#allocation11] sm:$0x3] }
 0x233   : > { %v13423_v27 = vadd.f32 0.8, %v1207_v11  ;;  %1748 = vmatpush.bf16.msrb.mxu3 %v9001_v34  ;;  %v13432_v31 = vperm.slane %v1247_v12, 0  ;;  %v13437_v8 = vperm.slane %v1269_v28, 0  ;;  %v13452_v14 = vperm.slane %v1269_v28, 1 }
 0x234   : > { %v1205_v36 = vrot.slane %v1204_v30, 1  ;;  %v11481_v2 = vld [vmem:[#allocation13 + $0xac] sm:$0xf] }
 0x235   : > { %12291 = vrsqrt.f32 %v13423_v27  ;;  %1776 = vmatpush.bf16.msrb.mxu0 %v9145_v46  ;;  %vm1217_vm10 = vweird.f32 %v13423_v27 }
 0x236   : > { %v1206_v40 = vadd.f32 %v1205_v36, %v1204_v30  ;;  %1834 = vmatpush.bf16.msrb.mxu2 %v9149_v38  ;;  %v11523_v30 = vld [vmem:[#allocation13 + $0x1f4] sm:$0xf0]  ;;  %1916 = vmatpush.bf16.msra.mxu1 %v9109_v24  ;;  %v13439_v36 = vperm.slane %v1247_v12, 1 }
 0x237   : > { %1857 = vmatpush.bf16.msra.mxu3 %v9121_v9  ;;  %v9249_v6 = vor.u32 %v11523_v30, %v9248_v63  ;;  %v9202_v30 = vld [vmem:[#allocation13 + $0x198] sm:$0xf0] }
 0x238   : > { %v1208_v52 = vmul.f32 %v1206_v40, %v13336_v39 }
 0x239   : > { %1777 = vmatpush.bf16.msrb.mxu0 %v9129_v58 }
 0x23a   : > { %v13428_v57 = vadd.f32 0.8, %v1208_v52  ;;  %1835 = vmatpush.bf16.msrb.mxu2 %v9133_v54 }
 0x23b   : > { %v12292_v51 = vpop.eup %12291  ;;  %1858 = vmatpush.bf16.msra.mxu3 %v9105_v29  ;;  %v11509_v29 = vld [vmem:[#allocation13 + $0x18c] sm:$0xf] }
 0x23c   : > { %v1212_v53 = vmul.f32 %v12292_v51, %v13423_v27  ;;  %12293 = vrsqrt.f32 %v13428_v57  ;;  %vm1218_vm9 = vweird.f32 %v12292_v51  ;;  %vm1227_vm12 = vweird.f32 %v13428_v57 }
 0x23d   : > { %vm1219_vm11 = vmor %vm1217_vm10, %vm1218_vm9  ;;  %1886 = vmatpush.bf16.msra.mxu0 %v9249_v6 }
 0x23e   : > { %v1213_v62 = vmul.f32 %v12292_v51, %v1212_v53  ;;  %1944 = vmatpush.bf16.msra.mxu2 %v9253_v60 }
 0x240   : > { %v1214_v11 = vmul.f32 0.5, %v1213_v62 }
 0x242   : > { %v1215_v16 = vsub.f32 1.5, %v1214_v11  ;;  %v12294_v32 = vpop.eup %12293  ;;  %1945 = vmatpush.bf16.msra.mxu2 %v9237_v13  ;;  %v9090_v11 = vld [vmem:[#allocation13 + $0xb8] sm:$0xf0] }
 0x243   : > { %v1222_v35 = vmul.f32 %v12294_v32, %v13428_v57  ;;  %vm1228_vm13 = vweird.f32 %v12294_v32  ;;  %v11483_v57 = vld [vmem:[#allocation13 + $0xb4] sm:$0xf0] }
 0x244   : > { %v1216_v4 = vmul.f32 %v12292_v51, %v1215_v16  ;;  %vm1229_vm1 = vmor %vm1227_vm12, %vm1228_vm13  ;;  %v9093_v16 = vor.u32 %v11481_v2, %v9090_v11 }
 0x245   : > { %v1223_v40 = vmul.f32 %v12294_v32, %v1222_v35 }
 0x246   : > { %v13434_v34 = vsel %vm1219_vm11, %v12292_v51, %v1216_v4  ;;  %1917 = vmatpush.bf16.msra.mxu1 %v9093_v16  ;;  %v11505_v16 = vld [vmem:[#allocation13 + $0x16c] sm:$0xf] }
 0x247   : > { %v1231_v27 = vmul.f32 %v13434_v34, %v13339_v43  ;;  %v1233_v38 = vmul.f32 %v13434_v34, %v13341_v44  ;;  %v1235_v41 = vmul.f32 %v13434_v34, %v13343_v45  ;;  %v1237_v42 = vmul.f32 %v13434_v34, %v13345_v47 }
 0x248   : > { %v1239_v46 = vmul.f32 %v13434_v34, %v13351_v50  ;;  %v1245_v44 = vmul.f32 %v13434_v34, %v13366_v15  ;;  %v1224_v51 = vmul.f32 0.5, %v1223_v40  ;;  %v1241_v53 = vmul.f32 %v13434_v34, %v13355_v59  ;;  %v9218_v15 = vld [vmem:[#allocation13 + $0x1b8] sm:$0xf0] }
 0x249   : > { %v1253_v43 = vmul.f32 %v13432_v31, %v1231_v27  ;;  %v1255_v49 = vmul.f32 %v13432_v31, %v1233_v38  ;;  %v1257_v45 = vmul.f32 %v13432_v31, %v1235_v41  ;;  %v1259_v52 = vmul.f32 %v13432_v31, %v1237_v42 }
 0x24a   : > { %v1225_v54 = vsub.f32 1.5, %v1224_v51  ;;  %v1261_v58 = vmul.f32 %v13432_v31, %v1239_v46  ;;  %v1267_v23 = vmul.f32 %v13432_v31, %v1245_v44  ;;  %v9221_v9 = vor.u32 %v11513_v56, %v9218_v15  ;;  %v11477_v51 = vld [vmem:[#allocation13 + $0x8c] sm:$0xf]  ;;  %v11479_v56 = vld [vmem:[#allocation13 + $0x94] sm:$0xf0] }
 0x24b   : > { %v1275_v47 = vadd.f32 %v13437_v8, %v1253_v43  ;;  %v1277_v50 = vadd.f32 %v13437_v8, %v1255_v49  ;;  %v1279_v55 = vadd.f32 %v13437_v8, %v1257_v45  ;;  %v1281_v18 = vadd.f32 %v13437_v8, %v1259_v52  ;;  %v9074_v45 = vld [vmem:[#allocation13 + $0x98] sm:$0xf0]  ;;  %v9216_v15 = vld [vmem:[#allocation13 + $0x1a8] sm:$0xf] }
 0x24c   : > { %v1226_v62 = vmul.f32 %v12294_v32, %v1225_v54  ;;  %1946 = vmatpush.bf16.msra.mxu2 %v9221_v9  ;;  %v1263_v63 = vmul.f32 %v13432_v31, %v1241_v53  ;;  %v1283_v4 = vadd.f32 %v13437_v8, %v1261_v58  ;;  %v9089_v40 = vor.u32 %v11483_v57, %v9088_v10  ;;  %v9186_v10 = vld [vmem:[#allocation13 + $0x178] sm:$0xf0] }
 0x24d   : > { %vm1291_vm14 = vcmp.ge.f32.partialorder %v1275_v47, 0.0  ;;  %vm1293_vm15 = vcmp.ge.f32.partialorder %v1277_v50, 0.0  ;;  %v1307_v60 = vmul.f32 0.2, %v1275_v47  ;;  %v1309_v61 = vmul.f32 0.2, %v1277_v50 }
 0x24e   : > { %vm1295_vm0 = vcmp.ge.f32.partialorder %v1279_v55, 0.0  ;;  %v1311_v0 = vmul.f32 0.2, %v1279_v55  ;;  %v1313_v7 = vmul.f32 0.2, %v1281_v18  ;;  %v13471_v12 = vsel %vm1229_vm1, %v12294_v32, %v1226_v62  ;;  %1859 = vmatpush.bf16.msra.mxu3 %v9089_v40 }
 0x24f   : > { %v1323_v59 = vsel %vm1291_vm14, %v1275_v47, %v1307_v60  ;;  %v1325_v5 = vsel %vm1293_vm15, %v1277_v50, %v1309_v61  ;;  %vm1297_vm2 = vcmp.ge.f32.partialorder %v1281_v18, 0.0  ;;  %v1232_v17 = vmul.f32 %v13471_v12, %v13372_v19  ;;  %v11515_v62 = vld [vmem:[#allocation13 + $0x1b4] sm:$0xf0] }
 0x250   : > { %v13473_v13 = vpack.c.bf16 %v1325_v5, %v1323_v59  ;;  %v1234_v24 = vmul.f32 %v13471_v12, %v13376_v21  ;;  %v1246_v28 = vmul.f32 %v13471_v12, %v13414_v20  ;;  %v1236_v19 = vmul.f32 %v13471_v12, %v13380_v22 }
 0x251   : > { %v1238_v21 = vmul.f32 %v13471_v12, %v13386_v3  ;;  %v1254_v32 = vmul.f32 %v13439_v36, %v1232_v17  ;;  %v1327_v35 = vsel %vm1295_vm0, %v1279_v55, %v1311_v0  ;;  %v1329_v20 = vsel %vm1297_vm2, %v1281_v18, %v1313_v7  ;;  %v9072_v18 = vld [vmem:[#allocation13 + $0x88] sm:$0xf]  ;;  %v11473_v17 = vld [vmem:[#allocation13 + $0x6c] sm:$0xf] }
 0x252   : > { %1749 = vmatmul.bf16.vlgmr.msrb.gmra.mxu3 %v13473_v13  ;;  %1807 = vmatmul.bf16.vlgmr.msrb.gmra.mxu1 %v13473_v13  ;;  %v1256_v6 = vmul.f32 %v13439_v36, %v1234_v24  ;;  %v1258_v27 = vmul.f32 %v13439_v36, %v1236_v19  ;;  %v9233_v22 = vor.u32 %v11519_v26, %v9232_v25  ;;  %vm1299_vm3 = vcmp.ge.f32.partialorder %v1283_v4, 0.0  ;;  %v9058_v25 = vld [vmem:[#allocation13 + $0x78] sm:$0xf0]  ;;  %v9056_v26 = vld [vmem:[#allocation13 + $0x68] sm:$0xf] }
 0x253   : > { %v1260_v38 = vmul.f32 %v13439_v36, %v1238_v21  ;;  %v1276_v41 = vadd.f32 %v13452_v14, %v1254_v32  ;;  %v9205_v42 = vor.u32 %v11509_v29, %v9202_v30  ;;  %v1268_v46 = vmul.f32 %v13439_v36, %v1246_v28  ;;  %v11511_v29 = vld [vmem:[#allocation13 + $0x194] sm:$0xf0]  ;;  %v11501_v30 = vld [vmem:[#allocation13 + $0x14c] sm:$0xf] }
 0x254   : > { %v1278_v3 = vadd.f32 %v13452_v14, %v1256_v6  ;;  %v13499_v43 = vadd.f32 %v13452_v14, %v1258_v27  ;;  %1887 = vmatpush.bf16.msra.mxu0 %v9233_v22  ;;  %v1285_v49 = vadd.f32 %v13437_v8, %v1263_v63  ;;  %v1315_v44 = vmul.f32 0.2, %v1283_v4  ;;  %v11475_v63 = vld [vmem:[#allocation13 + $0x74] sm:$0xf0] }
 0x255   : > { %vm1292_vm4 = vcmp.ge.f32.partialorder %v1276_v41, 0.0  ;;  %v1308_v52 = vmul.f32 0.2, %v1276_v41  ;;  %1947 = vmatpush.bf16.msra.mxu2 %v9205_v42  ;;  %v1243_v50 = vmul.f32 %v13434_v34, %v13359_v1  ;;  %v13505_v53 = vadd.f32 %v13437_v8, %v1267_v23 }
 0x256   : > { %vm1294_vm5 = vcmp.ge.f32.partialorder %v1278_v3, 0.0  ;;  %v1310_v47 = vmul.f32 0.2, %v1278_v3  ;;  %v1244_v54 = vmul.f32 %v13471_v12, %v13406_v48  ;;  %v13510_v55 = vadd.f32 %v13452_v14, %v1260_v38 }
 0x257   : > { %v1324_v58 = vsel %vm1292_vm4, %v1276_v41, %v1308_v52  ;;  %vm1301_vm6 = vcmp.ge.f32.partialorder %v1285_v49, 0.0  ;;  %v1317_v61 = vmul.f32 0.2, %v1285_v49  ;;  %v13513_v0 = vadd.f32 %v13452_v14, %v1268_v46  ;;  %v9042_v46 = vld [vmem:[#allocation13 + $0x58] sm:$0xf0] }
 0x258   : > { %v1326_v60 = vsel %vm1294_vm5, %v1278_v3, %v1310_v47  ;;  %v13517_v34 = vpack.c.bf16 %v1329_v20, %v1327_v35  ;;  %v1331_v48 = vsel %vm1299_vm3, %v1283_v4, %v1315_v44  ;;  %v13521_v23 = vmul.f32 0.2, %v13499_v43  ;;  %v11469_v3 = vld [vmem:[#allocation13 + $0x4c] sm:$0xf]  ;;  %v11471_v52 = vld [vmem:[#allocation13 + $0x54] sm:$0xf0] }
 0x259   : > { %v13515_v1 = vpack.c.bf16 %v1326_v60, %v1324_v58  ;;  %v1333_v2 = vsel %vm1301_vm6, %v1285_v49, %v1317_v61  ;;  %v9077_v59 = vor.u32 %v11477_v51, %v9074_v45  ;;  %v9073_v5 = vor.u32 %v11479_v56, %v9072_v18  ;;  %v9040_v45 = vld [vmem:[#allocation13 + $0x48] sm:$0xf] }
 0x25a   : > { %vm1296_vm7 = vcmp.ge.f32.partialorder %v13499_v43, 0.0  ;;  %vm1298_vm8 = vcmp.ge.f32.partialorder %v13510_v55, 0.0  ;;  %v13527_v7 = vpack.c.bf16 %v1333_v2, %v1331_v48  ;;  %v9217_v9 = vor.u32 %v11515_v62, %v9216_v15  ;;  %v9184_v47 = vld [vmem:[#allocation13 + $0x168] sm:$0xf] }
 0x25b   : > { %1778 = vmatmul.bf16.vlgmr.msrb.gmra.mxu0 %v13515_v1  ;;  %1836 = vmatmul.bf16.vlgmr.msrb.gmra.mxu2 %v13515_v1  ;;  %v1240_v11 = vmul.f32 %v13471_v12, %v13396_v33  ;;  %v1242_v24 = vmul.f32 %v13471_v12, %v13400_v37  ;;  %v9189_v57 = vor.u32 %v11505_v16, %v9186_v10  ;;  %v9200_v33 = vld [vmem:[#allocation13 + $0x188] sm:$0xf]  ;;  %v9170_v12 = vld [vmem:[#allocation13 + $0x158] sm:$0xf0]  ;;  %vm1305_vm9 = vcmp.ge.f32.partialorder %v13505_v53, 0.0 }
 0x25c   : > { %1918 = vmatpush.bf16.msra.mxu1 %v9077_v59  ;;  %1860 = vmatpush.bf16.msra.mxu3 %v9073_v5  ;;  %v1265_v4 = vmul.f32 %v13432_v31, %v1243_v50  ;;  %v9061_v19 = vor.u32 %v11473_v17, %v9058_v25  ;;  %v9057_v21 = vor.u32 %v11475_v63, %v9056_v26  ;;  %v1321_v27 = vmul.f32 0.2, %v13505_v53  ;;  %v11497_v5 = vld [vmem:[#allocation13 + $0x12c] sm:$0xf]  ;;  %v9026_v10 = vld [vmem:[#allocation13 + $0x38] sm:$0xf0] }
 0x25d   : > { %1888 = vmatpush.bf16.msra.mxu0 %v9217_v9  ;;  %v1262_v28 = vmul.f32 %v13439_v36, %v1240_v11  ;;  %v1266_v32 = vmul.f32 %v13439_v36, %v1244_v54  ;;  %v1264_v6 = vmul.f32 %v13439_v36, %v1242_v24  ;;  %1948 = vmatpush.bf16.msra.mxu2 %v9189_v57  ;;  %v1314_v40 = vmul.f32 0.2, %v13510_v55  ;;  %v9154_v9 = vld [vmem:[#allocation13 + $0x138] sm:$0xf0]  ;;  %v9024_v11 = vld [vmem:[#allocation13 + $0x28] sm:$0xf] }
 0x25e   : > { %v9201_v37 = vor.u32 %v11511_v29, %v9200_v33  ;;  %v1287_v35 = vadd.f32 %v13437_v8, %v1265_v4  ;;  %v9173_v20 = vor.u32 %v11501_v30, %v9170_v12  ;;  %v1337_v41 = vsel %vm1305_vm9, %v13505_v53, %v1321_v27  ;;  %v11507_v53 = vld [vmem:[#allocation13 + $0x174] sm:$0xf0]  ;;  %v11465_v16 = vld [vmem:[#allocation13 + $0x2c] sm:$0xf]  ;;  %v9168_v24 = vld [vmem:[#allocation13 + $0x148] sm:$0xf] }
 0x25f   : > { %v1284_v31 = vadd.f32 %v13452_v14, %v1262_v28  ;;  %v1288_v38 = vadd.f32 %v13452_v14, %v1266_v32  ;;  %v1286_v22 = vadd.f32 %v13452_v14, %v1264_v6  ;;  %vm1306_vm12 = vcmp.ge.f32.partialorder %v13513_v0, 0.0  ;;  %v11503_v57 = vld [vmem:[#allocation13 + $0x154] sm:$0xf0]  ;;  %v9008_v25 = vld [vmem:[#allocation13 + $0x8] sm:$0xf] }
 0x260   : > { %1919 = vmatpush.bf16.msra.mxu1 %v9061_v19  ;;  %1861 = vmatpush.bf16.msra.mxu3 %v9057_v21  ;;  %vm1303_vm10 = vcmp.ge.f32.partialorder %v1287_v35, 0.0  ;;  %v1319_v36 = vmul.f32 0.2, %v1287_v35  ;;  %v9045_v51 = vor.u32 %v11469_v3, %v9042_v46  ;;  %v9041_v54 = vor.u32 %v11471_v52, %v9040_v45  ;;  %v11461_v63 = vld [vmem:[#allocation13 + $0xc] sm:$0xf] }
 0x261   : > { %vm1300_vm11 = vcmp.ge.f32.partialorder %v1284_v31, 0.0  ;;  %v1316_v8 = vmul.f32 0.2, %v1284_v31  ;;  %vm1302_vm13 = vcmp.ge.f32.partialorder %v1286_v22, 0.0  ;;  %v1318_v42 = vmul.f32 0.2, %v1286_v22  ;;  %1889 = vmatpush.bf16.msra.mxu0 %v9201_v37  ;;  %1949 = vmatpush.bf16.msra.mxu2 %v9173_v20 }
 0x262   : > { %1754 = vmatmul.bf16.gmra.mxu3 %v13517_v34  ;;  %1812 = vmatmul.bf16.gmra.mxu1 %v13517_v34  ;;  %v1335_v14 = vsel %vm1303_vm10, %v1287_v35, %v1319_v36  ;;  %vm1304_vm14 = vcmp.ge.f32.partialorder %v1288_v38, 0.0  ;;  %v1320_v18 = vmul.f32 0.2, %v1288_v38  ;;  %v1322_v56 = vmul.f32 0.2, %v13513_v0 }
 0x263   : > { %v1332_v49 = vsel %vm1300_vm11, %v1284_v31, %v1316_v8  ;;  %v13548_v44 = vpack.c.bf16 %v1337_v41, %v1335_v14  ;;  %v1334_v50 = vsel %vm1302_vm13, %v1286_v22, %v1318_v42  ;;  %v9185_v58 = vor.u32 %v11507_v53, %v9184_v47  ;;  %v9010_v4 = vld [vmem:[#allocation13 + $0x18] sm:$0xf0]  ;;  %v11493_v21 = vld [vmem:[#allocation13 + $0x10c] sm:$0xf]  ;;  %v9152_v29 = vld [vmem:[#allocation13 + $0x128] sm:$0xf] }
 0x264   : > { %v13551_v15 = vpack.c.bf16 %v1334_v50, %v1332_v49  ;;  %1920 = vmatpush.bf16.msra.mxu1 %v9045_v51  ;;  %v1328_v60 = vsel %vm1296_vm7, %v13499_v43, %v13521_v23  ;;  %v1330_v61 = vsel %vm1298_vm8, %v13510_v55, %v1314_v40  ;;  %1862 = vmatpush.bf16.msra.mxu3 %v9041_v54  ;;  %v11467_v23 = vld [vmem:[#allocation13 + $0x34] sm:$0xf0]  ;;  %v9138_v33 = vld [vmem:[#allocation13 + $0x118] sm:$0xf0]  ;;  %v9136_v37 = vld [vmem:[#allocation13 + $0x108] sm:$0xf] }
 0x265   : > { %v1336_v62 = vsel %vm1304_vm14, %v1288_v38, %v1320_v18  ;;  %v1338_v48 = vsel %vm1306_vm12, %v13513_v0, %v1322_v56  ;;  %1890 = vmatpush.bf16.msra.mxu0 %v9185_v58  ;;  %v1342_v59 = vpack.c.bf16 %v1330_v61, %v1328_v60  ;;  %v9157_v43 = vor.u32 %v11497_v5, %v9154_v9  ;;  %v11463_v0 = vld [vmem:[#allocation13 + $0x14] sm:$0xf0]  ;;  %v13582_v45 = vld [vmem:[#allocation14] sm:$0xf] }
 0x266   : > { %v1346_v2 = vpack.c.bf16 %v1338_v48, %v1336_v62  ;;  %v9025_v55 = vor.u32 %v11467_v23, %v9024_v11  ;;  %v9029_v17 = vor.u32 %v11465_v16, %v9026_v10  ;;  %v9169_v26 = vor.u32 %v11503_v57, %v9168_v24  ;;  %v11499_v32 = vld [vmem:[#allocation13 + $0x134] sm:$0xf0] }
 0x267   : > { %1950 = vmatpush.bf16.msra.mxu2 %v9157_v43  ;;  %v9009_v28 = vor.u32 %v11463_v0, %v9008_v25  ;;  %v9013_v19 = vor.u32 %v11461_v63, %v9010_v4  ;;  %v9141_v30 = vor.u32 %v11493_v21, %v9138_v33  ;;  %v9153_v6 = vor.u32 %v11499_v32, %v9152_v29  ;;  %v11495_v12 = vld [vmem:[#allocation13 + $0x114] sm:$0xf0] }
 0x268   : > { %1863 = vmatpush.bf16.msra.mxu3 %v9025_v55  ;;  %1921 = vmatpush.bf16.msra.mxu1 %v9029_v17  ;;  %v9137_v35 = vor.u32 %v11495_v12, %v9136_v37  ;;  %v1413_v47 = vperm.slane %v13582_v45, 0  ;;  %v1414_v61 = vperm.slane %v13582_v45, 1 }
 0x269   : > { %1891 = vmatpush.bf16.msra.mxu0 %v9169_v26 }
 0x26b   : > { %1783 = vmatmul.bf16.gmra.mxu0 %v1342_v59  ;;  %1841 = vmatmul.bf16.gmra.mxu2 %v1342_v59 }
 0x26c   : > { %1951 = vmatpush.bf16.msra.mxu2 %v9141_v30  ;;  %1864 = vmatpush.bf16.msra.mxu3 %v9009_v28 }
 0x26d   : > { %1922 = vmatpush.bf16.msra.mxu1 %v9013_v19  ;;  %1892 = vmatpush.bf16.msra.mxu0 %v9153_v6 }
 0x271   : > { %1893 = vmatpush.bf16.msra.mxu0 %v9137_v35 }
 0x272   : > { %1759 = vmatmul.bf16.gmra.mxu3 %v13527_v7  ;;  %1817 = vmatmul.bf16.gmra.mxu1 %v13527_v7 }
 0x27b   : > { %1788 = vmatmul.bf16.gmra.mxu0 %v13551_v15  ;;  %1846 = vmatmul.bf16.gmra.mxu2 %v13551_v15 }
 0x282   : > { %1764 = vmatmul.bf16.gmra.mxu3 %v13548_v44  ;;  %1822 = vmatmul.bf16.gmra.mxu1 %v13548_v44 }
 0x28b   : > { %1793 = vmatmul.bf16.gmra.mxu0 %v1346_v2  ;;  %1851 = vmatmul.bf16.gmra.mxu2 %v1346_v2 }
 0x292   : > { %1865 = vmatmul.bf16.vlgmr.msra.gmra.mxu3 %v13473_v13  ;;  %1923 = vmatmul.bf16.vlgmr.msra.gmra.mxu1 %v13473_v13 }
 0x29b   : > { %1894 = vmatmul.bf16.vlgmr.msra.gmra.mxu0 %v13515_v1  ;;  %1952 = vmatmul.bf16.vlgmr.msra.gmra.mxu2 %v13515_v1 }
 0x2a2   : > { %1870 = vmatmul.bf16.gmra.mxu3 %v13517_v34  ;;  %1928 = vmatmul.bf16.gmra.mxu1 %v13517_v34 }
 0x2ab   : > { %1899 = vmatmul.bf16.gmra.mxu0 %v1342_v59  ;;  %1957 = vmatmul.bf16.gmra.mxu2 %v1342_v59 }
 0x2b2   : > { %1875 = vmatmul.bf16.gmra.mxu3 %v13527_v7  ;;  %1933 = vmatmul.bf16.gmra.mxu1 %v13527_v7 }
 0x2bb   : > { %1904 = vmatmul.bf16.gmra.mxu0 %v13551_v15  ;;  %1962 = vmatmul.bf16.gmra.mxu2 %v13551_v15 }
 0x2c2   : > { %1880 = vmatmul.bf16.gmra.mxu3 %v13548_v44  ;;  %1938 = vmatmul.bf16.gmra.mxu1 %v13548_v44 }
 0x2cb   : > { %1909 = vmatmul.bf16.gmra.mxu0 %v1346_v2  ;;  %1967 = vmatmul.bf16.gmra.mxu2 %v1346_v2 }
 0x2cf   : > { %v1808_v13 = vpop.f32.mrf.mxu1 }
 0x2d0   : > { %v1809_v16 = vadd.f32 %v1808_v13, %v1414_v61 }
 0x2d5   : > { %v1750_v1 = vpop.f32.mrf.mxu3 }
 0x2d6   : > { %v1751_v56 = vadd.f32 %v1750_v1, %v1413_v47 }
 0x2d7   : > { %v1810_v31 = vpop.f32.mrf.mxu1 }
 0x2d8   : > { %v1779_v34 = vpop.f32.mrf.mxu0  ;;  %v1811_v5 = vadd.f32 %v1810_v31, %v1414_v61 }
 0x2d9   : > { %v13588_v48 = vadd.f32 %v1779_v34, %v1751_v56 }
 0x2dd   : > { %v1752_v20 = vpop.f32.mrf.mxu3 }
 0x2de   : > { %v1837_v27 = vpop.f32.mrf.mxu2  ;;  %v1753_v54 = vadd.f32 %v1752_v20, %v1413_v47 }
 0x2df   : > { %v1813_v38 = vpop.f32.mrf.mxu1  ;;  %v13599_v0 = vadd.f32 %v1837_v27, %v1809_v16 }
 0x2e0   : > { %v1781_v40 = vpop.f32.mrf.mxu0  ;;  %v1814_v10 = vadd.f32 %v1813_v38, %v1414_v61 }
 0x2e1   : > { %v13585_v58 = vadd.f32 %v1781_v40, %v1753_v54 }
 0x2e3   : > { %v1973_v11 = vadd.f32 %v13585_v58, %v13588_v48 }
 0x2e5   : > { %v1755_v22 = vpop.f32.mrf.mxu3 }
 0x2e6   : > { %v1839_v7 = vpop.f32.mrf.mxu2  ;;  %v1756_v15 = vadd.f32 %v1755_v22, %v1413_v47 }
 0x2e7   : > { %v1815_v36 = vpop.f32.mrf.mxu1  ;;  %v13596_v55 = vadd.f32 %v1839_v7, %v1811_v5 }
 0x2e8   : > { %v1784_v8 = vpop.f32.mrf.mxu0  ;;  %v1816_v63 = vadd.f32 %v1815_v36, %v1414_v61 }
 0x2e9   : > { %v13590_v2 = vadd.f32 %v1784_v8, %v1756_v15  ;;  %v1986_v21 = vadd.f32 %v13596_v55, %v13599_v0 }
 0x2eb   : > { %v1974_v24 = vadd.f32 %v1973_v11, %v13590_v2 }
 0x2ed   : > { %v1757_v41 = vpop.f32.mrf.mxu3 }
 0x2ee   : > { %v1842_v3 = vpop.f32.mrf.mxu2  ;;  %v1758_v60 = vadd.f32 %v1757_v41, %v1413_v47 }
 0x2ef   : > { %v1818_v42 = vpop.f32.mrf.mxu1  ;;  %v13601_v4 = vadd.f32 %v1842_v3, %v1814_v10 }
 0x2f0   : > { %v1786_v14 = vpop.f32.mrf.mxu0  ;;  %v1819_v30 = vadd.f32 %v1818_v42, %v1414_v61 }
 0x2f1   : > { %v13594_v43 = vadd.f32 %v1786_v14, %v1758_v60  ;;  %v1987_v12 = vadd.f32 %v1986_v21, %v13601_v4 }
 0x2f3   : > { %v1975_v28 = vadd.f32 %v1974_v24, %v13594_v43 }
 0x2f5   : > { %v1760_v46 = vpop.f32.mrf.mxu3 }
 0x2f6   : > { %v1844_v49 = vpop.f32.mrf.mxu2  ;;  %v1761_v59 = vadd.f32 %v1760_v46, %v1413_v47 }
 0x2f7   : > { %v1820_v44 = vpop.f32.mrf.mxu1  ;;  %v13606_v33 = vadd.f32 %v1844_v49, %v1816_v63 }
 0x2f8   : > { %v1789_v51 = vpop.f32.mrf.mxu0  ;;  %v1821_v13 = vadd.f32 %v1820_v44, %v1414_v61 }
 0x2f9   : > { %v1790_v57 = vadd.f32 %v1789_v51, %v1761_v59  ;;  %v1988_v34 = vadd.f32 %v1987_v12, %v13606_v33 }
 0x2fb   : > { %v1976_v32 = vadd.f32 %v1975_v28, %v1790_v57 }
 0x2fd   : > { %v1762_v52 = vpop.f32.mrf.mxu3 }
 0x2fe   : > { %v1847_v50 = vpop.f32.mrf.mxu2  ;;  %v1763_v23 = vadd.f32 %v1762_v52, %v1413_v47 }
 0x2ff   : > { %v1823_v53 = vpop.f32.mrf.mxu1  ;;  %v13609_v1 = vadd.f32 %v1847_v50, %v1819_v30 }
 0x300   : > { %v1791_v18 = vpop.f32.mrf.mxu0  ;;  %v1824_v27 = vadd.f32 %v1823_v53, %v1414_v61 }
 0x301   : > { %v1792_v19 = vadd.f32 %v1791_v18, %v1763_v23  ;;  %v1989_v7 = vadd.f32 %v1988_v34, %v13609_v1 }
 0x303   : > { %v1977_v31 = vadd.f32 %v1976_v32, %v1792_v19 }
 0x305   : > { %v1765_v62 = vpop.f32.mrf.mxu3 }
 0x306   : > { %v1849_v9 = vpop.f32.mrf.mxu2  ;;  %v1766_v25 = vadd.f32 %v1765_v62, %v1413_v47 }
 0x307   : > { %v1825_v26 = vpop.f32.mrf.mxu1  ;;  %v13612_v38 = vadd.f32 %v1849_v9, %v1821_v13 }
 0x308   : > { %v1794_v17 = vpop.f32.mrf.mxu0  ;;  %v1826_v14 = vadd.f32 %v1825_v26, %v1414_v61 }
 0x309   : > { %v1795_v6 = vadd.f32 %v1794_v17, %v1766_v25  ;;  %v1990_v42 = vadd.f32 %v1989_v7, %v13612_v38 }
 0x30b   : > { %v1978_v40 = vadd.f32 %v1977_v31, %v1795_v6 }
 0x30d   : > { %v1767_v29 = vpop.f32.mrf.mxu3 }
 0x30e   : > { %v1768_v37 = vadd.f32 %v1767_v29, %v1413_v47  ;;  %v1852_v35 = vpop.f32.mrf.mxu2 }
 0x30f   : > { %v13615_v36 = vadd.f32 %v1852_v35, %v1824_v27  ;;  %v13617_v41 = vpop.f32.mrf.mxu1 }
 0x310   : > { %v1796_v20 = vpop.f32.mrf.mxu0 }
 0x311   : > { %v1797_v22 = vadd.f32 %v1796_v20, %v1768_v37  ;;  %v1991_v44 = vadd.f32 %v1990_v42, %v13615_v36 }
 0x313   : > { %v1979_v8 = vadd.f32 %v1978_v40, %v1797_v22 }
 0x315   : > { %v13619_v3 = vpop.f32.mrf.mxu3  ;;  %v1980_v46 = vrot.slane %v1979_v8, 4 }
 0x316   : > { %v1854_v49 = vpop.f32.mrf.mxu2 }
 0x317   : > { %v1981_v51 = vadd.f32 %v1980_v46, %v1979_v8  ;;  %v13623_v52 = vadd.f32 %v1854_v49, %v1826_v14  ;;  %v13630_v62 = vpop.f32.mrf.mxu1 }
 0x318   : > { %v13625_v47 = vpop.f32.mrf.mxu0 }
 0x319   : > { %v1982_v50 = vrot.slane %v1981_v51, 2  ;;  %v1992_v54 = vadd.f32 %v1991_v44, %v13623_v52 }
 0x31b   : > { %v1983_v53 = vadd.f32 %v1982_v50, %v1981_v51  ;;  %v1993_v18 = vrot.slane %v1992_v54, 4 }
 0x31d   : > { %v13628_v56 = vpop.f32.mrf.mxu3  ;;  %v1984_v15 = vrot.slane %v1983_v53, 1  ;;  %v1994_v60 = vadd.f32 %v1993_v18, %v1992_v54  ;;  %v11584_v18 = vld [vmem:[#allocation19 + $0x1dc] sm:$0xf0] }
 0x31e   : > { %v13632_v61 = vpop.f32.mrf.mxu2 }
 0x31f   : > { %v1985_v59 = vadd.f32 %v1984_v15, %v1983_v53  ;;  %v1995_v5 = vrot.slane %v1994_v60, 2  ;;  %v13659_v21 = vpop.f32.mrf.mxu1  ;;  %v9480_v53 = vld [vmem:[#allocation19 + $0x1c0] sm:$0xf] }
 0x320   : > { %v13634_v9 = vpop.f32.mrf.mxu0 }
 0x321   : > { %v2025_v11 = vmul.f32 %v1985_v59, %v13336_v39  ;;  %v1996_v17 = vadd.f32 %v1995_v5, %v1994_v60 }
 0x323   : > { %v13638_v23 = vsub.f32 %v13588_v48, %v2025_v11  ;;  %v13641_v16 = vsub.f32 %v13585_v58, %v2025_v11  ;;  %v13644_v10 = vsub.f32 %v13590_v2, %v2025_v11  ;;  %v13649_v25 = vsub.f32 %v13594_v43, %v2025_v11 }
 0x324   : > { %v13655_v48 = vsub.f32 %v1790_v57, %v2025_v11  ;;  %v1997_v2 = vrot.slane %v1996_v17, 1  ;;  %v13661_v29 = vsub.f32 %v1792_v19, %v2025_v11  ;;  %v13669_v57 = vsub.f32 %v1795_v6, %v2025_v11 }
 0x325   : > { %v13646_v24 = vpop.f32.mrf.mxu3  ;;  %v2061_v26 = vmul.f32 %v13638_v23, %v13638_v23  ;;  %v2065_v63 = vmul.f32 %v13641_v16, %v13641_v16  ;;  %v2069_v58 = vmul.f32 %v13644_v10, %v13644_v10  ;;  %v2073_v32 = vmul.f32 %v13649_v25, %v13649_v25 }
 0x326   : > { %v13663_v30 = vpop.f32.mrf.mxu2  ;;  %v1998_v12 = vadd.f32 %v1997_v2, %v1996_v17  ;;  %v2077_v35 = vmul.f32 %v13655_v48, %v13655_v48  ;;  %v13674_v34 = vsub.f32 %v1797_v22, %v2025_v11  ;;  %v2081_v19 = vmul.f32 %v13661_v29, %v13661_v29 }
 0x327   : > { %v2093_v28 = vadd.f32 %v2065_v63, %v2061_v26  ;;  %v2085_v8 = vmul.f32 %v13669_v57, %v13669_v57  ;;  %v13707_v51 = vpop.f32.mrf.mxu1  ;;  %v9736_v63 = vld [vmem:[#allocation19 + $0x3c0] sm:$0xf] }
 0x328   : > { %v13665_v43 = vpop.f32.mrf.mxu0  ;;  %v2026_v31 = vmul.f32 %v1998_v12, %v13336_v39 }
 0x329   : > { %v2094_v37 = vadd.f32 %v2093_v28, %v2069_v58  ;;  %v11648_v58 = vld [vmem:[#allocation19 + $0x3dc] sm:$0xf0] }
 0x32a   : > { %v13681_v40 = vsub.f32 %v13599_v0, %v2026_v31  ;;  %v13684_v6 = vsub.f32 %v13596_v55, %v2026_v31  ;;  %v13687_v7 = vsub.f32 %v13601_v4, %v2026_v31  ;;  %v13692_v42 = vsub.f32 %v13606_v33, %v2026_v31  ;;  %v9448_v28 = vld [vmem:[#allocation19 + $0x180] sm:$0xf] }
 0x32b   : > { %v2095_v13 = vadd.f32 %v2094_v37, %v2073_v32  ;;  %v2089_v55 = vmul.f32 %v13674_v34, %v13674_v34  ;;  %v13703_v49 = vsub.f32 %v13609_v1, %v2026_v31  ;;  %v13710_v50 = vsub.f32 %v13612_v38, %v2026_v31 }
 0x32c   : > { %v2062_v14 = vmul.f32 %v13681_v40, %v13681_v40  ;;  %v2066_v0 = vmul.f32 %v13684_v6, %v13684_v6  ;;  %v2070_v44 = vmul.f32 %v13687_v7, %v13687_v7  ;;  %v2074_v60 = vmul.f32 %v13692_v42, %v13692_v42 }
 0x32d   : > { %v13678_v20 = vpop.f32.mrf.mxu3  ;;  %v2096_v27 = vadd.f32 %v2095_v13, %v2077_v35  ;;  %v9481_v1 = vor.u32 %v11584_v18, %v9480_v53  ;;  %v13719_v17 = vsub.f32 %v13615_v36, %v2026_v31  ;;  %v2078_v38 = vmul.f32 %v13703_v49, %v13703_v49  ;;  %v11576_v35 = vld [vmem:[#allocation19 + $0x19c] sm:$0xf0] }
 0x32e   : > { %v2106_v33 = vadd.f32 %v2066_v0, %v2062_v14  ;;  %v13712_v54 = vpop.f32.mrf.mxu2  ;;  %v13724_v32 = vsub.f32 %v13623_v52, %v2026_v31  ;;  %v2082_v37 = vmul.f32 %v13710_v50, %v13710_v50  ;;  %v9737_v36 = vor.u32 %v11648_v58, %v9736_v63  ;;  %v9704_v14 = vld [vmem:[#allocation19 + $0x380] sm:$0xf] }
 0x32f   : > { %v2097_v22 = vadd.f32 %v2096_v27, %v2081_v19  ;;  %3975 = vmatpush.bf16.msrb.mxu3 %v9481_v1  ;;  %v9449_v19 = vor.u32 %v11576_v35, %v9448_v28  ;;  %v11640_v0 = vld [vmem:[#allocation19 + $0x39c] sm:$0xf0] }
 0x330   : > { %v13700_v46 = vpop.f32.mrf.mxu0  ;;  %v2107_v59 = vadd.f32 %v2106_v33, %v2070_v44  ;;  %4004 = vmatpush.bf16.msrb.mxu0 %v9737_v36  ;;  %v2090_v31 = vmul.f32 %v13724_v32, %v13724_v32  ;;  %v9705_v44 = vor.u32 %v11640_v0, %v9704_v14  ;;  %v9416_v33 = vld [vmem:[#allocation19 + $0x140] sm:$0xf] }
 0x331   : > { %v2098_v4 = vadd.f32 %v2097_v22, %v2085_v8  ;;  %v2086_v8 = vmul.f32 %v13719_v17, %v13719_v17  ;;  %v11568_v53 = vld [vmem:[#allocation19 + $0x15c] sm:$0xf0] }
 0x332   : > { %v2108_v26 = vadd.f32 %v2107_v59, %v2074_v60  ;;  %v9417_v60 = vor.u32 %v11568_v53, %v9416_v33  ;;  %v9384_v35 = vld [vmem:[#allocation19 + $0x100] sm:$0xf] }
 0x333   : > { %v2099_v15 = vadd.f32 %v2098_v4, %v2089_v55  ;;  %3976 = vmatpush.bf16.msrb.mxu3 %v9449_v19  ;;  %v13734_v4 = vpop.f32.mrf.mxu1  ;;  %v9352_v53 = vld [vmem:[#allocation19 + $0xc0] sm:$0xf] }
 0x334   : > { %v2109_v12 = vadd.f32 %v2108_v26, %v2078_v38  ;;  %4005 = vmatpush.bf16.msrb.mxu0 %v9705_v44  ;;  %v1415_v26 = vperm.slane %v13582_v45, 2 }
 0x335   : > { %v13716_v5 = vpop.f32.mrf.mxu3  ;;  %v2100_v11 = vrot.slane %v2099_v15, 4 }
 0x336   : > { %v2110_v22 = vadd.f32 %v2109_v12, %v2082_v37  ;;  %v13736_v18 = vpop.f32.mrf.mxu2  ;;  %v1869_v12 = vadd.f32 %v13628_v56, %v1415_v26  ;;  %v1867_v36 = vadd.f32 %v13619_v3, %v1415_v26  ;;  %v1872_v0 = vadd.f32 %v13646_v24, %v1415_v26 }
 0x337   : > { %v2101_v2 = vadd.f32 %v2100_v11, %v2099_v15  ;;  %3977 = vmatpush.bf16.msrb.mxu3 %v9417_v60  ;;  %v1874_v3 = vadd.f32 %v13678_v20, %v1415_v26  ;;  %v11552_v60 = vld [vmem:[#allocation19 + $0xdc] sm:$0xf0]  ;;  %v13762_v20 = vperm.slane %v13582_v45, 3 }
 0x338   : > { %v13728_v13 = vpop.f32.mrf.mxu0  ;;  %v2111_v55 = vadd.f32 %v2110_v22, %v2086_v8  ;;  %v9672_v8 = vld [vmem:[#allocation19 + $0x340] sm:$0xf]  ;;  %v13751_v56 = vadd.f32 %v13634_v9, %v1869_v12  ;;  %v9353_v24 = vor.u32 %v11552_v60, %v9352_v53  ;;  %v1877_v9 = vadd.f32 %v13716_v5, %v1415_v26 }
 0x339   : > { %v2102_v27 = vrot.slane %v2101_v2, 2  ;;  %v11632_v22 = vld [vmem:[#allocation19 + $0x35c] sm:$0xf0] }
 0x33a   : > { %v2112_v1 = vadd.f32 %v2111_v55, %v2090_v31  ;;  %v9673_v44 = vor.u32 %v11632_v22, %v9672_v8  ;;  %v13773_v45 = vadd.f32 %v13728_v13, %v1877_v9  ;;  %v1930_v13 = vadd.f32 %v13659_v21, %v13762_v20 }
 0x33b   : > { %v2103_v52 = vadd.f32 %v2102_v27, %v2101_v2  ;;  %v11560_v27 = vld [vmem:[#allocation19 + $0x11c] sm:$0xf0] }
 0x33c   : > { %v2113_v38 = vrot.slane %v2112_v1, 4  ;;  %v9385_v55 = vor.u32 %v11560_v27, %v9384_v35  ;;  %4006 = vmatpush.bf16.msrb.mxu0 %v9673_v44  ;;  %v13799_v21 = vadd.f32 %v13712_v54, %v1930_v13 }
 0x33d   : > { %v1878_v15 = vpop.f32.mrf.mxu3  ;;  %v2104_v59 = vrot.slane %v2103_v52, 1 }
 0x33e   : > { %v2114_v28 = vadd.f32 %v2113_v38, %v2112_v1  ;;  %v13748_v31 = vpop.f32.mrf.mxu2  ;;  %3978 = vmatpush.bf16.msrb.mxu3 %v9385_v55  ;;  %v11624_v38 = vld [vmem:[#allocation19 + $0x31c] sm:$0xf0]  ;;  %v1879_v27 = vadd.f32 %v1878_v15, %v1415_v26  ;;  %v1927_v55 = vadd.f32 %v13630_v62, %v13762_v20 }
 0x33f   : > { %v2105_v11 = vadd.f32 %v2104_v59, %v2103_v52  ;;  %v13746_v52 = vpop.f32.mrf.mxu1  ;;  %v13755_v59 = vadd.f32 %v13625_v47, %v1867_v36  ;;  %v13768_v36 = vadd.f32 %v13700_v46, %v1874_v3  ;;  %v1925_v46 = vadd.f32 %v13617_v41, %v13762_v20 }
 0x340   : > { %v1907_v63 = vpop.f32.mrf.mxu0  ;;  %v2115_v37 = vrot.slane %v2114_v28, 2 }
 0x341   : > { %v2145_v58 = vmul.f32 %v2105_v11, %v13336_v39  ;;  %v9640_v11 = vld [vmem:[#allocation19 + $0x300] sm:$0xf]  ;;  %v1999_v35 = vadd.f32 %v13751_v56, %v13755_v59  ;;  %v13782_v44 = vadd.f32 %v1907_v63, %v1879_v27  ;;  %v13795_v63 = vld [vmem:[#allocation16] sm:$0xf]  ;;  %v1937_v27 = vadd.f32 %v13746_v52, %v13762_v20 }
 0x342   : > { %v2116_v14 = vadd.f32 %v2115_v37, %v2114_v28  ;;  %v13758_v28 = vadd.f32 %v13665_v43, %v1872_v0  ;;  %v9641_v37 = vor.u32 %v11624_v38, %v9640_v11  ;;  %3979 = vmatpush.bf16.msrb.mxu3 %v9353_v24  ;;  %v13790_v24 = vadd.f32 %v13632_v61, %v1925_v46 }
 0x343   : > { %v13740_v2 = vadd.f32 0.8, %v2145_v58  ;;  %17022 = vst [vmem:[#allocation39_spill] sm:$0xff] %v13795_v63  ;;  %v13812_v54 = vperm.slane %v13795_v63, 0 }
 0x344   : > { %v2117_v33 = vrot.slane %v2116_v14, 1  ;;  %4007 = vmatpush.bf16.msrb.mxu0 %v9641_v37  ;;  %v2000_v5 = vadd.f32 %v1999_v35, %v13758_v28  ;;  %v1935_v37 = vadd.f32 %v13734_v4, %v13762_v20 }
 0x345   : > { %v1881_v19 = vpop.f32.mrf.mxu3  ;;  %12295 = vrsqrt.f32 %v13740_v2  ;;  %vm2159_vm0 = vweird.f32 %v13740_v2 }
 0x346   : > { %v2118_v58 = vadd.f32 %v2117_v33, %v2116_v14  ;;  %v1882_v22 = vadd.f32 %v1881_v19, %v1415_v26  ;;  %v2001_v15 = vadd.f32 %v2000_v5, %v13768_v36  ;;  %v13787_v19 = vadd.f32 %v13663_v30, %v1927_v55  ;;  %v1965_v60 = vpop.f32.mrf.mxu2 }
 0x347   : > { %v1939_v53 = vpop.f32.mrf.mxu1  ;;  %v13828_v5 = vadd.f32 %v13748_v31, %v1935_v37  ;;  %v13840_v31 = vadd.f32 %v1965_v60, %v1937_v27 }
 0x348   : > { %v1910_v1 = vpop.f32.mrf.mxu0  ;;  %v2146_v47 = vmul.f32 %v2118_v58, %v13336_v39  ;;  %v2002_v62 = vadd.f32 %v2001_v15, %v13773_v45  ;;  %v2012_v9 = vadd.f32 %v13787_v19, %v13790_v24  ;;  %v1940_v13 = vadd.f32 %v1939_v53, %v13762_v20 }
 0x349   : > { %v13793_v41 = vadd.f32 %v1910_v1, %v1882_v22  ;;  %v13807_v1 = vld [vmem:[#allocation17] sm:$0xf] }
 0x34a   : > { %v13775_v0 = vadd.f32 0.8, %v2146_v47  ;;  %v2003_v61 = vadd.f32 %v2002_v62, %v13782_v44 }
 0x34b   : > { %v12296_v12 = vpop.eup %12295 }
 0x34c   : > { %v2154_v8 = vmul.f32 %v12296_v12, %v13740_v2  ;;  %vm2160_vm15 = vweird.f32 %v12296_v12  ;;  %12297 = vrsqrt.f32 %v13775_v0  ;;  %v2004_v47 = vadd.f32 %v2003_v61, %v13793_v41 }
 0x34d   : > { %v1883_v43 = vpop.f32.mrf.mxu3  ;;  %vm2161_vm1 = vmor %vm2159_vm0, %vm2160_vm15  ;;  %v2013_v2 = vadd.f32 %v2012_v9, %v13799_v21  ;;  %vm2169_vm7 = vweird.f32 %v13775_v0 }
 0x34e   : > { %v2155_v14 = vmul.f32 %v12296_v12, %v2154_v8  ;;  %v1884_v33 = vadd.f32 %v1883_v43, %v1415_v26  ;;  %v1932_v26 = vadd.f32 %v13707_v51, %v13762_v20  ;;  %v13825_v43 = vperm.slane %v13807_v1, 0 }
 0x350   : > { %v2156_v3 = vmul.f32 0.5, %v2155_v14  ;;  %v1912_v30 = vpop.f32.mrf.mxu0  ;;  %v13817_v51 = vadd.f32 %v13736_v18, %v1932_v26 }
 0x351   : > { %v13804_v38 = vadd.f32 %v1912_v30, %v1884_v33 }
 0x352   : > { %v2157_v11 = vsub.f32 1.5, %v2156_v3  ;;  %v13831_v18 = vpop.eup %12297  ;;  %v2014_v46 = vadd.f32 %v2013_v2, %v13817_v51  ;;  %v1941_v3 = vpop.f32.mrf.mxu1 }
 0x353   : > { %v2005_v4 = vadd.f32 %v2004_v47, %v13804_v38  ;;  %v1942_v37 = vadd.f32 %v1941_v3, %v13762_v20  ;;  %vm2170_vm2 = vweird.f32 %v13831_v18  ;;  %v11616_v3 = vld [vmem:[#allocation19 + $0x2dc] sm:$0xf0] }
 0x354   : > { %v2158_v58 = vmul.f32 %v12296_v12, %v2157_v11  ;;  %vm2171_vm10 = vmor %vm2169_vm7, %vm2170_vm2 }
 0x355   : > { %v2006_v62 = vrot.slane %v2005_v4, 4 }
 0x356   : > { %v2162_v35 = vsel %vm2161_vm1, %v12296_v12, %v2158_v58  ;;  %v13856_v58 = vperm.slane %v13795_v63, 1 }
 0x357   : > { %v2193_v8 = vmul.f32 %v2162_v35, %v13638_v23  ;;  %v2209_v22 = vmul.f32 %v2162_v35, %v13655_v48  ;;  %v2213_v12 = vmul.f32 %v2162_v35, %v13661_v29  ;;  %v2217_v14 = vmul.f32 %v2162_v35, %v13669_v57  ;;  %v1968_v57 = vpop.f32.mrf.mxu2 }
 0x358   : > { %v2221_v52 = vmul.f32 %v2162_v35, %v13674_v34  ;;  %v2197_v23 = vmul.f32 %v2162_v35, %v13641_v16  ;;  %v2164_v34 = vmul.f32 %v13831_v18, %v13775_v0  ;;  %v2015_v16 = vadd.f32 %v2014_v46, %v13828_v5 }
 0x359   : > { %v2235_v55 = vmul.f32 %v13812_v54, %v2193_v8  ;;  %v2251_v15 = vmul.f32 %v13812_v54, %v2209_v22  ;;  %v2255_v33 = vmul.f32 %v13812_v54, %v2213_v12  ;;  %v2259_v48 = vmul.f32 %v13812_v54, %v2217_v14  ;;  %v9320_v14 = vld [vmem:[#allocation19 + $0x80] sm:$0xf] }
 0x35a   : > { %v2263_v29 = vmul.f32 %v13812_v54, %v2221_v52  ;;  %v2239_v61 = vmul.f32 %v13812_v54, %v2197_v23  ;;  %v2016_v9 = vadd.f32 %v2015_v16, %v13840_v31  ;;  %v2201_v53 = vmul.f32 %v2162_v35, %v13644_v10  ;;  %v11544_v52 = vld [vmem:[#allocation19 + $0x9c] sm:$0xf0] }
 0x35b   : > { %v2293_v60 = vadd.f32 %v13825_v43, %v2251_v15  ;;  %v2297_v11 = vadd.f32 %v13825_v43, %v2255_v33  ;;  %v2301_v30 = vadd.f32 %v13825_v43, %v2259_v48  ;;  %v2277_v47 = vadd.f32 %v13825_v43, %v2235_v55 }
 0x35c   : > { %v2305_v26 = vadd.f32 %v13825_v43, %v2263_v29  ;;  %v13863_v2 = vadd.f32 %v1968_v57, %v1940_v13  ;;  %v2165_v27 = vmul.f32 %v13831_v18, %v2164_v34  ;;  %v2007_v12 = vadd.f32 %v2006_v62, %v2005_v4  ;;  %v9608_v29 = vld [vmem:[#allocation19 + $0x2c0] sm:$0xf] }
 0x35d   : > { %vm2325_vm3 = vcmp.ge.f32.partialorder %v2293_v60, 0.0  ;;  %vm2329_vm4 = vcmp.ge.f32.partialorder %v2297_v11, 0.0  ;;  %vm2333_vm5 = vcmp.ge.f32.partialorder %v2301_v30, 0.0  ;;  %v2357_v8 = vmul.f32 0.2, %v2293_v60 }
 0x35e   : > { %vm2337_vm6 = vcmp.ge.f32.partialorder %v2305_v26, 0.0  ;;  %v2361_v22 = vmul.f32 0.2, %v2297_v11  ;;  %v2281_v20 = vadd.f32 %v13825_v43, %v2239_v61  ;;  %v2365_v10 = vmul.f32 0.2, %v2301_v30 }
 0x35f   : > { %v2369_v23 = vmul.f32 0.2, %v2305_v26  ;;  %v2166_v55 = vmul.f32 0.5, %v2165_v27  ;;  %v2205_v46 = vmul.f32 %v2162_v35, %v13649_v25  ;;  %v2389_v15 = vsel %vm2325_vm3, %v2293_v60, %v2357_v8  ;;  %v1970_v63 = vpop.f32.mrf.mxu2  ;;  %v9288_v25 = vld [vmem:[#allocation19 + $0x40] sm:$0xf] }
 0x360   : > { %v2393_v33 = vsel %vm2329_vm4, %v2297_v11, %v2361_v22  ;;  %v2008_v48 = vrot.slane %v2007_v12, 2  ;;  %v2341_v57 = vmul.f32 0.2, %v2277_v47  ;;  %v2397_v34 = vsel %vm2333_vm5, %v2301_v30, %v2365_v10  ;;  %v11536_v35 = vld [vmem:[#allocation19 + $0x5c] sm:$0xf0] }
 0x361   : > { %v2401_v16 = vsel %vm2337_vm6, %v2305_v26, %v2369_v23  ;;  %v13870_v4 = vpack.c.bf16 %v2393_v33, %v2389_v15  ;;  %v2243_v13 = vmul.f32 %v13812_v54, %v2201_v53  ;;  %v2167_v61 = vsub.f32 1.5, %v2166_v55  ;;  %v9576_v22 = vld [vmem:[#allocation19 + $0x280] sm:$0xf] }
 0x362   : > { %v13873_v62 = vpack.c.bf16 %v2401_v16, %v2397_v34  ;;  %v2009_v27 = vadd.f32 %v2008_v48, %v2007_v12  ;;  %v2345_v60 = vmul.f32 0.2, %v2281_v20  ;;  %v9321_v11 = vor.u32 %v11544_v52, %v9320_v14  ;;  %v11608_v30 = vld [vmem:[#allocation19 + $0x29c] sm:$0xf0] }
 0x363   : > { %17023 = vst [vmem:[#allocation40_spill] sm:$0xff] %v13870_v4  ;;  %v9609_v8 = vor.u32 %v11616_v3, %v9608_v29  ;;  %vm2309_vm8 = vcmp.ge.f32.partialorder %v2277_v47, 0.0  ;;  %vm2313_vm9 = vcmp.ge.f32.partialorder %v2281_v20, 0.0  ;;  %v2168_v26 = vmul.f32 %v13831_v18, %v2167_v61  ;;  %v9256_v14 = vld [vmem:[#allocation19] sm:$0xf] }
 0x364   : > { %17024 = vst [vmem:[#allocation41_spill] sm:$0xff] %v13873_v62  ;;  %v2017_v53 = vadd.f32 %v2016_v9, %v13863_v2  ;;  %v2247_v10 = vmul.f32 %v13812_v54, %v2205_v46  ;;  %v13882_v12 = vperm.slane %v13807_v1, 1  ;;  %v13884_v23 = vadd.f32 %v1970_v63, %v1942_v37  ;;  %3980 = vmatpush.bf16.msrb.mxu3 %v9321_v11  ;;  %v11528_v52 = vld [vmem:[#allocation19 + $0x1c] sm:$0xf0] }
 0x365   : > { %4008 = vmatpush.bf16.msrb.mxu0 %v9609_v8  ;;  %v9289_v0 = vor.u32 %v11536_v35, %v9288_v25  ;;  %v13887_v55 = vadd.f32 %v13825_v43, %v2243_v13  ;;  %v13890_v9 = vsel %vm2171_vm10, %v13831_v18, %v2168_v26  ;;  %v2010_v54 = vrot.slane %v2009_v27, 1  ;;  %v9544_v15 = vld [vmem:[#allocation19 + $0x240] sm:$0xf] }
 0x366   : > { %v9577_v46 = vor.u32 %v11608_v30, %v9576_v22  ;;  %v11600_v33 = vld [vmem:[#allocation19 + $0x25c] sm:$0xf0]  ;;  %v2194_v48 = vmul.f32 %v13890_v9, %v13681_v40  ;;  %v2198_v63 = vmul.f32 %v13890_v9, %v13684_v6  ;;  %v2373_v37 = vsel %vm2309_vm8, %v2277_v47, %v2341_v57 }
 0x367   : > { %v2377_v29 = vsel %vm2313_vm9, %v2281_v20, %v2345_v60  ;;  %v2210_v3 = vmul.f32 %v13890_v9, %v13703_v49  ;;  %v2214_v18 = vmul.f32 %v13890_v9, %v13710_v50  ;;  %v2218_v34 = vmul.f32 %v13890_v9, %v13719_v17 }
 0x368   : > { %v2222_v16 = vmul.f32 %v13890_v9, %v13724_v32  ;;  %v2236_v40 = vmul.f32 %v13856_v58, %v2194_v48  ;;  %v2018_v6 = vadd.f32 %v2017_v53, %v13884_v23  ;;  %3981 = vmatpush.bf16.msrb.mxu3 %v9289_v0  ;;  %v9257_v47 = vor.u32 %v11528_v52, %v9256_v14 }
 0x369   : > { %v9545_v57 = vor.u32 %v11600_v33, %v9544_v15  ;;  %v2252_v20 = vmul.f32 %v13856_v58, %v2210_v3  ;;  %v2256_v49 = vmul.f32 %v13856_v58, %v2214_v18  ;;  %v2260_v13 = vmul.f32 %v13856_v58, %v2218_v34  ;;  %4009 = vmatpush.bf16.msrb.mxu0 %v9577_v46 }
 0x36a   : > { %v2264_v50 = vmul.f32 %v13856_v58, %v2222_v16  ;;  %v2240_v17 = vmul.f32 %v13856_v58, %v2198_v63  ;;  %v2011_v61 = vadd.f32 %v2010_v54, %v2009_v27  ;;  %v13913_v32 = vpack.c.bf16 %v2377_v29, %v2373_v37 }
 0x36b   : > { %v2294_v25 = vadd.f32 %v13882_v12, %v2252_v20  ;;  %v2298_v35 = vadd.f32 %v13882_v12, %v2256_v49  ;;  %v2302_v60 = vadd.f32 %v13882_v12, %v2260_v13  ;;  %v2289_v8 = vadd.f32 %v13825_v43, %v2247_v10 }
 0x36c   : > { %17025 = vst [vmem:[#allocation42_spill] sm:$0xff] %v13913_v32  ;;  %v2306_v11 = vadd.f32 %v13882_v12, %v2264_v50  ;;  %3982 = vmatpush.bf16.msrb.mxu3 %v9257_v47  ;;  %vm2317_vm11 = vcmp.ge.f32.partialorder %v13887_v55, 0.0  ;;  %v2278_v22 = vadd.f32 %v13882_v12, %v2236_v40  ;;  %v2019_v30 = vrot.slane %v2018_v6, 4  ;;  %v9512_v40 = vld [vmem:[#allocation19 + $0x200] sm:$0xf] }
 0x36d   : > { %4010 = vmatpush.bf16.msrb.mxu0 %v9545_v57  ;;  %v2282_v27 = vadd.f32 %v13882_v12, %v2240_v17  ;;  %vm2326_vm12 = vcmp.ge.f32.partialorder %v2294_v25, 0.0  ;;  %vm2330_vm13 = vcmp.ge.f32.partialorder %v2298_v35, 0.0  ;;  %v2027_v26 = vmul.f32 %v2011_v61, %v13336_v39  ;;  %v11592_v47 = vld [vmem:[#allocation19 + $0x21c] sm:$0xf0] }
 0x36e   : > { %vm2334_vm14 = vcmp.ge.f32.partialorder %v2302_v60, 0.0  ;;  %vm2338_vm15 = vcmp.ge.f32.partialorder %v2306_v11, 0.0  ;;  %v2358_v53 = vmul.f32 0.2, %v2294_v25  ;;  %v2362_v0 = vmul.f32 0.2, %v2298_v35 }
 0x36f   : > { %3983 = vmatmul.bf16.vlgmr.msrb.gmra.mxu3 %v13913_v32  ;;  %v2349_v43 = vmul.f32 0.2, %v13887_v55  ;;  %v2366_v10 = vmul.f32 0.2, %v2302_v60  ;;  %v2370_v14 = vmul.f32 0.2, %v2306_v11  ;;  %v13927_v52 = vsub.f32 %v13755_v59, %v2027_v26 }
 0x370   : > { %v2353_v54 = vmul.f32 0.2, %v2289_v8  ;;  %v2390_v46 = vsel %vm2326_vm12, %v2294_v25, %v2358_v53  ;;  %v2394_v15 = vsel %vm2330_vm13, %v2298_v35, %v2362_v0  ;;  %v13930_v33 = vsub.f32 %v13751_v56, %v2027_v26 }
 0x371   : > { %v2398_v48 = vsel %vm2334_vm14, %v2302_v60, %v2366_v10  ;;  %v2402_v63 = vsel %vm2338_vm15, %v2306_v11, %v2370_v14  ;;  %v13932_v37 = vpack.c.bf16 %v2394_v15, %v2390_v46  ;;  %v2020_v29 = vadd.f32 %v2019_v30, %v2018_v6 }
 0x372   : > { %v2342_v3 = vmul.f32 0.2, %v2278_v22  ;;  %v2346_v18 = vmul.f32 0.2, %v2282_v27  ;;  %v13934_v34 = vpack.c.bf16 %v2402_v63, %v2398_v48  ;;  %v13937_v16 = vsub.f32 %v13758_v28, %v2027_v26 }
 0x373   : > { %17026 = vst [vmem:[#allocation43_spill] sm:$0xff] %v13932_v37  ;;  %v2202_v59 = vmul.f32 %v13890_v9, %v13687_v7  ;;  %vm2310_vm0 = vcmp.ge.f32.partialorder %v2278_v22, 0.0  ;;  %vm2314_vm1 = vcmp.ge.f32.partialorder %v2282_v27, 0.0  ;;  %v2063_v56 = vmul.f32 %v13927_v52, %v13927_v52 }
 0x374   : > { %vm2321_vm2 = vcmp.ge.f32.partialorder %v2289_v8, 0.0  ;;  %v2206_v6 = vmul.f32 %v13890_v9, %v13692_v42  ;;  %v13946_v57 = vsub.f32 %v13768_v36, %v2027_v26  ;;  %v2067_v28 = vmul.f32 %v13930_v33, %v13930_v33 }
 0x375   : > { %v2381_v7 = vsel %vm2317_vm11, %v13887_v55, %v2349_v43  ;;  %v13954_v20 = vsub.f32 %v13773_v45, %v2027_v26  ;;  %v2071_v49 = vmul.f32 %v13937_v16, %v13937_v16  ;;  %v2021_v13 = vrot.slane %v2020_v29, 2 }
 0x376   : > { %v2119_v50 = vadd.f32 %v2067_v28, %v2063_v56  ;;  %v9513_v17 = vor.u32 %v11592_v47, %v9512_v40  ;;  %v2374_v42 = vsel %vm2310_vm0, %v2278_v22, %v2342_v3  ;;  %v2378_v9 = vsel %vm2314_vm1, %v2282_v27, %v2346_v18  ;;  %v9992_v40 = vld [vmem:[#allocation19 + $0x5c0] sm:$0xf] }
 0x377   : > { %v2385_v36 = vsel %vm2321_vm2, %v2289_v8, %v2353_v54  ;;  %v2244_v61 = vmul.f32 %v13856_v58, %v2202_v59  ;;  %v2022_v25 = vadd.f32 %v2021_v13, %v2020_v29  ;;  %v13959_v35 = vpack.c.bf16 %v2378_v9, %v2374_v42  ;;  %v11712_v47 = vld [vmem:[#allocation19 + $0x5dc] sm:$0xf0]  ;;  %v9482_v13 = vld [vmem:[#allocation19 + $0x1e0] sm:$0xf0] }
 0x378   : > { %v2248_v60 = vmul.f32 %v13856_v58, %v2206_v6  ;;  %v13963_v55 = vsub.f32 %v13782_v44, %v2027_v26  ;;  %v2075_v45 = vmul.f32 %v13946_v57, %v13946_v57  ;;  %v2120_v11 = vadd.f32 %v2119_v50, %v2071_v49  ;;  %4011 = vmatpush.bf16.msrb.mxu0 %v9513_v17  ;;  %v11580_v6 = vld [vmem:[#allocation19 + $0x1c4] sm:$0xf] }
 0x379   : > { %17027 = vst [vmem:[#allocation44_spill] sm:$0xff] %v13959_v35  ;;  %v2023_v30 = vrot.slane %v2022_v25, 1  ;;  %v13968_v22 = vsub.f32 %v13793_v41, %v2027_v26  ;;  %v2079_v8 = vmul.f32 %v13954_v20, %v13954_v20  ;;  %v13972_v53 = vpack.c.bf16 %v2385_v36, %v2381_v7 }
 0x37a   : > { %v2121_v27 = vadd.f32 %v2120_v11, %v2075_v45  ;;  %v2286_v58 = vadd.f32 %v13882_v12, %v2244_v61  ;;  %v2290_v44 = vadd.f32 %v13882_v12, %v2248_v60  ;;  %v13978_v43 = vsub.f32 %v13804_v38, %v2027_v26  ;;  %v10248_v60 = vld [vmem:[#allocation19 + $0x7c0] sm:$0xf] }
 0x37b   : > { %17028 = vst [vmem:[#allocation45_spill] sm:$0xff] %v13972_v53  ;;  %v2024_v0 = vadd.f32 %v2023_v30, %v2022_v25  ;;  %4012 = vmatmul.bf16.vlgmr.msrb.gmra.mxu0 %v13959_v35  ;;  %v2083_v41 = vmul.f32 %v13963_v55, %v13963_v55  ;;  %v2087_v54 = vmul.f32 %v13968_v22, %v13968_v22  ;;  %v11776_v45 = vld [vmem:[#allocation19 + $0x7dc] sm:$0xf0] }
 0x37c   : > { %v2122_v10 = vadd.f32 %v2121_v27, %v2079_v8  ;;  %vm2318_vm3 = vcmp.ge.f32.partialorder %v2286_v58, 0.0  ;;  %v2350_v26 = vmul.f32 0.2, %v2286_v58  ;;  %v2354_v48 = vmul.f32 0.2, %v2290_v44 }
 0x37d   : > { %v2028_v14 = vmul.f32 %v2024_v0, %v13336_v39  ;;  %v2091_v63 = vmul.f32 %v13978_v43, %v13978_v43  ;;  %vm2322_vm4 = vcmp.ge.f32.partialorder %v2290_v44, 0.0  ;;  %v9993_v49 = vor.u32 %v11712_v47, %v9992_v40  ;;  %v9960_v8 = vld [vmem:[#allocation19 + $0x580] sm:$0xf]  ;;  %v11636_v40 = vld [vmem:[#allocation19 + $0x384] sm:$0xf] }
 0x37e   : > { %v2123_v46 = vadd.f32 %v2122_v10, %v2083_v41  ;;  %v2386_v28 = vsel %vm2322_vm4, %v2290_v44, %v2354_v48  ;;  %v9485_v42 = vor.u32 %v11580_v6, %v9482_v13  ;;  %v10249_v30 = vor.u32 %v11776_v45, %v10248_v60  ;;  %v11704_v27 = vld [vmem:[#allocation19 + $0x59c] sm:$0xf0]  ;;  %v11644_v41 = vld [vmem:[#allocation19 + $0x3c4] sm:$0xf] }
 0x37f   : > { %3988 = vmatmul.bf16.gmra.mxu3 %v13972_v53  ;;  %v13987_v15 = vsub.f32 %v13790_v24, %v2028_v14  ;;  %v13990_v12 = vsub.f32 %v13787_v19, %v2028_v14  ;;  %v13993_v38 = vsub.f32 %v13799_v21, %v2028_v14  ;;  %v13998_v3 = vsub.f32 %v13817_v51, %v2028_v14  ;;  %v9738_v10 = vld [vmem:[#allocation19 + $0x3e0] sm:$0xf0] }
 0x380   : > { %v2124_v29 = vadd.f32 %v2123_v46, %v2087_v54  ;;  %v14005_v21 = vsub.f32 %v13828_v5, %v2028_v14  ;;  %v2382_v51 = vsel %vm2318_vm3, %v2286_v58, %v2350_v26  ;;  %v14011_v50 = vsub.f32 %v13840_v31, %v2028_v14  ;;  %4033 = vmatpush.bf16.msrb.mxu1 %v9993_v49  ;;  %v11572_v26 = vld [vmem:[#allocation19 + $0x184] sm:$0xf] }
 0x381   : > { %v2064_v24 = vmul.f32 %v13987_v15, %v13987_v15  ;;  %v2068_v19 = vmul.f32 %v13990_v12, %v13990_v12  ;;  %v2072_v59 = vmul.f32 %v13993_v38, %v13993_v38  ;;  %v2076_v5 = vmul.f32 %v13998_v3, %v13998_v3  ;;  %4091 = vmatpush.bf16.msra.mxu3 %v9485_v42  ;;  %v9450_v48 = vld [vmem:[#allocation19 + $0x1a0] sm:$0xf0] }
 0x382   : > { %v2125_v18 = vadd.f32 %v2124_v29, %v2091_v63  ;;  %v14016_v36 = vsub.f32 %v13863_v2, %v2028_v14  ;;  %v2080_v61 = vmul.f32 %v14005_v21, %v14005_v21  ;;  %v14020_v11 = vpack.c.bf16 %v2386_v28, %v2382_v51  ;;  %4062 = vmatpush.bf16.msrb.mxu2 %v10249_v30  ;;  %v9706_v28 = vld [vmem:[#allocation19 + $0x3a0] sm:$0xf0] }
 0x383   : > { %v2132_v56 = vadd.f32 %v2068_v19, %v2064_v24  ;;  %v14023_v58 = vsub.f32 %v13884_v23, %v2028_v14  ;;  %v2084_v2 = vmul.f32 %v14011_v50, %v14011_v50  ;;  %v9961_v44 = vor.u32 %v11704_v27, %v9960_v8  ;;  %v10216_v24 = vld [vmem:[#allocation19 + $0x780] sm:$0xf]  ;;  %v9418_v49 = vld [vmem:[#allocation19 + $0x160] sm:$0xf0] }
 0x384   : > { %v2126_v7 = vrot.slane %v2125_v18, 4  ;;  %17029 = vst [vmem:[#allocation46_spill] sm:$0xff] %v14020_v11  ;;  %v9741_v46 = vor.u32 %v11644_v41, %v9738_v10  ;;  %v2088_v63 = vmul.f32 %v14016_v36, %v14016_v36  ;;  %v11768_v19 = vld [vmem:[#allocation19 + $0x79c] sm:$0xf0]  ;;  %v9453_v14 = vor.u32 %v11572_v26, %v9450_v48  ;;  %v11556_v30 = vld [vmem:[#allocation19 + $0x104] sm:$0xf] }
 0x385   : > { %v2133_v17 = vadd.f32 %v2132_v56, %v2072_v59  ;;  %4034 = vmatpush.bf16.msrb.mxu1 %v9961_v44  ;;  %v9928_v23 = vld [vmem:[#allocation19 + $0x540] sm:$0xf]  ;;  %v10217_v59 = vor.u32 %v11768_v19, %v10216_v24  ;;  %v2092_v47 = vmul.f32 %v14023_v58, %v14023_v58  ;;  %v9386_v8 = vld [vmem:[#allocation19 + $0x120] sm:$0xf0] }
 0x386   : > { %v2127_v9 = vadd.f32 %v2126_v7, %v2125_v18  ;;  %v11696_v56 = vld [vmem:[#allocation19 + $0x55c] sm:$0xf0]  ;;  %4120 = vmatpush.bf16.msra.mxu0 %v9741_v46  ;;  %4092 = vmatpush.bf16.msra.mxu3 %v9453_v14  ;;  %v11564_v7 = vld [vmem:[#allocation19 + $0x144] sm:$0xf] }
 0x387   : > { %v2134_v25 = vadd.f32 %v2133_v17, %v2076_v5  ;;  %v9929_v51 = vor.u32 %v11696_v56, %v9928_v23  ;;  %4063 = vmatpush.bf16.msrb.mxu2 %v10217_v59  ;;  %v9709_v5 = vor.u32 %v11636_v40, %v9706_v28  ;;  %v9421_v17 = vor.u32 %v11564_v7, %v9418_v49  ;;  %v11628_v44 = vld [vmem:[#allocation19 + $0x344] sm:$0xf]  ;;  %v10152_v26 = vld [vmem:[#allocation19 + $0x700] sm:$0xf] }
 0x388   : > { %v2128_v31 = vrot.slane %v2127_v9, 2  ;;  %v9674_v41 = vld [vmem:[#allocation19 + $0x360] sm:$0xf0]  ;;  %v11752_v48 = vld [vmem:[#allocation19 + $0x71c] sm:$0xf0] }
 0x389   : > { %v2135_v0 = vadd.f32 %v2134_v25, %v2080_v61  ;;  %v11760_v61 = vld [vmem:[#allocation19 + $0x75c] sm:$0xf0]  ;;  %4035 = vmatpush.bf16.msrb.mxu1 %v9929_v51  ;;  %v11548_v19 = vld [vmem:[#allocation19 + $0xc4] sm:$0xf] }
 0x38a   : > { %v2129_v54 = vadd.f32 %v2128_v31, %v2127_v9  ;;  %v10184_v9 = vld [vmem:[#allocation19 + $0x740] sm:$0xf]  ;;  %4121 = vmatpush.bf16.msra.mxu0 %v9709_v5  ;;  %4093 = vmatpush.bf16.msra.mxu3 %v9421_v17  ;;  %v9354_v23 = vld [vmem:[#allocation19 + $0xe0] sm:$0xf0] }
 0x38b   : > { %v2136_v29 = vadd.f32 %v2135_v0, %v2084_v2  ;;  %4017 = vmatmul.bf16.gmra.mxu0 %v14020_v11  ;;  %v9896_v25 = vld [vmem:[#allocation19 + $0x500] sm:$0xf]  ;;  %v10185_v45 = vor.u32 %v11760_v61, %v10184_v9  ;;  %v9389_v0 = vor.u32 %v11556_v30, %v9386_v8  ;;  %v9357_v59 = vor.u32 %v11548_v19, %v9354_v23  ;;  %v11620_v56 = vld [vmem:[#allocation19 + $0x304] sm:$0xf] }
 0x38c   : > { %v2130_v18 = vrot.slane %v2129_v54, 1  ;;  %v11688_v31 = vld [vmem:[#allocation19 + $0x51c] sm:$0xf0]  ;;  %v9642_v40 = vld [vmem:[#allocation19 + $0x320] sm:$0xf0] }
 0x38d   : > { %v2137_v6 = vadd.f32 %v2136_v29, %v2088_v63  ;;  %v9897_v2 = vor.u32 %v11688_v31, %v9896_v25  ;;  %4064 = vmatpush.bf16.msrb.mxu2 %v10185_v45  ;;  %v9864_v63 = vld [vmem:[#allocation19 + $0x4c0] sm:$0xf]  ;;  %v10153_v29 = vor.u32 %v11752_v48, %v10152_v26  ;;  %v11540_v5 = vld [vmem:[#allocation19 + $0x84] sm:$0xf] }
 0x38e   : > { %v2131_v13 = vadd.f32 %v2130_v18, %v2129_v54  ;;  %v9677_v54 = vor.u32 %v11628_v44, %v9674_v41  ;;  %v11680_v24 = vld [vmem:[#allocation19 + $0x4dc] sm:$0xf0]  ;;  %4094 = vmatpush.bf16.msra.mxu3 %v9389_v0  ;;  %v9322_v17 = vld [vmem:[#allocation19 + $0xa0] sm:$0xf0] }
 0x38f   : > { %3993 = vmatmul.bf16.gmra.mxu3 %v13870_v4  ;;  %v2138_v42 = vadd.f32 %v2137_v6, %v2092_v47  ;;  %4036 = vmatpush.bf16.msrb.mxu1 %v9897_v2  ;;  %v9865_v18 = vor.u32 %v11680_v24, %v9864_v63  ;;  %v9645_v47 = vor.u32 %v11620_v56, %v9642_v40  ;;  %v10120_v51 = vld [vmem:[#allocation19 + $0x6c0] sm:$0xf]  ;;  %v11612_v25 = vld [vmem:[#allocation19 + $0x2c4] sm:$0xf] }
 0x390   : > { %v2147_v60 = vmul.f32 %v2131_v13, %v13336_v39  ;;  %4122 = vmatpush.bf16.msra.mxu0 %v9677_v54  ;;  %v11744_v28 = vld [vmem:[#allocation19 + $0x6dc] sm:$0xf0]  ;;  %v9325_v61 = vor.u32 %v11540_v5, %v9322_v17  ;;  %v11532_v48 = vld [vmem:[#allocation19 + $0x44] sm:$0xf] }
 0x391   : > { %v2139_v27 = vrot.slane %v2138_v42, 4  ;;  %4065 = vmatpush.bf16.msrb.mxu2 %v10153_v29  ;;  %v9832_v7 = vld [vmem:[#allocation19 + $0x480] sm:$0xf]  ;;  %v10121_v49 = vor.u32 %v11744_v28, %v10120_v51  ;;  %v9290_v63 = vld [vmem:[#allocation19 + $0x60] sm:$0xf0] }
 0x392   : > { %v14034_v10 = vadd.f32 0.8, %v2147_v60  ;;  %v11672_v13 = vld [vmem:[#allocation19 + $0x49c] sm:$0xf0]  ;;  %4095 = vmatpush.bf16.msra.mxu3 %v9357_v59  ;;  %v9610_v60 = vld [vmem:[#allocation19 + $0x2e0] sm:$0xf0]  ;;  %v9293_v29 = vor.u32 %v11532_v48, %v9290_v63 }
 0x393   : > { %v2140_v46 = vadd.f32 %v2139_v27, %v2138_v42  ;;  %4037 = vmatpush.bf16.msrb.mxu1 %v9865_v18  ;;  %v9833_v9 = vor.u32 %v11672_v13, %v9832_v7  ;;  %v9613_v31 = vor.u32 %v11612_v25, %v9610_v60  ;;  %v10088_v27 = vld [vmem:[#allocation19 + $0x680] sm:$0xf]  ;;  %v11604_v24 = vld [vmem:[#allocation19 + $0x284] sm:$0xf] }
 0x394   : > { %12299 = vrsqrt.f32 %v14034_v10  ;;  %4123 = vmatpush.bf16.msra.mxu0 %v9645_v47  ;;  %v11736_v2 = vld [vmem:[#allocation19 + $0x69c] sm:$0xf0]  ;;  %v9578_v19 = vld [vmem:[#allocation19 + $0x2a0] sm:$0xf0]  ;;  %vm2179_vm6 = vweird.f32 %v14034_v10 }
 0x395   : > { %v2141_v14 = vrot.slane %v2140_v46, 2  ;;  %4066 = vmatpush.bf16.msrb.mxu2 %v10121_v49  ;;  %v10089_v0 = vor.u32 %v11736_v2, %v10088_v27  ;;  %v9800_v44 = vld [vmem:[#allocation19 + $0x440] sm:$0xf]  ;;  %v9581_v59 = vor.u32 %v11604_v24, %v9578_v19  ;;  %v11524_v28 = vld [vmem:[#allocation19 + $0x4] sm:$0xf] }
 0x396   : > { %v11664_v41 = vld [vmem:[#allocation19 + $0x45c] sm:$0xf0]  ;;  %4096 = vmatpush.bf16.msra.mxu3 %v9325_v61  ;;  %v9258_v7 = vld [vmem:[#allocation19 + $0x20] sm:$0xf0] }
 0x397   : > { %v2142_v6 = vadd.f32 %v2141_v14, %v2140_v46  ;;  %4038 = vmatpush.bf16.msrb.mxu1 %v9833_v9  ;;  %v9801_v26 = vor.u32 %v11664_v41, %v9800_v44  ;;  %v10056_v18 = vld [vmem:[#allocation19 + $0x640] sm:$0xf]  ;;  %v9261_v13 = vor.u32 %v11524_v28, %v9258_v7  ;;  %v11596_v5 = vld [vmem:[#allocation19 + $0x244] sm:$0xf]  ;;  %v14050_v41 = vperm.slane %v13807_v1, 2 }
 0x398   : > { %4124 = vmatpush.bf16.msra.mxu0 %v9613_v31  ;;  %v11728_v56 = vld [vmem:[#allocation19 + $0x65c] sm:$0xf0]  ;;  %v9546_v17 = vld [vmem:[#allocation19 + $0x260] sm:$0xf0]  ;;  %v17030_v31 = vld [vmem:[#allocation39_spill] sm:$0xff] }
 0x399   : > { %v2143_v42 = vrot.slane %v2142_v6, 1  ;;  %4067 = vmatpush.bf16.msrb.mxu2 %v10089_v0  ;;  %v9768_v40 = vld [vmem:[#allocation19 + $0x400] sm:$0xf]  ;;  %v10057_v51 = vor.u32 %v11728_v56, %v10056_v18  ;;  %v9549_v25 = vor.u32 %v11596_v5, %v9546_v17  ;;  %v11588_v60 = vld [vmem:[#allocation19 + $0x204] sm:$0xf] }
 0x39a   : > { %v12300_v45 = vpop.eup %12299  ;;  %v11656_v47 = vld [vmem:[#allocation19 + $0x41c] sm:$0xf0]  ;;  %4097 = vmatpush.bf16.msra.mxu3 %v9293_v29  ;;  %v9514_v27 = vld [vmem:[#allocation19 + $0x220] sm:$0xf0] }
 0x39b   : > { %v2174_v30 = vmul.f32 %v12300_v45, %v14034_v10  ;;  %v2144_v8 = vadd.f32 %v2143_v42, %v2142_v6  ;;  %4022 = vmatmul.bf16.gmra.mxu0 %v13932_v37  ;;  %4039 = vmatpush.bf16.msrb.mxu1 %v9801_v26  ;;  %vm2180_vm5 = vweird.f32 %v12300_v45  ;;  %v9769_v49 = vor.u32 %v11656_v47, %v9768_v40  ;;  %v10024_v9 = vld [vmem:[#allocation19 + $0x600] sm:$0xf] }
 0x39c   : > { %4125 = vmatpush.bf16.msra.mxu0 %v9581_v59  ;;  %v11720_v61 = vld [vmem:[#allocation19 + $0x61c] sm:$0xf0]  ;;  %vm2181_vm7 = vmor %vm2179_vm6, %vm2180_vm5  ;;  %v9517_v0 = vor.u32 %v11588_v60, %v9514_v27 }
 0x39d   : > { %v2175_v54 = vmul.f32 %v12300_v45, %v2174_v30  ;;  %v2148_v46 = vmul.f32 %v2144_v8, %v13336_v39  ;;  %4068 = vmatpush.bf16.msrb.mxu2 %v10057_v51  ;;  %v2229_v30 = vperm.slane %v17030_v31, 2  ;;  %v10025_v8 = vor.u32 %v11720_v61, %v10024_v9  ;;  %v10250_v51 = vld [vmem:[#allocation19 + $0x7e0] sm:$0xf0] }
 0x39e   : > { %4098 = vmatpush.bf16.msra.mxu3 %v9261_v13  ;;  %v11708_v61 = vld [vmem:[#allocation19 + $0x5c4] sm:$0xf] }
 0x39f   : > { %3998 = vmatmul.bf16.gmra.mxu3 %v13873_v62  ;;  %v2176_v23 = vmul.f32 0.5, %v2175_v54  ;;  %v14041_v14 = vadd.f32 0.8, %v2148_v46  ;;  %4040 = vmatpush.bf16.msrb.mxu1 %v9769_v49 }
 0x3a0   : > { %4126 = vmatpush.bf16.msra.mxu0 %v9549_v25  ;;  %v9994_v25 = vld [vmem:[#allocation19 + $0x5e0] sm:$0xf0] }
 0x3a1   : > { %v2177_v6 = vsub.f32 1.5, %v2176_v23  ;;  %12301 = vrsqrt.f32 %v14041_v14  ;;  %4069 = vmatpush.bf16.msrb.mxu2 %v10025_v8  ;;  %vm2189_vm15 = vweird.f32 %v14041_v14 }
 0x3a3   : > { %v2178_v42 = vmul.f32 %v12300_v45, %v2177_v6  ;;  %v11772_v6 = vld [vmem:[#allocation19 + $0x7c4] sm:$0xf] }
 0x3a4   : > { %4127 = vmatpush.bf16.msra.mxu0 %v9517_v0  ;;  %v11764_v0 = vld [vmem:[#allocation19 + $0x784] sm:$0xf] }
 0x3a5   : > { %v2182_v2 = vsel %vm2181_vm7, %v12300_v45, %v2178_v42 }
 0x3a6   : > { %v2195_v10 = vmul.f32 %v2182_v2, %v13927_v52  ;;  %v2199_v44 = vmul.f32 %v2182_v2, %v13930_v33  ;;  %v2211_v54 = vmul.f32 %v2182_v2, %v13954_v20  ;;  %v2215_v46 = vmul.f32 %v2182_v2, %v13963_v55 }
 0x3a7   : > { %v2219_v26 = vmul.f32 %v2182_v2, %v13968_v22  ;;  %v2223_v45 = vmul.f32 %v2182_v2, %v13978_v43  ;;  %v12302_v18 = vpop.eup %12301  ;;  %v2203_v59 = vmul.f32 %v2182_v2, %v13937_v16  ;;  %v2207_v56 = vmul.f32 %v2182_v2, %v13946_v57 }
 0x3a8   : > { %v2237_v48 = vmul.f32 %v2229_v30, %v2195_v10  ;;  %v2241_v63 = vmul.f32 %v2229_v30, %v2199_v44  ;;  %v2253_v29 = vmul.f32 %v2229_v30, %v2211_v54  ;;  %v2257_v24 = vmul.f32 %v2229_v30, %v2215_v46  ;;  %v10218_v10 = vld [vmem:[#allocation19 + $0x7a0] sm:$0xf0] }
 0x3a9   : > { %v2261_v19 = vmul.f32 %v2229_v30, %v2219_v26  ;;  %v2265_v52 = vmul.f32 %v2229_v30, %v2223_v45  ;;  %v2184_v47 = vmul.f32 %v12302_v18, %v14041_v14  ;;  %v2245_v57 = vmul.f32 %v2229_v30, %v2203_v59 }
 0x3aa   : > { %v2279_v33 = vadd.f32 %v14050_v41, %v2237_v48  ;;  %v2283_v23 = vadd.f32 %v14050_v41, %v2241_v63  ;;  %v2295_v20 = vadd.f32 %v14050_v41, %v2253_v29  ;;  %v2299_v55 = vadd.f32 %v14050_v41, %v2257_v24 }
 0x3ab   : > { %v2303_v22 = vadd.f32 %v14050_v41, %v2261_v19  ;;  %v2307_v43 = vadd.f32 %v14050_v41, %v2265_v52  ;;  %4027 = vmatmul.bf16.gmra.mxu0 %v13934_v34  ;;  %v2185_v5 = vmul.f32 %v12302_v18, %v2184_v47  ;;  %v2249_v60 = vmul.f32 %v2229_v30, %v2207_v56 }
 0x3ac   : > { %vm2311_vm8 = vcmp.ge.f32.partialorder %v2279_v33, 0.0  ;;  %vm2327_vm9 = vcmp.ge.f32.partialorder %v2295_v20, 0.0  ;;  %vm2331_vm10 = vcmp.ge.f32.partialorder %v2299_v55, 0.0  ;;  %v2343_v40 = vmul.f32 0.2, %v2279_v33 }
 0x3ad   : > { %vm2335_vm11 = vcmp.ge.f32.partialorder %v2303_v22, 0.0  ;;  %vm2339_vm12 = vcmp.ge.f32.partialorder %v2307_v43, 0.0  ;;  %v2347_v28 = vmul.f32 0.2, %v2283_v23  ;;  %v2359_v7 = vmul.f32 0.2, %v2295_v20 }
 0x3ae   : > { %v2363_v49 = vmul.f32 0.2, %v2299_v55  ;;  %vm2315_vm13 = vcmp.ge.f32.partialorder %v2283_v23, 0.0  ;;  %v2367_v13 = vmul.f32 0.2, %v2303_v22  ;;  %v2375_v9 = vsel %vm2311_vm8, %v2279_v33, %v2343_v40 }
 0x3af   : > { %4099 = vmatmul.bf16.vlgmr.msra.gmra.mxu3 %v13913_v32  ;;  %v2371_v16 = vmul.f32 0.2, %v2307_v43  ;;  %v2391_v17 = vsel %vm2327_vm9, %v2295_v20, %v2359_v7  ;;  %v2186_v54 = vmul.f32 0.5, %v2185_v5  ;;  %v2379_v46 = vsel %vm2315_vm13, %v2283_v23, %v2347_v28  ;;  %v9962_v28 = vld [vmem:[#allocation19 + $0x5a0] sm:$0xf0] }
 0x3b0   : > { %v2395_v42 = vsel %vm2331_vm10, %v2299_v55, %v2363_v49  ;;  %v2399_v8 = vsel %vm2335_vm11, %v2303_v22, %v2367_v13  ;;  %v10253_v26 = vor.u32 %v11772_v6, %v10250_v51  ;;  %v14077_v45 = vpack.c.bf16 %v2379_v46, %v2375_v9  ;;  %v11700_v51 = vld [vmem:[#allocation19 + $0x584] sm:$0xf] }
 0x3b1   : > { %v2403_v27 = vsel %vm2339_vm12, %v2307_v43, %v2371_v16  ;;  %v14072_v2 = vpack.c.bf16 %v2395_v42, %v2391_v17  ;;  %v9997_v48 = vor.u32 %v11708_v61, %v9994_v25  ;;  %v2187_v63 = vsub.f32 1.5, %v2186_v54  ;;  %v11756_v5 = vld [vmem:[#allocation19 + $0x744] sm:$0xf] }
 0x3b2   : > { %v14074_v44 = vpack.c.bf16 %v2403_v27, %v2399_v8  ;;  %17033 = vst [vmem:[#allocation48_spill] sm:$0xff] %v14077_v45  ;;  %vm2190_vm14 = vweird.f32 %v12302_v18  ;;  %4178 = vmatpush.bf16.msra.mxu2 %v10253_v26  ;;  %v10221_v30 = vor.u32 %v11764_v0, %v10218_v10  ;;  %v2287_v29 = vadd.f32 %v14050_v41, %v2245_v57  ;;  %v10186_v57 = vld [vmem:[#allocation19 + $0x760] sm:$0xf0]  ;;  %v9744_v26 = vld [vmem:[#allocation19 + $0x3c8] sm:$0xf] }
 0x3b3   : > { %17031 = vst [vmem:[#allocation39_spill] sm:$0xff] %v14072_v2  ;;  %v2291_v24 = vadd.f32 %v14050_v41, %v2249_v60  ;;  %4041 = vmatmul.bf16.vlgmr.msrb.gmra.mxu1 %v14077_v45  ;;  %v2188_v19 = vmul.f32 %v12302_v18, %v2187_v63  ;;  %vm2191_vm0 = vmor %vm2189_vm15, %vm2190_vm14  ;;  %v14084_v52 = vperm.slane %v17030_v31, 3  ;;  %v14087_v23 = vperm.slane %v13807_v1, 3  ;;  %v11692_v61 = vld [vmem:[#allocation19 + $0x544] sm:$0xf] }
 0x3b4   : > { %17032 = vst [vmem:[#allocation47_spill] sm:$0xff] %v14074_v44  ;;  %4149 = vmatpush.bf16.msra.mxu1 %v9997_v48  ;;  %vm2319_vm1 = vcmp.ge.f32.partialorder %v2287_v29, 0.0  ;;  %v9965_v9 = vor.u32 %v11700_v51, %v9962_v28  ;;  %v9930_v25 = vld [vmem:[#allocation19 + $0x560] sm:$0xf0] }
 0x3b5   : > { %v2192_v33 = vsel %vm2191_vm0, %v12302_v18, %v2188_v19  ;;  %vm2323_vm2 = vcmp.ge.f32.partialorder %v2291_v24, 0.0  ;;  %v2351_v18 = vmul.f32 0.2, %v2287_v29  ;;  %v2355_v1 = vmul.f32 0.2, %v2291_v24 }
 0x3b6   : > { %4179 = vmatpush.bf16.msra.mxu2 %v10221_v30  ;;  %v2196_v20 = vmul.f32 %v2192_v33, %v13987_v15  ;;  %v2200_v41 = vmul.f32 %v2192_v33, %v13990_v12  ;;  %v2212_v55 = vmul.f32 %v2192_v33, %v14005_v21  ;;  %v2216_v14 = vmul.f32 %v2192_v33, %v14011_v50  ;;  %v11748_v60 = vld [vmem:[#allocation19 + $0x704] sm:$0xf]  ;;  %v9488_v19 = vld [vmem:[#allocation19 + $0x1c8] sm:$0xf] }
 0x3b7   : > { %v2220_v22 = vmul.f32 %v2192_v33, %v14016_v36  ;;  %v2224_v31 = vmul.f32 %v2192_v33, %v14023_v58  ;;  %v2383_v7 = vsel %vm2319_vm1, %v2287_v29, %v2351_v18  ;;  %v2387_v49 = vsel %vm2323_vm2, %v2291_v24, %v2355_v1  ;;  %v10154_v8 = vld [vmem:[#allocation19 + $0x720] sm:$0xf0]  ;;  %v11649_v24 = vld [vmem:[#allocation19 + $0x3e4] sm:$0xf0] }
 0x3b8   : > { %v2238_v43 = vmul.f32 %v14084_v52, %v2196_v20  ;;  %v2242_v59 = vmul.f32 %v14084_v52, %v2200_v41  ;;  %v2254_v15 = vmul.f32 %v14084_v52, %v2212_v55  ;;  %v2258_v12 = vmul.f32 %v14084_v52, %v2216_v14  ;;  %4150 = vmatpush.bf16.msra.mxu1 %v9965_v9 }
 0x3b9   : > { %v2262_v21 = vmul.f32 %v14084_v52, %v2220_v22  ;;  %v2266_v50 = vmul.f32 %v14084_v52, %v2224_v31  ;;  %v2204_v13 = vmul.f32 %v2192_v33, %v13993_v38  ;;  %v2208_v16 = vmul.f32 %v2192_v33, %v13998_v3  ;;  %v11585_v33 = vld [vmem:[#allocation19 + $0x1e4] sm:$0xf0] }
 0x3ba   : > { %v2280_v36 = vadd.f32 %v14087_v23, %v2238_v43  ;;  %v2284_v58 = vadd.f32 %v14087_v23, %v2242_v59  ;;  %v2296_v56 = vadd.f32 %v14087_v23, %v2254_v15  ;;  %v2300_v40 = vadd.f32 %v14087_v23, %v2258_v12  ;;  %v9456_v15 = vld [vmem:[#allocation19 + $0x188] sm:$0xf] }
 0x3bb   : > { %4128 = vmatmul.bf16.vlgmr.msra.gmra.mxu0 %v13959_v35  ;;  %v2304_v47 = vadd.f32 %v14087_v23, %v2262_v21  ;;  %v2308_v6 = vadd.f32 %v14087_v23, %v2266_v50  ;;  %v10189_v38 = vor.u32 %v11756_v5, %v10186_v57  ;;  %v14113_v10 = vpack.c.bf16 %v2387_v49, %v2383_v7  ;;  %v11577_v12 = vld [vmem:[#allocation19 + $0x1a4] sm:$0xf0]  ;;  %v9898_v21 = vld [vmem:[#allocation19 + $0x520] sm:$0xf0] }
 0x3bc   : > { %vm2312_vm3 = vcmp.ge.f32.partialorder %v2280_v36, 0.0  ;;  %vm2316_vm4 = vcmp.ge.f32.partialorder %v2284_v58, 0.0  ;;  %vm2328_vm5 = vcmp.ge.f32.partialorder %v2296_v56, 0.0  ;;  %vm2332_vm6 = vcmp.ge.f32.partialorder %v2300_v40, 0.0  ;;  %v11740_v50 = vld [vmem:[#allocation19 + $0x6c4] sm:$0xf] }
 0x3bd   : > { %vm2336_vm7 = vcmp.ge.f32.partialorder %v2304_v47, 0.0  ;;  %v2344_v17 = vmul.f32 0.2, %v2280_v36  ;;  %v2348_v42 = vmul.f32 0.2, %v2284_v58  ;;  %vm2340_vm8 = vcmp.ge.f32.partialorder %v2308_v6, 0.0  ;;  %4180 = vmatpush.bf16.msra.mxu2 %v10189_v38 }
 0x3be   : > { %v2360_v27 = vmul.f32 0.2, %v2296_v56  ;;  %v2364_v0 = vmul.f32 0.2, %v2300_v40  ;;  %17034 = vst [vmem:[#allocation49_spill] sm:$0xff] %v14113_v10  ;;  %v2246_v48 = vmul.f32 %v14084_v52, %v2204_v13  ;;  %v2250_v20 = vmul.f32 %v14084_v52, %v2208_v16 }
 0x3bf   : > { %4104 = vmatmul.bf16.gmra.mxu3 %v13972_v53  ;;  %v2368_v3 = vmul.f32 0.2, %v2304_v47  ;;  %v2372_v54 = vmul.f32 0.2, %v2308_v6  ;;  %v2376_v46 = vsel %vm2312_vm3, %v2280_v36, %v2344_v17  ;;  %v2380_v29 = vsel %vm2316_vm4, %v2284_v58, %v2348_v42  ;;  %v11684_v52 = vld [vmem:[#allocation19 + $0x504] sm:$0xf] }
 0x3c0   : > { %v2392_v63 = vsel %vm2328_vm5, %v2296_v56, %v2360_v27  ;;  %v2396_v30 = vsel %vm2332_vm6, %v2300_v40, %v2364_v0  ;;  %v14128_v31 = vpack.c.bf16 %v2380_v29, %v2376_v46  ;;  %v9933_v18 = vor.u32 %v11692_v61, %v9930_v25  ;;  %v10122_v40 = vld [vmem:[#allocation19 + $0x6e0] sm:$0xf0]  ;;  %v9424_v49 = vld [vmem:[#allocation19 + $0x148] sm:$0xf] }
 0x3c1   : > { %v2400_v41 = vsel %vm2336_vm7, %v2304_v47, %v2368_v3  ;;  %v2404_v55 = vsel %vm2340_vm8, %v2308_v6, %v2372_v54  ;;  %v14123_v14 = vpack.c.bf16 %v2396_v30, %v2392_v63  ;;  %v10157_v1 = vor.u32 %v11748_v60, %v10154_v8  ;;  %v9712_v47 = vld [vmem:[#allocation19 + $0x388] sm:$0xf]  ;;  %v11676_v16 = vld [vmem:[#allocation19 + $0x4c4] sm:$0xf] }
 0x3c2   : > { %v14126_v22 = vpack.c.bf16 %v2404_v55, %v2400_v41  ;;  %17035 = vst [vmem:[#allocation50_spill] sm:$0xff] %v14128_v31  ;;  %v9745_v43 = vor.u32 %v11649_v24, %v9744_v26  ;;  %v9489_v59 = vor.u32 %v11585_v33, %v9488_v19  ;;  %4070 = vmatmul.bf16.vlgmr.msrb.gmra.mxu2 %v14128_v31  ;;  %v11641_v6 = vld [vmem:[#allocation19 + $0x3a4] sm:$0xf0]  ;;  %v9866_v5 = vld [vmem:[#allocation19 + $0x4e0] sm:$0xf0] }
 0x3c3   : > { %4046 = vmatmul.bf16.gmra.mxu1 %v14113_v10  ;;  %v2288_v36 = vadd.f32 %v14087_v23, %v2246_v48  ;;  %v2292_v58 = vadd.f32 %v14087_v23, %v2250_v20  ;;  %4181 = vmatpush.bf16.msra.mxu2 %v10157_v1  ;;  %v9901_v56 = vor.u32 %v11684_v52, %v9898_v21  ;;  %v11569_v13 = vld [vmem:[#allocation19 + $0x164] sm:$0xf0]  ;;  %v11732_v57 = vld [vmem:[#allocation19 + $0x684] sm:$0xf] }
 0x3c4   : > { %4151 = vmatpush.bf16.msra.mxu1 %v9933_v18  ;;  %4236 = vmatpush.bf16.msrb.mxu0 %v9745_v43  ;;  %v10125_v51 = vor.u32 %v11740_v50, %v10122_v40  ;;  %v9457_v28 = vor.u32 %v11577_v12, %v9456_v15  ;;  %v9713_v7 = vor.u32 %v11641_v6, %v9712_v47  ;;  %v10090_v17 = vld [vmem:[#allocation19 + $0x6a0] sm:$0xf0]  ;;  %v9680_v42 = vld [vmem:[#allocation19 + $0x348] sm:$0xf] }
 0x3c5   : > { %4207 = vmatpush.bf16.msrb.mxu3 %v9489_v59  ;;  %v9869_v23 = vor.u32 %v11676_v16, %v9866_v5  ;;  %v10093_v9 = vor.u32 %v11732_v57, %v10090_v17  ;;  %v11633_v61 = vld [vmem:[#allocation19 + $0x364] sm:$0xf0]  ;;  %v2352_v25 = vmul.f32 0.2, %v2288_v36  ;;  %v2356_v60 = vmul.f32 0.2, %v2292_v58 }
 0x3c6   : > { %v9425_v8 = vor.u32 %v11569_v13, %v9424_v49  ;;  %v9392_v27 = vld [vmem:[#allocation19 + $0x108] sm:$0xf]  ;;  %v9681_v0 = vor.u32 %v11633_v61, %v9680_v42  ;;  %vm2320_vm9 = vcmp.ge.f32.partialorder %v2288_v36, 0.0  ;;  %vm2324_vm10 = vcmp.ge.f32.partialorder %v2292_v58, 0.0  ;;  %v11668_v33 = vld [vmem:[#allocation19 + $0x484] sm:$0xf] }
 0x3c7   : > { %4182 = vmatpush.bf16.msra.mxu2 %v10125_v51  ;;  %v11561_v38 = vld [vmem:[#allocation19 + $0x124] sm:$0xf0]  ;;  %v2384_v48 = vsel %vm2320_vm9, %v2288_v36, %v2352_v25  ;;  %v2388_v63 = vsel %vm2324_vm10, %v2292_v58, %v2356_v60  ;;  %v9834_v20 = vld [vmem:[#allocation19 + $0x4a0] sm:$0xf0] }
 0x3c8   : > { %4152 = vmatpush.bf16.msra.mxu1 %v9901_v56  ;;  %4237 = vmatpush.bf16.msrb.mxu0 %v9713_v7  ;;  %v9648_v3 = vld [vmem:[#allocation19 + $0x308] sm:$0xf]  ;;  %v9393_v46 = vor.u32 %v11561_v38, %v9392_v27  ;;  %v14136_v24 = vpack.c.bf16 %v2388_v63, %v2384_v48  ;;  %v9837_v55 = vor.u32 %v11668_v33, %v9834_v20  ;;  %v11724_v59 = vld [vmem:[#allocation19 + $0x644] sm:$0xf] }
 0x3c9   : > { %4208 = vmatpush.bf16.msrb.mxu3 %v9457_v28  ;;  %v11625_v54 = vld [vmem:[#allocation19 + $0x324] sm:$0xf0]  ;;  %v10058_v15 = vld [vmem:[#allocation19 + $0x660] sm:$0xf0] }
 0x3ca   : > { %v9649_v26 = vor.u32 %v11625_v54, %v9648_v3  ;;  %v9360_v30 = vld [vmem:[#allocation19 + $0xc8] sm:$0xf]  ;;  %17036 = vst [vmem:[#allocation51_spill] sm:$0xff] %v14136_v24  ;;  %v11660_v52 = vld [vmem:[#allocation19 + $0x444] sm:$0xf]  ;;  %v10061_v21 = vor.u32 %v11724_v59, %v10058_v15 }
 0x3cb   : > { %4133 = vmatmul.bf16.gmra.mxu0 %v14020_v11  ;;  %4183 = vmatpush.bf16.msra.mxu2 %v10093_v9  ;;  %v11553_v29 = vld [vmem:[#allocation19 + $0xe4] sm:$0xf0]  ;;  %v9802_v50 = vld [vmem:[#allocation19 + $0x460] sm:$0xf0] }
 0x3cc   : > { %4153 = vmatpush.bf16.msra.mxu1 %v9869_v23  ;;  %4238 = vmatpush.bf16.msrb.mxu0 %v9681_v0  ;;  %v9361_v19 = vor.u32 %v11553_v29, %v9360_v30  ;;  %v9328_v41 = vld [vmem:[#allocation19 + $0x88] sm:$0xf]  ;;  %v9805_v40 = vor.u32 %v11660_v52, %v9802_v50  ;;  %v11716_v51 = vld [vmem:[#allocation19 + $0x604] sm:$0xf] }
 0x3cd   : > { %4209 = vmatpush.bf16.msrb.mxu3 %v9425_v8  ;;  %v11545_v18 = vld [vmem:[#allocation19 + $0xa4] sm:$0xf0]  ;;  %v10026_v7 = vld [vmem:[#allocation19 + $0x620] sm:$0xf0] }
 0x3ce   : > { %v9616_v1 = vld [vmem:[#allocation19 + $0x2c8] sm:$0xf]  ;;  %v9329_v56 = vor.u32 %v11545_v18, %v9328_v41  ;;  %v11652_v49 = vld [vmem:[#allocation19 + $0x404] sm:$0xf]  ;;  %v10029_v16 = vor.u32 %v11716_v51, %v10026_v7  ;;  %v9490_v51 = vld [vmem:[#allocation19 + $0x1e8] sm:$0xf0] }
 0x3cf   : > { %4109 = vmatmul.bf16.gmra.mxu3 %v13870_v4  ;;  %v11617_v43 = vld [vmem:[#allocation19 + $0x2e4] sm:$0xf0]  ;;  %4184 = vmatpush.bf16.msra.mxu2 %v10061_v21  ;;  %v9770_v13 = vld [vmem:[#allocation19 + $0x420] sm:$0xf0] }
 0x3d0   : > { %4239 = vmatpush.bf16.msrb.mxu0 %v9649_v26  ;;  %v9617_v12 = vor.u32 %v11617_v43, %v9616_v1  ;;  %4154 = vmatpush.bf16.msra.mxu1 %v9837_v55  ;;  %v9296_v36 = vld [vmem:[#allocation19 + $0x48] sm:$0xf]  ;;  %v9773_v57 = vor.u32 %v11652_v49, %v9770_v13  ;;  %v14145_v29 = vld [vmem:[#allocation20] sm:$0xff] }
 0x3d1   : > { %4210 = vmatpush.bf16.msrb.mxu3 %v9393_v46  ;;  %v11537_v58 = vld [vmem:[#allocation19 + $0x64] sm:$0xf0] }
 0x3d2   : > { %4075 = vmatmul.bf16.gmra.mxu2 %v14136_v24  ;;  %v9584_v47 = vld [vmem:[#allocation19 + $0x288] sm:$0xf]  ;;  %v9297_v23 = vor.u32 %v11537_v58, %v9296_v36 }
 0x3d3   : > { %4051 = vmatmul.bf16.gmra.mxu1 %v14072_v2  ;;  %v11609_v6 = vld [vmem:[#allocation19 + $0x2a4] sm:$0xf0]  ;;  %4185 = vmatpush.bf16.msra.mxu2 %v10029_v16 }
 0x3d4   : > { %4240 = vmatpush.bf16.msrb.mxu0 %v9617_v12  ;;  %v9585_v28 = vor.u32 %v11609_v6, %v9584_v47  ;;  %v9552_v5 = vld [vmem:[#allocation19 + $0x248] sm:$0xf]  ;;  %4155 = vmatpush.bf16.msra.mxu1 %v9805_v40  ;;  %v9746_v47 = vld [vmem:[#allocation19 + $0x3e8] sm:$0xf0] }
 0x3d5   : > { %4211 = vmatpush.bf16.msrb.mxu3 %v9361_v19  ;;  %v11601_v17 = vld [vmem:[#allocation19 + $0x264] sm:$0xf0]  ;;  %v14148_v19 = vperm.slane %v14145_v29, 0  ;;  %v11581_v6 = vld [vmem:[#allocation19 + $0x1cc] sm:$0xf] }
 0x3d6   : > { %v9264_v42 = vld [vmem:[#allocation19 + $0x8] sm:$0xf]  ;;  %v9553_v61 = vor.u32 %v11601_v17, %v9552_v5  ;;  %v9493_v13 = vor.u32 %v11581_v6, %v9490_v51  ;;  %v11549_v6 = vld [vmem:[#allocation19 + $0xcc] sm:$0xf] }
 0x3d7   : > { %v11529_v9 = vld [vmem:[#allocation19 + $0x24] sm:$0xf0]  ;;  %v9362_v51 = vld [vmem:[#allocation19 + $0xe8] sm:$0xf0] }
 0x3d8   : > { %4241 = vmatpush.bf16.msrb.mxu0 %v9585_v28  ;;  %v9520_v25 = vld [vmem:[#allocation19 + $0x208] sm:$0xf]  ;;  %4156 = vmatpush.bf16.msra.mxu1 %v9773_v57  ;;  %v9265_v8 = vor.u32 %v11529_v9, %v9264_v42  ;;  %v9458_v42 = vld [vmem:[#allocation19 + $0x1a8] sm:$0xf0] }
 0x3d9   : > { %4212 = vmatpush.bf16.msrb.mxu3 %v9329_v56  ;;  %v11593_v60 = vld [vmem:[#allocation19 + $0x224] sm:$0xf0]  ;;  %v11645_v56 = vld [vmem:[#allocation19 + $0x3cc] sm:$0xf] }
 0x3da   : > { %v9521_v27 = vor.u32 %v11593_v60, %v9520_v25  ;;  %v10256_v0 = vld [vmem:[#allocation19 + $0x7c8] sm:$0xf]  ;;  %v9749_v49 = vor.u32 %v11645_v56, %v9746_v47  ;;  %v11621_v56 = vld [vmem:[#allocation19 + $0x30c] sm:$0xf] }
 0x3db   : > { %4138 = vmatmul.bf16.gmra.mxu0 %v13932_v37  ;;  %v11777_v38 = vld [vmem:[#allocation19 + $0x7e4] sm:$0xf0] }
 0x3dc   : > { %4242 = vmatpush.bf16.msrb.mxu0 %v9553_v61  ;;  %v10000_v3 = vld [vmem:[#allocation19 + $0x5c8] sm:$0xf]  ;;  %v10257_v54 = vor.u32 %v11777_v38, %v10256_v0 }
 0x3dd   : > { %4213 = vmatpush.bf16.msrb.mxu3 %v9297_v23  ;;  %v11713_v46 = vld [vmem:[#allocation19 + $0x5e4] sm:$0xf0]  ;;  %v11573_v23 = vld [vmem:[#allocation19 + $0x18c] sm:$0xf] }
 0x3de   : > { %v10224_v26 = vld [vmem:[#allocation19 + $0x788] sm:$0xf]  ;;  %v10001_v63 = vor.u32 %v11713_v46, %v10000_v3  ;;  %4294 = vmatpush.bf16.msrb.mxu2 %v10257_v54  ;;  %v9461_v61 = vor.u32 %v11573_v23, %v9458_v42  ;;  %v11637_v54 = vld [vmem:[#allocation19 + $0x38c] sm:$0xf] }
 0x3df   : > { %4114 = vmatmul.bf16.gmra.mxu3 %v13873_v62  ;;  %v11769_v48 = vld [vmem:[#allocation19 + $0x7a4] sm:$0xf0]  ;;  %v9714_v46 = vld [vmem:[#allocation19 + $0x3a8] sm:$0xf0] }
 0x3e0   : > { %4243 = vmatpush.bf16.msrb.mxu0 %v9521_v27  ;;  %v10225_v30 = vor.u32 %v11769_v48, %v10224_v26  ;;  %4265 = vmatpush.bf16.msrb.mxu1 %v10001_v63  ;;  %v9968_v18 = vld [vmem:[#allocation19 + $0x588] sm:$0xf]  ;;  %v9717_v48 = vor.u32 %v11637_v54, %v9714_v46  ;;  %v11565_v63 = vld [vmem:[#allocation19 + $0x14c] sm:$0xf] }
 0x3e1   : > { %4214 = vmatpush.bf16.msrb.mxu3 %v9265_v8  ;;  %v11705_v1 = vld [vmem:[#allocation19 + $0x5a4] sm:$0xf0]  ;;  %v11541_v23 = vld [vmem:[#allocation19 + $0x8c] sm:$0xf] }
 0x3e2   : > { %4080 = vmatmul.bf16.gmra.mxu2 %v14123_v14  ;;  %v10192_v43 = vld [vmem:[#allocation19 + $0x748] sm:$0xf]  ;;  %v9969_v15 = vor.u32 %v11705_v1, %v9968_v18 }
 0x3e3   : > { %4056 = vmatmul.bf16.gmra.mxu1 %v14074_v44  ;;  %4295 = vmatpush.bf16.msrb.mxu2 %v10225_v30  ;;  %v11761_v12 = vld [vmem:[#allocation19 + $0x764] sm:$0xf0]  ;;  %v9426_v30 = vld [vmem:[#allocation19 + $0x168] sm:$0xf0] }
 0x3e4   : > { %v9936_v52 = vld [vmem:[#allocation19 + $0x548] sm:$0xf]  ;;  %v10193_v50 = vor.u32 %v11761_v12, %v10192_v43  ;;  %4266 = vmatpush.bf16.msrb.mxu1 %v9969_v15  ;;  %4352 = vmatpush.bf16.msra.mxu0 %v9749_v49  ;;  %v11557_v12 = vld [vmem:[#allocation19 + $0x10c] sm:$0xf] }
 0x3e5   : > { %v11697_v21 = vld [vmem:[#allocation19 + $0x564] sm:$0xf0]  ;;  %4323 = vmatpush.bf16.msra.mxu3 %v9493_v13  ;;  %v9365_v13 = vor.u32 %v11549_v6, %v9362_v51 }
 0x3e6   : > { %v10160_v36 = vld [vmem:[#allocation19 + $0x708] sm:$0xf]  ;;  %v9937_v40 = vor.u32 %v11697_v21, %v9936_v52  ;;  %v9394_v52 = vld [vmem:[#allocation19 + $0x128] sm:$0xf0] }
 0x3e7   : > { %v11753_v58 = vld [vmem:[#allocation19 + $0x724] sm:$0xf0]  ;;  %4296 = vmatpush.bf16.msrb.mxu2 %v10193_v50  ;;  %v11629_v21 = vld [vmem:[#allocation19 + $0x34c] sm:$0xf] }
 0x3e8   : > { %v10161_v7 = vor.u32 %v11753_v58, %v10160_v36  ;;  %4267 = vmatpush.bf16.msrb.mxu1 %v9937_v40  ;;  %v9904_v60 = vld [vmem:[#allocation19 + $0x508] sm:$0xf]  ;;  %4353 = vmatpush.bf16.msra.mxu0 %v9717_v48  ;;  %v9682_v50 = vld [vmem:[#allocation19 + $0x368] sm:$0xf0]  ;;  %v9397_v36 = vor.u32 %v11557_v12, %v9394_v52 }
 0x3e9   : > { %v11689_v8 = vld [vmem:[#allocation19 + $0x524] sm:$0xf0]  ;;  %4324 = vmatpush.bf16.msra.mxu3 %v9461_v61  ;;  %v9685_v58 = vor.u32 %v11629_v21, %v9682_v50  ;;  %v9650_v40 = vld [vmem:[#allocation19 + $0x328] sm:$0xf0] }
 0x3ea   : > { %v10128_v27 = vld [vmem:[#allocation19 + $0x6c8] sm:$0xf]  ;;  %v9905_v38 = vor.u32 %v11689_v8, %v9904_v60  ;;  %v9330_v61 = vld [vmem:[#allocation19 + $0xa8] sm:$0xf0] }
 0x3eb   : > { %4143 = vmatmul.bf16.gmra.mxu0 %v13934_v34  ;;  %4297 = vmatpush.bf16.msrb.mxu2 %v10161_v7  ;;  %v11745_v3 = vld [vmem:[#allocation19 + $0x6e4] sm:$0xf0]  ;;  %v9653_v7 = vor.u32 %v11621_v56, %v9650_v40  ;;  %v9618_v60 = vld [vmem:[#allocation19 + $0x2e8] sm:$0xf0] }
 0x3ec   : > { %v10129_v26 = vor.u32 %v11745_v3, %v10128_v27  ;;  %4268 = vmatpush.bf16.msrb.mxu1 %v9905_v38  ;;  %v11737_v18 = vld [vmem:[#allocation19 + $0x6a4] sm:$0xf0]  ;;  %4354 = vmatpush.bf16.msra.mxu0 %v9685_v58  ;;  %v9333_v3 = vor.u32 %v11541_v23, %v9330_v61  ;;  %v9266_v58 = vld [vmem:[#allocation19 + $0x28] sm:$0xf0] }
 0x3ed   : > { %v10064_v27 = vld [vmem:[#allocation19 + $0x648] sm:$0xf]  ;;  %v11597_v56 = vld [vmem:[#allocation19 + $0x24c] sm:$0xf] }
 0x3ee   : > { %v11729_v38 = vld [vmem:[#allocation19 + $0x664] sm:$0xf0]  ;;  %v11773_v61 = vld [vmem:[#allocation19 + $0x7cc] sm:$0xf] }
 0x3ef   : > { %4215 = vmatmul.bf16.vlgmr.msrb.gmra.mxu3 %v13913_v32  ;;  %4298 = vmatpush.bf16.msrb.mxu2 %v10129_v26  ;;  %v9808_v46 = vld [vmem:[#allocation19 + $0x448] sm:$0xf]  ;;  %v10065_v48 = vor.u32 %v11729_v38, %v10064_v27  ;;  %v11709_v38 = vld [vmem:[#allocation19 + $0x5cc] sm:$0xf] }
 0x3f0   : > { %4355 = vmatpush.bf16.msra.mxu0 %v9653_v7  ;;  %v9776_v12 = vld [vmem:[#allocation19 + $0x408] sm:$0xf] }
 0x3f1   : > { %v11657_v52 = vld [vmem:[#allocation19 + $0x424] sm:$0xf0] }
 0x3f2   : > { %v3984_v33 = vpop.f32.mrf.mxu3  ;;  %4085 = vmatmul.bf16.gmra.mxu2 %v14126_v22  ;;  %v9777_v40 = vor.u32 %v11657_v52, %v9776_v12  ;;  %v9970_v12 = vld [vmem:[#allocation19 + $0x5a8] sm:$0xf0] }
 0x3f3   : > { %v3985_v20 = vadd.f32 %v3984_v33, %v14148_v19  ;;  %4157 = vmatmul.bf16.vlgmr.msra.gmra.mxu1 %v14077_v45  ;;  %v9872_v33 = vld [vmem:[#allocation19 + $0x4c8] sm:$0xf]  ;;  %v11757_v52 = vld [vmem:[#allocation19 + $0x74c] sm:$0xf] }
 0x3f8   : > { %v4013_v41 = vpop.f32.mrf.mxu0 }
 0x3f9   : > { %v14153_v59 = vadd.f32 %v4013_v41, %v3985_v20  ;;  %v9429_v20 = vor.u32 %v11565_v63, %v9426_v30  ;;  %v11681_v41 = vld [vmem:[#allocation19 + $0x4e4] sm:$0xf0]  ;;  %v11533_v30 = vld [vmem:[#allocation19 + $0x4c] sm:$0xf] }
 0x3fa   : > { %v3986_v55 = vpop.f32.mrf.mxu3  ;;  %v9873_v43 = vor.u32 %v11681_v41, %v9872_v33  ;;  %v11665_v63 = vld [vmem:[#allocation19 + $0x464] sm:$0xf0]  ;;  %v9298_v33 = vld [vmem:[#allocation19 + $0x68] sm:$0xf0] }
 0x3fb   : > { %4244 = vmatmul.bf16.vlgmr.msrb.gmra.mxu0 %v13959_v35  ;;  %v3987_v28 = vadd.f32 %v3986_v55, %v14148_v19  ;;  %v10096_v55 = vld [vmem:[#allocation19 + $0x688] sm:$0xf]  ;;  %4325 = vmatpush.bf16.msra.mxu3 %v9429_v20  ;;  %v9809_v20 = vor.u32 %v11665_v63, %v9808_v46  ;;  %v9301_v41 = vor.u32 %v11533_v30, %v9298_v33  ;;  %v14189_v33 = vperm.slane %v14145_v29, 1 }
 0x3fc   : > { %v10097_v15 = vor.u32 %v11737_v18, %v10096_v55  ;;  %4269 = vmatpush.bf16.msrb.mxu1 %v9873_v43  ;;  %v11605_v55 = vld [vmem:[#allocation19 + $0x28c] sm:$0xf] }
 0x3fd   : > { %v9586_v18 = vld [vmem:[#allocation19 + $0x2a8] sm:$0xf0] }
 0x3fe   : > { %4299 = vmatpush.bf16.msrb.mxu2 %v10097_v15  ;;  %v9589_v43 = vor.u32 %v11605_v55, %v9586_v18  ;;  %v11721_v15 = vld [vmem:[#allocation19 + $0x624] sm:$0xf0] }
 0x3ff   : > { %4220 = vmatmul.bf16.gmra.mxu3 %v13972_v53 }
 0x400   : > { %v4015_v16 = vpop.f32.mrf.mxu0  ;;  %4326 = vmatpush.bf16.msra.mxu3 %v9397_v36  ;;  %v11525_v36 = vld [vmem:[#allocation19 + $0xc] sm:$0xf] }
 0x401   : > { %v14158_v57 = vadd.f32 %v4015_v16, %v3987_v28  ;;  %v9269_v6 = vor.u32 %v11525_v36, %v9266_v58  ;;  %v10194_v36 = vld [vmem:[#allocation19 + $0x768] sm:$0xf0] }
 0x402   : > { %v3989_v5 = vpop.f32.mrf.mxu3  ;;  %4186 = vmatmul.bf16.vlgmr.msra.gmra.mxu2 %v14128_v31 }
 0x403   : > { %v3990_v17 = vadd.f32 %v3989_v5, %v14148_v19  ;;  %4162 = vmatmul.bf16.gmra.mxu1 %v14113_v10  ;;  %v9840_v5 = vld [vmem:[#allocation19 + $0x488] sm:$0xf]  ;;  %4300 = vmatpush.bf16.msrb.mxu2 %v10065_v48  ;;  %v10226_v48 = vld [vmem:[#allocation19 + $0x7a8] sm:$0xf0] }
 0x404   : > { %4327 = vmatpush.bf16.msra.mxu3 %v9365_v13  ;;  %v11589_v13 = vld [vmem:[#allocation19 + $0x20c] sm:$0xf] }
 0x408   : > { %v4018_v9 = vpop.f32.mrf.mxu0  ;;  %4328 = vmatpush.bf16.msra.mxu3 %v9333_v3  ;;  %v10002_v3 = vld [vmem:[#allocation19 + $0x5e8] sm:$0xf0] }
 0x409   : > { %v14163_v0 = vadd.f32 %v4018_v9, %v3990_v17  ;;  %v11673_v17 = vld [vmem:[#allocation19 + $0x4a4] sm:$0xf0]  ;;  %v10005_v46 = vor.u32 %v11709_v38, %v10002_v3  ;;  %v11650_v38 = vld [vmem:[#allocation19 + $0x3ec] sm:$0xf0] }
 0x40a   : > { %v3991_v25 = vpop.f32.mrf.mxu3  ;;  %v9841_v9 = vor.u32 %v11673_v17, %v9840_v5  ;;  %v9464_v3 = vld [vmem:[#allocation19 + $0x190] sm:$0xf] }
 0x40b   : > { %4249 = vmatmul.bf16.gmra.mxu0 %v14020_v11  ;;  %v3992_v1 = vadd.f32 %v3991_v25, %v14148_v19  ;;  %v11613_v25 = vld [vmem:[#allocation19 + $0x2cc] sm:$0xf] }
 0x40c   : > { %v9621_v54 = vor.u32 %v11613_v25, %v9618_v60  ;;  %4270 = vmatpush.bf16.msrb.mxu1 %v9841_v9  ;;  %4329 = vmatpush.bf16.msra.mxu3 %v9301_v41  ;;  %v10258_v25 = vld [vmem:[#allocation19 + $0x7e8] sm:$0xf0] }
 0x40e   : > { %4356 = vmatpush.bf16.msra.mxu0 %v9621_v54  ;;  %v11765_v54 = vld [vmem:[#allocation19 + $0x78c] sm:$0xf] }
 0x40f   : > { %4225 = vmatmul.bf16.gmra.mxu3 %v13870_v4  ;;  %v10229_v63 = vor.u32 %v11765_v54, %v10226_v48  ;;  %v11578_v48 = vld [vmem:[#allocation19 + $0x1ac] sm:$0xf0] }
 0x410   : > { %v4020_v47 = vpop.f32.mrf.mxu0  ;;  %4271 = vmatpush.bf16.msrb.mxu1 %v9809_v20  ;;  %4330 = vmatpush.bf16.msra.mxu3 %v9269_v6  ;;  %v9938_v6 = vld [vmem:[#allocation19 + $0x568] sm:$0xf0] }
 0x411   : > { %v14168_v49 = vadd.f32 %v4020_v47, %v3992_v1  ;;  %v10032_v1 = vld [vmem:[#allocation19 + $0x608] sm:$0xf]  ;;  %v9554_v47 = vld [vmem:[#allocation19 + $0x268] sm:$0xf0] }
 0x412   : > { %v3994_v28 = vpop.f32.mrf.mxu3  ;;  %4191 = vmatmul.bf16.gmra.mxu2 %v14136_v24  ;;  %v10033_v50 = vor.u32 %v11721_v15, %v10032_v1  ;;  %4357 = vmatpush.bf16.msra.mxu0 %v9589_v43  ;;  %v11701_v15 = vld [vmem:[#allocation19 + $0x58c] sm:$0xf] }
 0x413   : > { %v3995_v16 = vadd.f32 %v3994_v28, %v14148_v19  ;;  %4167 = vmatmul.bf16.gmra.mxu1 %v14072_v2  ;;  %v9557_v28 = vor.u32 %v11597_v56, %v9554_v47  ;;  %v11693_v47 = vld [vmem:[#allocation19 + $0x54c] sm:$0xf] }
 0x414   : > { %4301 = vmatpush.bf16.msrb.mxu2 %v10033_v50  ;;  %4272 = vmatpush.bf16.msrb.mxu1 %v9777_v40  ;;  %v9973_v50 = vor.u32 %v11701_v15, %v9970_v12 }
 0x416   : > { %4358 = vmatpush.bf16.msra.mxu0 %v9557_v28 }
 0x418   : > { %v4023_v42 = vpop.f32.mrf.mxu0  ;;  %4381 = vmatpush.bf16.msra.mxu1 %v10005_v46 }
 0x419   : > { %v14173_v26 = vadd.f32 %v4023_v42, %v3995_v16  ;;  %v9522_v16 = vld [vmem:[#allocation19 + $0x228] sm:$0xf0] }
 0x41a   : > { %v3996_v8 = vpop.f32.mrf.mxu3  ;;  %v9525_v17 = vor.u32 %v11589_v13, %v9522_v16  ;;  %v10162_v13 = vld [vmem:[#allocation19 + $0x728] sm:$0xf0] }
 0x41b   : > { %4254 = vmatmul.bf16.gmra.mxu0 %v13932_v37  ;;  %v3997_v21 = vadd.f32 %v3996_v8, %v14148_v19  ;;  %v10261_v8 = vor.u32 %v11773_v61, %v10258_v25 }
 0x41c   : > { %4359 = vmatpush.bf16.msra.mxu0 %v9525_v17  ;;  %4382 = vmatpush.bf16.msra.mxu1 %v9973_v50  ;;  %v11642_v50 = vld [vmem:[#allocation19 + $0x3ac] sm:$0xf0] }
 0x41d   : > { %4410 = vmatpush.bf16.msra.mxu2 %v10261_v8 }
 0x41f   : > { %4230 = vmatmul.bf16.gmra.mxu3 %v13873_v62 }
 0x420   : > { %v4025_v51 = vpop.f32.mrf.mxu0 }
 0x421   : > { %v14178_v5 = vadd.f32 %v4025_v51, %v3997_v21  ;;  %4411 = vmatpush.bf16.msra.mxu2 %v10229_v63  ;;  %v11749_v51 = vld [vmem:[#allocation19 + $0x70c] sm:$0xf] }
 0x422   : > { %v3999_v7 = vpop.f32.mrf.mxu3  ;;  %4196 = vmatmul.bf16.gmra.mxu2 %v14123_v14  ;;  %v10165_v17 = vor.u32 %v11749_v51, %v10162_v13  ;;  %v9874_v13 = vld [vmem:[#allocation19 + $0x4e8] sm:$0xf0] }
 0x423   : > { %v4000_v23 = vadd.f32 %v3999_v7, %v14148_v19  ;;  %4172 = vmatmul.bf16.gmra.mxu1 %v14074_v44  ;;  %v9941_v7 = vor.u32 %v11693_v47, %v9938_v6  ;;  %v11570_v47 = vld [vmem:[#allocation19 + $0x16c] sm:$0xf0] }
 0x425   : > { %4383 = vmatpush.bf16.msra.mxu1 %v9941_v7  ;;  %v11677_v7 = vld [vmem:[#allocation19 + $0x4cc] sm:$0xf] }
 0x428   : > { %v4028_v42 = vpop.f32.mrf.mxu0 }
 0x429   : > { %v14183_v60 = vadd.f32 %v4028_v42, %v4000_v23 }
 0x42a   : > { %v4001_v9 = vpop.f32.mrf.mxu3 }
 0x42b   : > { %4259 = vmatmul.bf16.gmra.mxu0 %v13934_v34  ;;  %v4002_v27 = vadd.f32 %v4001_v9, %v14148_v19  ;;  %v11586_v9 = vld [vmem:[#allocation19 + $0x1ec] sm:$0xf0] }
 0x42f   : > { %4331 = vmatmul.bf16.vlgmr.msra.gmra.mxu3 %v13913_v32 }
 0x430   : > { %v4030_v30 = vpop.f32.mrf.mxu0  ;;  %v4042_v55 = vpop.f32.mrf.mxu1 }
 0x431   : > { %v14191_v41 = vadd.f32 %v4030_v30, %v4002_v27  ;;  %v14194_v19 = vadd.f32 %v4042_v55, %v14153_v59  ;;  %v10197_v59 = vor.u32 %v11757_v52, %v10194_v36  ;;  %v9752_v27 = vld [vmem:[#allocation19 + $0x3d0] sm:$0xf]  ;;  %v11685_v30 = vld [vmem:[#allocation19 + $0x50c] sm:$0xf] }
 0x432   : > { %v4100_v20 = vpop.f32.mrf.mxu3  ;;  %4201 = vmatmul.bf16.gmra.mxu2 %v14126_v22  ;;  %v9753_v46 = vor.u32 %v11650_v38, %v9752_v27  ;;  %v11741_v55 = vld [vmem:[#allocation19 + $0x6cc] sm:$0xf]  ;;  %v9720_v52 = vld [vmem:[#allocation19 + $0x390] sm:$0xf] }
 0x433   : > { %v4101_v18 = vadd.f32 %v4100_v20, %v14189_v33  ;;  %4273 = vmatmul.bf16.vlgmr.msrb.gmra.mxu1 %v14077_v45  ;;  %4412 = vmatpush.bf16.msra.mxu2 %v10197_v59  ;;  %v9906_v20 = vld [vmem:[#allocation19 + $0x528] sm:$0xf0]  ;;  %v9432_v36 = vld [vmem:[#allocation19 + $0x150] sm:$0xf] }
 0x434   : > { %4468 = vmatpush.bf16.msrb.mxu0 %v9753_v46  ;;  %v9688_v27 = vld [vmem:[#allocation19 + $0x350] sm:$0xf] }
 0x435   : > { %v11634_v38 = vld [vmem:[#allocation19 + $0x36c] sm:$0xf0] }
 0x437   : > { %4413 = vmatpush.bf16.msra.mxu2 %v10165_v17 }
 0x438   : > { %v4129_v1 = vpop.f32.mrf.mxu0  ;;  %v4044_v58 = vpop.f32.mrf.mxu1 }
 0x439   : > { %v14199_v21 = vadd.f32 %v4129_v1, %v4101_v18  ;;  %v14203_v56 = vadd.f32 %v4044_v58, %v14158_v57  ;;  %v9496_v57 = vld [vmem:[#allocation19 + $0x1d0] sm:$0xf]  ;;  %v9909_v1 = vor.u32 %v11685_v30, %v9906_v20 }
 0x43a   : > { %v4102_v43 = vpop.f32.mrf.mxu3  ;;  %v9497_v25 = vor.u32 %v11586_v9, %v9496_v57  ;;  %v9400_v57 = vld [vmem:[#allocation19 + $0x110] sm:$0xf] }
 0x43b   : > { %4360 = vmatmul.bf16.vlgmr.msra.gmra.mxu0 %v13959_v35  ;;  %v4103_v40 = vadd.f32 %v4102_v43, %v14189_v33  ;;  %v10130_v43 = vld [vmem:[#allocation19 + $0x6e8] sm:$0xf0]  ;;  %4384 = vmatpush.bf16.msra.mxu1 %v9909_v1  ;;  %v11562_v9 = vld [vmem:[#allocation19 + $0x12c] sm:$0xf0] }
 0x43c   : > { %4439 = vmatpush.bf16.msrb.mxu3 %v9497_v25  ;;  %v10133_v12 = vor.u32 %v11741_v55, %v10130_v43  ;;  %v9656_v30 = vld [vmem:[#allocation19 + $0x310] sm:$0xf] }
 0x43d   : > { %v11626_v1 = vld [vmem:[#allocation19 + $0x32c] sm:$0xf0] }
 0x43e   : > { %4414 = vmatpush.bf16.msra.mxu2 %v10133_v12 }
 0x43f   : > { %4336 = vmatmul.bf16.gmra.mxu3 %v13972_v53 }
 0x440   : > { %v4131_v28 = vpop.f32.mrf.mxu0  ;;  %v4047_v42 = vpop.f32.mrf.mxu1 }
 0x441   : > { %v14207_v23 = vadd.f32 %v4131_v28, %v4103_v40  ;;  %v14210_v61 = vadd.f32 %v4047_v42, %v14163_v0  ;;  %v9465_v0 = vor.u32 %v11578_v48, %v9464_v3  ;;  %v9721_v40 = vor.u32 %v11642_v50, %v9720_v52  ;;  %v10098_v42 = vld [vmem:[#allocation19 + $0x6a8] sm:$0xf0]  ;;  %v9368_v48 = vld [vmem:[#allocation19 + $0xd0] sm:$0xf] }
 0x442   : > { %v4105_v16 = vpop.f32.mrf.mxu3  ;;  %4302 = vmatmul.bf16.vlgmr.msrb.gmra.mxu2 %v14128_v31  ;;  %v9433_v28 = vor.u32 %v11570_v47, %v9432_v36  ;;  %v11669_v52 = vld [vmem:[#allocation19 + $0x48c] sm:$0xf]  ;;  %v9336_v36 = vld [vmem:[#allocation19 + $0x90] sm:$0xf] }
 0x443   : > { %v4106_v8 = vadd.f32 %v4105_v16, %v14189_v33  ;;  %4278 = vmatmul.bf16.gmra.mxu1 %v14113_v10  ;;  %4440 = vmatpush.bf16.msrb.mxu3 %v9465_v0  ;;  %v11733_v16 = vld [vmem:[#allocation19 + $0x68c] sm:$0xf]  ;;  %v9624_v47 = vld [vmem:[#allocation19 + $0x2d0] sm:$0xf] }
 0x444   : > { %4469 = vmatpush.bf16.msrb.mxu0 %v9721_v40  ;;  %v9842_v50 = vld [vmem:[#allocation19 + $0x4a8] sm:$0xf0]  ;;  %v11546_v40 = vld [vmem:[#allocation19 + $0xac] sm:$0xf0] }
 0x445   : > { %v4071_v58 = vpop.f32.mrf.mxu2 }
 0x446   : > { %v14222_v6 = vadd.f32 %v4071_v58, %v14194_v19  ;;  %v10101_v19 = vor.u32 %v11733_v16, %v10098_v42  ;;  %v11661_v42 = vld [vmem:[#allocation19 + $0x44c] sm:$0xf] }
 0x447   : > { %4441 = vmatpush.bf16.msrb.mxu3 %v9433_v28  ;;  %v11725_v28 = vld [vmem:[#allocation19 + $0x64c] sm:$0xf] }
 0x448   : > { %v4134_v54 = vpop.f32.mrf.mxu0  ;;  %v4049_v15 = vpop.f32.mrf.mxu1  ;;  %4415 = vmatpush.bf16.msra.mxu2 %v10101_v19 }
 0x449   : > { %v14215_v18 = vadd.f32 %v4134_v54, %v4106_v8  ;;  %v14219_v59 = vadd.f32 %v4049_v15, %v14168_v49  ;;  %v9877_v49 = vor.u32 %v11677_v7, %v9874_v13  ;;  %v9401_v8 = vor.u32 %v11562_v9, %v9400_v57  ;;  %v10066_v7 = vld [vmem:[#allocation19 + $0x668] sm:$0xf0]  ;;  %v9304_v9 = vld [vmem:[#allocation19 + $0x50] sm:$0xf] }
 0x44a   : > { %v4107_v63 = vpop.f32.mrf.mxu3  ;;  %v9689_v54 = vor.u32 %v11634_v38, %v9688_v27  ;;  %v9657_v15 = vor.u32 %v11626_v1, %v9656_v30  ;;  %v9337_v13 = vor.u32 %v11546_v40, %v9336_v36  ;;  %v9810_v57 = vld [vmem:[#allocation19 + $0x468] sm:$0xf0]  ;;  %v11538_v38 = vld [vmem:[#allocation19 + $0x6c] sm:$0xf0] }
 0x44b   : > { %4365 = vmatmul.bf16.gmra.mxu0 %v14020_v11  ;;  %v4108_v51 = vadd.f32 %v4107_v63, %v14189_v33  ;;  %4385 = vmatpush.bf16.msra.mxu1 %v9877_v49  ;;  %v11554_v63 = vld [vmem:[#allocation19 + $0xec] sm:$0xf0]  ;;  %v9813_v27 = vor.u32 %v11661_v42, %v9810_v57  ;;  %v10034_v1 = vld [vmem:[#allocation19 + $0x628] sm:$0xf0] }
 0x44c   : > { %4442 = vmatpush.bf16.msrb.mxu3 %v9401_v8  ;;  %4470 = vmatpush.bf16.msrb.mxu0 %v9689_v54  ;;  %v9369_v0 = vor.u32 %v11554_v63, %v9368_v48  ;;  %v9592_v54 = vld [vmem:[#allocation19 + $0x290] sm:$0xf]  ;;  %v9305_v63 = vor.u32 %v11538_v38, %v9304_v9 }
 0x44d   : > { %v4073_v20 = vpop.f32.mrf.mxu2  ;;  %v9272_v36 = vld [vmem:[#allocation19 + $0x10] sm:$0xf] }
 0x44e   : > { %v14234_v43 = vadd.f32 %v4073_v20, %v14203_v56  ;;  %v9528_v42 = vld [vmem:[#allocation19 + $0x210] sm:$0xf] }
 0x44f   : > { %4341 = vmatmul.bf16.gmra.mxu3 %v13870_v4  ;;  %v11594_v57 = vld [vmem:[#allocation19 + $0x22c] sm:$0xf0] }
 0x450   : > { %v4136_v17 = vpop.f32.mrf.mxu0  ;;  %v4052_v46 = vpop.f32.mrf.mxu1  ;;  %v4903_v12 = vadd.f32 %v14234_v43, %v14222_v6  ;;  %4443 = vmatpush.bf16.msrb.mxu3 %v9369_v0  ;;  %4471 = vmatpush.bf16.msrb.mxu0 %v9657_v15  ;;  %v11717_v0 = vld [vmem:[#allocation19 + $0x60c] sm:$0xf] }
 0x451   : > { %v14228_v3 = vadd.f32 %v4136_v17, %v4108_v51  ;;  %v14231_v55 = vadd.f32 %v4052_v46, %v14173_v26  ;;  %v9845_v26 = vor.u32 %v11669_v52, %v9842_v50  ;;  %v11618_v51 = vld [vmem:[#allocation19 + $0x2ec] sm:$0xf0]  ;;  %v10069_v17 = vor.u32 %v11725_v28, %v10066_v7  ;;  %v9778_v50 = vld [vmem:[#allocation19 + $0x428] sm:$0xf0] }
 0x452   : > { %v14226_v25 = vpop.f32.mrf.mxu3  ;;  %4307 = vmatmul.bf16.gmra.mxu2 %v14136_v24  ;;  %v9625_v16 = vor.u32 %v11618_v51, %v9624_v47  ;;  %v11610_v46 = vld [vmem:[#allocation19 + $0x2ac] sm:$0xf0]  ;;  %v10037_v52 = vor.u32 %v11717_v0, %v10034_v1 }
 0x453   : > { %4283 = vmatmul.bf16.gmra.mxu1 %v14072_v2  ;;  %4416 = vmatpush.bf16.msra.mxu2 %v10069_v17  ;;  %v9593_v30 = vor.u32 %v11610_v46, %v9592_v54  ;;  %v9560_v51 = vld [vmem:[#allocation19 + $0x250] sm:$0xf] }
 0x454   : > { %4386 = vmatpush.bf16.msra.mxu1 %v9845_v26  ;;  %4444 = vmatpush.bf16.msrb.mxu3 %v9337_v13  ;;  %v11530_v26 = vld [vmem:[#allocation19 + $0x2c] sm:$0xf0] }
 0x455   : > { %v4076_v19 = vpop.f32.mrf.mxu2  ;;  %4472 = vmatpush.bf16.msrb.mxu0 %v9625_v16  ;;  %v9273_v47 = vor.u32 %v11530_v26, %v9272_v36  ;;  %v11602_v28 = vld [vmem:[#allocation19 + $0x26c] sm:$0xf0] }
 0x456   : > { %v14247_v48 = vadd.f32 %v4076_v19, %v14210_v61  ;;  %v9561_v7 = vor.u32 %v11602_v28, %v9560_v51  ;;  %v9529_v19 = vor.u32 %v11594_v57, %v9528_v42  ;;  %v10008_v42 = vld [vmem:[#allocation19 + $0x5d0] sm:$0xf]  ;;  %v11582_v57 = vld [vmem:[#allocation19 + $0x1d4] sm:$0xf] }
 0x457   : > { %4417 = vmatpush.bf16.msra.mxu2 %v10037_v52 }
 0x458   : > { %v14239_v58 = vpop.f32.mrf.mxu0  ;;  %v4054_v49 = vpop.f32.mrf.mxu1  ;;  %4387 = vmatpush.bf16.msra.mxu1 %v9813_v27  ;;  %v4904_v20 = vadd.f32 %v4903_v12, %v14247_v48  ;;  %4445 = vmatpush.bf16.msrb.mxu3 %v9305_v63 }
 0x459   : > { %v4055_v8 = vadd.f32 %v4054_v49, %v14178_v5  ;;  %v11653_v5 = vld [vmem:[#allocation19 + $0x40c] sm:$0xf]  ;;  %4473 = vmatpush.bf16.msrb.mxu0 %v9593_v30  ;;  %v14276_v30 = vperm.slane %v14145_v29, 2 }
 0x45a   : > { %v14242_v56 = vpop.f32.mrf.mxu3  ;;  %v9781_v40 = vor.u32 %v11653_v5, %v9778_v50 }
 0x45b   : > { %4370 = vmatmul.bf16.gmra.mxu0 %v13932_v37 }
 0x45c   : > { %4388 = vmatpush.bf16.msra.mxu1 %v9781_v40  ;;  %4446 = vmatpush.bf16.msrb.mxu3 %v9273_v47 }
 0x45d   : > { %v4078_v13 = vpop.f32.mrf.mxu2  ;;  %4474 = vmatpush.bf16.msrb.mxu0 %v9561_v7 }
 0x45e   : > { %v14257_v17 = vadd.f32 %v4078_v13, %v14219_v59 }
 0x45f   : > { %4346 = vmatmul.bf16.gmra.mxu3 %v13873_v62 }
 0x460   : > { %v14251_v15 = vpop.f32.mrf.mxu0  ;;  %v4057_v12 = vpop.f32.mrf.mxu1  ;;  %v4905_v49 = vadd.f32 %v4904_v20, %v14257_v17 }
 0x461   : > { %v4058_v16 = vadd.f32 %v4057_v12, %v14183_v60  ;;  %4475 = vmatpush.bf16.msrb.mxu0 %v9529_v19 }
 0x462   : > { %v14253_v61 = vpop.f32.mrf.mxu3  ;;  %4312 = vmatmul.bf16.gmra.mxu2 %v14123_v14 }
 0x463   : > { %4288 = vmatmul.bf16.gmra.mxu1 %v14074_v44 }
 0x465   : > { %v4081_v38 = vpop.f32.mrf.mxu2 }
 0x466   : > { %v14269_v54 = vadd.f32 %v4081_v38, %v14231_v55 }
 0x468   : > { %v14261_v9 = vpop.f32.mrf.mxu0  ;;  %v4059_v60 = vpop.f32.mrf.mxu1  ;;  %v4906_v46 = vadd.f32 %v4905_v49, %v14269_v54 }
 0x469   : > { %17037 = vst [vmem:[#allocation52_spill] sm:$0xff] %v14261_v9  ;;  %v4060_v59 = vadd.f32 %v4059_v60, %v14191_v41  ;;  %v11698_v9 = vld [vmem:[#allocation19 + $0x56c] sm:$0xf0] }
 0x46a   : > { %v14264_v27 = vpop.f32.mrf.mxu3 }
 0x46b   : > { %4375 = vmatmul.bf16.gmra.mxu0 %v13934_v34 }
 0x46d   : > { %v4083_v1 = vpop.f32.mrf.mxu2 }
 0x46e   : > { %v14280_v5 = vadd.f32 %v4083_v1, %v4055_v8 }
 0x46f   : > { %4447 = vmatmul.bf16.vlgmr.msrb.gmra.mxu3 %v13913_v32 }
 0x470   : > { %v14273_v63 = vpop.f32.mrf.mxu0  ;;  %v14278_v0 = vpop.f32.mrf.mxu1  ;;  %v4907_v55 = vadd.f32 %v4906_v46, %v14280_v5  ;;  %v9498_v46 = vld [vmem:[#allocation19 + $0x1f0] sm:$0xf0] }
 0x471   : > { %17038 = vst [vmem:[#allocation53_spill] sm:$0xff] %v14273_v63 }
 0x472   : > { %v4216_v20 = vpop.f32.mrf.mxu3  ;;  %4317 = vmatmul.bf16.gmra.mxu2 %v14126_v22 }
 0x473   : > { %v4217_v41 = vadd.f32 %v4216_v20, %v14276_v30  ;;  %4389 = vmatmul.bf16.vlgmr.msra.gmra.mxu1 %v14077_v45 }
 0x475   : > { %v4086_v26 = vpop.f32.mrf.mxu2 }
 0x476   : > { %v14291_v40 = vadd.f32 %v4086_v26, %v4058_v16  ;;  %v11714_v16 = vld [vmem:[#allocation19 + $0x5ec] sm:$0xf0] }
 0x477   : > { %v10009_v60 = vor.u32 %v11714_v16, %v10008_v42  ;;  %v9976_v26 = vld [vmem:[#allocation19 + $0x590] sm:$0xf]  ;;  %v11646_v42 = vld [vmem:[#allocation19 + $0x3d4] sm:$0xf] }
 0x478   : > { %v4245_v52 = vpop.f32.mrf.mxu0  ;;  %v14289_v29 = vpop.f32.mrf.mxu1  ;;  %v4908_v8 = vadd.f32 %v4907_v55, %v14291_v40  ;;  %v10264_v55 = vld [vmem:[#allocation19 + $0x7d0] sm:$0xf]  ;;  %v9754_v16 = vld [vmem:[#allocation19 + $0x3f0] sm:$0xf0] }
 0x479   : > { %v14286_v36 = vadd.f32 %v4245_v52, %v4217_v41  ;;  %v9501_v41 = vor.u32 %v11582_v57, %v9498_v46  ;;  %4497 = vmatpush.bf16.msrb.mxu1 %v10009_v60  ;;  %v11778_v52 = vld [vmem:[#allocation19 + $0x7ec] sm:$0xf0]  ;;  %v9757_v60 = vor.u32 %v11646_v42, %v9754_v16  ;;  %v9466_v46 = vld [vmem:[#allocation19 + $0x1b0] sm:$0xf0] }
 0x47a   : > { %v4218_v50 = vpop.f32.mrf.mxu3 }
 0x47b   : > { %4476 = vmatmul.bf16.vlgmr.msrb.gmra.mxu0 %v13959_v35  ;;  %v4219_v28 = vadd.f32 %v4218_v50, %v14276_v30  ;;  %4555 = vmatpush.bf16.msra.mxu3 %v9501_v41  ;;  %v9944_v41 = vld [vmem:[#allocation19 + $0x550] sm:$0xf] }
 0x47c   : > { %4584 = vmatpush.bf16.msra.mxu0 %v9757_v60  ;;  %v11762_v60 = vld [vmem:[#allocation19 + $0x76c] sm:$0xf0] }
 0x47d   : > { %v4088_v12 = vpop.f32.mrf.mxu2 }
 0x47e   : > { %v14298_v13 = vadd.f32 %v4088_v12, %v4060_v59  ;;  %v11706_v12 = vld [vmem:[#allocation19 + $0x5ac] sm:$0xf0] }
 0x47f   : > { %4452 = vmatmul.bf16.gmra.mxu3 %v13972_v53  ;;  %v9977_v57 = vor.u32 %v11706_v12, %v9976_v26  ;;  %v11638_v26 = vld [vmem:[#allocation19 + $0x394] sm:$0xf] }
 0x480   : > { %v4247_v47 = vpop.f32.mrf.mxu0  ;;  %v14296_v7 = vpop.f32.mrf.mxu1  ;;  %v4909_v49 = vadd.f32 %v4908_v8, %v14298_v13  ;;  %v9722_v12 = vld [vmem:[#allocation19 + $0x3b0] sm:$0xf0] }
 0x481   : > { %v14302_v19 = vadd.f32 %v4247_v47, %v4219_v28  ;;  %v10265_v47 = vor.u32 %v11778_v52, %v10264_v55  ;;  %4498 = vmatpush.bf16.msrb.mxu1 %v9977_v57  ;;  %v9725_v16 = vor.u32 %v11638_v26, %v9722_v12  ;;  %v9402_v26 = vld [vmem:[#allocation19 + $0x130] sm:$0xf0] }
 0x482   : > { %v4221_v51 = vpop.f32.mrf.mxu3  ;;  %v4910_v20 = vrot.slane %v4909_v49, 4  ;;  %4418 = vmatmul.bf16.vlgmr.msra.gmra.mxu2 %v14128_v31  ;;  %v11630_v12 = vld [vmem:[#allocation19 + $0x354] sm:$0xf] }
 0x483   : > { %4394 = vmatmul.bf16.gmra.mxu1 %v14113_v10  ;;  %v4222_v50 = vadd.f32 %v4221_v51, %v14276_v30  ;;  %4526 = vmatpush.bf16.msrb.mxu2 %v10265_v47  ;;  %v11770_v10 = vld [vmem:[#allocation19 + $0x7ac] sm:$0xf0]  ;;  %v9945_v47 = vor.u32 %v11698_v9, %v9944_v41  ;;  %v11558_v41 = vld [vmem:[#allocation19 + $0x114] sm:$0xf] }
 0x484   : > { %v4911_v59 = vadd.f32 %v4910_v20, %v4909_v49  ;;  %v11574_v49 = vld [vmem:[#allocation19 + $0x194] sm:$0xf]  ;;  %4585 = vmatpush.bf16.msra.mxu0 %v9725_v16  ;;  %v11690_v9 = vld [vmem:[#allocation19 + $0x52c] sm:$0xf0] }
 0x485   : > { %v14311_v28 = vpop.f32.mrf.mxu2  ;;  %v9469_v51 = vor.u32 %v11574_v49, %v9466_v46  ;;  %v9434_v49 = vld [vmem:[#allocation19 + $0x170] sm:$0xf0]  ;;  %v10200_v46 = vld [vmem:[#allocation19 + $0x750] sm:$0xf]  ;;  %4499 = vmatpush.bf16.msrb.mxu1 %v9945_v47  ;;  %v4159_v47 = vadd.f32 %v14278_v0, %v14199_v21 }
 0x486   : > { %v4912_v31 = vrot.slane %v4911_v59, 2 }
 0x487   : > { %4556 = vmatpush.bf16.msra.mxu3 %v9469_v51  ;;  %v10201_v51 = vor.u32 %v11762_v60, %v10200_v46  ;;  %v11754_v60 = vld [vmem:[#allocation19 + $0x72c] sm:$0xf0] }
 0x488   : > { %v4250_v38 = vpop.f32.mrf.mxu0  ;;  %v14309_v8 = vpop.f32.mrf.mxu1  ;;  %v4913_v20 = vadd.f32 %v4912_v31, %v4911_v59 }
 0x489   : > { %v14314_v55 = vadd.f32 %v4250_v38, %v4222_v50 }
 0x48a   : > { %v14305_v1 = vpop.f32.mrf.mxu3  ;;  %v4914_v42 = vrot.slane %v4913_v20, 1 }
 0x48b   : > { %4481 = vmatmul.bf16.gmra.mxu0 %v14020_v11  ;;  %v10232_v11 = vld [vmem:[#allocation19 + $0x790] sm:$0xf] }
 0x48c   : > { %v10233_v52 = vor.u32 %v11770_v10, %v10232_v11  ;;  %v4915_v57 = vadd.f32 %v4914_v42, %v4913_v20  ;;  %v9912_v11 = vld [vmem:[#allocation19 + $0x510] sm:$0xf]  ;;  %v4161_v10 = vadd.f32 %v14289_v29, %v14207_v23  ;;  %v9405_v20 = vor.u32 %v11558_v41, %v9402_v26  ;;  %v9690_v42 = vld [vmem:[#allocation19 + $0x370] sm:$0xf0] }
 0x48d   : > { %v4189_v50 = vpop.f32.mrf.mxu2  ;;  %v9693_v23 = vor.u32 %v11630_v12, %v9690_v42  ;;  %v11622_v26 = vld [vmem:[#allocation19 + $0x314] sm:$0xf]  ;;  %v10136_v42 = vld [vmem:[#allocation19 + $0x6d0] sm:$0xf] }
 0x48e   : > { %4527 = vmatpush.bf16.msrb.mxu2 %v10233_v52  ;;  %v5007_v52 = vmul.f32 %v4915_v57, %v13336_v39 }
 0x48f   : > { %4457 = vmatmul.bf16.gmra.mxu3 %v13870_v4  ;;  %v11566_v4 = vld [vmem:[#allocation19 + $0x154] sm:$0xf]  ;;  %4586 = vmatpush.bf16.msra.mxu0 %v9693_v23 }
 0x490   : > { %v14316_v63 = vpop.f32.mrf.mxu0  ;;  %v9437_v59 = vor.u32 %v11566_v4, %v9434_v49  ;;  %v14318_v38 = vpop.f32.mrf.mxu1  ;;  %v9913_v4 = vor.u32 %v11690_v9, %v9912_v11  ;;  %v14325_v49 = vadd.f32 %v4189_v50, %v4161_v10  ;;  %v14329_v29 = vsub.f32 %v14222_v6, %v5007_v52  ;;  %v9880_v11 = vld [vmem:[#allocation19 + $0x4d0] sm:$0xf]  ;;  %v11550_v10 = vld [vmem:[#allocation19 + $0xd4] sm:$0xf] }
 0x491   : > { %v14332_v16 = vsub.f32 %v14234_v43, %v5007_v52  ;;  %v14338_v57 = vsub.f32 %v14257_v17, %v5007_v52  ;;  %v14341_v21 = vsub.f32 %v14269_v54, %v5007_v52  ;;  %v14344_v0 = vsub.f32 %v14280_v5, %v5007_v52  ;;  %v10168_v43 = vld [vmem:[#allocation19 + $0x710] sm:$0xf] }
 0x492   : > { %v4226_v31 = vpop.f32.mrf.mxu3  ;;  %4557 = vmatpush.bf16.msra.mxu3 %v9437_v59  ;;  %17039 = vst [vmem:[#allocation54_spill] sm:$0xff] %v14325_v49  ;;  %4528 = vmatpush.bf16.msrb.mxu2 %v10201_v51  ;;  %v14335_v59 = vsub.f32 %v14247_v48, %v5007_v52  ;;  %v14347_v46 = vsub.f32 %v14291_v40, %v5007_v52  ;;  %v11682_v40 = vld [vmem:[#allocation19 + $0x4ec] sm:$0xf0] }
 0x493   : > { %4399 = vmatmul.bf16.gmra.mxu1 %v14072_v2  ;;  %17040 = vst [vmem:[#allocation55_spill] sm:$0xff] %v14329_v29  ;;  %v14350_v6 = vsub.f32 %v14298_v13, %v5007_v52  ;;  %v5079_v17 = vmul.f32 %v14329_v29, %v14329_v29  ;;  %v5087_v54 = vmul.f32 %v14332_v16, %v14332_v16  ;;  %v9370_v13 = vld [vmem:[#allocation19 + $0xf0] sm:$0xf0] }
 0x494   : > { %17041 = vst [vmem:[#allocation56_spill] sm:$0xff] %v14332_v16  ;;  %4500 = vmatpush.bf16.msrb.mxu1 %v9913_v4  ;;  %v14357_v5 = vadd.f32 %v14311_v28, %v4159_v47  ;;  %4423 = vmatmul.bf16.gmra.mxu2 %v14136_v24  ;;  %v5095_v50 = vmul.f32 %v14335_v59, %v14335_v59  ;;  %v9658_v28 = vld [vmem:[#allocation19 + $0x330] sm:$0xf0] }
 0x495   : > { %17042 = vst [vmem:[#allocation57_spill] sm:$0xff] %v14335_v59  ;;  %v4164_v51 = vadd.f32 %v14296_v7, %v14215_v18  ;;  %v4224_v9 = vadd.f32 %v14305_v1, %v14276_v30  ;;  %v4227_v41 = vadd.f32 %v4226_v31, %v14276_v30  ;;  %v5103_v52 = vmul.f32 %v14338_v57, %v14338_v57  ;;  %v11746_v18 = vld [vmem:[#allocation19 + $0x6ec] sm:$0xf0]  ;;  %v4192_v47 = vpop.f32.mrf.mxu2  ;;  %v9338_v59 = vld [vmem:[#allocation19 + $0xb0] sm:$0xf0] }
 0x496   : > { %17043 = vst [vmem:[#allocation58_spill] sm:$0xff] %v14338_v57  ;;  %4558 = vmatpush.bf16.msra.mxu3 %v9405_v20  ;;  %v5143_v4 = vadd.f32 %v5087_v54, %v5079_v17  ;;  %v4916_v20 = vadd.f32 %v14325_v49, %v14357_v5  ;;  %v10169_v12 = vor.u32 %v11754_v60, %v10168_v43  ;;  %v9848_v1 = vld [vmem:[#allocation19 + $0x490] sm:$0xf]  ;;  %v11542_v54 = vld [vmem:[#allocation19 + $0x94] sm:$0xf] }
 0x497   : > { %17044 = vst [vmem:[#allocation59_spill] sm:$0xff] %v14341_v21  ;;  %v5111_v31 = vmul.f32 %v14341_v21, %v14341_v21  ;;  %v10137_v23 = vor.u32 %v11746_v18, %v10136_v42  ;;  %v9881_v2 = vor.u32 %v11682_v40, %v9880_v11  ;;  %v9373_v57 = vor.u32 %v11550_v10, %v9370_v13  ;;  %v11674_v17 = vld [vmem:[#allocation19 + $0x4ac] sm:$0xf0]  ;;  %v9626_v16 = vld [vmem:[#allocation19 + $0x2f0] sm:$0xf0] }
 0x498   : > { %v4255_v48 = vpop.f32.mrf.mxu0  ;;  %17045 = vst [vmem:[#allocation60_spill] sm:$0xff] %v14357_v5  ;;  %v14372_v7 = vpop.f32.mrf.mxu1  ;;  %v5144_v49 = vadd.f32 %v5143_v4, %v5095_v50  ;;  %v14376_v43 = vadd.f32 %v4192_v47, %v4164_v51  ;;  %4529 = vmatpush.bf16.msrb.mxu2 %v10169_v12  ;;  %v9661_v60 = vor.u32 %v11622_v26, %v9658_v28  ;;  %v10104_v10 = vld [vmem:[#allocation19 + $0x690] sm:$0xf]  ;;  %v9306_v4 = vld [vmem:[#allocation19 + $0x70] sm:$0xf0] }
 0x499   : > { %v9849_v5 = vor.u32 %v11674_v17, %v9848_v1  ;;  %4501 = vmatpush.bf16.msrb.mxu1 %v9881_v2  ;;  %v9341_v21 = vor.u32 %v11542_v54, %v9338_v59  ;;  %v14380_v42 = vadd.f32 %v14316_v63, %v4224_v9  ;;  %v11738_v13 = vld [vmem:[#allocation19 + $0x6ac] sm:$0xf0]  ;;  %v14383_v51 = vadd.f32 %v4255_v48, %v4227_v41  ;;  %v11534_v2 = vld [vmem:[#allocation19 + $0x54] sm:$0xf] }
 0x49a   : > { %v4228_v24 = vpop.f32.mrf.mxu3  ;;  %v5145_v11 = vadd.f32 %v5144_v49, %v5103_v52  ;;  %v4917_v40 = vadd.f32 %v4916_v20, %v14376_v43  ;;  %4559 = vmatpush.bf16.msra.mxu3 %v9373_v57  ;;  %4587 = vmatpush.bf16.msra.mxu0 %v9661_v60  ;;  %v9816_v50 = vld [vmem:[#allocation19 + $0x450] sm:$0xf]  ;;  %v10105_v63 = vor.u32 %v11738_v13, %v10104_v10  ;;  %v11606_v49 = vld [vmem:[#allocation19 + $0x294] sm:$0xf] }
 0x49b   : > { %4486 = vmatmul.bf16.gmra.mxu0 %v13932_v37  ;;  %v11614_v37 = vld [vmem:[#allocation19 + $0x2d4] sm:$0xf]  ;;  %v11666_v28 = vld [vmem:[#allocation19 + $0x46c] sm:$0xf0]  ;;  %v5127_v9 = vmul.f32 %v14347_v46, %v14347_v46  ;;  %v4166_v57 = vadd.f32 %v14309_v8, %v14228_v3  ;;  %v4229_v48 = vadd.f32 %v4228_v24, %v14276_v30  ;;  %v9309_v1 = vor.u32 %v11534_v2, %v9306_v4 }
 0x49c   : > { %v9629_v29 = vor.u32 %v11614_v37, %v9626_v16  ;;  %v5119_v37 = vmul.f32 %v14344_v0, %v14344_v0  ;;  %v5146_v16 = vadd.f32 %v5145_v11, %v5111_v31  ;;  %4530 = vmatpush.bf16.msrb.mxu2 %v10137_v23  ;;  %v9594_v59 = vld [vmem:[#allocation19 + $0x2b0] sm:$0xf0]  ;;  %v10072_v20 = vld [vmem:[#allocation19 + $0x650] sm:$0xf]  ;;  %v9817_v18 = vor.u32 %v11666_v28, %v9816_v50 }
 0x49d   : > { %4502 = vmatpush.bf16.msrb.mxu1 %v9849_v5  ;;  %v11730_v12 = vld [vmem:[#allocation19 + $0x66c] sm:$0xf0]  ;;  %v4194_v47 = vpop.f32.mrf.mxu2  ;;  %v9597_v23 = vor.u32 %v11606_v49, %v9594_v59  ;;  %v11526_v54 = vld [vmem:[#allocation19 + $0x14] sm:$0xf]  ;;  %v5135_v3 = vmul.f32 %v14350_v6, %v14350_v6 }
 0x49e   : > { %v5147_v41 = vadd.f32 %v5146_v16, %v5119_v37  ;;  %4560 = vmatpush.bf16.msra.mxu3 %v9341_v21  ;;  %4588 = vmatpush.bf16.msra.mxu0 %v9629_v29  ;;  %v9784_v31 = vld [vmem:[#allocation19 + $0x410] sm:$0xf]  ;;  %v14396_v24 = vadd.f32 %v4194_v47, %v4166_v57  ;;  %v9274_v5 = vld [vmem:[#allocation19 + $0x30] sm:$0xf0]  ;;  %v10073_v21 = vor.u32 %v11730_v12, %v10072_v20 }
 0x49f   : > { %4462 = vmatmul.bf16.gmra.mxu3 %v13873_v62  ;;  %v11658_v17 = vld [vmem:[#allocation19 + $0x42c] sm:$0xf0]  ;;  %v11598_v60 = vld [vmem:[#allocation19 + $0x254] sm:$0xf]  ;;  %v9277_v16 = vor.u32 %v11526_v54, %v9274_v5 }
 0x4a0   : > { %v4257_v26 = vpop.f32.mrf.mxu0  ;;  %v14392_v52 = vpop.f32.mrf.mxu1  ;;  %v5148_v8 = vadd.f32 %v5147_v41, %v5127_v9  ;;  %4531 = vmatpush.bf16.msrb.mxu2 %v10105_v63  ;;  %v9562_v11 = vld [vmem:[#allocation19 + $0x270] sm:$0xf0]  ;;  %v9785_v10 = vor.u32 %v11658_v17, %v9784_v31  ;;  %v14400_v50 = vadd.f32 %v4917_v40, %v14396_v24  ;;  %v10040_v28 = vld [vmem:[#allocation19 + $0x610] sm:$0xf] }
 0x4a1   : > { %4503 = vmatpush.bf16.msrb.mxu1 %v9817_v18  ;;  %v11722_v2 = vld [vmem:[#allocation19 + $0x62c] sm:$0xf0]  ;;  %v14402_v4 = vadd.f32 %v4257_v26, %v4229_v48  ;;  %v9565_v63 = vor.u32 %v11598_v60, %v9562_v11  ;;  %v11590_v5 = vld [vmem:[#allocation19 + $0x214] sm:$0xf] }
 0x4a2   : > { %v4231_v29 = vpop.f32.mrf.mxu3  ;;  %v5149_v13 = vadd.f32 %v5148_v8, %v5135_v3  ;;  %4561 = vmatpush.bf16.msra.mxu3 %v9309_v1  ;;  %4589 = vmatpush.bf16.msra.mxu0 %v9597_v23  ;;  %v10041_v59 = vor.u32 %v11722_v2, %v10040_v28  ;;  %v9530_v60 = vld [vmem:[#allocation19 + $0x230] sm:$0xf0]  ;;  %v4116_v28 = vadd.f32 %v14253_v61, %v14189_v33 }
 0x4a3   : > { %4404 = vmatmul.bf16.gmra.mxu1 %v14074_v44  ;;  %v4232_v57 = vadd.f32 %v4231_v29, %v14276_v30  ;;  %v4111_v29 = vadd.f32 %v14226_v25, %v14189_v33 }
 0x4a4   : > { %v5150_v49 = vrot.slane %v5149_v13, 4  ;;  %4428 = vmatmul.bf16.gmra.mxu2 %v14123_v14 }
 0x4a5   : > { %4532 = vmatpush.bf16.msrb.mxu2 %v10073_v21  ;;  %4504 = vmatpush.bf16.msrb.mxu1 %v9785_v10  ;;  %v4197_v41 = vpop.f32.mrf.mxu2  ;;  %v9533_v21 = vor.u32 %v11590_v5, %v9530_v60  ;;  %v14423_v10 = vld [vmem:[#allocation20] sm:$0xff]  ;;  %v4140_v2 = vadd.f32 %v14239_v58, %v4111_v29 }
 0x4a6   : > { %v5151_v9 = vadd.f32 %v5150_v49, %v5149_v13  ;;  %4562 = vmatpush.bf16.msra.mxu3 %v9277_v16  ;;  %4590 = vmatpush.bf16.msra.mxu0 %v9565_v63  ;;  %v14426_v13 = vperm.slane %v14423_v10, 3 }
 0x4a7   : > { %v4169_v63 = vadd.f32 %v14318_v38, %v4140_v2 }
 0x4a8   : > { %v4260_v37 = vpop.f32.mrf.mxu0  ;;  %v4175_v40 = vpop.f32.mrf.mxu1  ;;  %v5152_v26 = vrot.slane %v5151_v9, 2 }
 0x4a9   : > { %4533 = vmatpush.bf16.msrb.mxu2 %v10041_v59  ;;  %v14408_v20 = vadd.f32 %v4260_v37, %v4232_v57 }
 0x4aa   : > { %v5153_v48 = vadd.f32 %v5152_v26, %v5151_v9  ;;  %v4233_v18 = vpop.f32.mrf.mxu3  ;;  %4591 = vmatpush.bf16.msra.mxu0 %v9533_v21  ;;  %v17049_v21 = vld [vmem:[#allocation49_spill] sm:$0xff] }
 0x4ab   : > { %4491 = vmatmul.bf16.gmra.mxu0 %v13934_v34  ;;  %v4234_v47 = vadd.f32 %v4233_v18, %v14276_v30  ;;  %v4113_v30 = vadd.f32 %v14242_v56, %v14189_v33  ;;  %v4118_v56 = vadd.f32 %v14264_v27, %v14189_v33 }
 0x4ac   : > { %v5154_v1 = vrot.slane %v5153_v48, 1 }
 0x4ad   : > { %v4199_v17 = vpop.f32.mrf.mxu2  ;;  %v4142_v49 = vadd.f32 %v14251_v15, %v4113_v30  ;;  %v17048_v15 = vld [vmem:[#allocation53_spill] sm:$0xff] }
 0x4ae   : > { %v5155_v31 = vadd.f32 %v5154_v1, %v5153_v48  ;;  %v14442_v48 = vadd.f32 %v4197_v41, %v4169_v63  ;;  %v4147_v1 = vadd.f32 %v17048_v15, %v4118_v56  ;;  %v17053_v63 = vld [vmem:[#allocation56_spill] sm:$0xff] }
 0x4af   : > { %4563 = vmatmul.bf16.vlgmr.msra.gmra.mxu3 %v13913_v32  ;;  %v4171_v26 = vadd.f32 %v14372_v7, %v4142_v49 }
 0x4b0   : > { %v4262_v12 = vpop.f32.mrf.mxu0  ;;  %v4274_v23 = vpop.f32.mrf.mxu1  ;;  %v5247_v3 = vmul.f32 %v5155_v31, %v13336_v39 }
 0x4b1   : > { %v14412_v54 = vadd.f32 %v4274_v23, %v14286_v36  ;;  %v14416_v11 = vadd.f32 %v4262_v12, %v4234_v47  ;;  %v17047_v12 = vld [vmem:[#allocation52_spill] sm:$0xff]  ;;  %v14446_v38 = vadd.f32 %v4199_v17, %v4171_v26  ;;  %v4919_v47 = vadd.f32 %v14400_v50, %v14442_v48  ;;  %v17056_v26 = vld [vmem:[#allocation59_spill] sm:$0xff] }
 0x4b2   : > { %v5255_v8 = vadd.f32 0.8, %v5247_v3  ;;  %v4332_v37 = vpop.f32.mrf.mxu3  ;;  %v4145_v18 = vadd.f32 %v17047_v12, %v4116_v28  ;;  %v4176_v23 = vadd.f32 %v4175_v40, %v4147_v1  ;;  %v17051_v28 = vld [vmem:[#allocation50_spill] sm:$0xff] }
 0x4b3   : > { %4505 = vmatmul.bf16.vlgmr.msrb.gmra.mxu1 %v14077_v45  ;;  %v4333_v16 = vadd.f32 %v4332_v37, %v14426_v13  ;;  %v17057_v1 = vld [vmem:[#allocation46_spill] sm:$0xff] }
 0x4b4   : > { %12303 = vrsqrt.f32 %v5255_v8  ;;  %4433 = vmatmul.bf16.gmra.mxu2 %v14126_v22  ;;  %v4174_v27 = vadd.f32 %v14392_v52, %v4145_v18  ;;  %v4920_v52 = vadd.f32 %v4919_v47, %v14446_v38  ;;  %vm5269_vm12 = vweird.f32 %v5255_v8  ;;  %v17058_v47 = vld [vmem:[#allocation40_spill] sm:$0xff] }
 0x4b5   : > { %v4202_v25 = vpop.f32.mrf.mxu2 }
 0x4b6   : > { %v14451_v3 = vadd.f32 %v4202_v25, %v4174_v27 }
 0x4b8   : > { %v4361_v36 = vpop.f32.mrf.mxu0  ;;  %v4276_v59 = vpop.f32.mrf.mxu1  ;;  %v4921_v40 = vadd.f32 %v4920_v52, %v14451_v3  ;;  %v11710_v52 = vld [vmem:[#allocation19 + $0x5d4] sm:$0xf] }
 0x4b9   : > { %v4277_v57 = vadd.f32 %v4276_v59, %v14302_v19  ;;  %v14439_v58 = vadd.f32 %v4361_v36, %v4333_v16  ;;  %v17052_v16 = vld [vmem:[#allocation55_spill] sm:$0xff] }
 0x4ba   : > { %v12304_v9 = vpop.eup %12303  ;;  %v4334_v41 = vpop.f32.mrf.mxu3 }
 0x4bb   : > { %4592 = vmatmul.bf16.vlgmr.msra.gmra.mxu0 %v13959_v35  ;;  %17046 = vst [vmem:[#allocation61_spill] sm:$0xff] %v14439_v58  ;;  %v5264_v61 = vmul.f32 %v12304_v9, %v5255_v8  ;;  %v4335_v5 = vadd.f32 %v4334_v41, %v14426_v13  ;;  %vm5270_vm11 = vweird.f32 %v12304_v9  ;;  %v17055_v8 = vld [vmem:[#allocation58_spill] sm:$0xff] }
 0x4bc   : > { %vm5271_vm13 = vmor %vm5269_vm12, %vm5270_vm11 }
 0x4bd   : > { %v5265_v33 = vmul.f32 %v12304_v9, %v5264_v61  ;;  %v4204_v7 = vpop.f32.mrf.mxu2 }
 0x4be   : > { %v14455_v17 = vadd.f32 %v4204_v7, %v4176_v23 }
 0x4bf   : > { %4568 = vmatmul.bf16.gmra.mxu3 %v13972_v53  ;;  %v5266_v19 = vmul.f32 0.5, %v5265_v33 }
 0x4c0   : > { %v4363_v31 = vpop.f32.mrf.mxu0  ;;  %v4279_v29 = vpop.f32.mrf.mxu1  ;;  %v4922_v25 = vadd.f32 %v4921_v40, %v14455_v17 }
 0x4c1   : > { %v5267_v60 = vsub.f32 1.5, %v5266_v19  ;;  %v4280_v30 = vadd.f32 %v4279_v29, %v14314_v55  ;;  %v14459_v36 = vadd.f32 %v4363_v31, %v4335_v5  ;;  %v17054_v55 = vld [vmem:[#allocation57_spill] sm:$0xff]  ;;  %v17061_v5 = vld [vmem:[#allocation39_spill] sm:$0xff]  ;;  %v10010_v29 = vld [vmem:[#allocation19 + $0x5f0] sm:$0xf0] }
 0x4c2   : > { %v14490_v15 = vpop.f32.mrf.mxu3  ;;  %v4923_v19 = vrot.slane %v4922_v25, 4  ;;  %v10013_v40 = vor.u32 %v11710_v52, %v10010_v29  ;;  %v9978_v52 = vld [vmem:[#allocation19 + $0x5b0] sm:$0xf0] }
 0x4c3   : > { %4510 = vmatmul.bf16.gmra.mxu1 %v17049_v21  ;;  %17050 = vst [vmem:[#allocation52_spill] sm:$0xff] %v14459_v36  ;;  %v5268_v50 = vmul.f32 %v12304_v9, %v5267_v60 }
 0x4c4   : > { %4534 = vmatmul.bf16.vlgmr.msrb.gmra.mxu2 %v17051_v28  ;;  %v4924_v7 = vadd.f32 %v4923_v19, %v4922_v25  ;;  %v11587_v25 = vld [vmem:[#allocation19 + $0x1f4] sm:$0xf0]  ;;  %4613 = vmatpush.bf16.msra.mxu1 %v10013_v40  ;;  %v11774_v19 = vld [vmem:[#allocation19 + $0x7d4] sm:$0xf] }
 0x4c5   : > { %v5272_v2 = vsel %vm5271_vm13, %v12304_v9, %v5268_v50  ;;  %v4303_v27 = vpop.f32.mrf.mxu2  ;;  %v9472_v40 = vld [vmem:[#allocation19 + $0x198] sm:$0xf] }
 0x4c6   : > { %v14467_v56 = vmul.f32 %v5272_v2, %v17052_v16  ;;  %v14470_v49 = vmul.f32 %v5272_v2, %v17053_v63  ;;  %v14473_v59 = vmul.f32 %v5272_v2, %v17054_v55  ;;  %v14476_v61 = vmul.f32 %v5272_v2, %v17055_v8  ;;  %v9504_v16 = vld [vmem:[#allocation19 + $0x1d8] sm:$0xf] }
 0x4c7   : > { %v14479_v12 = vmul.f32 %v5272_v2, %v17056_v26  ;;  %v14482_v9 = vmul.f32 %v5272_v2, %v14344_v0  ;;  %v14485_v18 = vmul.f32 %v5272_v2, %v14347_v46  ;;  %v14488_v33 = vmul.f32 %v5272_v2, %v14350_v6  ;;  %v17063_v55 = vld [vmem:[#allocation51_spill] sm:$0xff] }
 0x4c8   : > { %v14464_v37 = vpop.f32.mrf.mxu0  ;;  %v4281_v31 = vpop.f32.mrf.mxu1  ;;  %v14497_v0 = vadd.f32 %v4303_v27, %v14412_v54  ;;  %v4925_v60 = vrot.slane %v4924_v7, 2  ;;  %v9505_v26 = vor.u32 %v11587_v25, %v9504_v16  ;;  %v11579_v16 = vld [vmem:[#allocation19 + $0x1b4] sm:$0xf0] }
 0x4c9   : > { %v14505_v2 = vadd.f32 %v4281_v31, %v14380_v42  ;;  %v11702_v31 = vld [vmem:[#allocation19 + $0x594] sm:$0xf] }
 0x4ca   : > { %17060 = vst [vmem:[#allocation55_spill] sm:$0xff] %v14497_v0  ;;  %v14499_v41 = vpop.f32.mrf.mxu3  ;;  %v4926_v63 = vadd.f32 %v4925_v60, %v4924_v7  ;;  %4671 = vmatpush.bf16.msrb.mxu3 %v9505_v26  ;;  %v9760_v60 = vld [vmem:[#allocation19 + $0x3d8] sm:$0xf]  ;;  %v9981_v36 = vor.u32 %v11702_v31, %v9978_v52  ;;  %v9473_v26 = vor.u32 %v11579_v16, %v9472_v40 }
 0x4cb   : > { %4597 = vmatmul.bf16.gmra.mxu0 %v17057_v1  ;;  %v11571_v40 = vld [vmem:[#allocation19 + $0x174] sm:$0xf0] }
 0x4cc   : > { %4614 = vmatpush.bf16.msra.mxu1 %v9981_v36 }
 0x4cd   : > { %v4305_v46 = vpop.f32.mrf.mxu2 }
 0x4ce   : > { %v14502_v50 = vadd.f32 %v4305_v46, %v4277_v57  ;;  %v4927_v57 = vrot.slane %v4926_v63, 1  ;;  %v10266_v46 = vld [vmem:[#allocation19 + $0x7f0] sm:$0xf0]  ;;  %4672 = vmatpush.bf16.msrb.mxu3 %v9473_v26 }
 0x4cf   : > { %4573 = vmatmul.bf16.gmra.mxu3 %v17058_v47  ;;  %v10269_v42 = vor.u32 %v11774_v19, %v10266_v46  ;;  %v11766_v46 = vld [vmem:[#allocation19 + $0x794] sm:$0xf] }
 0x4d0   : > { %v14494_v23 = vpop.f32.mrf.mxu0  ;;  %v4284_v6 = vpop.f32.mrf.mxu1  ;;  %17062 = vst [vmem:[#allocation56_spill] sm:$0xff] %v14502_v50  ;;  %v4929_v54 = vadd.f32 %v14502_v50, %v14497_v0  ;;  %v10234_v0 = vld [vmem:[#allocation19 + $0x7b0] sm:$0xf0] }
 0x4d1   : > { %17059 = vst [vmem:[#allocation53_spill] sm:$0xff] %v14494_v23  ;;  %v14511_v8 = vadd.f32 %v4284_v6, %v14383_v51  ;;  %v4928_v23 = vadd.f32 %v4927_v57, %v4926_v63  ;;  %v11651_v51 = vld [vmem:[#allocation19 + $0x3f4] sm:$0xf0]  ;;  %4642 = vmatpush.bf16.msra.mxu2 %v10269_v42  ;;  %v10237_v57 = vor.u32 %v11766_v46, %v10234_v0  ;;  %v17068_v42 = vld [vmem:[#allocation60_spill] sm:$0xff]  ;;  %v9946_v0 = vld [vmem:[#allocation19 + $0x570] sm:$0xf0] }
 0x4d2   : > { %v14515_v29 = vpop.f32.mrf.mxu3  ;;  %v17067_v6 = vld [vmem:[#allocation43_spill] sm:$0xff]  ;;  %v9761_v25 = vor.u32 %v11651_v51, %v9760_v60  ;;  %v10202_v26 = vld [vmem:[#allocation19 + $0x770] sm:$0xf0] }
 0x4d3   : > { %4515 = vmatmul.bf16.gmra.mxu1 %v17061_v5  ;;  %17065 = vst [vmem:[#allocation58_spill] sm:$0xff] %v14515_v29  ;;  %v14521_v19 = vmul.f32 %v4928_v23, %v13336_v39  ;;  %v17070_v23 = vld [vmem:[#allocation54_spill] sm:$0xff]  ;;  %v9440_v51 = vld [vmem:[#allocation19 + $0x158] sm:$0xf] }
 0x4d4   : > { %4539 = vmatmul.bf16.gmra.mxu2 %v17063_v55  ;;  %4700 = vmatpush.bf16.msrb.mxu0 %v9761_v25  ;;  %v11758_v25 = vld [vmem:[#allocation19 + $0x754] sm:$0xf]  ;;  %v9696_v55 = vld [vmem:[#allocation19 + $0x358] sm:$0xf] }
 0x4d5   : > { %v4308_v7 = vpop.f32.mrf.mxu2  ;;  %v14530_v31 = vsub.f32 %v17068_v42, %v14521_v19  ;;  %v14534_v52 = vsub.f32 %v17070_v23, %v14521_v19  ;;  %v14538_v36 = vsub.f32 %v14376_v43, %v14521_v19  ;;  %4643 = vmatpush.bf16.msra.mxu2 %v10237_v57  ;;  %v11686_v46 = vld [vmem:[#allocation19 + $0x514] sm:$0xf]  ;;  %v14556_v57 = vsub.f32 %v14446_v38, %v14521_v19 }
 0x4d6   : > { %v14517_v50 = vadd.f32 %v4308_v7, %v4280_v30  ;;  %v11643_v7 = vld [vmem:[#allocation19 + $0x3b4] sm:$0xf0] }
 0x4d7   : > { %17069 = vst [vmem:[#allocation60_spill] sm:$0xff] %v14530_v31  ;;  %v5080_v16 = vmul.f32 %v14530_v31, %v14530_v31  ;;  %v5088_v43 = vmul.f32 %v14534_v52, %v14534_v52  ;;  %v5096_v42 = vmul.f32 %v14538_v36, %v14538_v36 }
 0x4d8   : > { %v14513_v27 = vpop.f32.mrf.mxu0  ;;  %17066 = vst [vmem:[#allocation59_spill] sm:$0xff] %v14517_v50  ;;  %v4930_v63 = vadd.f32 %v4929_v54, %v14517_v50  ;;  %v11694_v54 = vld [vmem:[#allocation19 + $0x554] sm:$0xf]  ;;  %v10205_v50 = vor.u32 %v11758_v25, %v10202_v26 }
 0x4d9   : > { %17064 = vst [vmem:[#allocation57_spill] sm:$0xff] %v14513_v27  ;;  %v4286_v27 = vpop.f32.mrf.mxu1  ;;  %v9949_v47 = vor.u32 %v11694_v54, %v9946_v0  ;;  %v10170_v54 = vld [vmem:[#allocation19 + $0x730] sm:$0xf0] }
 0x4da   : > { %v14525_v30 = vadd.f32 %v4286_v27, %v14402_v4  ;;  %17071 = vst [vmem:[#allocation54_spill] sm:$0xff] %v14534_v52  ;;  %v14542_v4 = vsub.f32 %v14396_v24, %v14521_v19  ;;  %v9728_v27 = vld [vmem:[#allocation19 + $0x398] sm:$0xf]  ;;  %v14552_v24 = vsub.f32 %v14442_v48, %v14521_v19  ;;  %v14560_v29 = vpop.f32.mrf.mxu3  ;;  %4644 = vmatpush.bf16.msra.mxu2 %v10205_v50  ;;  %v11678_v25 = vld [vmem:[#allocation19 + $0x4d4] sm:$0xf] }
 0x4db   : > { %4602 = vmatmul.bf16.gmra.mxu0 %v17067_v6  ;;  %17072 = vst [vmem:[#allocation62_spill] sm:$0xff] %v14538_v36  ;;  %v5156_v6 = vadd.f32 %v5088_v43, %v5080_v16  ;;  %v11563_v48 = vld [vmem:[#allocation19 + $0x134] sm:$0xf0]  ;;  %v9729_v58 = vor.u32 %v11643_v7, %v9728_v27  ;;  %v9441_v36 = vor.u32 %v11571_v40, %v9440_v51  ;;  %v11750_v16 = vld [vmem:[#allocation19 + $0x714] sm:$0xf] }
 0x4dc   : > { %17074 = vst [vmem:[#allocation64_spill] sm:$0xff] %v14560_v29  ;;  %v11635_v52 = vld [vmem:[#allocation19 + $0x374] sm:$0xf0]  ;;  %v5104_v38 = vmul.f32 %v14542_v4, %v14542_v4  ;;  %4615 = vmatpush.bf16.msra.mxu1 %v9949_v47  ;;  %v10173_v43 = vor.u32 %v11750_v16, %v10170_v54  ;;  %v5112_v47 = vmul.f32 %v14552_v24, %v14552_v24  ;;  %v11670_v40 = vld [vmem:[#allocation19 + $0x494] sm:$0xf] }
 0x4dd   : > { %v4310_v23 = vpop.f32.mrf.mxu2  ;;  %v5157_v29 = vadd.f32 %v5156_v6, %v5096_v42  ;;  %4701 = vmatpush.bf16.msrb.mxu0 %v9729_v58  ;;  %4673 = vmatpush.bf16.msrb.mxu3 %v9441_v36  ;;  %v9697_v7 = vor.u32 %v11635_v52, %v9696_v55  ;;  %v9376_v51 = vld [vmem:[#allocation19 + $0xd8] sm:$0xf]  ;;  %v14574_v6 = vsub.f32 %v14451_v3, %v14521_v19  ;;  %v11742_v52 = vld [vmem:[#allocation19 + $0x6d4] sm:$0xf] }
 0x4de   : > { %v14563_v5 = vadd.f32 %v4310_v23, %v14505_v2  ;;  %v14581_v58 = vsub.f32 %v14455_v17, %v14521_v19  ;;  %v5120_v55 = vmul.f32 %v14556_v57, %v14556_v57  ;;  %4645 = vmatpush.bf16.msra.mxu2 %v10173_v43  ;;  %v10138_v36 = vld [vmem:[#allocation19 + $0x6f0] sm:$0xf0]  ;;  %v11547_v54 = vld [vmem:[#allocation19 + $0xb4] sm:$0xf0] }
 0x4df   : > { %4578 = vmatmul.bf16.gmra.mxu3 %v13873_v62  ;;  %v9408_v62 = vld [vmem:[#allocation19 + $0x118] sm:$0xf]  ;;  %v5158_v50 = vadd.f32 %v5157_v29, %v5104_v38  ;;  %v10141_v26 = vor.u32 %v11742_v52, %v10138_v36  ;;  %v9850_v19 = vld [vmem:[#allocation19 + $0x4b0] sm:$0xf0]  ;;  %v5128_v38 = vmul.f32 %v14574_v6, %v14574_v6 }
 0x4e0   : > { %v14544_v60 = vpop.f32.mrf.mxu0  ;;  %v4931_v2 = vadd.f32 %v4930_v63, %v14563_v5  ;;  %v9409_v27 = vor.u32 %v11563_v48, %v9408_v62  ;;  %v11627_v63 = vld [vmem:[#allocation19 + $0x334] sm:$0xf0]  ;;  %v9818_v52 = vld [vmem:[#allocation19 + $0x470] sm:$0xf0] }
 0x4e1   : > { %17073 = vst [vmem:[#allocation63_spill] sm:$0xff] %v14544_v60  ;;  %v9914_v60 = vld [vmem:[#allocation19 + $0x530] sm:$0xf0]  ;;  %v4289_v1 = vpop.f32.mrf.mxu1  ;;  %v5159_v3 = vadd.f32 %v5158_v50, %v5112_v47  ;;  %4702 = vmatpush.bf16.msrb.mxu0 %v9697_v7  ;;  %v9344_v48 = vld [vmem:[#allocation19 + $0x98] sm:$0xf] }
 0x4e2   : > { %v9917_v31 = vor.u32 %v11686_v46, %v9914_v60  ;;  %v14570_v0 = vadd.f32 %v4289_v1, %v14408_v20  ;;  %v9882_v60 = vld [vmem:[#allocation19 + $0x4f0] sm:$0xf0]  ;;  %v11555_v20 = vld [vmem:[#allocation19 + $0xf4] sm:$0xf0]  ;;  %4674 = vmatpush.bf16.msrb.mxu3 %v9409_v27  ;;  %v14587_v17 = vpop.f32.mrf.mxu3  ;;  %v9853_v27 = vor.u32 %v11670_v40, %v9850_v19  ;;  %4646 = vmatpush.bf16.msra.mxu2 %v10141_v26 }
 0x4e3   : > { %4520 = vmatmul.bf16.gmra.mxu1 %v14074_v44  ;;  %v9664_v1 = vld [vmem:[#allocation19 + $0x318] sm:$0xf]  ;;  %v9885_v29 = vor.u32 %v11678_v25, %v9882_v60  ;;  %v9377_v42 = vor.u32 %v11555_v20, %v9376_v51  ;;  %v5160_v16 = vadd.f32 %v5159_v3, %v5120_v55  ;;  %v5136_v60 = vmul.f32 %v14581_v58, %v14581_v58  ;;  %v11734_v50 = vld [vmem:[#allocation19 + $0x694] sm:$0xf] }
 0x4e4   : > { %4544 = vmatmul.bf16.gmra.mxu2 %v14123_v14  ;;  %4616 = vmatpush.bf16.msra.mxu1 %v9917_v31  ;;  %v9665_v23 = vor.u32 %v11627_v63, %v9664_v1  ;;  %v9632_v43 = vld [vmem:[#allocation19 + $0x2d8] sm:$0xf]  ;;  %v10106_v20 = vld [vmem:[#allocation19 + $0x6b0] sm:$0xf0]  ;;  %v9345_v63 = vor.u32 %v11547_v54, %v9344_v48 }
 0x4e5   : > { %v4313_v46 = vpop.f32.mrf.mxu2  ;;  %v11619_v25 = vld [vmem:[#allocation19 + $0x2f4] sm:$0xf0]  ;;  %v5161_v51 = vadd.f32 %v5160_v16, %v5128_v38  ;;  %v10109_v1 = vor.u32 %v11734_v50, %v10106_v20  ;;  %v11662_v3 = vld [vmem:[#allocation19 + $0x454] sm:$0xf] }
 0x4e6   : > { %v14592_v31 = vadd.f32 %v4313_v46, %v14511_v8  ;;  %4675 = vmatpush.bf16.msrb.mxu3 %v9377_v42  ;;  %4703 = vmatpush.bf16.msrb.mxu0 %v9665_v23  ;;  %v9633_v55 = vor.u32 %v11619_v25, %v9632_v43  ;;  %v9312_v36 = vld [vmem:[#allocation19 + $0x58] sm:$0xf]  ;;  %v9821_v16 = vor.u32 %v11662_v3, %v9818_v52  ;;  %v11654_v43 = vld [vmem:[#allocation19 + $0x414] sm:$0xf] }
 0x4e7   : > { %v5162_v40 = vadd.f32 %v5161_v51, %v5136_v60  ;;  %v11539_v46 = vld [vmem:[#allocation19 + $0x74] sm:$0xf0]  ;;  %4647 = vmatpush.bf16.msra.mxu2 %v10109_v1  ;;  %v9786_v25 = vld [vmem:[#allocation19 + $0x430] sm:$0xf0] }
 0x4e8   : > { %v14583_v62 = vpop.f32.mrf.mxu0  ;;  %v4932_v47 = vadd.f32 %v4931_v2, %v14592_v31  ;;  %4617 = vmatpush.bf16.msra.mxu1 %v9885_v29  ;;  %v9600_v19 = vld [vmem:[#allocation19 + $0x298] sm:$0xf]  ;;  %v11726_v29 = vld [vmem:[#allocation19 + $0x654] sm:$0xf]  ;;  %v9313_v23 = vor.u32 %v11539_v46, %v9312_v36  ;;  %v9789_v36 = vor.u32 %v11654_v43, %v9786_v25 }
 0x4e9   : > { %v4291_v7 = vpop.f32.mrf.mxu1  ;;  %v11611_v26 = vld [vmem:[#allocation19 + $0x2b4] sm:$0xf0]  ;;  %v5163_v2 = vrot.slane %v5162_v40, 4  ;;  %v10042_v52 = vld [vmem:[#allocation19 + $0x630] sm:$0xf0] }
 0x4ea   : > { %v14599_v8 = vadd.f32 %v4291_v7, %v14416_v11  ;;  %v10074_v11 = vld [vmem:[#allocation19 + $0x670] sm:$0xf0]  ;;  %4676 = vmatpush.bf16.msrb.mxu3 %v9345_v63  ;;  %4704 = vmatpush.bf16.msrb.mxu0 %v9633_v55  ;;  %v9601_v48 = vor.u32 %v11611_v26, %v9600_v19  ;;  %v14603_v54 = vpop.f32.mrf.mxu3  ;;  %v9280_v60 = vld [vmem:[#allocation19 + $0x18] sm:$0xf] }
 0x4eb   : > { %4607 = vmatmul.bf16.gmra.mxu0 %v13934_v34  ;;  %v10077_v42 = vor.u32 %v11726_v29, %v10074_v11  ;;  %v5164_v51 = vadd.f32 %v5163_v2, %v5162_v40  ;;  %v11531_v20 = vld [vmem:[#allocation19 + $0x34] sm:$0xf0]  ;;  %v11718_v55 = vld [vmem:[#allocation19 + $0x614] sm:$0xf]  ;;  %v14612_v29 = vld [vmem:[#allocation22] sm:$0xff] }
 0x4ec   : > { %4618 = vmatpush.bf16.msra.mxu1 %v9853_v27  ;;  %v9568_v27 = vld [vmem:[#allocation19 + $0x258] sm:$0xf]  ;;  %v10045_v46 = vor.u32 %v11718_v55, %v10042_v52  ;;  %v9281_v40 = vor.u32 %v11531_v20, %v9280_v60 }
 0x4ed   : > { %v4315_v7 = vpop.f32.mrf.mxu2  ;;  %v11603_v1 = vld [vmem:[#allocation19 + $0x274] sm:$0xf0]  ;;  %v5165_v3 = vrot.slane %v5164_v51, 2  ;;  %4648 = vmatpush.bf16.msra.mxu2 %v10077_v42 }
 0x4ee   : > { %v14606_v50 = vadd.f32 %v4315_v7, %v14525_v30  ;;  %4677 = vmatpush.bf16.msrb.mxu3 %v9313_v23  ;;  %4705 = vmatpush.bf16.msrb.mxu0 %v9601_v48  ;;  %v9569_v19 = vor.u32 %v11603_v1, %v9568_v27  ;;  %v9536_v26 = vld [vmem:[#allocation19 + $0x218] sm:$0xf]  ;;  %v5409_v48 = vperm.slane %v14612_v29, 0 }
 0x4ef   : > { %v5166_v30 = vadd.f32 %v5165_v3, %v5164_v51  ;;  %v11595_v2 = vld [vmem:[#allocation19 + $0x234] sm:$0xf0]  ;;  %v14622_v51 = vld [vmem:[#allocation23] sm:$0xff] }
 0x4f0   : > { %v14601_v38 = vpop.f32.mrf.mxu0  ;;  %v4933_v63 = vadd.f32 %v4932_v47, %v14606_v50  ;;  %4619 = vmatpush.bf16.msra.mxu1 %v9821_v16  ;;  %v14615_v47 = vperm.slane %v14423_v10, 4  ;;  %v9537_v42 = vor.u32 %v11595_v2, %v9536_v26  ;;  %v5491_v3 = vperm.slane %v14622_v51, 0 }
 0x4f1   : > { %17075 = vst [vmem:[#allocation65_spill] sm:$0xff] %v14601_v38  ;;  %v14608_v38 = vpop.f32.mrf.mxu1  ;;  %v5167_v7 = vrot.slane %v5166_v30, 1  ;;  %4649 = vmatpush.bf16.msra.mxu2 %v10045_v46  ;;  %v5433_v52 = vmul.f32 %v5409_v48, %v14470_v49  ;;  %v5449_v46 = vmul.f32 %v5409_v48, %v14476_v61  ;;  %v5481_v49 = vmul.f32 %v5409_v48, %v14488_v33 }
 0x4f2   : > { %4678 = vmatpush.bf16.msrb.mxu3 %v9281_v40  ;;  %4706 = vmatpush.bf16.msrb.mxu0 %v9569_v19  ;;  %v4448_v23 = vpop.f32.mrf.mxu3  ;;  %v5465_v19 = vmul.f32 %v5409_v48, %v14482_v9 }
 0x4f3   : > { %v5168_v43 = vadd.f32 %v5167_v7, %v5166_v30  ;;  %v4449_v60 = vadd.f32 %v4448_v23, %v14615_v47  ;;  %v5515_v2 = vadd.f32 %v5491_v3, %v5433_v52 }
 0x4f4   : > { %4549 = vmatmul.bf16.gmra.mxu2 %v14126_v22  ;;  %4620 = vmatpush.bf16.msra.mxu1 %v9789_v36  ;;  %v5441_v36 = vmul.f32 %v5409_v48, %v14473_v59 }
 0x4f5   : > { %v4318_v16 = vpop.f32.mrf.mxu2  ;;  %v5248_v10 = vmul.f32 %v5168_v43, %v13336_v39  ;;  %4679 = vmatmul.bf16.vlgmr.msrb.gmra.mxu3 %v13913_v32  ;;  %v5563_v43 = vadd.f32 %v5491_v3, %v5481_v49  ;;  %vm5579_vm15 = vcmp.ge.f32.partialorder %v5515_v2, 0.0 }
 0x4f6   : > { %v14619_v25 = vadd.f32 %v4318_v16, %v14570_v0  ;;  %4707 = vmatpush.bf16.msrb.mxu0 %v9537_v42  ;;  %v5425_v0 = vmul.f32 %v5409_v48, %v14467_v56  ;;  %v5473_v56 = vmul.f32 %v5409_v48, %v14485_v18  ;;  %v5547_v16 = vadd.f32 %v5491_v3, %v5465_v19 }
 0x4f7   : > { %4621 = vmatmul.bf16.vlgmr.msra.gmra.mxu1 %v14077_v45  ;;  %v14634_v55 = vadd.f32 0.8, %v5248_v10  ;;  %vm5627_vm5 = vcmp.ge.f32.partialorder %v5563_v43, 0.0 }
 0x4f8   : > { %v4477_v11 = vpop.f32.mrf.mxu0  ;;  %v4934_v27 = vadd.f32 %v4933_v63, %v14619_v25  ;;  %v5457_v63 = vmul.f32 %v5409_v48, %v14479_v12  ;;  %v5507_v59 = vadd.f32 %v5491_v3, %v5425_v0  ;;  %v5531_v12 = vadd.f32 %v5491_v3, %v5449_v46 }
 0x4f9   : > { %v14625_v20 = vpop.f32.mrf.mxu1  ;;  %v14630_v1 = vadd.f32 %v4477_v11, %v4449_v60  ;;  %12305 = vrsqrt.f32 %v14634_v55  ;;  %v5523_v11 = vadd.f32 %v5491_v3, %v5441_v36  ;;  %v5555_v23 = vadd.f32 %v5491_v3, %v5473_v56 }
 0x4fa   : > { %v14646_v26 = vpop.f32.mrf.mxu3  ;;  %v5539_v9 = vadd.f32 %v5491_v3, %v5457_v63  ;;  %vm5571_vm14 = vcmp.ge.f32.partialorder %v5507_v59, 0.0  ;;  %vm5595_vm1 = vcmp.ge.f32.partialorder %v5531_v12, 0.0  ;;  %vm5611_vm3 = vcmp.ge.f32.partialorder %v5547_v16, 0.0 }
 0x4fb   : > { %4708 = vmatmul.bf16.vlgmr.msrb.gmra.mxu0 %v13959_v35  ;;  %17077 = vst [vmem:[#allocation67_spill] sm:$0xff] %v14646_v26  ;;  %vm5587_vm0 = vcmp.ge.f32.partialorder %v5523_v11, 0.0  ;;  %v5635_v48 = vmul.f32 0.2, %v5507_v59  ;;  %vm5619_vm4 = vcmp.ge.f32.partialorder %v5555_v23, 0.0  ;;  %vm5279_vm7 = vweird.f32 %v14634_v55 }
 0x4fc   : > { %vm5603_vm2 = vcmp.ge.f32.partialorder %v5539_v9, 0.0  ;;  %v5643_v0 = vmul.f32 0.2, %v5515_v2  ;;  %v5659_v46 = vmul.f32 0.2, %v5531_v12 }
 0x4fd   : > { %v4320_v30 = vpop.f32.mrf.mxu2  ;;  %v5667_v63 = vmul.f32 0.2, %v5539_v9  ;;  %v5683_v49 = vmul.f32 0.2, %v5555_v23 }
 0x4fe   : > { %v14650_v61 = vadd.f32 %v4320_v30, %v14599_v8  ;;  %v5675_v30 = vmul.f32 0.2, %v5547_v16 }
 0x4ff   : > { %v12306_v18 = vpop.eup %12305 }
 0x500   : > { %v14639_v40 = vpop.f32.mrf.mxu0  ;;  %v4935_v42 = vadd.f32 %v4934_v27, %v14650_v61  ;;  %v5274_v33 = vmul.f32 %v12306_v18, %v14634_v55  ;;  %v5651_v27 = vmul.f32 0.2, %v5523_v11  ;;  %vm5280_vm6 = vweird.f32 %v12306_v18 }
 0x501   : > { %17076 = vst [vmem:[#allocation66_spill] sm:$0xff] %v14639_v40  ;;  %v14652_v7 = vpop.f32.mrf.mxu1  ;;  %vm5281_vm8 = vmor %vm5279_vm7, %vm5280_vm6  ;;  %v5492_v55 = vperm.slane %v14622_v51, 1 }
 0x502   : > { %v4936_v60 = vrot.slane %v4935_v42, 4  ;;  %v5275_v52 = vmul.f32 %v12306_v18, %v5274_v33  ;;  %v4453_v3 = vpop.f32.mrf.mxu3  ;;  %v4338_v33 = vadd.f32 %v14490_v15, %v14426_v13  ;;  %v14673_v35 = vsel %vm5587_vm0, %v5523_v11, %v5651_v27 }
 0x503   : > { %v4454_v56 = vadd.f32 %v4453_v3, %v14615_v47  ;;  %v14670_v3 = vsel %vm5579_vm15, %v5515_v2, %v5643_v0  ;;  %v14684_v15 = vsel %vm5611_vm3, %v5547_v16, %v5675_v30  ;;  %v14687_v2 = vsel %vm5619_vm4, %v5555_v23, %v5683_v49  ;;  %v17080_v23 = vld [vmem:[#allocation46_spill] sm:$0xff]  ;;  %v17081_v0 = vld [vmem:[#allocation61_spill] sm:$0xff] }
 0x504   : > { %4650 = vmatmul.bf16.vlgmr.msra.gmra.mxu2 %v17051_v28  ;;  %v4937_v10 = vadd.f32 %v4936_v60, %v4935_v42  ;;  %v5276_v40 = vmul.f32 0.5, %v5275_v52  ;;  %v5691_v42 = vmul.f32 0.2, %v5563_v43  ;;  %v14664_v60 = vsel %vm5571_vm14, %v5507_v59, %v5635_v48 }
 0x505   : > { %v14657_v36 = vpop.f32.mrf.mxu2  ;;  %4684 = vmatmul.bf16.gmra.mxu3 %v13972_v53  ;;  %v14679_v59 = vsel %vm5603_vm2, %v5539_v9, %v5667_v63  ;;  %v14698_v9 = vadd.f32 %v14499_v41, %v14426_v13  ;;  %v14701_v16 = vadd.f32 %v14464_v37, %v4338_v33  ;;  %v14707_v27 = vadd.f32 %v14608_v38, %v17081_v0  ;;  %v17083_v63 = vld [vmem:[#allocation60_spill] sm:$0xff]  ;;  %v17085_v37 = vld [vmem:[#allocation62_spill] sm:$0xff]  ;;  %v17086_v53 = vld [vmem:[#allocation51_spill] sm:$0xff] }
 0x506   : > { %v4938_v19 = vrot.slane %v4937_v10, 2  ;;  %v5277_v52 = vsub.f32 1.5, %v5276_v40  ;;  %v14693_v11 = vsel %vm5627_vm5, %v5563_v43, %v5691_v42 }
 0x507   : > { %4626 = vmatmul.bf16.gmra.mxu1 %v17049_v21  ;;  %v14676_v21 = vsel %vm5595_vm1, %v5531_v12, %v5659_v46  ;;  %v5410_v12 = vperm.slane %v14612_v29, 1 }
 0x508   : > { %v4482_v8 = vpop.f32.mrf.mxu0  ;;  %v4939_v32 = vadd.f32 %v4938_v19, %v4937_v10  ;;  %v5278_v10 = vmul.f32 %v12306_v18, %v5277_v52  ;;  %v17084_v19 = vld [vmem:[#allocation54_spill] sm:$0xff] }
 0x509   : > { %v14661_v26 = vpop.f32.mrf.mxu1  ;;  %v14681_v28 = vadd.f32 %v4482_v8, %v4454_v56 }
 0x50a   : > { %v4940_v48 = vrot.slane %v4939_v32, 1  ;;  %v5282_v8 = vsel %vm5281_vm8, %v12306_v18, %v5278_v10  ;;  %v14711_v29 = vpop.f32.mrf.mxu3 }
 0x50b   : > { %17078 = vst [vmem:[#allocation68_spill] sm:$0xff] %v14681_v28  ;;  %4713 = vmatmul.bf16.gmra.mxu0 %v17080_v23  ;;  %v5344_v41 = vmul.f32 %v5282_v8, %v17083_v63  ;;  %v5352_v56 = vmul.f32 %v5282_v8, %v17084_v19  ;;  %v5360_v30 = vmul.f32 %v5282_v8, %v17085_v37 }
 0x50c   : > { %v4941_v43 = vadd.f32 %v4940_v48, %v4939_v32  ;;  %17082 = vst [vmem:[#allocation61_spill] sm:$0xff] %v14711_v29  ;;  %v5368_v49 = vmul.f32 %v5282_v8, %v14542_v4  ;;  %v5376_v18 = vmul.f32 %v5282_v8, %v14552_v24  ;;  %v5384_v51 = vmul.f32 %v5282_v8, %v14556_v57 }
 0x50d   : > { %v14709_v46 = vpop.f32.mrf.mxu2  ;;  %v5392_v38 = vmul.f32 %v5282_v8, %v14574_v6  ;;  %v5400_v32 = vmul.f32 %v5282_v8, %v14581_v58  ;;  %v5426_v33 = vmul.f32 %v5410_v12, %v5344_v41  ;;  %v5434_v52 = vmul.f32 %v5410_v12, %v5352_v56  ;;  %v10272_v41 = vld [vmem:[#allocation19 + $0x7d8] sm:$0xf] }
 0x50e   : > { %v5442_v48 = vmul.f32 %v5410_v12, %v5360_v30  ;;  %v5450_v10 = vmul.f32 %v5410_v12, %v5368_v49  ;;  %v5458_v0 = vmul.f32 %v5410_v12, %v5376_v18  ;;  %v5466_v63 = vmul.f32 %v5410_v12, %v5384_v51 }
 0x50f   : > { %v5474_v19 = vmul.f32 %v5410_v12, %v5392_v38  ;;  %v5482_v37 = vmul.f32 %v5410_v12, %v5400_v32  ;;  %v5516_v4 = vadd.f32 %v5492_v55, %v5434_v52  ;;  %v11779_v12 = vld [vmem:[#allocation19 + $0x7f4] sm:$0xf0] }
 0x510   : > { %v14690_v40 = vpop.f32.mrf.mxu0  ;;  %v5524_v29 = vadd.f32 %v5492_v55, %v5442_v48  ;;  %v5532_v24 = vadd.f32 %v5492_v55, %v5450_v10  ;;  %v5540_v57 = vadd.f32 %v5492_v55, %v5458_v0  ;;  %v5548_v6 = vadd.f32 %v5492_v55, %v5466_v63  ;;  %v17087_v48 = vld [vmem:[#allocation39_spill] sm:$0xff] }
 0x511   : > { %17079 = vst [vmem:[#allocation69_spill] sm:$0xff] %v14690_v40  ;;  %v14721_v42 = vpop.f32.mrf.mxu1  ;;  %v5508_v40 = vadd.f32 %v5492_v55, %v5426_v33  ;;  %v5556_v23 = vadd.f32 %v5492_v55, %v5474_v19  ;;  %v5564_v58 = vadd.f32 %v5492_v55, %v5482_v37  ;;  %vm5580_vm10 = vcmp.ge.f32.partialorder %v5516_v4, 0.0 }
 0x512   : > { %vm5588_vm11 = vcmp.ge.f32.partialorder %v5524_v29, 0.0  ;;  %vm5596_vm12 = vcmp.ge.f32.partialorder %v5532_v24, 0.0  ;;  %vm5604_vm13 = vcmp.ge.f32.partialorder %v5540_v57, 0.0  ;;  %vm5612_vm14 = vcmp.ge.f32.partialorder %v5548_v6, 0.0  ;;  %v14728_v30 = vpop.f32.mrf.mxu3 }
 0x513   : > { %vm5572_vm9 = vcmp.ge.f32.partialorder %v5508_v40, 0.0  ;;  %vm5620_vm15 = vcmp.ge.f32.partialorder %v5556_v23, 0.0  ;;  %vm5628_vm0 = vcmp.ge.f32.partialorder %v5564_v58, 0.0  ;;  %v5636_v49 = vmul.f32 0.2, %v5508_v40 }
 0x514   : > { %4655 = vmatmul.bf16.gmra.mxu2 %v17086_v53  ;;  %v5644_v18 = vmul.f32 0.2, %v5516_v4  ;;  %v5652_v51 = vmul.f32 0.2, %v5524_v29  ;;  %v5009_v55 = vmul.f32 %v4941_v43, %v13336_v39  ;;  %v5660_v38 = vmul.f32 0.2, %v5532_v24 }
 0x515   : > { %v5668_v32 = vmul.f32 0.2, %v5540_v57  ;;  %v5676_v33 = vmul.f32 0.2, %v5548_v6  ;;  %v10273_v52 = vor.u32 %v11779_v12, %v10272_v41  ;;  %v5684_v0 = vmul.f32 0.2, %v5556_v23 }
 0x516   : > { %v5692_v63 = vmul.f32 0.2, %v5564_v58  ;;  %v5700_v19 = vsel %vm5572_vm9, %v5508_v40, %v5636_v49  ;;  %v5708_v37 = vsel %vm5580_vm10, %v5516_v4, %v5644_v18  ;;  %v17088_v53 = vld [vmem:[#allocation40_spill] sm:$0xff]  ;;  %v5716_v28 = vsel %vm5588_vm11, %v5524_v29, %v5652_v51 }
 0x517   : > { %v14726_v56 = vpop.f32.mrf.mxu2  ;;  %4631 = vmatmul.bf16.gmra.mxu1 %v17087_v48  ;;  %4689 = vmatmul.bf16.gmra.mxu3 %v17088_v53  ;;  %v5724_v43 = vsel %vm5596_vm12, %v5532_v24, %v5660_v38  ;;  %v5732_v45 = vsel %vm5604_vm13, %v5540_v57, %v5668_v32  ;;  %v5740_v41 = vsel %vm5612_vm14, %v5548_v6, %v5676_v33  ;;  %v11771_v32 = vld [vmem:[#allocation19 + $0x7b4] sm:$0xf0]  ;;  %v17093_v33 = vld [vmem:[#allocation52_spill] sm:$0xff]  ;;  %v9378_v53 = vld [vmem:[#allocation19 + $0xf8] sm:$0xf0] }
 0x518   : > { %v14724_v8 = vpop.f32.mrf.mxu0  ;;  %4758 = vmatpush.bf16.msrb.mxu2 %v10273_v52  ;;  %v5748_v12 = vsel %vm5620_vm15, %v5556_v23, %v5684_v0  ;;  %v5756_v48 = vsel %vm5628_vm0, %v5564_v58, %v5692_v63  ;;  %v5763_v39 = vpack.c.bf16 %v5700_v19, %v14664_v60  ;;  %v5767_v40 = vpack.c.bf16 %v5708_v37, %v14670_v3  ;;  %v17090_v58 = vld [vmem:[#allocation55_spill] sm:$0xff]  ;;  %v17091_v60 = vld [vmem:[#allocation56_spill] sm:$0xff] }
 0x519   : > { %v14732_v10 = vpop.f32.mrf.mxu1  ;;  %v5771_v4 = vpack.c.bf16 %v5716_v28, %v14673_v35  ;;  %v5775_v49 = vpack.c.bf16 %v5724_v43, %v14676_v21  ;;  %v5779_v29 = vpack.c.bf16 %v5732_v45, %v14679_v59  ;;  %v5783_v24 = vpack.c.bf16 %v5740_v41, %v14684_v15  ;;  %v17092_v35 = vld [vmem:[#allocation59_spill] sm:$0xff] }
 0x51a   : > { %v5787_v6 = vpack.c.bf16 %v5748_v12, %v14687_v2  ;;  %v5791_v23 = vpack.c.bf16 %v5756_v48, %v14693_v11  ;;  %5795 = vst [vmem:[#allocation2] sm:$0xff] %v5763_v39  ;;  %v14754_v18 = vsub.f32 %v17090_v58, %v5009_v55  ;;  %v14757_v3 = vsub.f32 %v17091_v60, %v5009_v55  ;;  %v10016_v39 = vld [vmem:[#allocation19 + $0x5d8] sm:$0xf]  ;;  %v14771_v11 = vpop.f32.mrf.mxu3 }
 0x51b   : > { %5799 = vst [vmem:[#allocation2 + $0x20] sm:$0xff] %v5767_v40  ;;  %v14760_v21 = vsub.f32 %v17092_v35, %v5009_v55  ;;  %v14763_v45 = vsub.f32 %v14563_v5, %v5009_v55  ;;  %v14766_v28 = vsub.f32 %v14592_v31, %v5009_v55  ;;  %v14769_v59 = vsub.f32 %v14606_v50, %v5009_v55  ;;  %v11715_v15 = vld [vmem:[#allocation19 + $0x5f4] sm:$0xf0] }
 0x51c   : > { %5803 = vst [vmem:[#allocation2 + $0x40] sm:$0xff] %v5771_v4  ;;  %v14774_v51 = vsub.f32 %v14619_v25, %v5009_v55  ;;  %v14777_v38 = vsub.f32 %v14650_v61, %v5009_v55  ;;  %v5081_v5 = vmul.f32 %v14754_v18, %v14754_v18  ;;  %v5089_v31 = vmul.f32 %v14757_v3, %v14757_v3  ;;  %v10240_v50 = vld [vmem:[#allocation19 + $0x798] sm:$0xf]  ;;  %v17094_v61 = vld [vmem:[#allocation53_spill] sm:$0xff] }
 0x51d   : > { %5807 = vst [vmem:[#allocation2 + $0x60] sm:$0xff] %v5775_v49  ;;  %v4393_v52 = vadd.f32 %v14625_v20, %v17093_v33  ;;  %v4396_v48 = vadd.f32 %v14652_v7, %v14701_v16  ;;  %v9984_v25 = vld [vmem:[#allocation19 + $0x598] sm:$0xf]  ;;  %v4369_v55 = vadd.f32 %v17094_v61, %v14698_v9  ;;  %v5097_v19 = vmul.f32 %v14760_v21, %v14760_v21  ;;  %v11583_v7 = vld [vmem:[#allocation19 + $0x1dc] sm:$0xf] }
 0x51e   : > { %v11707_v0 = vld [vmem:[#allocation19 + $0x5b4] sm:$0xf0]  ;;  %5811 = vst [vmem:[#allocation2 + $0x80] sm:$0xff] %v5779_v29  ;;  %v5169_v37 = vadd.f32 %v5089_v31, %v5081_v5  ;;  %v14795_v43 = vadd.f32 %v14657_v36, %v14707_v27  ;;  %v10017_v20 = vor.u32 %v11715_v15, %v10016_v39  ;;  %v5105_v16 = vmul.f32 %v14763_v45, %v14763_v45  ;;  %v11647_v49 = vld [vmem:[#allocation19 + $0x3dc] sm:$0xf] }
 0x51f   : > { %v4426_v2 = vpop.f32.mrf.mxu2  ;;  %v10208_v41 = vld [vmem:[#allocation19 + $0x758] sm:$0xf]  ;;  %5815 = vst [vmem:[#allocation2 + $0xa0] sm:$0xff] %v5783_v24  ;;  %v10241_v9 = vor.u32 %v11771_v32, %v10240_v50  ;;  %v14800_v40 = vadd.f32 %v14709_v46, %v4393_v52  ;;  %v4398_v4 = vadd.f32 %v14661_v26, %v4369_v55  ;;  %v9762_v29 = vld [vmem:[#allocation19 + $0x3f8] sm:$0xf0]  ;;  %v9985_v36 = vor.u32 %v11707_v0, %v9984_v25 }
 0x520   : > { %v14749_v57 = vpop.f32.mrf.mxu0  ;;  %v11763_v12 = vld [vmem:[#allocation19 + $0x774] sm:$0xf0]  ;;  %5819 = vst [vmem:[#allocation2 + $0xc0] sm:$0xff] %v5787_v6  ;;  %v5170_v58 = vadd.f32 %v5169_v37, %v5097_v19  ;;  %4729 = vmatpush.bf16.msrb.mxu1 %v10017_v20  ;;  %v14804_v27 = vadd.f32 %v14726_v56, %v4396_v48  ;;  %v9506_v24 = vld [vmem:[#allocation19 + $0x1f8] sm:$0xf0]  ;;  %v5113_v56 = vmul.f32 %v14766_v28, %v14766_v28 }
 0x521   : > { %17089 = vst [vmem:[#allocation60_spill] sm:$0xff] %v14749_v57  ;;  %v14789_v63 = vpop.f32.mrf.mxu1  ;;  %v9952_v60 = vld [vmem:[#allocation19 + $0x558] sm:$0xf]  ;;  %4759 = vmatpush.bf16.msrb.mxu2 %v10241_v9  ;;  %v4942_v46 = vadd.f32 %v14800_v40, %v14795_v43  ;;  %v10209_v35 = vor.u32 %v11763_v12, %v10208_v41  ;;  %v11575_v6 = vld [vmem:[#allocation19 + $0x19c] sm:$0xf]  ;;  %v14814_v32 = vadd.f32 %v4426_v2, %v4398_v4 }
 0x522   : > { %5823 = vst [vmem:[#allocation2 + $0xe0] sm:$0xff] %v5791_v23  ;;  %v11699_v26 = vld [vmem:[#allocation19 + $0x574] sm:$0xf0]  ;;  %v5171_v5 = vadd.f32 %v5170_v58, %v5105_v16  ;;  %v9765_v23 = vor.u32 %v11647_v49, %v9762_v29  ;;  %v9474_v33 = vld [vmem:[#allocation19 + $0x1b8] sm:$0xf0]  ;;  %v9509_v48 = vor.u32 %v11583_v7, %v9506_v24  ;;  %v4463_v55 = vpop.f32.mrf.mxu3  ;;  %v5121_v19 = vmul.f32 %v14769_v59, %v14769_v59 }
 0x523   : > { %v17095_v39 = vld [vmem:[#allocation43_spill] sm:$0xff]  ;;  %v4943_v52 = vadd.f32 %v4942_v46, %v14804_v27  ;;  %v9953_v20 = vor.u32 %v11699_v26, %v9952_v60  ;;  %v9477_v7 = vor.u32 %v11575_v6, %v9474_v33  ;;  %v5129_v58 = vmul.f32 %v14774_v51, %v14774_v51 }
 0x524   : > { %4660 = vmatmul.bf16.gmra.mxu2 %v14123_v14  ;;  %4718 = vmatmul.bf16.gmra.mxu0 %v17095_v39  ;;  %v10176_v31 = vld [vmem:[#allocation19 + $0x718] sm:$0xf]  ;;  %v11639_v0 = vld [vmem:[#allocation19 + $0x39c] sm:$0xf]  ;;  %v5172_v37 = vadd.f32 %v5171_v5, %v5113_v56  ;;  %v17096_v56 = vld [vmem:[#allocation41_spill] sm:$0xff] }
 0x525   : > { %v11755_v50 = vld [vmem:[#allocation19 + $0x734] sm:$0xf0]  ;;  %v9730_v61 = vld [vmem:[#allocation19 + $0x3b8] sm:$0xf0]  ;;  %4730 = vmatpush.bf16.msrb.mxu1 %v9985_v36  ;;  %4816 = vmatpush.bf16.msra.mxu0 %v9765_v23  ;;  %v14822_v16 = vadd.f32 %v4943_v52, %v14814_v32 }
 0x526   : > { %v9920_v41 = vld [vmem:[#allocation19 + $0x518] sm:$0xf]  ;;  %4760 = vmatpush.bf16.msrb.mxu2 %v10209_v35  ;;  %v10177_v12 = vor.u32 %v11755_v50, %v10176_v31  ;;  %4787 = vmatpush.bf16.msra.mxu3 %v9509_v48  ;;  %v11567_v9 = vld [vmem:[#allocation19 + $0x15c] sm:$0xf]  ;;  %v5173_v36 = vadd.f32 %v5172_v37, %v5121_v19  ;;  %v9733_v46 = vor.u32 %v11639_v0, %v9730_v61 }
 0x527   : > { %v14817_v25 = vpop.f32.mrf.mxu2  ;;  %v11691_v2 = vld [vmem:[#allocation19 + $0x534] sm:$0xf0]  ;;  %v11631_v4 = vld [vmem:[#allocation19 + $0x35c] sm:$0xf]  ;;  %4636 = vmatmul.bf16.gmra.mxu1 %v14074_v44  ;;  %v5137_v35 = vmul.f32 %v14777_v38, %v14777_v38  ;;  %4694 = vmatmul.bf16.gmra.mxu3 %v17096_v56 }
 0x528   : > { %v14810_v15 = vpop.f32.mrf.mxu0  ;;  %v9698_v49 = vld [vmem:[#allocation19 + $0x378] sm:$0xf0]  ;;  %v10144_v60 = vld [vmem:[#allocation19 + $0x6d8] sm:$0xf]  ;;  %v5174_v6 = vadd.f32 %v5173_v36, %v5129_v58  ;;  %v9921_v5 = vor.u32 %v11691_v2, %v9920_v41  ;;  %v17099_v2 = vld [vmem:[#allocation64_spill] sm:$0xff] }
 0x529   : > { %v14824_v29 = vpop.f32.mrf.mxu1  ;;  %v11747_v24 = vld [vmem:[#allocation19 + $0x6f4] sm:$0xf0]  ;;  %v9442_v26 = vld [vmem:[#allocation19 + $0x178] sm:$0xf0]  ;;  %4731 = vmatpush.bf16.msrb.mxu1 %v9953_v20  ;;  %4817 = vmatpush.bf16.msra.mxu0 %v9733_v46  ;;  %v9701_v23 = vor.u32 %v11631_v4, %v9698_v49  ;;  %v17098_v20 = vld [vmem:[#allocation58_spill] sm:$0xff]  ;;  %v4345_v58 = vadd.f32 %v17099_v2, %v14426_v13 }
 0x52a   : > { %v9888_v31 = vld [vmem:[#allocation19 + $0x4d8] sm:$0xf]  ;;  %4761 = vmatpush.bf16.msrb.mxu2 %v10177_v12  ;;  %v10145_v33 = vor.u32 %v11747_v24, %v10144_v60  ;;  %4788 = vmatpush.bf16.msra.mxu3 %v9477_v7  ;;  %v9445_v52 = vor.u32 %v11567_v9, %v9442_v26  ;;  %v11559_v48 = vld [vmem:[#allocation19 + $0x11c] sm:$0xf]  ;;  %v5175_v37 = vadd.f32 %v5174_v6, %v5137_v35  ;;  %v14842_v9 = vpop.f32.mrf.mxu3 }
 0x52b   : > { %v11683_v50 = vld [vmem:[#allocation19 + $0x4f4] sm:$0xf0]  ;;  %v11623_v0 = vld [vmem:[#allocation19 + $0x31c] sm:$0xf]  ;;  %v4343_v41 = vadd.f32 %v17098_v20, %v14426_v13  ;;  %v4459_v12 = vadd.f32 %v14728_v30, %v14615_v47  ;;  %17100 = vst [vmem:[#allocation62_spill] sm:$0xff] %v14842_v9  ;;  %v4464_v24 = vadd.f32 %v4463_v55, %v14615_v47  ;;  %v17101_v55 = vld [vmem:[#allocation57_spill] sm:$0xff] }
 0x52c   : > { %v9666_v61 = vld [vmem:[#allocation19 + $0x338] sm:$0xf0]  ;;  %v10112_v44 = vld [vmem:[#allocation19 + $0x698] sm:$0xf]  ;;  %v5176_v4 = vrot.slane %v5175_v37, 4  ;;  %v9889_v49 = vor.u32 %v11683_v50, %v9888_v31  ;;  %v4348_v31 = vadd.f32 %v14587_v17, %v14426_v13 }
 0x52d   : > { %v11739_v57 = vld [vmem:[#allocation19 + $0x6b4] sm:$0xf0]  ;;  %v9410_v56 = vld [vmem:[#allocation19 + $0x138] sm:$0xf0]  ;;  %4732 = vmatpush.bf16.msrb.mxu1 %v9921_v5  ;;  %4818 = vmatpush.bf16.msra.mxu0 %v9701_v23  ;;  %v9669_v60 = vor.u32 %v11623_v0, %v9666_v61  ;;  %v4372_v50 = vadd.f32 %v17101_v55, %v4343_v41 }
 0x52e   : > { %v11551_v36 = vld [vmem:[#allocation19 + $0xdc] sm:$0xf]  ;;  %v9856_v46 = vld [vmem:[#allocation19 + $0x498] sm:$0xf]  ;;  %4762 = vmatpush.bf16.msrb.mxu2 %v10145_v33  ;;  %4789 = vmatpush.bf16.msra.mxu3 %v9445_v52  ;;  %v10113_v26 = vor.u32 %v11739_v57, %v10112_v44  ;;  %v9413_v35 = vor.u32 %v11559_v48, %v9410_v56  ;;  %v14853_v44 = vadd.f32 %v14724_v8, %v4459_v12 }
 0x52f   : > { %v14840_v7 = vpop.f32.mrf.mxu2  ;;  %v11675_v6 = vld [vmem:[#allocation19 + $0x4b4] sm:$0xf0]  ;;  %v11615_v20 = vld [vmem:[#allocation19 + $0x2dc] sm:$0xf]  ;;  %v4401_v61 = vadd.f32 %v14721_v42, %v4372_v50  ;;  %v9381_v17 = vor.u32 %v11551_v36, %v9378_v53  ;;  %v4377_v53 = vadd.f32 %v14583_v62, %v4348_v31 }
 0x530   : > { %v14832_v19 = vpop.f32.mrf.mxu0  ;;  %v9634_v30 = vld [vmem:[#allocation19 + $0x2f8] sm:$0xf0]  ;;  %v10080_v9 = vld [vmem:[#allocation19 + $0x658] sm:$0xf]  ;;  %v9857_v56 = vor.u32 %v11675_v6, %v9856_v46 }
 0x531   : > { %17097 = vst [vmem:[#allocation54_spill] sm:$0xff] %v14832_v19  ;;  %v4506_v2 = vpop.f32.mrf.mxu1  ;;  %v5177_v19 = vadd.f32 %v5176_v4, %v5175_v37  ;;  %v11731_v39 = vld [vmem:[#allocation19 + $0x674] sm:$0xf0]  ;;  %4733 = vmatpush.bf16.msrb.mxu1 %v9889_v49  ;;  %4819 = vmatpush.bf16.msra.mxu0 %v9669_v60  ;;  %v11543_v52 = vld [vmem:[#allocation19 + $0x9c] sm:$0xf]  ;;  %v9637_v48 = vor.u32 %v11615_v20, %v9634_v30  ;;  %v14868_v30 = vld [vmem:[#allocation20] sm:$0xff] }
 0x532   : > { %v14846_v5 = vadd.f32 %v4506_v2, %v14630_v1  ;;  %v17102_v23 = vld [vmem:[#allocation63_spill] sm:$0xff]  ;;  %v14856_v1 = vadd.f32 %v14810_v15, %v4464_v24  ;;  %4763 = vmatpush.bf16.msrb.mxu2 %v10113_v26  ;;  %4790 = vmatpush.bf16.msra.mxu3 %v9413_v35  ;;  %v10081_v37 = vor.u32 %v11731_v39, %v10080_v9 }
 0x533   : > { %v4374_v33 = vadd.f32 %v17102_v23, %v4345_v58  ;;  %v5178_v57 = vrot.slane %v5177_v19, 2  ;;  %v9824_v0 = vld [vmem:[#allocation19 + $0x458] sm:$0xf]  ;;  %v11607_v58 = vld [vmem:[#allocation19 + $0x29c] sm:$0xf]  ;;  %v4350_v15 = vadd.f32 %v14603_v54, %v14426_v13  ;;  %v14865_v24 = vadd.f32 %v14817_v25, %v4401_v61  ;;  %v17104_v61 = vld [vmem:[#allocation38_spill] sm:$0xff] }
 0x534   : > { %v11667_v41 = vld [vmem:[#allocation19 + $0x474] sm:$0xf0]  ;;  %v9602_v8 = vld [vmem:[#allocation19 + $0x2b8] sm:$0xf0]  ;;  %4665 = vmatmul.bf16.gmra.mxu2 %v14126_v22  ;;  %4723 = vmatmul.bf16.gmra.mxu0 %v13934_v34  ;;  %v14871_v13 = vperm.slane %v14868_v30, 5  ;;  %v4406_v2 = vadd.f32 %v14789_v63, %v4377_v53 }
 0x535   : > { %v5179_v12 = vadd.f32 %v5178_v57, %v5177_v19  ;;  %v9346_v4 = vld [vmem:[#allocation19 + $0xb8] sm:$0xf0]  ;;  %v10048_v49 = vld [vmem:[#allocation19 + $0x618] sm:$0xf]  ;;  %v4403_v42 = vadd.f32 %v14732_v10, %v4374_v33  ;;  %4734 = vmatpush.bf16.msrb.mxu1 %v9857_v56  ;;  %4820 = vmatpush.bf16.msra.mxu0 %v9637_v48  ;;  %v9825_v26 = vor.u32 %v11667_v41, %v9824_v0  ;;  %v4564_v10 = vpop.f32.mrf.mxu3  ;;  %v17103_v57 = vld [vmem:[#allocation65_spill] sm:$0xff] }
 0x536   : > { %v11723_v60 = vld [vmem:[#allocation19 + $0x634] sm:$0xf0]  ;;  %v9605_v35 = vor.u32 %v11607_v58, %v9602_v8  ;;  %v11599_v6 = vld [vmem:[#allocation19 + $0x25c] sm:$0xf]  ;;  %4791 = vmatpush.bf16.msra.mxu3 %v9381_v17  ;;  %4764 = vmatpush.bf16.msrb.mxu2 %v10081_v37  ;;  %v9349_v54 = vor.u32 %v11543_v52, %v9346_v4  ;;  %v4565_v23 = vadd.f32 %v4564_v10, %v14871_v13 }
 0x537   : > { %v4434_v39 = vpop.f32.mrf.mxu2  ;;  %v9792_v9 = vld [vmem:[#allocation19 + $0x418] sm:$0xf]  ;;  %v5180_v46 = vrot.slane %v5179_v12, 1  ;;  %v9570_v20 = vld [vmem:[#allocation19 + $0x278] sm:$0xf0]  ;;  %v10049_v62 = vor.u32 %v11723_v60, %v10048_v49  ;;  %v14875_v31 = vadd.f32 %v14840_v7, %v4403_v42  ;;  %v4945_v33 = vadd.f32 %v14822_v16, %v14865_v24 }
 0x538   : > { %v11659_v19 = vld [vmem:[#allocation19 + $0x434] sm:$0xf0]  ;;  %v4593_v36 = vpop.f32.mrf.mxu0  ;;  %v11535_v55 = vld [vmem:[#allocation19 + $0x5c] sm:$0xf]  ;;  %v4379_v56 = vadd.f32 %v17103_v57, %v4350_v15  ;;  %v9573_v0 = vor.u32 %v11599_v6, %v9570_v20  ;;  %v14884_v37 = vadd.f32 %v4434_v39, %v4406_v2 }
 0x539   : > { %v5181_v25 = vadd.f32 %v5180_v46, %v5179_v12  ;;  %v9314_v50 = vld [vmem:[#allocation19 + $0x78] sm:$0xf0]  ;;  %v9793_v48 = vor.u32 %v11659_v19, %v9792_v9  ;;  %v14881_v52 = vpop.f32.mrf.mxu1  ;;  %4735 = vmatpush.bf16.msrb.mxu1 %v9825_v26  ;;  %4821 = vmatpush.bf16.msra.mxu0 %v9605_v35  ;;  %v14886_v63 = vadd.f32 %v4593_v36, %v4565_v23  ;;  %v17107_v35 = vld [vmem:[#allocation68_spill] sm:$0xff]  ;;  %v17110_v23 = vld [vmem:[#allocation42_spill] sm:$0xff] }
 0x53a   : > { %4792 = vmatpush.bf16.msra.mxu3 %v9349_v54  ;;  %v9317_v7 = vor.u32 %v11535_v55, %v9314_v50  ;;  %4765 = vmatpush.bf16.msrb.mxu2 %v10049_v62  ;;  %v11591_v41 = vld [vmem:[#allocation19 + $0x21c] sm:$0xf]  ;;  %v4946_v8 = vadd.f32 %v4945_v33, %v14875_v31  ;;  %v4408_v12 = vadd.f32 %v14824_v29, %v4379_v56  ;;  %v17106_v29 = vld [vmem:[#allocation48_spill] sm:$0xff]  ;;  %v17108_v62 = vld [vmem:[#allocation50_spill] sm:$0xff] }
 0x53b   : > { %v5249_v17 = vmul.f32 %v5181_v25, %v17104_v61  ;;  %17105 = vst [vmem:[#allocation55_spill] sm:$0xff] %v14886_v63  ;;  %v9538_v58 = vld [vmem:[#allocation19 + $0x238] sm:$0xf0]  ;;  %v17109_v25 = vld [vmem:[#allocation44_spill] sm:$0xff] }
 0x53c   : > { %v11527_v4 = vld [vmem:[#allocation19 + $0x1c] sm:$0xf]  ;;  %v4947_v42 = vadd.f32 %v4946_v8, %v14884_v37  ;;  %v9541_v39 = vor.u32 %v11591_v41, %v9538_v58 }
 0x53d   : > { %v5257_v16 = vadd.f32 0.8, %v5249_v17  ;;  %v9282_v49 = vld [vmem:[#allocation19 + $0x38] sm:$0xf0]  ;;  %4736 = vmatpush.bf16.msrb.mxu1 %v9793_v48  ;;  %4822 = vmatpush.bf16.msra.mxu0 %v9573_v0  ;;  %v14895_v19 = vpop.f32.mrf.mxu3 }
 0x53e   : > { %4793 = vmatpush.bf16.msra.mxu3 %v9317_v7  ;;  %v9285_v9 = vor.u32 %v11527_v4, %v9282_v49 }
 0x53f   : > { %v4436_v60 = vpop.f32.mrf.mxu2  ;;  %12307 = vrsqrt.f32 %v5257_v16  ;;  %vm5289_vm2 = vweird.f32 %v5257_v16 }
 0x540   : > { %v14890_v15 = vpop.f32.mrf.mxu0  ;;  %v14893_v53 = vadd.f32 %v4436_v60, %v4408_v12  ;;  %4737 = vmatmul.bf16.vlgmr.msrb.gmra.mxu1 %v17106_v29 }
 0x541   : > { %v4511_v46 = vpop.f32.mrf.mxu1  ;;  %4823 = vmatpush.bf16.msra.mxu0 %v9541_v39 }
 0x542   : > { %v4948_v36 = vadd.f32 %v4947_v42, %v14893_v53  ;;  %v14900_v6 = vadd.f32 %v4511_v46, %v17107_v35  ;;  %4794 = vmatpush.bf16.msra.mxu3 %v9285_v9  ;;  %v17112_v35 = vld [vmem:[#allocation51_spill] sm:$0xff] }
 0x544   : > { %v4949_v26 = vrot.slane %v4948_v36, 4  ;;  %4766 = vmatmul.bf16.vlgmr.msrb.gmra.mxu2 %v17108_v62  ;;  %4824 = vmatmul.bf16.vlgmr.msra.gmra.mxu0 %v17109_v25 }
 0x545   : > { %v12308_v20 = vpop.eup %12307  ;;  %4795 = vmatmul.bf16.vlgmr.msra.gmra.mxu3 %v17110_v23  ;;  %v14910_v56 = vpop.f32.mrf.mxu3 }
 0x546   : > { %v4950_v54 = vadd.f32 %v4949_v26, %v4948_v36  ;;  %v5284_v10 = vmul.f32 %v12308_v20, %v5257_v16  ;;  %vm5290_vm1 = vweird.f32 %v12308_v20 }
 0x547   : > { %v4535_v2 = vpop.f32.mrf.mxu2  ;;  %vm5291_vm3 = vmor %vm5289_vm2, %vm5290_vm1 }
 0x548   : > { %v14904_v55 = vpop.f32.mrf.mxu0  ;;  %v4951_v50 = vrot.slane %v4950_v54, 2  ;;  %v14908_v33 = vadd.f32 %v4535_v2, %v14846_v5  ;;  %v5285_v57 = vmul.f32 %v12308_v20, %v5284_v10  ;;  %v17120_v2 = vld [vmem:[#allocation66_spill] sm:$0xff] }
 0x549   : > { %v4513_v17 = vpop.f32.mrf.mxu1 }
 0x54a   : > { %v4952_v48 = vadd.f32 %v4951_v50, %v4950_v54  ;;  %v5286_v0 = vmul.f32 0.5, %v5285_v57  ;;  %v17121_v57 = vld [vmem:[#allocation61_spill] sm:$0xff] }
 0x54c   : > { %v5287_v7 = vsub.f32 1.5, %v5286_v0  ;;  %v4953_v41 = vrot.slane %v4952_v48, 1 }
 0x54d   : > { %v14914_v60 = vpop.f32.mrf.mxu3 }
 0x54e   : > { %v5288_v58 = vmul.f32 %v12308_v20, %v5287_v7  ;;  %v4954_v49 = vadd.f32 %v4953_v41, %v4952_v48  ;;  %v4456_v48 = vadd.f32 %v17121_v57, %v14615_v47 }
 0x54f   : > { %v4537_v8 = vpop.f32.mrf.mxu2 }
 0x550   : > { %v14912_v12 = vpop.f32.mrf.mxu0  ;;  %v5292_v4 = vsel %vm5291_vm3, %v12308_v20, %v5288_v58  ;;  %v17114_v20 = vld [vmem:[#allocation46_spill] sm:$0xff]  ;;  %v10274_v58 = vld [vmem:[#allocation19 + $0x7f8] sm:$0xf0] }
 0x551   : > { %v14917_v5 = vmul.f32 %v5292_v4, %v14754_v18  ;;  %v14920_v42 = vmul.f32 %v5292_v4, %v14757_v3  ;;  %v14923_v39 = vmul.f32 %v5292_v4, %v14760_v21  ;;  %v14926_v9 = vmul.f32 %v5292_v4, %v14763_v45  ;;  %v17111_v3 = vld [vmem:[#allocation49_spill] sm:$0xff]  ;;  %v4516_v26 = vpop.f32.mrf.mxu1  ;;  %v17113_v45 = vld [vmem:[#allocation67_spill] sm:$0xff] }
 0x552   : > { %v14929_v16 = vmul.f32 %v5292_v4, %v14766_v28  ;;  %v14932_v36 = vmul.f32 %v5292_v4, %v14769_v59  ;;  %v14935_v46 = vmul.f32 %v5292_v4, %v14774_v51  ;;  %v14938_v18 = vmul.f32 %v5292_v4, %v14777_v38  ;;  %4742 = vmatmul.bf16.gmra.mxu1 %v17111_v3  ;;  %v17116_v51 = vld [vmem:[#allocation45_spill] sm:$0xff]  ;;  %v11711_v4 = vld [vmem:[#allocation19 + $0x5dc] sm:$0xf] }
 0x553   : > { %v5010_v21 = vmul.f32 %v4954_v49, %v17104_v61  ;;  %v4451_v28 = vadd.f32 %v17113_v45, %v14615_v47 }
 0x554   : > { %4771 = vmatmul.bf16.gmra.mxu2 %v17112_v35  ;;  %4829 = vmatmul.bf16.gmra.mxu0 %v17114_v20  ;;  %v11767_v35 = vld [vmem:[#allocation19 + $0x79c] sm:$0xf] }
 0x555   : > { %4800 = vmatmul.bf16.gmra.mxu3 %v17116_v51  ;;  %v14949_v10 = vpop.f32.mrf.mxu3  ;;  %v14952_v38 = vsub.f32 %v14795_v43, %v5010_v21  ;;  %v14955_v25 = vsub.f32 %v14800_v40, %v5010_v21  ;;  %v4480_v50 = vadd.f32 %v17120_v2, %v4451_v28  ;;  %v14964_v7 = vsub.f32 %v14804_v27, %v5010_v21  ;;  %v11775_v43 = vld [vmem:[#allocation19 + $0x7dc] sm:$0xf]  ;;  %v17123_v2 = vld [vmem:[#allocation69_spill] sm:$0xff] }
 0x556   : > { %17117 = vst [vmem:[#allocation59_spill] sm:$0xff] %v14949_v10  ;;  %v14967_v41 = vsub.f32 %v14814_v32, %v5010_v21  ;;  %v10018_v40 = vld [vmem:[#allocation19 + $0x5f8] sm:$0xf0]  ;;  %v14978_v27 = vsub.f32 %v14865_v24, %v5010_v21  ;;  %v14986_v10 = vsub.f32 %v14875_v31, %v5010_v21 }
 0x557   : > { %v4540_v59 = vpop.f32.mrf.mxu2  ;;  %17118 = vst [vmem:[#allocation52_spill] sm:$0xff] %v14952_v38  ;;  %v4509_v0 = vadd.f32 %v14881_v52, %v4480_v50  ;;  %v5082_v20 = vmul.f32 %v14952_v38, %v14952_v38  ;;  %v5090_v52 = vmul.f32 %v14955_v25, %v14955_v25  ;;  %v11703_v32 = vld [vmem:[#allocation19 + $0x59c] sm:$0xf]  ;;  %v4485_v50 = vadd.f32 %v17123_v2, %v4456_v48 }
 0x558   : > { %v14946_v54 = vpop.f32.mrf.mxu0  ;;  %17119 = vst [vmem:[#allocation53_spill] sm:$0xff] %v14955_v25  ;;  %v9986_v51 = vld [vmem:[#allocation19 + $0x5b8] sm:$0xf0]  ;;  %v14991_v63 = vadd.f32 %v4540_v59, %v14900_v6  ;;  %v4517_v6 = vadd.f32 %v4516_v26, %v14853_v44  ;;  %v5122_v44 = vmul.f32 %v14986_v10, %v14986_v10 }
 0x559   : > { %17115 = vst [vmem:[#allocation56_spill] sm:$0xff] %v14946_v54  ;;  %v14958_v23 = vpop.f32.mrf.mxu1  ;;  %v14969_v49 = vadd.f32 %v4537_v8, %v4509_v0  ;;  %v5098_v8 = vmul.f32 %v14964_v7, %v14964_v7  ;;  %v5182_v0 = vadd.f32 %v5090_v52, %v5082_v20  ;;  %v10021_v54 = vor.u32 %v11711_v4, %v10018_v40  ;;  %v10242_v25 = vld [vmem:[#allocation19 + $0x7b8] sm:$0xf0] }
 0x55a   : > { %v4514_v38 = vadd.f32 %v4513_v17, %v4485_v50  ;;  %v17124_v48 = vld [vmem:[#allocation39_spill] sm:$0xff]  ;;  %v5106_v20 = vmul.f32 %v14967_v41, %v14967_v41  ;;  %v9989_v31 = vor.u32 %v11703_v32, %v9986_v51  ;;  %v5114_v52 = vmul.f32 %v14978_v27, %v14978_v27 }
 0x55b   : > { %v4955_v24 = vadd.f32 %v14969_v49, %v14908_v33  ;;  %12077 = vmatpush.bf16.msra.mxu1 %v10021_v54  ;;  %v11695_v40 = vld [vmem:[#allocation19 + $0x55c] sm:$0xf]  ;;  %4845 = vmatpush.bf16.msrb.mxu0 %v10021_v54  ;;  %v15009_v32 = vsub.f32 %v14893_v53, %v5010_v21  ;;  %v17127_v53 = vld [vmem:[#allocation40_spill] sm:$0xff] }
 0x55c   : > { %v9954_v17 = vld [vmem:[#allocation19 + $0x578] sm:$0xf0] }
 0x55d   : > { %v14981_v57 = vpop.f32.mrf.mxu3  ;;  %v4956_v4 = vadd.f32 %v4955_v24, %v14991_v63  ;;  %v11759_v26 = vld [vmem:[#allocation19 + $0x75c] sm:$0xf] }
 0x55f   : > { %v4542_v45 = vpop.f32.mrf.mxu2  ;;  %12078 = vmatpush.bf16.msra.mxu1 %v9989_v31  ;;  %4846 = vmatpush.bf16.msrb.mxu0 %v9989_v31  ;;  %v5138_v31 = vmul.f32 %v15009_v32, %v15009_v32 }
 0x560   : > { %v14971_v28 = vpop.f32.mrf.mxu0  ;;  %v15001_v59 = vadd.f32 %v4542_v45, %v4514_v38  ;;  %v10210_v38 = vld [vmem:[#allocation19 + $0x778] sm:$0xf0] }
 0x561   : > { %17122 = vst [vmem:[#allocation58_spill] sm:$0xff] %v14971_v28  ;;  %v10277_v28 = vor.u32 %v11775_v43, %v10274_v58  ;;  %v4521_v2 = vpop.f32.mrf.mxu1  ;;  %v5183_v43 = vadd.f32 %v5182_v0, %v5098_v8  ;;  %v14997_v58 = vsub.f32 %v14884_v37, %v5010_v21  ;;  %v10245_v8 = vor.u32 %v11767_v35, %v10242_v25  ;;  %v17125_v45 = vld [vmem:[#allocation43_spill] sm:$0xff] }
 0x562   : > { %4747 = vmatmul.bf16.gmra.mxu1 %v17124_v48  ;;  %v4461_v37 = vadd.f32 %v14771_v11, %v14615_v47  ;;  %v4957_v54 = vadd.f32 %v4956_v4, %v15001_v59  ;;  %v11687_v21 = vld [vmem:[#allocation19 + $0x51c] sm:$0xf]  ;;  %v15021_v24 = vadd.f32 %v4521_v2, %v14856_v1 }
 0x563   : > { %4874 = vmatpush.bf16.msra.mxu2 %v10277_v28  ;;  %v5184_v50 = vadd.f32 %v5183_v43, %v5106_v20  ;;  %12085 = vmatpush.bf16.msrb.mxu3 %v10277_v28  ;;  %v9957_v28 = vor.u32 %v11695_v40, %v9954_v17  ;;  %v9922_v0 = vld [vmem:[#allocation19 + $0x538] sm:$0xf0]  ;;  %v5130_v43 = vmul.f32 %v14997_v58, %v14997_v58 }
 0x564   : > { %4776 = vmatmul.bf16.gmra.mxu2 %v14123_v14  ;;  %4834 = vmatmul.bf16.gmra.mxu0 %v17125_v45  ;;  %v11751_v17 = vld [vmem:[#allocation19 + $0x71c] sm:$0xf]  ;;  %v9925_v1 = vor.u32 %v11687_v21, %v9922_v0 }
 0x565   : > { %v5185_v25 = vadd.f32 %v5184_v50, %v5114_v52  ;;  %4805 = vmatmul.bf16.gmra.mxu3 %v17127_v53  ;;  %v15023_v20 = vpop.f32.mrf.mxu3  ;;  %v10213_v52 = vor.u32 %v11759_v26, %v10210_v38  ;;  %v17129_v50 = vld [vmem:[#allocation60_spill] sm:$0xff]  ;;  %12079 = vmatpush.bf16.msra.mxu1 %v9957_v28  ;;  %v11679_v53 = vld [vmem:[#allocation19 + $0x4dc] sm:$0xf] }
 0x566   : > { %17128 = vst [vmem:[#allocation57_spill] sm:$0xff] %v15023_v20  ;;  %v4490_v45 = vadd.f32 %v17129_v50, %v4461_v37  ;;  %4847 = vmatpush.bf16.msrb.mxu0 %v9957_v28  ;;  %v11743_v38 = vld [vmem:[#allocation19 + $0x6dc] sm:$0xf] }
 0x567   : > { %v4545_v51 = vpop.f32.mrf.mxu2  ;;  %4875 = vmatpush.bf16.msra.mxu2 %v10245_v8  ;;  %v5186_v4 = vadd.f32 %v5185_v25, %v5122_v44  ;;  %12086 = vmatpush.bf16.msrb.mxu3 %v10245_v8  ;;  %v11671_v21 = vld [vmem:[#allocation19 + $0x49c] sm:$0xf] }
 0x568   : > { %v15015_v35 = vpop.f32.mrf.mxu0  ;;  %v15017_v11 = vadd.f32 %v4545_v51, %v4517_v6  ;;  %v10178_v6 = vld [vmem:[#allocation19 + $0x738] sm:$0xf0]  ;;  %v4519_v26 = vadd.f32 %v14958_v23, %v4490_v45 }
 0x569   : > { %17126 = vst [vmem:[#allocation64_spill] sm:$0xff] %v15015_v35  ;;  %v5187_v51 = vadd.f32 %v5186_v4, %v5130_v43  ;;  %v15031_v2 = vpop.f32.mrf.mxu1  ;;  %v9890_v35 = vld [vmem:[#allocation19 + $0x4f8] sm:$0xf0]  ;;  %v10181_v8 = vor.u32 %v11751_v17, %v10178_v6  ;;  %12080 = vmatpush.bf16.msra.mxu1 %v9925_v1 }
 0x56a   : > { %v4958_v40 = vadd.f32 %v4957_v54, %v15017_v11  ;;  %v10146_v54 = vld [vmem:[#allocation19 + $0x6f8] sm:$0xf0]  ;;  %v9893_v43 = vor.u32 %v11679_v53, %v9890_v35  ;;  %4848 = vmatpush.bf16.msrb.mxu0 %v9925_v1 }
 0x56b   : > { %4876 = vmatpush.bf16.msra.mxu2 %v10213_v52  ;;  %v5188_v44 = vadd.f32 %v5187_v51, %v5138_v31  ;;  %12087 = vmatpush.bf16.msrb.mxu3 %v10213_v52  ;;  %v9858_v0 = vld [vmem:[#allocation19 + $0x4b8] sm:$0xf0]  ;;  %v10149_v31 = vor.u32 %v11743_v38, %v10146_v54  ;;  %v17133_v54 = vld [vmem:[#allocation62_spill] sm:$0xff] }
 0x56c   : > { %v11735_v52 = vld [vmem:[#allocation19 + $0x69c] sm:$0xf]  ;;  %v9861_v35 = vor.u32 %v11671_v21, %v9858_v0  ;;  %v15051_v0 = vld [vmem:[#allocation22] sm:$0xff] }
 0x56d   : > { %v5189_v25 = vrot.slane %v5188_v44, 4  ;;  %v10114_v17 = vld [vmem:[#allocation19 + $0x6b8] sm:$0xf0]  ;;  %v15040_v45 = vpop.f32.mrf.mxu3  ;;  %12081 = vmatpush.bf16.msra.mxu1 %v9893_v43  ;;  %17134 = vst [vmem:[#allocation48_spill] sm:$0xff] %v15051_v0 }
 0x56e   : > { %v17131_v6 = vld [vmem:[#allocation47_spill] sm:$0xff]  ;;  %17132 = vst [vmem:[#allocation65_spill] sm:$0xff] %v15040_v45  ;;  %4849 = vmatpush.bf16.msrb.mxu0 %v9893_v43  ;;  %v17136_v45 = vld [vmem:[#allocation54_spill] sm:$0xff] }
 0x56f   : > { %v4547_v37 = vpop.f32.mrf.mxu2  ;;  %4877 = vmatpush.bf16.msra.mxu2 %v10181_v8  ;;  %v5190_v28 = vadd.f32 %v5189_v25, %v5188_v44  ;;  %12088 = vmatpush.bf16.msrb.mxu3 %v10181_v8  ;;  %v11663_v1 = vld [vmem:[#allocation19 + $0x45c] sm:$0xf]  ;;  %v4466_v25 = vadd.f32 %v17133_v54, %v14615_v47  ;;  %v15057_v54 = vperm.slane %v14868_v30, 6 }
 0x570   : > { %v15034_v4 = vadd.f32 %v4547_v37, %v4519_v26  ;;  %v15036_v50 = vpop.f32.mrf.mxu0  ;;  %v9826_v53 = vld [vmem:[#allocation19 + $0x478] sm:$0xf0]  ;;  %v10117_v37 = vor.u32 %v11735_v52, %v10114_v17 }
 0x571   : > { %17130 = vst [vmem:[#allocation63_spill] sm:$0xff] %v15036_v50  ;;  %v5191_v51 = vrot.slane %v5190_v28, 2  ;;  %v10082_v8 = vld [vmem:[#allocation19 + $0x678] sm:$0xf0]  ;;  %12082 = vmatpush.bf16.msra.mxu1 %v9861_v35  ;;  %v9829_v21 = vor.u32 %v11663_v1, %v9826_v53  ;;  %v4495_v20 = vadd.f32 %v17136_v45, %v4466_v25 }
 0x572   : > { %v4959_v23 = vadd.f32 %v4958_v40, %v15034_v4  ;;  %4752 = vmatmul.bf16.gmra.mxu1 %v17131_v6  ;;  %v11727_v40 = vld [vmem:[#allocation19 + $0x65c] sm:$0xf]  ;;  %4850 = vmatpush.bf16.msrb.mxu0 %v9861_v35 }
 0x573   : > { %4878 = vmatpush.bf16.msra.mxu2 %v10149_v31  ;;  %v5192_v26 = vadd.f32 %v5191_v51, %v5190_v28  ;;  %12089 = vmatpush.bf16.msrb.mxu3 %v10149_v31  ;;  %v5411_v28 = vperm.slane %v15051_v0, 2  ;;  %v17135_v31 = vld [vmem:[#allocation41_spill] sm:$0xff]  ;;  %v9794_v52 = vld [vmem:[#allocation19 + $0x438] sm:$0xf0]  ;;  %v10085_v51 = vor.u32 %v11727_v40, %v10082_v8  ;;  %v4524_v8 = vadd.f32 %v15031_v2, %v4495_v20 }
 0x574   : > { %4781 = vmatmul.bf16.gmra.mxu2 %v14126_v22  ;;  %v15043_v44 = vpop.f32.mrf.mxu1  ;;  %4839 = vmatmul.bf16.gmra.mxu0 %v13934_v34  ;;  %v11655_v34 = vld [vmem:[#allocation19 + $0x41c] sm:$0xf] }
 0x575   : > { %v5193_v50 = vrot.slane %v5192_v26, 1  ;;  %4810 = vmatmul.bf16.gmra.mxu3 %v17135_v31  ;;  %12083 = vmatpush.bf16.msra.mxu1 %v9829_v21  ;;  %v9797_v35 = vor.u32 %v11655_v34, %v9794_v52  ;;  %v5427_v31 = vmul.f32 %v5411_v28, %v14917_v5  ;;  %v5451_v5 = vmul.f32 %v5411_v28, %v14926_v9 }
 0x576   : > { %4851 = vmatpush.bf16.msrb.mxu0 %v9829_v21  ;;  %v4570_v21 = vadd.f32 %v14910_v56, %v14871_v13  ;;  %v5475_v9 = vmul.f32 %v5411_v28, %v14935_v46 }
 0x577   : > { %v4550_v38 = vpop.f32.mrf.mxu2  ;;  %4879 = vmatpush.bf16.msra.mxu2 %v10117_v37  ;;  %v5194_v17 = vadd.f32 %v5193_v50, %v5192_v26  ;;  %12090 = vmatpush.bf16.msrb.mxu3 %v10117_v37  ;;  %v5435_v50 = vmul.f32 %v5411_v28, %v14920_v42  ;;  %v5443_v26 = vmul.f32 %v5411_v28, %v14923_v39 }
 0x578   : > { %v15049_v43 = vadd.f32 %v4550_v38, %v15021_v24  ;;  %v11719_v24 = vld [vmem:[#allocation19 + $0x61c] sm:$0xf]  ;;  %v4709_v1 = vpop.f32.mrf.mxu0  ;;  %v4680_v37 = vpop.f32.mrf.mxu3  ;;  %v5459_v42 = vmul.f32 %v5411_v28, %v14929_v16  ;;  %v4567_v39 = vadd.f32 %v14895_v19, %v14871_v13  ;;  %v5483_v16 = vmul.f32 %v5411_v28, %v14938_v18 }
 0x579   : > { %v10050_v38 = vld [vmem:[#allocation19 + $0x638] sm:$0xf0]  ;;  %v5250_v53 = vmul.f32 %v5194_v17, %v17104_v61  ;;  %v4681_v25 = vadd.f32 %v4680_v37, %v15057_v54  ;;  %12084 = vmatpush.bf16.msra.mxu1 %v9797_v35  ;;  %v5467_v17 = vmul.f32 %v5411_v28, %v14932_v36  ;;  %v15091_v36 = vadd.f32 %v14904_v55, %v4570_v21 }
 0x57a   : > { %v4960_v47 = vadd.f32 %v4959_v23, %v15049_v43  ;;  %v15064_v23 = vld [vmem:[#allocation23] sm:$0xff]  ;;  %v10053_v45 = vor.u32 %v11719_v24, %v10050_v38  ;;  %4852 = vmatpush.bf16.msrb.mxu0 %v9797_v35 }
 0x57b   : > { %4880 = vmatpush.bf16.msra.mxu2 %v10085_v51  ;;  %17137 = vst [vmem:[#allocation68_spill] sm:$0xff] %v15064_v23  ;;  %v5493_v30 = vperm.slane %v15064_v23, 2  ;;  %v15067_v40 = vadd.f32 0.8, %v5250_v53  ;;  %12091 = vmatpush.bf16.msrb.mxu3 %v10085_v51  ;;  %v15082_v2 = vadd.f32 %v4709_v1, %v4681_v25  ;;  %v4596_v1 = vadd.f32 %v14890_v15, %v4567_v39 }
 0x57c   : > { %v15071_v34 = vpop.f32.mrf.mxu1 }
 0x57d   : > { %12309 = vrsqrt.f32 %v15067_v40  ;;  %v5509_v51 = vadd.f32 %v5493_v30, %v5427_v31  ;;  %v5517_v19 = vadd.f32 %v5493_v30, %v5435_v50  ;;  %v5525_v24 = vadd.f32 %v5493_v30, %v5443_v26 }
 0x57e   : > { %v5533_v56 = vadd.f32 %v5493_v30, %v5451_v5  ;;  %v5541_v53 = vadd.f32 %v5493_v30, %v5459_v42  ;;  %v5549_v46 = vadd.f32 %v5493_v30, %v5467_v17  ;;  %v5557_v18 = vadd.f32 %v5493_v30, %v5475_v9 }
 0x57f   : > { %v4552_v52 = vpop.f32.mrf.mxu2  ;;  %4881 = vmatpush.bf16.msra.mxu2 %v10053_v45  ;;  %12092 = vmatpush.bf16.msrb.mxu3 %v10053_v45  ;;  %v5565_v28 = vadd.f32 %v5493_v30, %v5483_v16  ;;  %vm5573_vm4 = vcmp.ge.f32.partialorder %v5509_v51, 0.0  ;;  %vm5581_vm5 = vcmp.ge.f32.partialorder %v5517_v19, 0.0  ;;  %vm5589_vm6 = vcmp.ge.f32.partialorder %v5525_v24, 0.0 }
 0x580   : > { %v15080_v20 = vadd.f32 %v4552_v52, %v4524_v8  ;;  %v4711_v8 = vpop.f32.mrf.mxu0  ;;  %v4682_v35 = vpop.f32.mrf.mxu3  ;;  %vm5597_vm7 = vcmp.ge.f32.partialorder %v5533_v56, 0.0  ;;  %vm5605_vm8 = vcmp.ge.f32.partialorder %v5541_v53, 0.0  ;;  %v5637_v15 = vmul.f32 0.2, %v5509_v51 }
 0x581   : > { %v5645_v30 = vmul.f32 0.2, %v5517_v19  ;;  %v5653_v45 = vmul.f32 0.2, %v5525_v24  ;;  %vm5613_vm9 = vcmp.ge.f32.partialorder %v5549_v46, 0.0  ;;  %vm5621_vm10 = vcmp.ge.f32.partialorder %v5557_v18, 0.0 }
 0x582   : > { %v4961_v38 = vadd.f32 %v4960_v47, %v15080_v20  ;;  %4858 = vmatmul.bf16.vlgmr.msra.gmra.mxu1 %v17111_v3  ;;  %v4683_v3 = vadd.f32 %v4682_v35, %v15057_v54  ;;  %v5669_v42 = vmul.f32 0.2, %v5541_v53  ;;  %v5677_v52 = vmul.f32 0.2, %v5549_v46 }
 0x583   : > { %v12310_v31 = vpop.eup %12309  ;;  %v5685_v21 = vmul.f32 0.2, %v5557_v18  ;;  %vm5629_vm11 = vcmp.ge.f32.partialorder %v5565_v28, 0.0  ;;  %v5693_v9 = vmul.f32 0.2, %v5565_v28  ;;  %vm5299_vm13 = vweird.f32 %v15067_v40 }
 0x584   : > { %v4962_v37 = vrot.slane %v4961_v38, 4  ;;  %4882 = vmatmul.bf16.vlgmr.msra.gmra.mxu2 %v17108_v62  ;;  %v15095_v50 = vpop.f32.mrf.mxu1  ;;  %v5294_v55 = vmul.f32 %v12310_v31, %v15067_v40  ;;  %4853 = vmatmul.bf16.vlgmr.msrb.gmra.mxu0 %v17106_v29  ;;  %v15101_v5 = vadd.f32 %v4711_v8, %v4683_v3  ;;  %v5661_v62 = vmul.f32 0.2, %v5533_v56 }
 0x585   : > { %4897 = vmatmul.bf16.vlgmr.msrb.gmra.mxu3 %v14126_v22  ;;  %v15105_v29 = vsel %vm5573_vm4, %v5509_v51, %v5637_v15  ;;  %v4572_v8 = vadd.f32 %v14914_v60, %v14871_v13  ;;  %vm5300_vm12 = vweird.f32 %v12310_v31  ;;  %v15122_v15 = vsel %vm5613_vm9, %v5549_v46, %v5677_v52  ;;  %v17138_v52 = vld [vmem:[#allocation55_spill] sm:$0xff] }
 0x586   : > { %v4963_v47 = vadd.f32 %v4962_v37, %v4961_v38  ;;  %v5295_v39 = vmul.f32 %v12310_v31, %v5294_v55  ;;  %v15108_v38 = vsel %vm5581_vm5, %v5517_v19, %v5645_v30  ;;  %v15111_v37 = vsel %vm5589_vm6, %v5525_v24, %v5653_v45  ;;  %vm5301_vm14 = vmor %vm5299_vm13, %vm5300_vm12 }
 0x587   : > { %v15099_v26 = vpop.f32.mrf.mxu2  ;;  %v15116_v35 = vsel %vm5597_vm7, %v5533_v56, %v5661_v62  ;;  %v15125_v19 = vsel %vm5621_vm10, %v5557_v18, %v5685_v21  ;;  %v15131_v56 = vsel %vm5629_vm11, %v5565_v28, %v5693_v9  ;;  %v4625_v45 = vadd.f32 %v15071_v34, %v4596_v1  ;;  %v17139_v1 = vld [vmem:[#allocation52_spill] sm:$0xff] }
 0x588   : > { %v4964_v25 = vrot.slane %v4963_v47, 2  ;;  %v5296_v16 = vmul.f32 0.5, %v5295_v39  ;;  %v4685_v51 = vpop.f32.mrf.mxu3  ;;  %v4714_v55 = vpop.f32.mrf.mxu0  ;;  %v5412_v46 = vperm.slane %v15051_v0, 3  ;;  %v5494_v18 = vperm.slane %v15064_v23, 3 }
 0x589   : > { %v4686_v60 = vadd.f32 %v4685_v51, %v15057_v54  ;;  %v15138_v62 = vadd.f32 %v14912_v12, %v4572_v8  ;;  %v15144_v28 = vadd.f32 %v15043_v44, %v17138_v52 }
 0x58a   : > { %v4965_v17 = vadd.f32 %v4964_v25, %v4963_v47  ;;  %v15119_v47 = vsel %vm5605_vm8, %v5541_v53, %v5669_v42  ;;  %v5297_v3 = vsub.f32 1.5, %v5296_v16 }
 0x58b   : > { %v15140_v42 = vadd.f32 %v4714_v55, %v4686_v60 }
 0x58c   : > { %v4966_v22 = vrot.slane %v4965_v17, 1  ;;  %v15128_v30 = vpop.f32.mrf.mxu1  ;;  %v5298_v53 = vmul.f32 %v12310_v31, %v5297_v3 }
 0x58e   : > { %v4967_v24 = vadd.f32 %v4966_v22, %v4965_v17  ;;  %v5302_v39 = vsel %vm5301_vm14, %v12310_v31, %v5298_v53  ;;  %v17140_v17 = vld [vmem:[#allocation53_spill] sm:$0xff] }
 0x58f   : > { %v4653_v25 = vpop.f32.mrf.mxu2  ;;  %v5346_v21 = vmul.f32 %v5302_v39, %v17139_v1  ;;  %v5354_v9 = vmul.f32 %v5302_v39, %v17140_v17  ;;  %v5362_v16 = vmul.f32 %v5302_v39, %v14964_v7  ;;  %v5370_v12 = vmul.f32 %v5302_v39, %v14967_v41  ;;  %v17141_v1 = vld [vmem:[#allocation51_spill] sm:$0xff] }
 0x590   : > { %v15147_v40 = vmul.f32 %v4967_v24, %v17104_v61  ;;  %v15149_v34 = vadd.f32 %v4653_v25, %v4625_v45  ;;  %v5378_v8 = vmul.f32 %v5302_v39, %v14978_v27  ;;  %v5386_v31 = vmul.f32 %v5302_v39, %v14986_v10  ;;  %v15160_v25 = vpop.f32.mrf.mxu3  ;;  %v15163_v17 = vpop.f32.mrf.mxu0 }
 0x591   : > { %v5394_v44 = vmul.f32 %v5302_v39, %v14997_v58  ;;  %v5402_v22 = vmul.f32 %v5302_v39, %v15009_v32  ;;  %v5428_v3 = vmul.f32 %v5412_v46, %v5346_v21  ;;  %v5436_v51 = vmul.f32 %v5412_v46, %v5354_v9 }
 0x592   : > { %4863 = vmatmul.bf16.gmra.mxu1 %v17124_v48  ;;  %v5444_v24 = vmul.f32 %v5412_v46, %v5362_v16  ;;  %v5452_v55 = vmul.f32 %v5412_v46, %v5370_v12  ;;  %v5460_v60 = vmul.f32 %v5412_v46, %v5378_v8  ;;  %v5468_v53 = vmul.f32 %v5412_v46, %v5386_v31 }
 0x593   : > { %v5476_v45 = vmul.f32 %v5412_v46, %v5394_v44  ;;  %v5484_v7 = vmul.f32 %v5412_v46, %v5402_v22  ;;  %v5510_v41 = vadd.f32 %v5494_v18, %v5428_v3  ;;  %v5518_v27 = vadd.f32 %v5494_v18, %v5436_v51 }
 0x594   : > { %v5526_v52 = vadd.f32 %v5494_v18, %v5444_v24  ;;  %v5534_v10 = vadd.f32 %v5494_v18, %v5452_v55  ;;  %4887 = vmatmul.bf16.gmra.mxu2 %v17141_v1  ;;  %v5542_v58 = vadd.f32 %v5494_v18, %v5460_v60  ;;  %v5550_v32 = vadd.f32 %v5494_v18, %v5468_v53  ;;  %v15165_v46 = vpop.f32.mrf.mxu1 }
 0x595   : > { %v5558_v39 = vadd.f32 %v5494_v18, %v5476_v45  ;;  %v5566_v48 = vadd.f32 %v5494_v18, %v5484_v7  ;;  %vm5574_vm15 = vcmp.ge.f32.partialorder %v5510_v41, 0.0  ;;  %vm5582_vm0 = vcmp.ge.f32.partialorder %v5518_v27, 0.0 }
 0x596   : > { %vm5590_vm1 = vcmp.ge.f32.partialorder %v5526_v52, 0.0  ;;  %vm5598_vm2 = vcmp.ge.f32.partialorder %v5534_v10, 0.0  ;;  %vm5606_vm3 = vcmp.ge.f32.partialorder %v5542_v58, 0.0  ;;  %vm5614_vm4 = vcmp.ge.f32.partialorder %v5550_v32, 0.0 }
 0x597   : > { %v4656_v21 = vpop.f32.mrf.mxu2  ;;  %vm5622_vm5 = vcmp.ge.f32.partialorder %v5558_v39, 0.0  ;;  %vm5630_vm6 = vcmp.ge.f32.partialorder %v5566_v48, 0.0  ;;  %v5638_v9 = vmul.f32 0.2, %v5510_v41  ;;  %v5646_v16 = vmul.f32 0.2, %v5518_v27 }
 0x598   : > { %v5654_v12 = vmul.f32 0.2, %v5526_v52  ;;  %v15169_v8 = vsub.f32 %v14908_v33, %v15147_v40  ;;  %v5662_v18 = vmul.f32 0.2, %v5534_v10  ;;  %v5670_v31 = vmul.f32 0.2, %v5542_v58 }
 0x599   : > { %v5678_v44 = vmul.f32 0.2, %v5550_v32  ;;  %v15173_v22 = vsub.f32 %v14969_v49, %v15147_v40  ;;  %v5686_v3 = vmul.f32 0.2, %v5558_v39  ;;  %v5694_v51 = vmul.f32 0.2, %v5566_v48 }
 0x59a   : > { %v5702_v24 = vsel %vm5574_vm15, %v5510_v41, %v5638_v9  ;;  %v5710_v55 = vsel %vm5582_vm0, %v5518_v27, %v5646_v16  ;;  %v5718_v60 = vsel %vm5590_vm1, %v5526_v52, %v5654_v12  ;;  %v5726_v53 = vsel %vm5598_vm2, %v5534_v10, %v5662_v18  ;;  %v4690_v7 = vpop.f32.mrf.mxu3 }
 0x59b   : > { %v5734_v33 = vsel %vm5606_vm3, %v5542_v58, %v5670_v31  ;;  %v5742_v45 = vsel %vm5614_vm4, %v5550_v32, %v5678_v44  ;;  %v5750_v1 = vsel %vm5622_vm5, %v5558_v39, %v5686_v3  ;;  %v5758_v49 = vsel %vm5630_vm6, %v5566_v48, %v5694_v51 }
 0x59c   : > { %v5764_v23 = vpack.c.bf16 %v5702_v24, %v15105_v29  ;;  %v5768_v0 = vpack.c.bf16 %v5710_v55, %v15108_v38  ;;  %v5772_v41 = vpack.c.bf16 %v5718_v60, %v15111_v37  ;;  %v5776_v27 = vpack.c.bf16 %v5726_v53, %v15116_v35  ;;  %v4634_v35 = vpop.f32.mrf.mxu1 }
 0x59d   : > { %v5780_v52 = vpack.c.bf16 %v5734_v33, %v15119_v47  ;;  %v5784_v10 = vpack.c.bf16 %v5742_v45, %v15122_v15  ;;  %v5788_v32 = vpack.c.bf16 %v5750_v1, %v15125_v19  ;;  %v5792_v9 = vpack.c.bf16 %v5758_v49, %v15131_v56  ;;  %v17142_v1 = vld [vmem:[#allocation59_spill] sm:$0xff] }
 0x59e   : > { %5796 = vst [vmem:[#allocation2 + $0x8] sm:$0xff] %v5764_v23  ;;  %v15193_v39 = vsub.f32 %v14991_v63, %v15147_v40  ;;  %v15197_v29 = vsub.f32 %v15001_v59, %v15147_v40  ;;  %v15201_v38 = vsub.f32 %v15017_v11, %v15147_v40  ;;  %v15205_v37 = vsub.f32 %v15034_v4, %v15147_v40 }
 0x59f   : > { %v4658_v58 = vpop.f32.mrf.mxu2  ;;  %5800 = vst [vmem:[#allocation2 + $0x28] sm:$0xff] %v5768_v0  ;;  %v15209_v23 = vsub.f32 %v15049_v43, %v15147_v40  ;;  %v15213_v63 = vsub.f32 %v15080_v20, %v15147_v40  ;;  %v5083_v59 = vmul.f32 %v15169_v8, %v15169_v8  ;;  %v5091_v11 = vmul.f32 %v15173_v22, %v15173_v22 }
 0x5a0   : > { %5804 = vst [vmem:[#allocation2 + $0x48] sm:$0xff] %v5772_v41  ;;  %v15221_v0 = vadd.f32 %v15099_v26, %v15144_v28  ;;  %v4628_v4 = vadd.f32 %v15095_v50, %v15091_v36  ;;  %v5099_v20 = vmul.f32 %v15193_v39, %v15193_v39  ;;  %v4630_v47 = vadd.f32 %v15128_v30, %v15138_v62 }
 0x5a1   : > { %v4719_v43 = vpop.f32.mrf.mxu0  ;;  %5808 = vst [vmem:[#allocation2 + $0x68] sm:$0xff] %v5776_v27  ;;  %v5195_v15 = vadd.f32 %v5091_v11, %v5083_v59  ;;  %v4688_v26 = vadd.f32 %v15160_v25, %v15057_v54  ;;  %v4691_v50 = vadd.f32 %v4690_v7, %v15057_v54  ;;  %v5107_v30 = vmul.f32 %v15197_v29, %v15197_v29  ;;  %v17144_v11 = vld [vmem:[#allocation56_spill] sm:$0xff] }
 0x5a2   : > { %5812 = vst [vmem:[#allocation2 + $0x88] sm:$0xff] %v5780_v52  ;;  %v4968_v19 = vadd.f32 %v15149_v34, %v15221_v0  ;;  %v15231_v56 = vadd.f32 %v4656_v21, %v4628_v4  ;;  %v15235_v36 = vadd.f32 %v4658_v58, %v4630_v47  ;;  %4868 = vmatmul.bf16.gmra.mxu1 %v17131_v6  ;;  %v4692_v28 = vpop.f32.mrf.mxu3 }
 0x5a3   : > { %5816 = vst [vmem:[#allocation2 + $0xa8] sm:$0xff] %v5784_v10  ;;  %v5196_v62 = vadd.f32 %v5195_v15, %v5099_v20  ;;  %v4693_v25 = vadd.f32 %v4692_v28, %v15057_v54  ;;  %v15245_v21 = vadd.f32 %v15163_v17, %v4688_v26  ;;  %v15247_v6 = vadd.f32 %v4719_v43, %v4691_v50  ;;  %v17146_v28 = vld [vmem:[#allocation64_spill] sm:$0xff] }
 0x5a4   : > { %5820 = vst [vmem:[#allocation2 + $0xc8] sm:$0xff] %v5788_v32  ;;  %v4969_v40 = vadd.f32 %v4968_v19, %v15231_v56  ;;  %4892 = vmatmul.bf16.gmra.mxu2 %v14123_v14  ;;  %v5115_v16 = vmul.f32 %v15201_v38, %v15201_v38  ;;  %v5123_v31 = vmul.f32 %v15205_v37, %v15205_v37  ;;  %v4637_v24 = vpop.f32.mrf.mxu1  ;;  %v17143_v32 = vld [vmem:[#allocation57_spill] sm:$0xff]  ;;  %v17145_v19 = vld [vmem:[#allocation58_spill] sm:$0xff] }
 0x5a5   : > { %5824 = vst [vmem:[#allocation2 + $0xe8] sm:$0xff] %v5792_v9  ;;  %v5197_v12 = vadd.f32 %v5196_v62, %v5107_v30  ;;  %v5131_v51 = vmul.f32 %v15209_v23, %v15209_v23  ;;  %v5139_v55 = vmul.f32 %v15213_v63, %v15213_v63  ;;  %v4575_v49 = vadd.f32 %v17142_v1, %v14871_v13  ;;  %v17147_v62 = vld [vmem:[#allocation65_spill] sm:$0xff] }
 0x5a6   : > { %v4970_v18 = vadd.f32 %v4969_v40, %v15235_v36  ;;  %v4577_v52 = vadd.f32 %v14981_v57, %v14871_v13  ;;  %v4580_v9 = vadd.f32 %v17143_v32, %v14871_v13  ;;  %v4582_v40 = vadd.f32 %v17147_v62, %v14871_v13 }
 0x5a7   : > { %v4661_v48 = vpop.f32.mrf.mxu2  ;;  %v5198_v44 = vadd.f32 %v5197_v12, %v5115_v16  ;;  %v4604_v4 = vadd.f32 %v17144_v11, %v4575_v49 }
 0x5a8   : > { %v4606_v26 = vadd.f32 %v17145_v19, %v4577_v52  ;;  %v4609_v57 = vadd.f32 %v17146_v28, %v4580_v9 }
 0x5a9   : > { %v4721_v14 = vpop.f32.mrf.mxu0  ;;  %v5199_v17 = vadd.f32 %v5198_v44, %v5123_v31  ;;  %v4633_v15 = vadd.f32 %v15165_v46, %v4604_v4 }
 0x5aa   : > { %v15254_v3 = vadd.f32 %v4721_v14, %v4693_v25  ;;  %v4695_v53 = vpop.f32.mrf.mxu3  ;;  %v4635_v16 = vadd.f32 %v4634_v35, %v4606_v26  ;;  %v4638_v14 = vadd.f32 %v4637_v24, %v4609_v57 }
 0x5ab   : > { %v5200_v60 = vadd.f32 %v5199_v17, %v5131_v51  ;;  %v4696_v7 = vadd.f32 %v4695_v53, %v15057_v54  ;;  %v15276_v12 = vadd.f32 %v4661_v48, %v4633_v15 }
 0x5ac   : > { %v4639_v43 = vpop.f32.mrf.mxu1 }
 0x5ad   : > { %v5201_v45 = vadd.f32 %v5200_v60, %v5139_v55  ;;  %v17148_v55 = vld [vmem:[#allocation63_spill] sm:$0xff] }
 0x5ae   : > { %v4611_v60 = vadd.f32 %v17148_v55, %v4582_v40 }
 0x5af   : > { %v4663_v33 = vpop.f32.mrf.mxu2  ;;  %v5202_v41 = vrot.slane %v5201_v45, 4 }
 0x5b0   : > { %v15278_v51 = vadd.f32 %v4663_v33, %v4635_v16  ;;  %v4640_v48 = vadd.f32 %v4639_v43, %v4611_v60 }
 0x5b1   : > { %v4724_v27 = vpop.f32.mrf.mxu0  ;;  %v5203_v10 = vadd.f32 %v5202_v41, %v5201_v45 }
 0x5b2   : > { %v15265_v58 = vadd.f32 %v4724_v27, %v4696_v7  ;;  %v4697_v20 = vpop.f32.mrf.mxu3 }
 0x5b3   : > { %v5204_v59 = vrot.slane %v5203_v10, 2  ;;  %v4698_v50 = vadd.f32 %v4697_v20, %v15057_v54  ;;  %v4971_v54 = vadd.f32 %v4970_v18, %v15276_v12 }
 0x5b5   : > { %v5205_v47 = vadd.f32 %v5204_v59, %v5203_v10  ;;  %v4972_v35 = vadd.f32 %v4971_v54, %v15278_v51 }
 0x5b7   : > { %v4666_v30 = vpop.f32.mrf.mxu2  ;;  %v5206_v25 = vrot.slane %v5205_v47, 1 }
 0x5b8   : > { %v15285_v53 = vadd.f32 %v4666_v30, %v4638_v14 }
 0x5b9   : > { %v4726_v31 = vpop.f32.mrf.mxu0  ;;  %v5207_v44 = vadd.f32 %v5206_v25, %v5205_v47 }
 0x5ba   : > { %v15280_v46 = vadd.f32 %v4726_v31, %v4698_v50  ;;  %v4973_v33 = vadd.f32 %v4972_v35, %v15285_v53 }
 0x5bb   : > { %v5251_v17 = vmul.f32 %v5207_v44, %v17104_v61 }
 0x5bd   : > { %v5259_v13 = vadd.f32 0.8, %v5251_v17  ;;  %v4738_v45 = vpop.f32.mrf.mxu1 }
 0x5be   : > { %v4739_v7 = vadd.f32 %v4738_v45, %v15082_v2 }
 0x5bf   : > { %v4668_v24 = vpop.f32.mrf.mxu2  ;;  %12311 = vrsqrt.f32 %v5259_v13  ;;  %vm5309_vm8 = vweird.f32 %v5259_v13 }
 0x5c0   : > { %v15290_v1 = vadd.f32 %v4668_v24, %v4640_v48 }
 0x5c1   : > { %v15293_v32 = vpop.f32.mrf.mxu0 }
 0x5c2   : > { %v4974_v49 = vadd.f32 %v4973_v33, %v15290_v1 }
 0x5c4   : > { %v4975_v18 = vrot.slane %v4974_v49, 4 }
 0x5c5   : > { %v12312_v41 = vpop.eup %12311  ;;  %v4740_v52 = vpop.f32.mrf.mxu1 }
 0x5c6   : > { %v4976_v27 = vadd.f32 %v4975_v18, %v4974_v49  ;;  %v5304_v10 = vmul.f32 %v12312_v41, %v5259_v13  ;;  %v4741_v9 = vadd.f32 %v4740_v52, %v15101_v5  ;;  %vm5310_vm7 = vweird.f32 %v12312_v41 }
 0x5c7   : > { %v4767_v59 = vpop.f32.mrf.mxu2  ;;  %vm5311_vm9 = vmor %vm5309_vm8, %vm5310_vm7 }
 0x5c8   : > { %v4977_v11 = vrot.slane %v4976_v27, 2  ;;  %v15296_v2 = vadd.f32 %v4767_v59, %v4739_v7  ;;  %v5305_v4 = vmul.f32 %v12312_v41, %v5304_v10  ;;  %v15328_v54 = vpop.f32.mrf.mxu3 }
 0x5c9   : > { %v15301_v62 = vpop.f32.mrf.mxu0 }
 0x5ca   : > { %v4978_v43 = vadd.f32 %v4977_v11, %v4976_v27  ;;  %v5306_v20 = vmul.f32 0.5, %v5305_v4 }
 0x5cc   : > { %v5307_v47 = vsub.f32 1.5, %v5306_v20  ;;  %v4979_v15 = vrot.slane %v4978_v43, 1 }
 0x5ce   : > { %v5308_v26 = vmul.f32 %v12312_v41, %v5307_v47  ;;  %v4980_v30 = vadd.f32 %v4979_v15, %v4978_v43 }
 0x5cf   : > { %v4743_v19 = vpop.f32.mrf.mxu1  ;;  %v4769_v28 = vpop.f32.mrf.mxu2 }
 0x5d0   : > { %v4744_v50 = vadd.f32 %v4743_v19, %v15140_v42  ;;  %v15299_v57 = vadd.f32 %v4769_v28, %v4741_v9  ;;  %v5312_v5 = vsel %vm5311_vm9, %v12312_v41, %v5308_v26 }
 0x5d1   : > { %v15304_v40 = vmul.f32 %v5312_v5, %v15169_v8  ;;  %v15307_v25 = vmul.f32 %v5312_v5, %v15173_v22  ;;  %v15310_v16 = vmul.f32 %v5312_v5, %v15193_v39  ;;  %v15313_v31 = vmul.f32 %v5312_v5, %v15197_v29 }
 0x5d2   : > { %v15316_v42 = vmul.f32 %v5312_v5, %v15201_v38  ;;  %v15319_v44 = vmul.f32 %v5312_v5, %v15205_v37  ;;  %v15322_v14 = vmul.f32 %v5312_v5, %v15209_v23  ;;  %v15325_v8 = vmul.f32 %v5312_v5, %v15213_v63  ;;  %v15336_v37 = vpop.f32.mrf.mxu0 }
 0x5d3   : > { %v5012_v22 = vmul.f32 %v4980_v30, %v17104_v61 }
 0x5d5   : > { %v15331_v29 = vsub.f32 %v15221_v0, %v5012_v22  ;;  %v15334_v38 = vsub.f32 %v15149_v34, %v5012_v22  ;;  %v15339_v23 = vsub.f32 %v15231_v56, %v5012_v22  ;;  %v15342_v63 = vsub.f32 %v15235_v36, %v5012_v22  ;;  %v15355_v36 = vpop.f32.mrf.mxu3 }
 0x5d6   : > { %v15349_v35 = vsub.f32 %v15276_v12, %v5012_v22  ;;  %v4981_v56 = vadd.f32 %v15299_v57, %v15296_v2  ;;  %v15362_v33 = vsub.f32 %v15278_v51, %v5012_v22  ;;  %v15372_v52 = vsub.f32 %v15285_v53, %v5012_v22 }
 0x5d7   : > { %v4745_v17 = vpop.f32.mrf.mxu1  ;;  %v4772_v39 = vpop.f32.mrf.mxu2  ;;  %v5084_v13 = vmul.f32 %v15331_v29, %v15331_v29  ;;  %v5092_v0 = vmul.f32 %v15334_v38, %v15334_v38  ;;  %v5100_v34 = vmul.f32 %v15339_v23, %v15339_v23  ;;  %v5108_v12 = vmul.f32 %v15342_v63, %v15342_v63 }
 0x5d8   : > { %v4746_v45 = vadd.f32 %v4745_v17, %v15245_v21  ;;  %v15358_v7 = vadd.f32 %v4772_v39, %v4744_v50  ;;  %v5116_v21 = vmul.f32 %v15349_v35, %v15349_v35  ;;  %v15378_v59 = vsub.f32 %v15290_v1, %v5012_v22 }
 0x5d9   : > { %v5208_v48 = vadd.f32 %v5092_v0, %v5084_v13  ;;  %v5124_v11 = vmul.f32 %v15362_v33, %v15362_v33  ;;  %v5132_v53 = vmul.f32 %v15372_v52, %v15372_v52 }
 0x5da   : > { %v4982_v18 = vadd.f32 %v4981_v56, %v15358_v7  ;;  %v15367_v41 = vpop.f32.mrf.mxu0  ;;  %v5140_v15 = vmul.f32 %v15378_v59, %v15378_v59 }
 0x5db   : > { %v5209_v49 = vadd.f32 %v5208_v48, %v5100_v34 }
 0x5dd   : > { %v15389_v26 = vpop.f32.mrf.mxu3 }
 0x5df   : > { %v4748_v55 = vpop.f32.mrf.mxu1  ;;  %v4774_v60 = vpop.f32.mrf.mxu2 }
 0x5e0   : > { %v4749_v24 = vadd.f32 %v4748_v55, %v15247_v6  ;;  %v15369_v27 = vadd.f32 %v4774_v60, %v4746_v45  ;;  %v5210_v6 = vadd.f32 %v5209_v49, %v5108_v12 }
 0x5e2   : > { %v4983_v51 = vadd.f32 %v4982_v18, %v15369_v27  ;;  %v5211_v4 = vadd.f32 %v5210_v6, %v5116_v21  ;;  %v15392_v5 = vpop.f32.mrf.mxu0  ;;  %v17150_v18 = vld [vmem:[#allocation48_spill] sm:$0xff] }
 0x5e3   : > { %v5413_v21 = vperm.slane %v17150_v18, 4 }
 0x5e4   : > { %v5212_v20 = vadd.f32 %v5211_v4, %v5124_v11  ;;  %v17151_v4 = vld [vmem:[#allocation68_spill] sm:$0xff] }
 0x5e5   : > { %v15398_v48 = vpop.f32.mrf.mxu3  ;;  %v5437_v11 = vmul.f32 %v5413_v21, %v15307_v25 }
 0x5e6   : > { %v5213_v19 = vadd.f32 %v5212_v20, %v5132_v53  ;;  %v5495_v53 = vperm.slane %v17151_v4, 4 }
 0x5e7   : > { %v4750_v10 = vpop.f32.mrf.mxu1  ;;  %v4777_v9 = vpop.f32.mrf.mxu2 }
 0x5e8   : > { %v15382_v43 = vadd.f32 %v4777_v9, %v4749_v24  ;;  %v5214_v1 = vadd.f32 %v5213_v19, %v5140_v15  ;;  %v4751_v50 = vadd.f32 %v4750_v10, %v15254_v3  ;;  %v5429_v9 = vmul.f32 %v5413_v21, %v15304_v40  ;;  %v12323_v40 = vld [vmem:[#allocation20] sm:$0xff] }
 0x5e9   : > { %v5453_v15 = vmul.f32 %v5413_v21, %v15313_v31 }
 0x5ea   : > { %v4984_v47 = vadd.f32 %v4983_v51, %v15382_v43  ;;  %v5215_v22 = vrot.slane %v5214_v1, 4  ;;  %v15402_v24 = vpop.f32.mrf.mxu0  ;;  %v5511_v31 = vadd.f32 %v5495_v53, %v5429_v9 }
 0x5eb   : > { %17149 = vst [vmem:[#allocation50_spill] sm:$0xff] %v15402_v24 }
 0x5ec   : > { %v5216_v39 = vadd.f32 %v5215_v22, %v5214_v1  ;;  %v5461_v1 = vmul.f32 %v5413_v21, %v15316_v42  ;;  %vm5575_vm10 = vcmp.ge.f32.partialorder %v5511_v31, 0.0 }
 0x5ee   : > { %v5217_v60 = vrot.slane %v5216_v39, 2 }
 0x5ef   : > { %v4753_v28 = vpop.f32.mrf.mxu1  ;;  %v4779_v30 = vpop.f32.mrf.mxu2 }
 0x5f0   : > { %v15394_v17 = vadd.f32 %v4779_v30, %v4751_v50  ;;  %v5218_v13 = vadd.f32 %v5217_v60, %v5216_v39  ;;  %v4754_v0 = vadd.f32 %v4753_v28, %v15265_v58  ;;  %v5469_v50 = vmul.f32 %v5413_v21, %v15319_v44 }
 0x5f1   : > { %v15424_v28 = vperm.slane %v12323_v40, 7  ;;  %v5477_v30 = vmul.f32 %v5413_v21, %v15322_v14  ;;  %v5519_v39 = vadd.f32 %v5495_v53, %v5437_v11  ;;  %v5535_v60 = vadd.f32 %v5495_v53, %v5453_v15 }
 0x5f2   : > { %v4985_v55 = vadd.f32 %v4984_v47, %v15394_v17  ;;  %v5219_v45 = vrot.slane %v5218_v13, 1  ;;  %v5445_v47 = vmul.f32 %v5413_v21, %v15310_v16  ;;  %v5485_v16 = vmul.f32 %v5413_v21, %v15325_v8  ;;  %v15429_v22 = vpop.f32.mrf.mxu0 }
 0x5f3   : > { %17152 = vst [vmem:[#allocation44_spill] sm:$0xff] %v15429_v22  ;;  %v15433_v44 = vadd.f32 %v15328_v54, %v15424_v28  ;;  %v5559_v14 = vadd.f32 %v5495_v53, %v5477_v30  ;;  %vm5583_vm11 = vcmp.ge.f32.partialorder %v5519_v39, 0.0  ;;  %vm5599_vm13 = vcmp.ge.f32.partialorder %v5535_v60, 0.0 }
 0x5f4   : > { %v5220_v12 = vadd.f32 %v5219_v45, %v5218_v13  ;;  %v5543_v13 = vadd.f32 %v5495_v53, %v5461_v1  ;;  %v5663_v11 = vmul.f32 0.2, %v5535_v60 }
 0x5f5   : > { %vm5623_vm0 = vcmp.ge.f32.partialorder %v5559_v14, 0.0 }
 0x5f6   : > { %v5252_v6 = vmul.f32 %v5220_v12, %v17104_v61  ;;  %v5567_v12 = vadd.f32 %v5495_v53, %v5485_v16  ;;  %vm5607_vm14 = vcmp.ge.f32.partialorder %v5543_v13, 0.0 }
 0x5f7   : > { %v4755_v34 = vpop.f32.mrf.mxu1  ;;  %v4782_v56 = vpop.f32.mrf.mxu2 }
 0x5f8   : > { %v15400_v3 = vadd.f32 %v4782_v56, %v4754_v0  ;;  %v15407_v10 = vadd.f32 0.8, %v5252_v6  ;;  %v4756_v58 = vadd.f32 %v4755_v34, %v15280_v46  ;;  %v15421_v46 = vpop.f32.mrf.mxu3  ;;  %v5551_v34 = vadd.f32 %v5495_v53, %v5469_v50 }
 0x5f9   : > { %v5639_v6 = vmul.f32 0.2, %v5511_v31  ;;  %vm5631_vm1 = vcmp.ge.f32.partialorder %v5567_v12, 0.0  ;;  %v5695_v40 = vmul.f32 0.2, %v5567_v12 }
 0x5fa   : > { %v4986_v49 = vadd.f32 %v4985_v55, %v15400_v3  ;;  %12313 = vrsqrt.f32 %v15407_v10  ;;  %v5527_v55 = vadd.f32 %v5495_v53, %v5445_v47  ;;  %vm5615_vm15 = vcmp.ge.f32.partialorder %v5551_v34, 0.0 }
 0x5fb   : > { %v5679_v15 = vmul.f32 0.2, %v5551_v34  ;;  %v5687_v53 = vmul.f32 0.2, %v5559_v14  ;;  %v15443_v30 = vsel %vm5575_vm10, %v5511_v31, %v5639_v6  ;;  %vm5319_vm3 = vweird.f32 %v15407_v10 }
 0x5fc   : > { %vm5591_vm12 = vcmp.ge.f32.partialorder %v5527_v55, 0.0  ;;  %v5655_v54 = vmul.f32 0.2, %v5527_v55 }
 0x5fd   : > { %v15460_v31 = vsel %vm5615_vm15, %v5551_v34, %v5679_v15  ;;  %v15462_v6 = vsel %vm5623_vm0, %v5559_v14, %v5687_v53  ;;  %v15479_v34 = vadd.f32 %v15389_v26, %v15424_v28 }
 0x5ff   : > { %v15410_v51 = vpop.f32.mrf.mxu1  ;;  %v4784_v20 = vpop.f32.mrf.mxu2 }
 0x600   : > { %v15418_v19 = vadd.f32 %v4784_v20, %v4756_v58  ;;  %v12314_v0 = vpop.eup %12313  ;;  %v5647_v58 = vmul.f32 0.2, %v5519_v39  ;;  %v5671_v20 = vmul.f32 0.2, %v5543_v13  ;;  %v15440_v50 = vpop.f32.mrf.mxu3 }
 0x601   : > { %v5314_v8 = vmul.f32 %v12314_v0, %v15407_v10  ;;  %vm5320_vm2 = vweird.f32 %v12314_v0  ;;  %v5496_v10 = vperm.slane %v17151_v4, 5 }
 0x602   : > { %v4987_v25 = vadd.f32 %v4986_v49, %v15418_v19  ;;  %v15446_v16 = vsel %vm5583_vm11, %v5519_v39, %v5647_v58  ;;  %vm5321_vm4 = vmor %vm5319_vm3, %vm5320_vm2 }
 0x603   : > { %v5315_v9 = vmul.f32 %v12314_v0, %v5314_v8  ;;  %v15448_v8 = vpop.f32.mrf.mxu0 }
 0x604   : > { %v4988_v42 = vrot.slane %v4987_v25, 4  ;;  %17153 = vst [vmem:[#allocation42_spill] sm:$0xff] %v15448_v8 }
 0x605   : > { %v5316_v1 = vmul.f32 0.5, %v5315_v9  ;;  %v15457_v9 = vsel %vm5607_vm14, %v5543_v13, %v5671_v20  ;;  %v15475_v13 = vadd.f32 %v15355_v36, %v15424_v28 }
 0x606   : > { %v4989_v56 = vadd.f32 %v4988_v42, %v4987_v25 }
 0x607   : > { %v15435_v45 = vpop.f32.mrf.mxu1  ;;  %v15438_v49 = vpop.f32.mrf.mxu2  ;;  %v5317_v42 = vsub.f32 1.5, %v5316_v1 }
 0x608   : > { %v4990_v21 = vrot.slane %v4989_v56, 2 }
 0x609   : > { %v5318_v39 = vmul.f32 %v12314_v0, %v5317_v42  ;;  %v15497_v42 = vpop.f32.mrf.mxu3 }
 0x60a   : > { %v4991_v47 = vadd.f32 %v4990_v21, %v4989_v56  ;;  %v15451_v56 = vsel %vm5591_vm12, %v5527_v55, %v5655_v54  ;;  %v15454_v21 = vsel %vm5599_vm13, %v5535_v60, %v5663_v11  ;;  %v15470_v55 = vsel %vm5631_vm1, %v5567_v12, %v5695_v40 }
 0x60b   : > { %v5414_v60 = vperm.slane %v17150_v18, 5  ;;  %v5322_v14 = vsel %vm5321_vm4, %v12314_v0, %v5318_v39  ;;  %v15484_v54 = vadd.f32 %v15398_v48, %v15424_v28  ;;  %v15499_v24 = vpop.f32.mrf.mxu0 }
 0x60c   : > { %v4992_v25 = vrot.slane %v4991_v47, 1  ;;  %v5348_v18 = vmul.f32 %v5322_v14, %v15331_v29  ;;  %v5356_v11 = vmul.f32 %v5322_v14, %v15334_v38  ;;  %v5364_v36 = vmul.f32 %v5322_v14, %v15339_v23 }
 0x60d   : > { %v5372_v20 = vmul.f32 %v5322_v14, %v15342_v63  ;;  %v5380_v26 = vmul.f32 %v5322_v14, %v15349_v35  ;;  %v5388_v0 = vmul.f32 %v5322_v14, %v15362_v33  ;;  %v5396_v4 = vmul.f32 %v5322_v14, %v15372_v52 }
 0x60e   : > { %v4993_v22 = vadd.f32 %v4992_v25, %v4991_v47  ;;  %v5404_v48 = vmul.f32 %v5322_v14, %v15378_v59  ;;  %v5430_v47 = vmul.f32 %v5414_v60, %v5348_v18  ;;  %v5438_v15 = vmul.f32 %v5414_v60, %v5356_v11 }
 0x60f   : > { %v15465_v58 = vpop.f32.mrf.mxu1  ;;  %v15467_v1 = vpop.f32.mrf.mxu2  ;;  %v5454_v53 = vmul.f32 %v5414_v60, %v5372_v20  ;;  %v5462_v40 = vmul.f32 %v5414_v60, %v5380_v26  ;;  %v5470_v29 = vmul.f32 %v5414_v60, %v5388_v0  ;;  %v5478_v25 = vmul.f32 %v5414_v60, %v5396_v4 }
 0x610   : > { %v15487_v12 = vmul.f32 %v4993_v22, %v17104_v61  ;;  %v5446_v22 = vmul.f32 %v5414_v60, %v5364_v36  ;;  %v5486_v38 = vmul.f32 %v5414_v60, %v5404_v48  ;;  %v5512_v23 = vadd.f32 %v5496_v10, %v5430_v47 }
 0x611   : > { %v5520_v63 = vadd.f32 %v5496_v10, %v5438_v15  ;;  %v5536_v35 = vadd.f32 %v5496_v10, %v5454_v53  ;;  %v5544_v61 = vadd.f32 %v5496_v10, %v5462_v40  ;;  %v5552_v33 = vadd.f32 %v5496_v10, %v5470_v29 }
 0x612   : > { %v5528_v39 = vadd.f32 %v5496_v10, %v5446_v22  ;;  %v5560_v8 = vadd.f32 %v5496_v10, %v5478_v25  ;;  %v5568_v52 = vadd.f32 %v5496_v10, %v5486_v38  ;;  %vm5576_vm5 = vcmp.ge.f32.partialorder %v5512_v23, 0.0 }
 0x613   : > { %vm5584_vm6 = vcmp.ge.f32.partialorder %v5520_v63, 0.0  ;;  %vm5600_vm8 = vcmp.ge.f32.partialorder %v5536_v35, 0.0  ;;  %vm5608_vm9 = vcmp.ge.f32.partialorder %v5544_v61, 0.0  ;;  %vm5616_vm10 = vcmp.ge.f32.partialorder %v5552_v33, 0.0 }
 0x614   : > { %vm5592_vm7 = vcmp.ge.f32.partialorder %v5528_v39, 0.0  ;;  %vm5624_vm11 = vcmp.ge.f32.partialorder %v5560_v8, 0.0  ;;  %vm5632_vm12 = vcmp.ge.f32.partialorder %v5568_v52, 0.0  ;;  %v5640_v14 = vmul.f32 0.2, %v5512_v23 }
 0x615   : > { %v5648_v18 = vmul.f32 0.2, %v5520_v63  ;;  %v5656_v11 = vmul.f32 0.2, %v5528_v39  ;;  %v15507_v10 = vsub.f32 %v15296_v2, %v15487_v12  ;;  %v5664_v36 = vmul.f32 0.2, %v5536_v35 }
 0x616   : > { %v5672_v20 = vmul.f32 0.2, %v5544_v61  ;;  %v5680_v26 = vmul.f32 0.2, %v5552_v33  ;;  %v15511_v0 = vsub.f32 %v15299_v57, %v15487_v12  ;;  %v5688_v4 = vmul.f32 0.2, %v5560_v8 }
 0x617   : > { %v15501_v59 = vpop.f32.mrf.mxu2  ;;  %v15503_v60 = vpop.f32.mrf.mxu1  ;;  %v5696_v48 = vmul.f32 0.2, %v5568_v52  ;;  %v5704_v47 = vsel %vm5576_vm5, %v5512_v23, %v5640_v14  ;;  %v5712_v15 = vsel %vm5584_vm6, %v5520_v63, %v5648_v18  ;;  %v5720_v22 = vsel %vm5592_vm7, %v5528_v39, %v5656_v11 }
 0x618   : > { %v5728_v53 = vsel %vm5600_vm8, %v5536_v35, %v5664_v36  ;;  %v5736_v2 = vsel %vm5608_vm9, %v5544_v61, %v5672_v20  ;;  %v5744_v40 = vsel %vm5616_vm10, %v5552_v33, %v5680_v26  ;;  %v5752_v29 = vsel %vm5624_vm11, %v5560_v8, %v5688_v4  ;;  %v4813_v14 = vpop.f32.mrf.mxu3 }
 0x619   : > { %v5760_v25 = vsel %vm5632_vm12, %v5568_v52, %v5696_v48  ;;  %v5765_v57 = vpack.c.bf16 %v5704_v47, %v15443_v30  ;;  %v5769_v38 = vpack.c.bf16 %v5712_v15, %v15446_v16  ;;  %v5773_v23 = vpack.c.bf16 %v5720_v22, %v15451_v56  ;;  %v17154_v47 = vld [vmem:[#allocation50_spill] sm:$0xff]  ;;  %v17155_v22 = vld [vmem:[#allocation44_spill] sm:$0xff] }
 0x61a   : > { %v5777_v63 = vpack.c.bf16 %v5728_v53, %v15454_v21  ;;  %v5781_v39 = vpack.c.bf16 %v5736_v2, %v15457_v9  ;;  %v5785_v35 = vpack.c.bf16 %v5744_v40, %v15460_v31  ;;  %v5789_v33 = vpack.c.bf16 %v5752_v29, %v15462_v6  ;;  %v4856_v31 = vpop.f32.mrf.mxu0 }
 0x61b   : > { %v5793_v8 = vpack.c.bf16 %v5760_v25, %v15470_v55  ;;  %5797 = vst [vmem:[#allocation2 + $0x10] sm:$0xff] %v5765_v57  ;;  %v15531_v30 = vsub.f32 %v15358_v7, %v15487_v12  ;;  %v15535_v16 = vsub.f32 %v15369_v27, %v15487_v12  ;;  %v15539_v56 = vsub.f32 %v15382_v43, %v15487_v12 }
 0x61c   : > { %5801 = vst [vmem:[#allocation2 + $0x30] sm:$0xff] %v5769_v38  ;;  %v15543_v21 = vsub.f32 %v15394_v17, %v15487_v12  ;;  %v15547_v9 = vsub.f32 %v15400_v3, %v15487_v12  ;;  %v15551_v7 = vsub.f32 %v15418_v19, %v15487_v12  ;;  %v5085_v27 = vmul.f32 %v15507_v10, %v15507_v10 }
 0x61d   : > { %5805 = vst [vmem:[#allocation2 + $0x50] sm:$0xff] %v5773_v23  ;;  %v5093_v43 = vmul.f32 %v15511_v0, %v15511_v0  ;;  %v4828_v17 = vadd.f32 %v15301_v62, %v15475_v13  ;;  %v4807_v3 = vadd.f32 %v15421_v46, %v15424_v28  ;;  %v4831_v6 = vadd.f32 %v15336_v37, %v15479_v34 }
 0x61e   : > { %5809 = vst [vmem:[#allocation2 + $0x70] sm:$0xff] %v5777_v63  ;;  %v5101_v55 = vmul.f32 %v15531_v30, %v15531_v30  ;;  %v4826_v52 = vadd.f32 %v15293_v32, %v15433_v44  ;;  %v4833_v13 = vadd.f32 %v15367_v41, %v15484_v54  ;;  %v5109_v37 = vmul.f32 %v15535_v16, %v15535_v16 }
 0x61f   : > { %v4890_v61 = vpop.f32.mrf.mxu2  ;;  %v4869_v19 = vpop.f32.mrf.mxu1  ;;  %5813 = vst [vmem:[#allocation2 + $0x90] sm:$0xff] %v5781_v39  ;;  %v5221_v12 = vadd.f32 %v5093_v43, %v5085_v27  ;;  %v4857_v18 = vadd.f32 %v4856_v31, %v4828_v17  ;;  %v4860_v62 = vadd.f32 %v15410_v51, %v4831_v6  ;;  %v4809_v32 = vadd.f32 %v15440_v50, %v15424_v28 }
 0x620   : > { %5817 = vst [vmem:[#allocation2 + $0xb0] sm:$0xff] %v5785_v35  ;;  %v4855_v34 = vadd.f32 %v15499_v24, %v4826_v52  ;;  %v4812_v44 = vadd.f32 %v15497_v42, %v15424_v28  ;;  %v4862_v51 = vadd.f32 %v15435_v45, %v4833_v13  ;;  %v4836_v41 = vadd.f32 %v15392_v5, %v4807_v3  ;;  %v4898_v4 = vpop.f32.mrf.mxu3 }
 0x621   : > { %5821 = vst [vmem:[#allocation2 + $0xd0] sm:$0xff] %v5789_v33  ;;  %v5222_v46 = vadd.f32 %v5221_v12, %v5101_v55  ;;  %v4886_v11 = vadd.f32 %v15467_v1, %v4857_v18  ;;  %v5117_v36 = vmul.f32 %v15539_v56, %v15539_v56  ;;  %v4889_v1 = vadd.f32 %v15501_v59, %v4860_v62 }
 0x622   : > { %5825 = vst [vmem:[#allocation2 + $0xf0] sm:$0xff] %v5793_v8  ;;  %v4884_v24 = vadd.f32 %v15438_v49, %v4855_v34  ;;  %v4814_v26 = vadd.f32 %v4813_v14, %v15424_v28  ;;  %v4865_v50 = vadd.f32 %v15465_v58, %v4836_v41  ;;  %v5125_v42 = vmul.f32 %v15543_v21, %v15543_v21  ;;  %v17156_v58 = vld [vmem:[#allocation42_spill] sm:$0xff] }
 0x623   : > { %v5223_v20 = vadd.f32 %v5222_v46, %v5109_v37  ;;  %v4891_v5 = vadd.f32 %v4890_v61, %v4862_v51  ;;  %v4838_v15 = vadd.f32 %v17154_v47, %v4809_v32  ;;  %v4841_v53 = vadd.f32 %v17155_v22, %v4812_v44  ;;  %v17157_v37 = vld [vmem:[#allocation38_spill] sm:$0xff] }
 0x624   : > { %v4994_v48 = vadd.f32 %v4886_v11, %v4884_v24  ;;  %v5133_v49 = vmul.f32 %v15547_v9, %v15547_v9  ;;  %v5141_v28 = vmul.f32 %v15551_v7, %v15551_v7  ;;  %v4843_v29 = vadd.f32 %v17156_v58, %v4814_v26 }
 0x625   : > { %v5224_v45 = vadd.f32 %v5223_v20, %v5117_v36  ;;  %v4867_v38 = vadd.f32 %v15503_v60, %v4838_v15  ;;  %v4870_v23 = vadd.f32 %v4869_v19, %v4841_v53 }
 0x626   : > { %v4995_v59 = vadd.f32 %v4994_v48, %v4889_v1 }
 0x627   : > { %v4893_v54 = vpop.f32.mrf.mxu2  ;;  %v5225_v2 = vadd.f32 %v5224_v45, %v5125_v42  ;;  %v4871_v25 = vpop.f32.mrf.mxu1  ;;  %v4899_v31 = vadd.f32 %v4898_v4, %v4870_v23 }
 0x628   : > { %v4894_v40 = vadd.f32 %v4893_v54, %v4865_v50  ;;  %v4996_v63 = vadd.f32 %v4995_v59, %v4891_v5  ;;  %v4872_v14 = vadd.f32 %v4871_v25, %v4843_v29  ;;  %v4900_v43 = vpop.f32.mrf.mxu3 }
 0x629   : > { %v5226_v57 = vadd.f32 %v5225_v2, %v5133_v49 }
 0x62a   : > { %v4997_v61 = vadd.f32 %v4996_v63, %v4894_v40  ;;  %v4901_v3 = vadd.f32 %v4900_v43, %v4872_v14 }
 0x62b   : > { %v5227_v35 = vadd.f32 %v5226_v57, %v5141_v28 }
 0x62d   : > { %v5228_v8 = vrot.slane %v5227_v35, 4 }
 0x62f   : > { %v4895_v39 = vpop.f32.mrf.mxu2  ;;  %v5229_v17 = vadd.f32 %v5228_v8, %v5227_v35 }
 0x630   : > { %v4896_v33 = vadd.f32 %v4895_v39, %v4867_v38 }
 0x631   : > { %v5230_v55 = vrot.slane %v5229_v17, 2 }
 0x632   : > { %v4998_v27 = vadd.f32 %v4997_v61, %v4896_v33 }
 0x633   : > { %v5231_v52 = vadd.f32 %v5230_v55, %v5229_v17  ;;  %v12324_v17 = vld [vmem:[#allocation22] sm:$0xff] }
 0x634   : > { %v4999_v6 = vadd.f32 %v4998_v27, %v4899_v31 }
 0x635   : > { %v5232_v62 = vrot.slane %v5231_v52, 1 }
 0x636   : > { %v5000_v12 = vadd.f32 %v4999_v6, %v4901_v3 }
 0x637   : > { %v5233_v19 = vadd.f32 %v5232_v62, %v5231_v52 }
 0x638   : > { %v5001_v18 = vrot.slane %v5000_v12, 4 }
 0x639   : > { %v5253_v46 = vmul.f32 %v5233_v19, %v17157_v37 }
 0x63a   : > { %v5002_v60 = vadd.f32 %v5001_v18, %v5000_v12  ;;  %v12325_v12 = vld [vmem:[#allocation23] sm:$0xff] }
 0x63b   : > { %v5261_v32 = vadd.f32 0.8, %v5253_v46  ;;  %v5497_v52 = vperm.slane %v12325_v12, 6 }
 0x63c   : > { %v5003_v13 = vrot.slane %v5002_v60, 2 }
 0x63d   : > { %12315 = vrsqrt.f32 %v5261_v32  ;;  %vm5329_vm14 = vweird.f32 %v5261_v32 }
 0x63e   : > { %v5004_v34 = vadd.f32 %v5003_v13, %v5002_v60 }
 0x640   : > { %v5005_v44 = vrot.slane %v5004_v34, 1 }
 0x642   : > { %v5006_v51 = vadd.f32 %v5005_v44, %v5004_v34 }
 0x643   : > { %v12316_v26 = vpop.eup %12315 }
 0x644   : > { %v5014_v41 = vmul.f32 %v5006_v51, %v17157_v37  ;;  %v5324_v45 = vmul.f32 %v12316_v26, %v5261_v32  ;;  %vm5330_vm13 = vweird.f32 %v12316_v26 }
 0x645   : > { %vm5331_vm15 = vmor %vm5329_vm14, %vm5330_vm13 }
 0x646   : > { %v15598_v54 = vsub.f32 %v4884_v24, %v5014_v41  ;;  %v15600_v36 = vsub.f32 %v4886_v11, %v5014_v41  ;;  %v15602_v20 = vsub.f32 %v4889_v1, %v5014_v41  ;;  %v15604_v4 = vsub.f32 %v4891_v5, %v5014_v41 }
 0x647   : > { %v15610_v48 = vsub.f32 %v4894_v40, %v5014_v41  ;;  %v5325_v11 = vmul.f32 %v12316_v26, %v5324_v45  ;;  %v15616_v22 = vsub.f32 %v4896_v33, %v5014_v41  ;;  %v15622_v29 = vsub.f32 %v4899_v31, %v5014_v41 }
 0x648   : > { %v5086_v50 = vmul.f32 %v15598_v54, %v15598_v54  ;;  %v5094_v42 = vmul.f32 %v15600_v36, %v15600_v36  ;;  %v5102_v24 = vmul.f32 %v15602_v20, %v15602_v20  ;;  %v5110_v1 = vmul.f32 %v15604_v4, %v15604_v4 }
 0x649   : > { %v5326_v5 = vmul.f32 0.5, %v5325_v11  ;;  %v5118_v53 = vmul.f32 %v15610_v48, %v15610_v48  ;;  %v5126_v28 = vmul.f32 %v15616_v22, %v15616_v22  ;;  %v15632_v33 = vsub.f32 %v4901_v3, %v5014_v41 }
 0x64a   : > { %v5234_v47 = vadd.f32 %v5094_v42, %v5086_v50  ;;  %v5134_v8 = vmul.f32 %v15622_v29, %v15622_v29 }
 0x64b   : > { %v5327_v2 = vsub.f32 1.5, %v5326_v5 }
 0x64c   : > { %v5235_v15 = vadd.f32 %v5234_v47, %v5102_v24 }
 0x64d   : > { %v5328_v40 = vmul.f32 %v12316_v26, %v5327_v2 }
 0x64e   : > { %v5236_v49 = vadd.f32 %v5235_v15, %v5110_v1 }
 0x64f   : > { %v5332_v58 = vsel %vm5331_vm15, %v12316_v26, %v5328_v40 }
 0x650   : > { %v5237_v59 = vadd.f32 %v5236_v49, %v5118_v53  ;;  %v5349_v57 = vmul.f32 %v5332_v58, %v15507_v10  ;;  %v5357_v38 = vmul.f32 %v5332_v58, %v15511_v0  ;;  %v5365_v23 = vmul.f32 %v5332_v58, %v15531_v30 }
 0x651   : > { %v5373_v63 = vmul.f32 %v5332_v58, %v15535_v16  ;;  %v5381_v39 = vmul.f32 %v5332_v58, %v15539_v56  ;;  %v5389_v35 = vmul.f32 %v5332_v58, %v15543_v21  ;;  %v5397_v14 = vmul.f32 %v5332_v58, %v15547_v9 }
 0x652   : > { %v5238_v25 = vadd.f32 %v5237_v59, %v5126_v28  ;;  %v5405_v61 = vmul.f32 %v5332_v58, %v15551_v7  ;;  %v5142_v0 = vmul.f32 %v15632_v33, %v15632_v33  ;;  %v5415_v7 = vperm.slane %v12324_v17, 6 }
 0x654   : > { %v5239_v10 = vadd.f32 %v5238_v25, %v5134_v8  ;;  %v5431_v6 = vmul.f32 %v5415_v7, %v5349_v57  ;;  %v5439_v55 = vmul.f32 %v5415_v7, %v5357_v38  ;;  %v5447_v18 = vmul.f32 %v5415_v7, %v5365_v23 }
 0x655   : > { %v5479_v62 = vmul.f32 %v5415_v7, %v5397_v14  ;;  %v5487_v60 = vmul.f32 %v5415_v7, %v5405_v61  ;;  %v5455_v19 = vmul.f32 %v5415_v7, %v5373_v63  ;;  %v5463_v46 = vmul.f32 %v5415_v7, %v5381_v39 }
 0x656   : > { %v5240_v30 = vadd.f32 %v5239_v10, %v5142_v0  ;;  %v5513_v34 = vadd.f32 %v5497_v52, %v5431_v6  ;;  %v5521_v32 = vadd.f32 %v5497_v52, %v5439_v55  ;;  %v5529_v44 = vadd.f32 %v5497_v52, %v5447_v18 }
 0x657   : > { %v5471_v41 = vmul.f32 %v5415_v7, %v5389_v35  ;;  %v5569_v26 = vadd.f32 %v5497_v52, %v5487_v60  ;;  %v5537_v50 = vadd.f32 %v5497_v52, %v5455_v19  ;;  %v15639_v45 = vadd.f32 %v5497_v52, %v5463_v46 }
 0x658   : > { %v5241_v31 = vrot.slane %v5240_v30, 4  ;;  %vm5577_vm0 = vcmp.ge.f32.partialorder %v5513_v34, 0.0  ;;  %vm5585_vm1 = vcmp.ge.f32.partialorder %v5521_v32, 0.0  ;;  %v5641_v24 = vmul.f32 0.2, %v5513_v34 }
 0x659   : > { %vm5593_vm2 = vcmp.ge.f32.partialorder %v5529_v44, 0.0  ;;  %v5649_v47 = vmul.f32 0.2, %v5521_v32  ;;  %v5657_v11 = vmul.f32 0.2, %v5529_v44  ;;  %v5553_v53 = vadd.f32 %v5497_v52, %v5471_v41 }
 0x65a   : > { %v5242_v16 = vadd.f32 %v5241_v31, %v5240_v30  ;;  %v5697_v5 = vmul.f32 0.2, %v5569_v26  ;;  %vm5633_vm4 = vcmp.ge.f32.partialorder %v5569_v26, 0.0  ;;  %v5665_v49 = vmul.f32 0.2, %v5537_v50 }
 0x65b   : > { %vm5601_vm6 = vcmp.ge.f32.partialorder %v5537_v50, 0.0  ;;  %v5673_v59 = vmul.f32 0.2, %v15639_v45  ;;  %v15643_v40 = vsel %vm5577_vm0, %v5513_v34, %v5641_v24  ;;  %vm5609_vm7 = vcmp.ge.f32.partialorder %v15639_v45, 0.0 }
 0x65c   : > { %v5243_v27 = vrot.slane %v5242_v16, 2  ;;  %v15647_v58 = vsel %vm5585_vm1, %v5521_v32, %v5649_v47  ;;  %v15650_v25 = vsel %vm5593_vm2, %v5529_v44, %v5657_v11  ;;  %v15655_v38 = vsel %vm5633_vm4, %v5569_v26, %v5697_v5 }
 0x65d   : > { %v5416_v23 = vperm.slane %v12324_v17, 7  ;;  %vm5617_vm10 = vcmp.ge.f32.partialorder %v5553_v53, 0.0  ;;  %v5498_v39 = vperm.slane %v12325_v12, 7  ;;  %v5681_v35 = vmul.f32 0.2, %v5553_v53 }
 0x65e   : > { %v5244_v56 = vadd.f32 %v5243_v27, %v5242_v16  ;;  %v5729_v14 = vsel %vm5601_vm6, %v5537_v50, %v5665_v49  ;;  %v5737_v18 = vsel %vm5609_vm7, %v15639_v45, %v5673_v59 }
 0x660   : > { %v5245_v43 = vrot.slane %v5244_v56, 1 }
 0x662   : > { %v5246_v21 = vadd.f32 %v5245_v43, %v5244_v56 }
 0x664   : > { %v5254_v9 = vmul.f32 %v5246_v21, %v17157_v37  ;;  %v5561_v37 = vadd.f32 %v5497_v52, %v5479_v62 }
 0x666   : > { %v5262_v3 = vadd.f32 0.8, %v5254_v9  ;;  %vm5625_vm3 = vcmp.ge.f32.partialorder %v5561_v37, 0.0  ;;  %v5689_v15 = vmul.f32 0.2, %v5561_v37 }
 0x668   : > { %12317 = vrsqrt.f32 %v5262_v3  ;;  %vm5339_vm8 = vweird.f32 %v5262_v3  ;;  %v15653_v57 = vsel %vm5625_vm3, %v5561_v37, %v5689_v15 }
 0x66e   : > { %v12318_v13 = vpop.eup %12317 }
 0x66f   : > { %v5334_v51 = vmul.f32 %v12318_v13, %v5262_v3  ;;  %vm5340_vm5 = vweird.f32 %v12318_v13 }
 0x670   : > { %vm5341_vm9 = vmor %vm5339_vm8, %vm5340_vm5 }
 0x671   : > { %v5335_v42 = vmul.f32 %v12318_v13, %v5334_v51 }
 0x673   : > { %v5336_v1 = vmul.f32 0.5, %v5335_v42 }
 0x675   : > { %v5337_v2 = vsub.f32 1.5, %v5336_v1 }
 0x677   : > { %v5338_v28 = vmul.f32 %v12318_v13, %v5337_v2 }
 0x679   : > { %v5342_v63 = vsel %vm5341_vm9, %v12318_v13, %v5338_v28  ;;  %v5745_v13 = vsel %vm5617_vm10, %v5553_v53, %v5681_v35 }
 0x67a   : > { %v5350_v61 = vmul.f32 %v5342_v63, %v15598_v54  ;;  %v5358_v8 = vmul.f32 %v5342_v63, %v15600_v36  ;;  %v5366_v10 = vmul.f32 %v5342_v63, %v15602_v20  ;;  %v5374_v0 = vmul.f32 %v5342_v63, %v15604_v4 }
 0x67b   : > { %v5382_v30 = vmul.f32 %v5342_v63, %v15610_v48  ;;  %v5390_v31 = vmul.f32 %v5342_v63, %v15616_v22  ;;  %v5398_v16 = vmul.f32 %v5342_v63, %v15622_v29  ;;  %v5406_v27 = vmul.f32 %v5342_v63, %v15632_v33 }
 0x67c   : > { %v5432_v56 = vmul.f32 %v5416_v23, %v5350_v61  ;;  %v5440_v43 = vmul.f32 %v5416_v23, %v5358_v8  ;;  %v5448_v21 = vmul.f32 %v5416_v23, %v5366_v10  ;;  %v5456_v9 = vmul.f32 %v5416_v23, %v5374_v0 }
 0x67d   : > { %v5464_v17 = vmul.f32 %v5416_v23, %v5382_v30  ;;  %v5472_v54 = vmul.f32 %v5416_v23, %v5390_v31  ;;  %v5480_v7 = vmul.f32 %v5416_v23, %v5398_v16  ;;  %v5488_v36 = vmul.f32 %v5416_v23, %v5406_v27 }
 0x67e   : > { %v5514_v3 = vadd.f32 %v5498_v39, %v5432_v56  ;;  %v5522_v20 = vadd.f32 %v5498_v39, %v5440_v43  ;;  %v5530_v6 = vadd.f32 %v5498_v39, %v5448_v21  ;;  %v5538_v4 = vadd.f32 %v5498_v39, %v5456_v9 }
 0x67f   : > { %v5546_v55 = vadd.f32 %v5498_v39, %v5464_v17  ;;  %v5554_v48 = vadd.f32 %v5498_v39, %v5472_v54  ;;  %v5562_v12 = vadd.f32 %v5498_v39, %v5480_v7  ;;  %v5570_v22 = vadd.f32 %v5498_v39, %v5488_v36 }
 0x680   : > { %vm5578_vm11 = vcmp.ge.f32.partialorder %v5514_v3, 0.0  ;;  %vm5586_vm12 = vcmp.ge.f32.partialorder %v5522_v20, 0.0  ;;  %vm5594_vm13 = vcmp.ge.f32.partialorder %v5530_v6, 0.0  ;;  %vm5602_vm14 = vcmp.ge.f32.partialorder %v5538_v4, 0.0 }
 0x681   : > { %vm5610_vm15 = vcmp.ge.f32.partialorder %v5546_v55, 0.0  ;;  %vm5618_vm0 = vcmp.ge.f32.partialorder %v5554_v48, 0.0  ;;  %vm5626_vm1 = vcmp.ge.f32.partialorder %v5562_v12, 0.0  ;;  %vm5634_vm2 = vcmp.ge.f32.partialorder %v5570_v22, 0.0 }
 0x682   : > { %v5642_v29 = vmul.f32 0.2, %v5514_v3  ;;  %v5650_v33 = vmul.f32 0.2, %v5522_v20  ;;  %v5658_v52 = vmul.f32 0.2, %v5530_v6 }
 0x683   : > { %v5666_v62 = vmul.f32 0.2, %v5538_v4  ;;  %v5674_v60 = vmul.f32 0.2, %v5546_v55  ;;  %v5682_v19 = vmul.f32 0.2, %v5554_v48 }
 0x684   : > { %v5690_v46 = vmul.f32 0.2, %v5562_v12  ;;  %v5698_v34 = vmul.f32 0.2, %v5570_v22  ;;  %v5706_v32 = vsel %vm5578_vm11, %v5514_v3, %v5642_v29  ;;  %v5714_v44 = vsel %vm5586_vm12, %v5522_v20, %v5650_v33 }
 0x685   : > { %v5722_v51 = vsel %vm5594_vm13, %v5530_v6, %v5658_v52  ;;  %v5730_v41 = vsel %vm5602_vm14, %v5538_v4, %v5666_v62  ;;  %v5738_v37 = vsel %vm5610_vm15, %v5546_v55, %v5674_v60  ;;  %v5746_v26 = vsel %vm5618_vm0, %v5554_v48, %v5682_v19 }
 0x686   : > { %v5754_v50 = vsel %vm5626_vm1, %v5562_v12, %v5690_v46  ;;  %v5762_v42 = vsel %vm5634_vm2, %v5570_v22, %v5698_v34  ;;  %v5766_v45 = vpack.c.bf16 %v5706_v32, %v15643_v40  ;;  %v5770_v24 = vpack.c.bf16 %v5714_v44, %v15647_v58 }
 0x687   : > { %v5774_v47 = vpack.c.bf16 %v5722_v51, %v15650_v25  ;;  %v5778_v11 = vpack.c.bf16 %v5730_v41, %v5729_v14  ;;  %v5782_v1 = vpack.c.bf16 %v5738_v37, %v5737_v18  ;;  %v5786_v15 = vpack.c.bf16 %v5746_v26, %v5745_v13 }
 0x688   : > { %v5790_v5 = vpack.c.bf16 %v5754_v50, %v15653_v57  ;;  %v5794_v53 = vpack.c.bf16 %v5762_v42, %v15655_v38  ;;  %5798 = vst [vmem:[#allocation2 + $0x18] sm:$0xff] %v5766_v45 }
 0x689   : > { %5802 = vst [vmem:[#allocation2 + $0x38] sm:$0xff] %v5770_v24 }
 0x68a   : > { %5806 = vst [vmem:[#allocation2 + $0x58] sm:$0xff] %v5774_v47 }
 0x68b   : > { %5810 = vst [vmem:[#allocation2 + $0x78] sm:$0xff] %v5778_v11 }
 0x68c   : > { %5814 = vst [vmem:[#allocation2 + $0x98] sm:$0xff] %v5782_v1 }
 0x68d   : > { %5818 = vst [vmem:[#allocation2 + $0xb8] sm:$0xff] %v5786_v15 }
 0x68e   : > { %5822 = vst [vmem:[#allocation2 + $0xd8] sm:$0xff] %v5790_v5 }
 0x68f   : > { %5826 = vst [vmem:[#allocation2 + $0xf8] sm:$0xff] %v5794_v53 }
 0x690 PF: > { %v10520_v49 = vld [vmem:[%s13276_s11 + $0xe0] sm:$0xf]  ;;  %v11842_v2 = vld [vmem:[%s13276_s11 + $0xec] sm:$0xf0]  ;;  %s17199_s30 = sld [smem:[#allocation98_spill]] (%p13153_p2) }
 0x691   : > { %v10648_v59 = vld [vmem:[%s13276_s11 + $0x1e0] sm:$0xf]  ;;  %v10521_v40 = vor.u32 %v11842_v2, %v10520_v49  ;;  %v11874_v28 = vld [vmem:[%s13276_s11 + $0x1ec] sm:$0xf0] }
 0x692   : > { %v10776_v58 = vld [vmem:[%s13276_s11 + $0x2e0] sm:$0xf]  ;;  %v11906_v25 = vld [vmem:[%s13276_s11 + $0x2ec] sm:$0xf0]  ;;  %v10649_v57 = vor.u32 %v11874_v28, %v10648_v59 }
 0x693   : > { %v10777_v38 = vor.u32 %v11906_v25, %v10776_v58  ;;  %v10904_v23 = vld [vmem:[%s13276_s11 + $0x3e0] sm:$0xf]  ;;  %v11938_v63 = vld [vmem:[%s13276_s11 + $0x3ec] sm:$0xf0]  ;;  %7565 = vmatpush.bf16.msra.mxu0 %v10521_v40 }
 0x694   : > { %v10504_v39 = vld [vmem:[%s13276_s11 + $0xc0] sm:$0xf]  ;;  %v10905_v35 = vor.u32 %v11938_v63, %v10904_v23  ;;  %v11838_v14 = vld [vmem:[%s13276_s11 + $0xcc] sm:$0xf0]  ;;  %7594 = vmatpush.bf16.msra.mxu1 %v10649_v57 }
 0x695   : > { %v10632_v61 = vld [vmem:[%s13276_s11 + $0x1c0] sm:$0xf]  ;;  %v11870_v8 = vld [vmem:[%s13276_s11 + $0x1cc] sm:$0xf0]  ;;  %7623 = vmatpush.bf16.msra.mxu2 %v10777_v38  ;;  %v10505_v10 = vor.u32 %v11838_v14, %v10504_v39 }
 0x696   : > { %v10633_v0 = vor.u32 %v11870_v8, %v10632_v61  ;;  %v10760_v30 = vld [vmem:[%s13276_s11 + $0x2c0] sm:$0xf]  ;;  %v11902_v31 = vld [vmem:[%s13276_s11 + $0x2cc] sm:$0xf0]  ;;  %7652 = vmatpush.bf16.msra.mxu3 %v10905_v35 }
 0x697   : > { %v10888_v16 = vld [vmem:[%s13276_s11 + $0x3c0] sm:$0xf]  ;;  %v10761_v27 = vor.u32 %v11902_v31, %v10760_v30  ;;  %v11934_v56 = vld [vmem:[%s13276_s11 + $0x3cc] sm:$0xf0]  ;;  %7566 = vmatpush.bf16.msra.mxu0 %v10505_v10 }
 0x698   : > { %v10488_v43 = vld [vmem:[%s13276_s11 + $0xa0] sm:$0xf]  ;;  %v11834_v21 = vld [vmem:[%s13276_s11 + $0xac] sm:$0xf0]  ;;  %v10889_v9 = vor.u32 %v11934_v56, %v10888_v16  ;;  %7595 = vmatpush.bf16.msra.mxu1 %v10633_v0 }
 0x699   : > { %v10616_v17 = vld [vmem:[%s13276_s11 + $0x1a0] sm:$0xf]  ;;  %v11866_v54 = vld [vmem:[%s13276_s11 + $0x1ac] sm:$0xf0]  ;;  %v10489_v36 = vor.u32 %v11834_v21, %v10488_v43  ;;  %7624 = vmatpush.bf16.msra.mxu2 %v10761_v27 }
 0x69a   : > { %v10744_v7 = vld [vmem:[%s13276_s11 + $0x2a0] sm:$0xf]  ;;  %v11898_v3 = vld [vmem:[%s13276_s11 + $0x2ac] sm:$0xf0]  ;;  %v10617_v4 = vor.u32 %v11866_v54, %v10616_v17  ;;  %7653 = vmatpush.bf16.msra.mxu3 %v10889_v9 }
 0x69b   : > { %v10872_v20 = vld [vmem:[%s13276_s11 + $0x3a0] sm:$0xf]  ;;  %v11930_v6 = vld [vmem:[%s13276_s11 + $0x3ac] sm:$0xf0]  ;;  %v10745_v55 = vor.u32 %v11898_v3, %v10744_v7  ;;  %7567 = vmatpush.bf16.msra.mxu0 %v10489_v36  ;;  %v10280_v7 = vld [vmem:[#allocation2] sm:$0xf] }
 0x69c   : > { %v10472_v48 = vld [vmem:[%s13276_s11 + $0x80] sm:$0xf]  ;;  %v11830_v12 = vld [vmem:[%s13276_s11 + $0x8c] sm:$0xf0]  ;;  %v10873_v29 = vor.u32 %v11930_v6, %v10872_v20  ;;  %7596 = vmatpush.bf16.msra.mxu1 %v10617_v4  ;;  %v11784_v36 = vld [vmem:[#allocation2 + $0x1c] sm:$0xf0] }
 0x69d   : > { %v10600_v22 = vld [vmem:[%s13276_s11 + $0x180] sm:$0xf]  ;;  %v11862_v33 = vld [vmem:[%s13276_s11 + $0x18c] sm:$0xf0]  ;;  %v10473_v19 = vor.u32 %v11830_v12, %v10472_v48  ;;  %7625 = vmatpush.bf16.msra.mxu2 %v10745_v55  ;;  %v11780_v3 = vld [vmem:[#allocation2 + $0x4] sm:$0xf] }
 0x69e   : > { %v10728_v52 = vld [vmem:[%s13276_s11 + $0x280] sm:$0xf]  ;;  %v11894_v18 = vld [vmem:[%s13276_s11 + $0x28c] sm:$0xf0]  ;;  %v10601_v13 = vor.u32 %v11862_v33, %v10600_v22  ;;  %7654 = vmatpush.bf16.msra.mxu3 %v10873_v29  ;;  %v10282_v20 = vld [vmem:[#allocation2 + $0x20] sm:$0xf0] }
 0x69f   : > { %v10856_v62 = vld [vmem:[%s13276_s11 + $0x380] sm:$0xf]  ;;  %v11926_v60 = vld [vmem:[%s13276_s11 + $0x38c] sm:$0xf0]  ;;  %v10729_v46 = vor.u32 %v11894_v18, %v10728_v52  ;;  %7568 = vmatpush.bf16.msra.mxu0 %v10473_v19  ;;  %v10288_v48 = vld [vmem:[#allocation2 + $0x8] sm:$0xf] }
 0x6a0   : > { %v10456_v34 = vld [vmem:[%s13276_s11 + $0x60] sm:$0xf]  ;;  %v11826_v32 = vld [vmem:[%s13276_s11 + $0x6c] sm:$0xf0]  ;;  %v10857_v51 = vor.u32 %v11926_v60, %v10856_v62  ;;  %7597 = vmatpush.bf16.msra.mxu1 %v10601_v13  ;;  %v11785_v52 = vld [vmem:[#allocation2 + $0x24] sm:$0xf0] }
 0x6a1   : > { %v10584_v44 = vld [vmem:[%s13276_s11 + $0x160] sm:$0xf]  ;;  %v11858_v41 = vld [vmem:[%s13276_s11 + $0x16c] sm:$0xf0]  ;;  %v10457_v45 = vor.u32 %v11826_v32, %v10456_v34  ;;  %7626 = vmatpush.bf16.msra.mxu2 %v10729_v46  ;;  %v15754_v32 = vor.u32 %v11784_v36, %v10280_v7 }
 0x6a2   : > { %v10712_v37 = vld [vmem:[%s13276_s11 + $0x260] sm:$0xf]  ;;  %v11890_v26 = vld [vmem:[%s13276_s11 + $0x26c] sm:$0xf0]  ;;  %v10585_v24 = vor.u32 %v11858_v41, %v10584_v44  ;;  %7655 = vmatpush.bf16.msra.mxu3 %v10857_v51 }
 0x6a3   : > { %v10840_v50 = vld [vmem:[%s13276_s11 + $0x360] sm:$0xf]  ;;  %v11922_v42 = vld [vmem:[%s13276_s11 + $0x36c] sm:$0xf0]  ;;  %v10713_v47 = vor.u32 %v11890_v26, %v10712_v37  ;;  %7569 = vmatpush.bf16.msra.mxu0 %v10457_v45  ;;  %v15759_v26 = vor.u32 %v11780_v3, %v10282_v20 }
 0x6a4   : > { %v10440_v11 = vld [vmem:[%s13276_s11 + $0x40] sm:$0xf]  ;;  %v11822_v1 = vld [vmem:[%s13276_s11 + $0x4c] sm:$0xf0]  ;;  %v10841_v5 = vor.u32 %v11922_v42, %v10840_v50  ;;  %7598 = vmatpush.bf16.msra.mxu1 %v10585_v24  ;;  %v15761_v50 = vor.u32 %v11785_v52, %v10288_v48  ;;  %v11793_v48 = vld [vmem:[#allocation2 + $0x64] sm:$0xf0] }
 0x6a5   : > { %v10568_v15 = vld [vmem:[%s13276_s11 + $0x140] sm:$0xf]  ;;  %v11854_v53 = vld [vmem:[%s13276_s11 + $0x14c] sm:$0xf0]  ;;  %v10441_v28 = vor.u32 %v11822_v1, %v10440_v11  ;;  %7627 = vmatpush.bf16.msra.mxu2 %v10713_v47 }
 0x6a6   : > { %v10696_v49 = vld [vmem:[%s13276_s11 + $0x240] sm:$0xf]  ;;  %v11886_v2 = vld [vmem:[%s13276_s11 + $0x24c] sm:$0xf0]  ;;  %v10569_v58 = vor.u32 %v11854_v53, %v10568_v15  ;;  %7656 = vmatpush.bf16.msra.mxu3 %v10841_v5 }
 0x6a7   : > { %v10824_v59 = vld [vmem:[%s13276_s11 + $0x340] sm:$0xf]  ;;  %v11918_v40 = vld [vmem:[%s13276_s11 + $0x34c] sm:$0xf0]  ;;  %v10697_v25 = vor.u32 %v11886_v2, %v10696_v49  ;;  %7570 = vmatpush.bf16.msra.mxu0 %v10441_v28 }
 0x6a8   : > { %v10424_v57 = vld [vmem:[%s13276_s11 + $0x20] sm:$0xf]  ;;  %v11818_v38 = vld [vmem:[%s13276_s11 + $0x2c] sm:$0xf0]  ;;  %v10825_v63 = vor.u32 %v11918_v40, %v10824_v59  ;;  %7599 = vmatpush.bf16.msra.mxu1 %v10569_v58 }
 0x6a9   : > { %v10552_v23 = vld [vmem:[%s13276_s11 + $0x120] sm:$0xf]  ;;  %v11850_v39 = vld [vmem:[%s13276_s11 + $0x12c] sm:$0xf0]  ;;  %v10425_v0 = vor.u32 %v11818_v38, %v10424_v57  ;;  %7628 = vmatpush.bf16.msra.mxu2 %v10697_v25 }
 0x6aa   : > { %v10680_v35 = vld [vmem:[%s13276_s11 + $0x220] sm:$0xf]  ;;  %v11882_v14 = vld [vmem:[%s13276_s11 + $0x22c] sm:$0xf0]  ;;  %v10553_v27 = vor.u32 %v11850_v39, %v10552_v23  ;;  %7657 = vmatpush.bf16.msra.mxu3 %v10825_v63 }
 0x6ab   : > { %v10808_v61 = vld [vmem:[%s13276_s11 + $0x320] sm:$0xf]  ;;  %v11914_v8 = vld [vmem:[%s13276_s11 + $0x32c] sm:$0xf0]  ;;  %v10681_v56 = vor.u32 %v11882_v14, %v10680_v35  ;;  %7571 = vmatpush.bf16.msra.mxu0 %v10425_v0 }
 0x6ac   : > { %v10408_v10 = vld [vmem:[%s13276_s11] sm:$0xf]  ;;  %v11814_v30 = vld [vmem:[%s13276_s11 + $0xc] sm:$0xf0]  ;;  %v10809_v17 = vor.u32 %v11914_v8, %v10808_v61  ;;  %7600 = vmatpush.bf16.msra.mxu1 %v10553_v27 }
 0x6ad   : > { %v10536_v31 = vld [vmem:[%s13276_s11 + $0x100] sm:$0xf]  ;;  %v11846_v16 = vld [vmem:[%s13276_s11 + $0x10c] sm:$0xf0]  ;;  %v10409_v55 = vor.u32 %v11814_v30, %v10408_v10  ;;  %7629 = vmatpush.bf16.msra.mxu2 %v10681_v56 }
 0x6ae   : > { %v10664_v43 = vld [vmem:[%s13276_s11 + $0x200] sm:$0xf]  ;;  %v11878_v21 = vld [vmem:[%s13276_s11 + $0x20c] sm:$0xf0]  ;;  %v10537_v29 = vor.u32 %v11846_v16, %v10536_v31  ;;  %7658 = vmatpush.bf16.msra.mxu3 %v10809_v17  ;;  %v10312_v31 = vld [vmem:[#allocation2 + $0x40] sm:$0xf] }
 0x6af   : > { %v10792_v9 = vld [vmem:[%s13276_s11 + $0x300] sm:$0xf]  ;;  %v11910_v54 = vld [vmem:[%s13276_s11 + $0x30c] sm:$0xf0]  ;;  %v10665_v33 = vor.u32 %v11878_v21, %v10664_v43  ;;  %7572 = vmatpush.bf16.msra.mxu0 %v10409_v55  ;;  %v11792_v16 = vld [vmem:[#allocation2 + $0x5c] sm:$0xf0] }
 0x6b0   : > { %v11288_v6 = vld [vmem:[%s13276_s11 + $0x6e0] sm:$0xf]  ;;  %v12034_v4 = vld [vmem:[%s13276_s11 + $0x6ec] sm:$0xf0]  ;;  %v10793_v60 = vor.u32 %v11910_v54, %v10792_v9  ;;  %7601 = vmatpush.bf16.msra.mxu1 %v10537_v29  ;;  %v11788_v17 = vld [vmem:[#allocation2 + $0x44] sm:$0xf] }
 0x6b1   : > { %v11416_v12 = vld [vmem:[%s13276_s11 + $0x7e0] sm:$0xf]  ;;  %v12066_v22 = vld [vmem:[%s13276_s11 + $0x7ec] sm:$0xf0]  ;;  %v11289_v19 = vor.u32 %v12034_v4, %v11288_v6  ;;  %7630 = vmatpush.bf16.msra.mxu2 %v10665_v33  ;;  %v10314_v54 = vld [vmem:[#allocation2 + $0x60] sm:$0xf0] }
 0x6b2   : > { %v11781_v18 = vld [vmem:[#allocation2 + $0xc] sm:$0xf]  ;;  %v11970_v46 = vld [vmem:[%s13276_s11 + $0x4ec] sm:$0xf0]  ;;  %v11417_v44 = vor.u32 %v12066_v22, %v11416_v12  ;;  %7659 = vmatpush.bf16.msra.mxu3 %v10793_v60  ;;  %7573 = vmatmul.bf16.vlgmr.msra.gmra.mxu0 %v15754_v32  ;;  %v10320_v6 = vld [vmem:[#allocation2 + $0x48] sm:$0xf] }
 0x6b3   : > { %v10290_v62 = vld [vmem:[#allocation2 + $0x28] sm:$0xf0]  ;;  %v12002_v51 = vld [vmem:[%s13276_s11 + $0x5ec] sm:$0xf0]  ;;  %7602 = vmatmul.bf16.vlgmr.msra.gmra.mxu1 %v15759_v26 }
 0x6b4   : > { %v11032_v13 = vld [vmem:[%s13276_s11 + $0x4e0] sm:$0xf]  ;;  %v12030_v37 = vld [vmem:[%s13276_s11 + $0x6cc] sm:$0xf0]  ;;  %v15765_v24 = vor.u32 %v11781_v18, %v10290_v62  ;;  %7631 = vmatmul.bf16.vlgmr.msra.gmra.mxu2 %v15761_v50 }
 0x6b5   : > { %v11160_v34 = vld [vmem:[%s13276_s11 + $0x5e0] sm:$0xf]  ;;  %v12062_v45 = vld [vmem:[%s13276_s11 + $0x7cc] sm:$0xf0]  ;;  %v11033_v47 = vor.u32 %v11970_v46, %v11032_v13  ;;  %7739 = vmatpush.bf16.msrb.mxu2 %v11289_v19  ;;  %v15798_v19 = vor.u32 %v11792_v16, %v10312_v31 }
 0x6b6   : > { %v11272_v41 = vld [vmem:[%s13276_s11 + $0x6c0] sm:$0xf]  ;;  %17158 = vst [vmem:[#allocation70_spill] sm:$0xff] %v15765_v24  ;;  %v11161_v11 = vor.u32 %v12002_v51, %v11160_v34  ;;  %v11966_v5 = vld [vmem:[%s13276_s11 + $0x4cc] sm:$0xf0]  ;;  %7768 = vmatpush.bf16.msrb.mxu3 %v11417_v44  ;;  %v15803_v51 = vor.u32 %v11788_v17, %v10314_v54 }
 0x6b7   : > { %v11400_v42 = vld [vmem:[%s13276_s11 + $0x7c0] sm:$0xf]  ;;  %v11273_v1 = vor.u32 %v12030_v37, %v11272_v41  ;;  %v11998_v2 = vld [vmem:[%s13276_s11 + $0x5cc] sm:$0xf0]  ;;  %7660 = vmatmul.bf16.vlgmr.msra.gmra.mxu3 %v15765_v24  ;;  %7681 = vmatpush.bf16.msrb.mxu0 %v11033_v47  ;;  %17159 = vst [vmem:[#allocation71_spill] sm:$0xff] %v15798_v19  ;;  %v15805_v41 = vor.u32 %v11793_v48, %v10320_v6 }
 0x6b8   : > { %v11016_v15 = vld [vmem:[%s13276_s11 + $0x4c0] sm:$0xf]  ;;  %v11401_v49 = vor.u32 %v12062_v45, %v11400_v42  ;;  %v12026_v40 = vld [vmem:[%s13276_s11 + $0x6ac] sm:$0xf0]  ;;  %7710 = vmatpush.bf16.msrb.mxu1 %v11161_v11  ;;  %17160 = vst [vmem:[#allocation72_spill] sm:$0xff] %v15803_v51 }
 0x6b9   : > { %v11144_v53 = vld [vmem:[%s13276_s11 + $0x5c0] sm:$0xf]  ;;  %v12058_v58 = vld [vmem:[%s13276_s11 + $0x7ac] sm:$0xf0]  ;;  %v11017_v25 = vor.u32 %v11966_v5, %v11016_v15  ;;  %7740 = vmatpush.bf16.msrb.mxu2 %v11273_v1  ;;  %17161 = vst [vmem:[#allocation73_spill] sm:$0xff] %v15805_v41 }
 0x6ba   : > { %v11256_v59 = vld [vmem:[%s13276_s11 + $0x6a0] sm:$0xf]  ;;  %v11145_v57 = vor.u32 %v11998_v2, %v11144_v53  ;;  %v11962_v63 = vld [vmem:[%s13276_s11 + $0x4ac] sm:$0xf0]  ;;  %7769 = vmatpush.bf16.msrb.mxu3 %v11401_v49  ;;  %v10344_v17 = vld [vmem:[#allocation2 + $0x80] sm:$0xf] }
 0x6bb   : > { %v11384_v28 = vld [vmem:[%s13276_s11 + $0x7a0] sm:$0xf]  ;;  %v11257_v38 = vor.u32 %v12026_v40, %v11256_v59  ;;  %v11994_v14 = vld [vmem:[%s13276_s11 + $0x5ac] sm:$0xf0]  ;;  %7682 = vmatpush.bf16.msrb.mxu0 %v11017_v25  ;;  %v11800_v54 = vld [vmem:[#allocation2 + $0x9c] sm:$0xf0] }
 0x6bc   : > { %v11000_v23 = vld [vmem:[%s13276_s11 + $0x4a0] sm:$0xf]  ;;  %v11385_v35 = vor.u32 %v12058_v58, %v11384_v28  ;;  %v12022_v8 = vld [vmem:[%s13276_s11 + $0x68c] sm:$0xf0]  ;;  %7711 = vmatpush.bf16.msrb.mxu1 %v11145_v57 }
 0x6bd   : > { %v11128_v39 = vld [vmem:[%s13276_s11 + $0x5a0] sm:$0xf]  ;;  %v12054_v0 = vld [vmem:[%s13276_s11 + $0x78c] sm:$0xf0]  ;;  %v11001_v30 = vor.u32 %v11962_v63, %v11000_v23  ;;  %7741 = vmatpush.bf16.msrb.mxu2 %v11257_v38 }
 0x6be   : > { %v11240_v61 = vld [vmem:[%s13276_s11 + $0x680] sm:$0xf]  ;;  %v11129_v27 = vor.u32 %v11994_v14, %v11128_v39  ;;  %v11958_v21 = vld [vmem:[%s13276_s11 + $0x48c] sm:$0xf0]  ;;  %7770 = vmatpush.bf16.msrb.mxu3 %v11385_v35 }
 0x6bf   : > { %v11368_v10 = vld [vmem:[%s13276_s11 + $0x780] sm:$0xf]  ;;  %v11241_v56 = vor.u32 %v12022_v8, %v11240_v61  ;;  %v11990_v36 = vld [vmem:[%s13276_s11 + $0x58c] sm:$0xf0]  ;;  %7683 = vmatpush.bf16.msrb.mxu0 %v11001_v30 }
 0x6c0   : > { %v10984_v43 = vld [vmem:[%s13276_s11 + $0x480] sm:$0xf]  ;;  %v11369_v7 = vor.u32 %v12054_v0, %v11368_v10  ;;  %v12018_v20 = vld [vmem:[%s13276_s11 + $0x66c] sm:$0xf0]  ;;  %7712 = vmatpush.bf16.msrb.mxu1 %v11129_v27 }
 0x6c1   : > { %v11112_v9 = vld [vmem:[%s13276_s11 + $0x580] sm:$0xf]  ;;  %v12050_v55 = vld [vmem:[%s13276_s11 + $0x76c] sm:$0xf0]  ;;  %v10985_v29 = vor.u32 %v11958_v21, %v10984_v43  ;;  %7742 = vmatpush.bf16.msrb.mxu2 %v11241_v56 }
 0x6c2   : > { %v11224_v3 = vld [vmem:[%s13276_s11 + $0x660] sm:$0xf]  ;;  %v11113_v33 = vor.u32 %v11990_v36, %v11112_v9  ;;  %v11954_v62 = vld [vmem:[%s13276_s11 + $0x46c] sm:$0xf0]  ;;  %7771 = vmatpush.bf16.msrb.mxu3 %v11369_v7  ;;  %7578 = vmatmul.bf16.gmra.mxu0 %v15798_v19  ;;  %v11796_v7 = vld [vmem:[#allocation2 + $0x84] sm:$0xf] }
 0x6c3   : > { %v11352_v4 = vld [vmem:[%s13276_s11 + $0x760] sm:$0xf]  ;;  %v11225_v52 = vor.u32 %v12018_v20, %v11224_v3  ;;  %v11986_v46 = vld [vmem:[%s13276_s11 + $0x56c] sm:$0xf0]  ;;  %7684 = vmatpush.bf16.msrb.mxu0 %v10985_v29  ;;  %7607 = vmatmul.bf16.gmra.mxu1 %v15803_v51  ;;  %v10346_v36 = vld [vmem:[#allocation2 + $0xa0] sm:$0xf0] }
 0x6c4   : > { %v11789_v12 = vld [vmem:[#allocation2 + $0x4c] sm:$0xf]  ;;  %v11353_v13 = vor.u32 %v12050_v55, %v11352_v4  ;;  %v12014_v44 = vld [vmem:[%s13276_s11 + $0x64c] sm:$0xf0]  ;;  %7713 = vmatpush.bf16.msrb.mxu1 %v11113_v33  ;;  %7636 = vmatmul.bf16.gmra.mxu2 %v15805_v41  ;;  %v10352_v3 = vld [vmem:[#allocation2 + $0x88] sm:$0xf] }
 0x6c5   : > { %v10322_v22 = vld [vmem:[#allocation2 + $0x68] sm:$0xf0]  ;;  %v12046_v42 = vld [vmem:[%s13276_s11 + $0x74c] sm:$0xf0]  ;;  %7743 = vmatpush.bf16.msrb.mxu2 %v11225_v52  ;;  %v11801_v20 = vld [vmem:[#allocation2 + $0xa4] sm:$0xf0] }
 0x6c6   : > { %v10968_v18 = vld [vmem:[%s13276_s11 + $0x460] sm:$0xf]  ;;  %v15809_v45 = vor.u32 %v11789_v12, %v10322_v22  ;;  %v11950_v5 = vld [vmem:[%s13276_s11 + $0x44c] sm:$0xf0]  ;;  %7772 = vmatpush.bf16.msrb.mxu3 %v11353_v13  ;;  %v15835_v12 = vor.u32 %v11800_v54, %v10344_v17  ;;  %v15837_v22 = vor.u32 %v11796_v7, %v10346_v36  ;;  %v15839_v29 = vor.u32 %v11801_v20, %v10352_v3  ;;  %v11904_v52 = vld [vmem:[%s13276_s11 + $0x2e4] sm:$0xf] }
 0x6c7   : > { %v11096_v60 = vld [vmem:[%s13276_s11 + $0x560] sm:$0xf]  ;;  %v10969_v47 = vor.u32 %v11954_v62, %v10968_v18  ;;  %v11982_v2 = vld [vmem:[%s13276_s11 + $0x54c] sm:$0xf0]  ;;  %v10778_v18 = vld [vmem:[%s13276_s11 + $0x2f0] sm:$0xf0] }
 0x6c8   : > { %v11208_v34 = vld [vmem:[%s13276_s11 + $0x640] sm:$0xf]  ;;  %17162 = vst [vmem:[#allocation74_spill] sm:$0xff] %v15809_v45  ;;  %v11097_v11 = vor.u32 %v11986_v46, %v11096_v60  ;;  %7665 = vmatmul.bf16.gmra.mxu3 %v15809_v45  ;;  %v12010_v28 = vld [vmem:[%s13276_s11 + $0x62c] sm:$0xf0]  ;;  %v10781_v60 = vor.u32 %v11904_v52, %v10778_v18 }
 0x6c9   : > { %v11336_v37 = vld [vmem:[%s13276_s11 + $0x740] sm:$0xf]  ;;  %v11209_v1 = vor.u32 %v12014_v44, %v11208_v34  ;;  %7685 = vmatpush.bf16.msrb.mxu0 %v10969_v47  ;;  %v11946_v38 = vld [vmem:[%s13276_s11 + $0x42c] sm:$0xf0]  ;;  %17163 = vst [vmem:[#allocation75_spill] sm:$0xff] %v15835_v12 }
 0x6ca   : > { %v10952_v15 = vld [vmem:[%s13276_s11 + $0x440] sm:$0xf]  ;;  %v11337_v53 = vor.u32 %v12046_v42, %v11336_v37  ;;  %7714 = vmatpush.bf16.msrb.mxu1 %v11097_v11  ;;  %v12042_v63 = vld [vmem:[%s13276_s11 + $0x72c] sm:$0xf0]  ;;  %17164 = vst [vmem:[#allocation76_spill] sm:$0xff] %v15837_v22 }
 0x6cb   : > { %v11080_v49 = vld [vmem:[%s13276_s11 + $0x540] sm:$0xf]  ;;  %v10953_v59 = vor.u32 %v11950_v5, %v10952_v15  ;;  %7744 = vmatpush.bf16.msrb.mxu2 %v11209_v1  ;;  %v11978_v14 = vld [vmem:[%s13276_s11 + $0x52c] sm:$0xf0]  ;;  %17165 = vst [vmem:[#allocation77_spill] sm:$0xff] %v15839_v29 }
 0x6cc   : > { %v11192_v40 = vld [vmem:[%s13276_s11 + $0x620] sm:$0xf]  ;;  %v11081_v25 = vor.u32 %v11982_v2, %v11080_v49  ;;  %7773 = vmatpush.bf16.msrb.mxu3 %v11337_v53  ;;  %v12006_v8 = vld [vmem:[%s13276_s11 + $0x60c] sm:$0xf0]  ;;  %v11840_v62 = vld [vmem:[%s13276_s11 + $0xe4] sm:$0xf] }
 0x6cd   : > { %v10936_v58 = vld [vmem:[%s13276_s11 + $0x420] sm:$0xf]  ;;  %v11193_v57 = vor.u32 %v12010_v28, %v11192_v40  ;;  %7686 = vmatpush.bf16.msrb.mxu0 %v10953_v59  ;;  %v12038_v30 = vld [vmem:[%s13276_s11 + $0x70c] sm:$0xf0]  ;;  %v10522_v13 = vld [vmem:[%s13276_s11 + $0xf0] sm:$0xf0] }
 0x6ce   : > { %v11320_v23 = vld [vmem:[%s13276_s11 + $0x720] sm:$0xf]  ;;  %v10937_v10 = vor.u32 %v11946_v38, %v10936_v58  ;;  %7715 = vmatpush.bf16.msrb.mxu1 %v11081_v25  ;;  %v11942_v56 = vld [vmem:[%s13276_s11 + $0x40c] sm:$0xf0]  ;;  %v11936_v46 = vld [vmem:[%s13276_s11 + $0x3e4] sm:$0xf]  ;;  %v10525_v44 = vor.u32 %v11840_v62, %v10522_v13 }
 0x6cf   : > { %v11321_v39 = vor.u32 %v12042_v63, %v11320_v23  ;;  %v11064_v35 = vld [vmem:[%s13276_s11 + $0x520] sm:$0xf]  ;;  %7745 = vmatpush.bf16.msrb.mxu2 %v11193_v57  ;;  %v11974_v9 = vld [vmem:[%s13276_s11 + $0x50c] sm:$0xf0]  ;;  %v10906_v34 = vld [vmem:[%s13276_s11 + $0x3f0] sm:$0xf0] }
 0x6d0   : > { %v11176_v61 = vld [vmem:[%s13276_s11 + $0x600] sm:$0xf]  ;;  %v11065_v31 = vor.u32 %v11978_v14, %v11064_v35  ;;  %v10909_v37 = vor.u32 %v11936_v46, %v10906_v34  ;;  %v11872_v42 = vld [vmem:[%s13276_s11 + $0x1e4] sm:$0xf]  ;;  %v10650_v47 = vld [vmem:[%s13276_s11 + $0x1f0] sm:$0xf0] }
 0x6d1   : > { %v11304_v0 = vld [vmem:[%s13276_s11 + $0x700] sm:$0xf]  ;;  %v11177_v16 = vor.u32 %v12006_v8, %v11176_v61  ;;  %7774 = vmatpush.bf16.msrb.mxu3 %v11321_v39  ;;  %7687 = vmatpush.bf16.msrb.mxu0 %v10937_v10  ;;  %v11900_v11 = vld [vmem:[%s13276_s11 + $0x2c4] sm:$0xf]  ;;  %v10653_v1 = vor.u32 %v11872_v42, %v10650_v47  ;;  %v10762_v15 = vld [vmem:[%s13276_s11 + $0x2d0] sm:$0xf0] }
 0x6d2   : > { %v10920_v27 = vld [vmem:[%s13276_s11 + $0x400] sm:$0xf]  ;;  %v11305_v43 = vor.u32 %v12038_v30, %v11304_v0  ;;  %7716 = vmatpush.bf16.msrb.mxu1 %v11065_v31  ;;  %7583 = vmatmul.bf16.gmra.mxu0 %v15835_v12  ;;  %v11836_v5 = vld [vmem:[%s13276_s11 + $0xc4] sm:$0xf]  ;;  %v10506_v53 = vld [vmem:[%s13276_s11 + $0xd0] sm:$0xf0]  ;;  %v10765_v49 = vor.u32 %v11900_v11, %v10762_v15 }
 0x6d3   : > { %v11048_v21 = vld [vmem:[%s13276_s11 + $0x500] sm:$0xf]  ;;  %v10921_v6 = vor.u32 %v11942_v56, %v10920_v27  ;;  %7746 = vmatpush.bf16.msrb.mxu2 %v11177_v16  ;;  %7612 = vmatmul.bf16.gmra.mxu1 %v15837_v22  ;;  %v10509_v2 = vor.u32 %v11836_v5, %v10506_v53  ;;  %v11932_v59 = vld [vmem:[%s13276_s11 + $0x3c4] sm:$0xf]  ;;  %v10890_v40 = vld [vmem:[%s13276_s11 + $0x3d0] sm:$0xf0] }
 0x6d4   : > { %v11797_v4 = vld [vmem:[#allocation2 + $0x8c] sm:$0xf]  ;;  %v11049_v48 = vor.u32 %v11974_v9, %v11048_v21  ;;  %7641 = vmatmul.bf16.gmra.mxu2 %v15839_v29  ;;  %v11868_v28 = vld [vmem:[%s13276_s11 + $0x1c4] sm:$0xf]  ;;  %v10893_v58 = vor.u32 %v11932_v59, %v10890_v40  ;;  %v10634_v25 = vld [vmem:[%s13276_s11 + $0x1d0] sm:$0xf0] }
 0x6d5   : > { %v10354_v55 = vld [vmem:[#allocation2 + $0xa8] sm:$0xf0]  ;;  %7775 = vmatpush.bf16.msrb.mxu3 %v11305_v43  ;;  %7688 = vmatpush.bf16.msrb.mxu0 %v10921_v6  ;;  %v10637_v57 = vor.u32 %v11868_v28, %v10634_v25  ;;  %v10376_v38 = vld [vmem:[#allocation2 + $0xc0] sm:$0xf]  ;;  %v11804_v63 = vld [vmem:[#allocation2 + $0xc4] sm:$0xf] }
 0x6d6   : > { %v15841_v33 = vor.u32 %v11797_v4, %v10354_v55  ;;  %7717 = vmatpush.bf16.msrb.mxu1 %v11049_v48  ;;  %v11808_v23 = vld [vmem:[#allocation2 + $0xdc] sm:$0xf0]  ;;  %v10378_v39 = vld [vmem:[#allocation2 + $0xe0] sm:$0xf0]  ;;  %v10384_v35 = vld [vmem:[#allocation2 + $0xc8] sm:$0xf] }
 0x6d7   : > { %7855 = vmatpush.bf16.msra.mxu2 %v10781_v60  ;;  %v11809_v14 = vld [vmem:[#allocation2 + $0xe4] sm:$0xf0]  ;;  %v11805_v61 = vld [vmem:[#allocation2 + $0xcc] sm:$0xf]  ;;  %v15863_v10 = vor.u32 %v11808_v23, %v10376_v38  ;;  %v15865_v0 = vor.u32 %v11804_v63, %v10378_v39  ;;  %v11896_v16 = vld [vmem:[%s13276_s11 + $0x2a4] sm:$0xf] }
 0x6d8   : > { %17166 = vst [vmem:[#allocation78_spill] sm:$0xff] %v15841_v33  ;;  %7670 = vmatmul.bf16.gmra.mxu3 %v15841_v33  ;;  %v10386_v8 = vld [vmem:[#allocation2 + $0xe8] sm:$0xf0]  ;;  %v15867_v30 = vor.u32 %v11809_v14, %v10384_v35  ;;  %v10746_v27 = vld [vmem:[%s13276_s11 + $0x2b0] sm:$0xf0] }
 0x6d9   : > { %7797 = vmatpush.bf16.msra.mxu0 %v10525_v44  ;;  %7884 = vmatpush.bf16.msra.mxu3 %v10909_v37  ;;  %17167 = vst [vmem:[#allocation79_spill] sm:$0xff] %v15863_v10  ;;  %v15869_v31 = vor.u32 %v11805_v61, %v10386_v8  ;;  %v11832_v56 = vld [vmem:[%s13276_s11 + $0xa4] sm:$0xf]  ;;  %v10749_v43 = vor.u32 %v11896_v16, %v10746_v27  ;;  %v10490_v21 = vld [vmem:[%s13276_s11 + $0xb0] sm:$0xf0] }
 0x6da   : > { %7826 = vmatpush.bf16.msra.mxu1 %v10653_v1  ;;  %17168 = vst [vmem:[#allocation80_spill] sm:$0xff] %v15865_v0  ;;  %v11928_v9 = vld [vmem:[%s13276_s11 + $0x3a4] sm:$0xf]  ;;  %v10874_v17 = vld [vmem:[%s13276_s11 + $0x3b0] sm:$0xf0]  ;;  %v10493_v54 = vor.u32 %v11832_v56, %v10490_v21 }
 0x6db   : > { %7856 = vmatpush.bf16.msra.mxu2 %v10765_v49  ;;  %17169 = vst [vmem:[#allocation81_spill] sm:$0xff] %v15867_v30  ;;  %v10877_v7 = vor.u32 %v11928_v9, %v10874_v17  ;;  %v11864_v36 = vld [vmem:[%s13276_s11 + $0x1a4] sm:$0xf]  ;;  %v10618_v3 = vld [vmem:[%s13276_s11 + $0x1b0] sm:$0xf0] }
 0x6dc   : > { %17170 = vst [vmem:[#allocation82_spill] sm:$0xff] %v15869_v31  ;;  %v11892_v20 = vld [vmem:[%s13276_s11 + $0x284] sm:$0xf]  ;;  %v10621_v6 = vor.u32 %v11864_v36, %v10618_v3  ;;  %v10730_v4 = vld [vmem:[%s13276_s11 + $0x290] sm:$0xf0] }
 0x6dd   : > { %7798 = vmatpush.bf16.msra.mxu0 %v10509_v2  ;;  %7885 = vmatpush.bf16.msra.mxu3 %v10893_v58  ;;  %v11828_v55 = vld [vmem:[%s13276_s11 + $0x84] sm:$0xf]  ;;  %v10474_v48 = vld [vmem:[%s13276_s11 + $0x90] sm:$0xf0]  ;;  %v10733_v52 = vor.u32 %v11892_v20, %v10730_v4  ;;  %v11782_v47 = vld [vmem:[#allocation2 + $0x14] sm:$0xf] }
 0x6de   : > { %7827 = vmatpush.bf16.msra.mxu1 %v10637_v57  ;;  %v10477_v18 = vor.u32 %v11828_v55, %v10474_v48  ;;  %v11924_v62 = vld [vmem:[%s13276_s11 + $0x384] sm:$0xf]  ;;  %v10858_v60 = vld [vmem:[%s13276_s11 + $0x390] sm:$0xf0]  ;;  %v10298_v11 = vld [vmem:[#allocation2 + $0x30] sm:$0xf0] }
 0x6df   : > { %7857 = vmatpush.bf16.msra.mxu2 %v10749_v43  ;;  %v11860_v13 = vld [vmem:[%s13276_s11 + $0x184] sm:$0xf]  ;;  %v10861_v46 = vor.u32 %v11924_v62, %v10858_v60  ;;  %v10602_v34 = vld [vmem:[%s13276_s11 + $0x190] sm:$0xf0]  ;;  %v10304_v1 = vld [vmem:[#allocation2 + $0x18] sm:$0xf]  ;;  %v15893_v2 = vor.u32 %v11782_v47, %v10298_v11 }
 0x6e0   : > { %v10605_v44 = vor.u32 %v11860_v13, %v10602_v34  ;;  %v10296_v37 = vld [vmem:[#allocation2 + $0x10] sm:$0xf]  ;;  %v11787_v15 = vld [vmem:[#allocation2 + $0x34] sm:$0xf0]  ;;  %v11783_v5 = vld [vmem:[#allocation2 + $0x1c] sm:$0xf] }
 0x6e1   : > { %7799 = vmatpush.bf16.msra.mxu0 %v10493_v54  ;;  %7886 = vmatpush.bf16.msra.mxu3 %v10877_v7  ;;  %v11786_v42 = vld [vmem:[#allocation2 + $0x2c] sm:$0xf0]  ;;  %v10306_v53 = vld [vmem:[#allocation2 + $0x38] sm:$0xf0]  ;;  %v15895_v59 = vor.u32 %v11787_v15, %v10304_v1  ;;  %v10714_v58 = vld [vmem:[%s13276_s11 + $0x270] sm:$0xf0] }
 0x6e2   : > { %7588 = vmatmul.bf16.gmra.mxu0 %v15863_v10  ;;  %7828 = vmatpush.bf16.msra.mxu1 %v10621_v6  ;;  %v15891_v49 = vor.u32 %v11786_v42, %v10296_v37  ;;  %v15897_v40 = vor.u32 %v11783_v5, %v10306_v53  ;;  %v11888_v28 = vld [vmem:[%s13276_s11 + $0x264] sm:$0xf]  ;;  %v10458_v38 = vld [vmem:[%s13276_s11 + $0x70] sm:$0xf0]  ;;  %v11790_v55 = vld [vmem:[#allocation2 + $0x54] sm:$0xf] }
 0x6e3   : > { %7617 = vmatmul.bf16.gmra.mxu1 %v15865_v0  ;;  %7858 = vmatpush.bf16.msra.mxu2 %v10733_v52  ;;  %v11824_v25 = vld [vmem:[%s13276_s11 + $0x64] sm:$0xf]  ;;  %v10717_v57 = vor.u32 %v11888_v28, %v10714_v58  ;;  %v10842_v63 = vld [vmem:[%s13276_s11 + $0x370] sm:$0xf0]  ;;  %v10330_v48 = vld [vmem:[#allocation2 + $0x70] sm:$0xf0] }
 0x6e4   : > { %7646 = vmatmul.bf16.gmra.mxu2 %v15867_v30  ;;  %v11920_v23 = vld [vmem:[%s13276_s11 + $0x364] sm:$0xf]  ;;  %v10461_v39 = vor.u32 %v11824_v25, %v10458_v38  ;;  %v10586_v61 = vld [vmem:[%s13276_s11 + $0x170] sm:$0xf0]  ;;  %v10336_v52 = vld [vmem:[#allocation2 + $0x58] sm:$0xf] }
 0x6e5   : > { %7800 = vmatpush.bf16.msra.mxu0 %v10477_v18  ;;  %7887 = vmatpush.bf16.msra.mxu3 %v10861_v46  ;;  %v10845_v35 = vor.u32 %v11920_v23, %v10842_v63  ;;  %v11856_v14 = vld [vmem:[%s13276_s11 + $0x164] sm:$0xf]  ;;  %v10698_v27 = vld [vmem:[%s13276_s11 + $0x250] sm:$0xf0]  ;;  %v11795_v18 = vld [vmem:[#allocation2 + $0x74] sm:$0xf0]  ;;  %v15921_v46 = vor.u32 %v11790_v55, %v10330_v48 }
 0x6e6   : > { %7829 = vmatpush.bf16.msra.mxu1 %v10605_v44  ;;  %v11884_v8 = vld [vmem:[%s13276_s11 + $0x244] sm:$0xf]  ;;  %v10589_v16 = vor.u32 %v11856_v14, %v10586_v61  ;;  %v10442_v43 = vld [vmem:[%s13276_s11 + $0x50] sm:$0xf0]  ;;  %v11791_v62 = vld [vmem:[#allocation2 + $0x5c] sm:$0xf]  ;;  %v15923_v34 = vor.u32 %v11795_v18, %v10336_v52 }
 0x6e7   : > { %7859 = vmatpush.bf16.msra.mxu2 %v10717_v57  ;;  %v11820_v56 = vld [vmem:[%s13276_s11 + $0x44] sm:$0xf]  ;;  %v10701_v21 = vor.u32 %v11884_v8, %v10698_v27  ;;  %v10826_v54 = vld [vmem:[%s13276_s11 + $0x350] sm:$0xf0]  ;;  %v10338_v60 = vld [vmem:[#allocation2 + $0x78] sm:$0xf0] }
 0x6e8   : > { %7675 = vmatmul.bf16.gmra.mxu3 %v15869_v31  ;;  %v10445_v9 = vor.u32 %v11820_v56, %v10442_v43  ;;  %v11916_v17 = vld [vmem:[%s13276_s11 + $0x344] sm:$0xf]  ;;  %v10570_v3 = vld [vmem:[%s13276_s11 + $0x150] sm:$0xf0]  ;;  %v15925_v44 = vor.u32 %v11791_v62, %v10338_v60 }
 0x6e9   : > { %7801 = vmatpush.bf16.msra.mxu0 %v10461_v39  ;;  %7888 = vmatpush.bf16.msra.mxu3 %v10845_v35  ;;  %v11852_v7 = vld [vmem:[%s13276_s11 + $0x144] sm:$0xf]  ;;  %v10829_v36 = vor.u32 %v11916_v17, %v10826_v54  ;;  %v10682_v42 = vld [vmem:[%s13276_s11 + $0x230] sm:$0xf0]  ;;  %v11798_v17 = vld [vmem:[#allocation2 + $0x94] sm:$0xf] }
 0x6ea   : > { %7830 = vmatpush.bf16.msra.mxu1 %v10589_v16  ;;  %v10573_v20 = vor.u32 %v11852_v7, %v10570_v3  ;;  %v10328_v6 = vld [vmem:[#allocation2 + $0x50] sm:$0xf]  ;;  %v10426_v1 = vld [vmem:[%s13276_s11 + $0x30] sm:$0xf0]  ;;  %v10362_v54 = vld [vmem:[#allocation2 + $0xb0] sm:$0xf0] }
 0x6eb   : > { %v11794_v4 = vld [vmem:[#allocation2 + $0x6c] sm:$0xf0]  ;;  %7860 = vmatpush.bf16.msra.mxu2 %v10701_v21  ;;  %v10810_v5 = vld [vmem:[%s13276_s11 + $0x330] sm:$0xf0]  ;;  %v10368_v7 = vld [vmem:[#allocation2 + $0x98] sm:$0xf] }
 0x6ec   : > { %v15919_v13 = vor.u32 %v11794_v4, %v10328_v6  ;;  %v11880_v37 = vld [vmem:[%s13276_s11 + $0x224] sm:$0xf]  ;;  %v10554_v25 = vld [vmem:[%s13276_s11 + $0x130] sm:$0xf0]  ;;  %v11799_v3 = vld [vmem:[#allocation2 + $0x9c] sm:$0xf]  ;;  %v15949_v4 = vor.u32 %v11798_v17, %v10362_v54 }
 0x6ed   : > { %7802 = vmatpush.bf16.msra.mxu0 %v10445_v9  ;;  %7889 = vmatpush.bf16.msra.mxu3 %v10829_v36  ;;  %v11816_v47 = vld [vmem:[%s13276_s11 + $0x24] sm:$0xf]  ;;  %v10685_v11 = vor.u32 %v11880_v37, %v10682_v42  ;;  %v10666_v23 = vld [vmem:[%s13276_s11 + $0x210] sm:$0xf0]  ;;  %v11803_v36 = vld [vmem:[#allocation2 + $0xb4] sm:$0xf0] }
 0x6ee   : > { %7831 = vmatpush.bf16.msra.mxu1 %v10573_v20  ;;  %v11912_v15 = vld [vmem:[%s13276_s11 + $0x324] sm:$0xf]  ;;  %v10429_v53 = vor.u32 %v11816_v47, %v10426_v1  ;;  %v10410_v39 = vld [vmem:[%s13276_s11 + $0x10] sm:$0xf0]  ;;  %v10370_v20 = vld [vmem:[#allocation2 + $0xb8] sm:$0xf0]  ;;  %v15951_v55 = vor.u32 %v11803_v36, %v10368_v7 }
 0x6ef   : > { %v10813_v28 = vor.u32 %v11912_v15, %v10810_v5  ;;  %v11848_v58 = vld [vmem:[%s13276_s11 + $0x124] sm:$0xf]  ;;  %7861 = vmatpush.bf16.msra.mxu2 %v10685_v11  ;;  %v10794_v8 = vld [vmem:[%s13276_s11 + $0x310] sm:$0xf0]  ;;  %v15953_v48 = vor.u32 %v11799_v3, %v10370_v20 }
 0x6f0   : > { %v11876_v57 = vld [vmem:[%s13276_s11 + $0x204] sm:$0xf]  ;;  %v10557_v38 = vor.u32 %v11848_v58, %v10554_v25  ;;  %v10538_v56 = vld [vmem:[%s13276_s11 + $0x110] sm:$0xf0]  ;;  %v11806_v58 = vld [vmem:[#allocation2 + $0xd4] sm:$0xf] }
 0x6f1   : > { %v11812_v63 = vld [vmem:[%s13276_s11 + $0x4] sm:$0xf]  ;;  %7803 = vmatpush.bf16.msra.mxu0 %v10429_v53  ;;  %7890 = vmatpush.bf16.msra.mxu3 %v10813_v28  ;;  %v10669_v35 = vor.u32 %v11876_v57, %v10666_v23  ;;  %v11290_v18 = vld [vmem:[%s13276_s11 + $0x6f0] sm:$0xf0] }
 0x6f2   : > { %7689 = vmatmul.bf16.vlgmr.msrb.gmra.mxu0 %v15891_v49  ;;  %v10413_v14 = vor.u32 %v11812_v63, %v10410_v39  ;;  %v11908_v61 = vld [vmem:[%s13276_s11 + $0x304] sm:$0xf]  ;;  %7832 = vmatpush.bf16.msra.mxu1 %v10557_v38  ;;  %v11034_v37 = vld [vmem:[%s13276_s11 + $0x4f0] sm:$0xf0] }
 0x6f3   : > { %7718 = vmatmul.bf16.vlgmr.msrb.gmra.mxu1 %v15893_v2  ;;  %v11844_v16 = vld [vmem:[%s13276_s11 + $0x104] sm:$0xf]  ;;  %v10797_v27 = vor.u32 %v11908_v61, %v10794_v8  ;;  %7862 = vmatpush.bf16.msra.mxu2 %v10669_v35  ;;  %v11418_v47 = vld [vmem:[%s13276_s11 + $0x7f0] sm:$0xf0]  ;;  %v10394_v61 = vld [vmem:[#allocation2 + $0xf0] sm:$0xf0] }
 0x6f4   : > { %7747 = vmatmul.bf16.vlgmr.msrb.gmra.mxu2 %v15895_v59  ;;  %v10541_v43 = vor.u32 %v11844_v16, %v10538_v56  ;;  %v10360_v21 = vld [vmem:[#allocation2 + $0x90] sm:$0xf]  ;;  %v11162_v28 = vld [vmem:[%s13276_s11 + $0x5f0] sm:$0xf0]  ;;  %v10400_v8 = vld [vmem:[#allocation2 + $0xd8] sm:$0xf]  ;;  %v15975_v17 = vor.u32 %v11806_v58, %v10394_v61 }
 0x6f5   : > { %v11802_v9 = vld [vmem:[#allocation2 + $0xac] sm:$0xf0]  ;;  %7804 = vmatpush.bf16.msra.mxu0 %v10413_v14  ;;  %7891 = vmatpush.bf16.msra.mxu3 %v10797_v27  ;;  %v11274_v38 = vld [vmem:[%s13276_s11 + $0x6d0] sm:$0xf0]  ;;  %v11811_v16 = vld [vmem:[#allocation2 + $0xf4] sm:$0xf0] }
 0x6f6   : > { %7833 = vmatpush.bf16.msra.mxu1 %v10541_v43  ;;  %v15947_v6 = vor.u32 %v11802_v9, %v10360_v21  ;;  %v12032_v52 = vld [vmem:[%s13276_s11 + $0x6e4] sm:$0xf]  ;;  %v11018_v39 = vld [vmem:[%s13276_s11 + $0x4d0] sm:$0xf0]  ;;  %v11807_v43 = vld [vmem:[#allocation2 + $0xdc] sm:$0xf]  ;;  %v15977_v54 = vor.u32 %v11811_v16, %v10400_v8 }
 0x6f7   : > { %v11968_v62 = vld [vmem:[%s13276_s11 + $0x4e4] sm:$0xf]  ;;  %v11293_v60 = vor.u32 %v12032_v52, %v11290_v18  ;;  %v11402_v14 = vld [vmem:[%s13276_s11 + $0x7d0] sm:$0xf0]  ;;  %v10402_v21 = vld [vmem:[#allocation2 + $0xf8] sm:$0xf0] }
 0x6f8   : > { %7776 = vmatmul.bf16.vlgmr.msrb.gmra.mxu3 %v15897_v40  ;;  %v12064_v42 = vld [vmem:[%s13276_s11 + $0x7e4] sm:$0xf]  ;;  %v11037_v11 = vor.u32 %v11968_v62, %v11034_v37  ;;  %v15979_v7 = vor.u32 %v11807_v43, %v10402_v21  ;;  %v11146_v3 = vld [vmem:[%s13276_s11 + $0x5d0] sm:$0xf0] }
 0x6f9   : > { %v11421_v1 = vor.u32 %v12064_v42, %v11418_v47  ;;  %7971 = vmatpush.bf16.msrb.mxu2 %v11293_v60  ;;  %v10392_v15 = vld [vmem:[#allocation2 + $0xd0] sm:$0xf]  ;;  %v11258_v18 = vld [vmem:[%s13276_s11 + $0x6b0] sm:$0xf0] }
 0x6fa   : > { %7913 = vmatpush.bf16.msrb.mxu0 %v11037_v11  ;;  %v11810_v5 = vld [vmem:[#allocation2 + $0xec] sm:$0xf0]  ;;  %v11002_v37 = vld [vmem:[%s13276_s11 + $0x4b0] sm:$0xf0] }
 0x6fb   : > { %8000 = vmatpush.bf16.msrb.mxu3 %v11421_v1  ;;  %v12000_v53 = vld [vmem:[%s13276_s11 + $0x5e4] sm:$0xf]  ;;  %v15973_v9 = vor.u32 %v11810_v5, %v10392_v15  ;;  %v11386_v47 = vld [vmem:[%s13276_s11 + $0x7b0] sm:$0xf0] }
 0x6fc   : > { %v11165_v25 = vor.u32 %v12000_v53, %v11162_v28  ;;  %v12028_v57 = vld [vmem:[%s13276_s11 + $0x6c4] sm:$0xf]  ;;  %v11130_v5 = vld [vmem:[%s13276_s11 + $0x5b0] sm:$0xf0] }
 0x6fd   : > { %v11964_v23 = vld [vmem:[%s13276_s11 + $0x4c4] sm:$0xf]  ;;  %v11277_v63 = vor.u32 %v12028_v57, %v11274_v38  ;;  %v11242_v58 = vld [vmem:[%s13276_s11 + $0x690] sm:$0xf0] }
 0x6fe   : > { %v12060_v35 = vld [vmem:[%s13276_s11 + $0x7c4] sm:$0xf]  ;;  %7942 = vmatpush.bf16.msrb.mxu1 %v11165_v25  ;;  %v11021_v27 = vor.u32 %v11964_v23, %v11018_v39  ;;  %v10986_v38 = vld [vmem:[%s13276_s11 + $0x490] sm:$0xf0] }
 0x6ff   : > { %v11405_v56 = vor.u32 %v12060_v35, %v11402_v14  ;;  %7972 = vmatpush.bf16.msrb.mxu2 %v11277_v63  ;;  %v11996_v36 = vld [vmem:[%s13276_s11 + $0x5c4] sm:$0xf]  ;;  %v11370_v63 = vld [vmem:[%s13276_s11 + $0x790] sm:$0xf0] }
 0x700   : > { %7914 = vmatpush.bf16.msrb.mxu0 %v11021_v27  ;;  %v11149_v20 = vor.u32 %v11996_v36, %v11146_v3  ;;  %v12024_v52 = vld [vmem:[%s13276_s11 + $0x6a4] sm:$0xf]  ;;  %v11114_v16 = vld [vmem:[%s13276_s11 + $0x590] sm:$0xf0] }
 0x701   : > { %8001 = vmatpush.bf16.msrb.mxu3 %v11405_v56  ;;  %v11960_v62 = vld [vmem:[%s13276_s11 + $0x4a4] sm:$0xf]  ;;  %v11261_v60 = vor.u32 %v12024_v52, %v11258_v18  ;;  %v11226_v43 = vld [vmem:[%s13276_s11 + $0x670] sm:$0xf0] }
 0x702   : > { %7694 = vmatmul.bf16.gmra.mxu0 %v15919_v13  ;;  %7943 = vmatpush.bf16.msrb.mxu1 %v11149_v20  ;;  %v12056_v42 = vld [vmem:[%s13276_s11 + $0x7a4] sm:$0xf]  ;;  %v11005_v11 = vor.u32 %v11960_v62, %v11002_v37  ;;  %v10970_v3 = vld [vmem:[%s13276_s11 + $0x470] sm:$0xf0] }
 0x703   : > { %7723 = vmatmul.bf16.gmra.mxu1 %v15921_v46  ;;  %v11389_v1 = vor.u32 %v12056_v42, %v11386_v47  ;;  %7973 = vmatpush.bf16.msrb.mxu2 %v11261_v60  ;;  %v11992_v15 = vld [vmem:[%s13276_s11 + $0x5a4] sm:$0xf]  ;;  %v11354_v52 = vld [vmem:[%s13276_s11 + $0x770] sm:$0xf0] }
 0x704   : > { %7752 = vmatmul.bf16.gmra.mxu2 %v15923_v34  ;;  %7915 = vmatpush.bf16.msrb.mxu0 %v11005_v11  ;;  %v11133_v53 = vor.u32 %v11992_v15, %v11130_v5  ;;  %v12020_v28 = vld [vmem:[%s13276_s11 + $0x684] sm:$0xf] }
 0x705   : > { %8002 = vmatpush.bf16.msrb.mxu3 %v11389_v1  ;;  %v11956_v25 = vld [vmem:[%s13276_s11 + $0x484] sm:$0xf]  ;;  %v11245_v57 = vor.u32 %v12020_v28, %v11242_v58  ;;  %v11098_v1 = vld [vmem:[%s13276_s11 + $0x570] sm:$0xf0] }
 0x706   : > { %v12052_v23 = vld [vmem:[%s13276_s11 + $0x784] sm:$0xf]  ;;  %7944 = vmatpush.bf16.msrb.mxu1 %v11133_v53  ;;  %v10989_v39 = vor.u32 %v11956_v25, %v10986_v38  ;;  %v11210_v53 = vld [vmem:[%s13276_s11 + $0x650] sm:$0xf0] }
 0x707   : > { %v11373_v35 = vor.u32 %v12052_v23, %v11370_v63  ;;  %7974 = vmatpush.bf16.msrb.mxu2 %v11245_v57  ;;  %v11988_v8 = vld [vmem:[%s13276_s11 + $0x584] sm:$0xf]  ;;  %v10954_v25 = vld [vmem:[%s13276_s11 + $0x450] sm:$0xf0] }
 0x708   : > { %7781 = vmatmul.bf16.gmra.mxu3 %v15925_v44  ;;  %7916 = vmatpush.bf16.msrb.mxu0 %v10989_v39  ;;  %v11117_v27 = vor.u32 %v11988_v8, %v11114_v16  ;;  %v12016_v56 = vld [vmem:[%s13276_s11 + $0x664] sm:$0xf]  ;;  %v11338_v38 = vld [vmem:[%s13276_s11 + $0x750] sm:$0xf0] }
 0x709   : > { %8003 = vmatpush.bf16.msrb.mxu3 %v11373_v35  ;;  %v11952_v21 = vld [vmem:[%s13276_s11 + $0x464] sm:$0xf]  ;;  %v11229_v36 = vor.u32 %v12016_v56, %v11226_v43  ;;  %v11082_v56 = vld [vmem:[%s13276_s11 + $0x550] sm:$0xf0] }
 0x70a   : > { %7945 = vmatpush.bf16.msrb.mxu1 %v11117_v27  ;;  %v12048_v20 = vld [vmem:[%s13276_s11 + $0x764] sm:$0xf]  ;;  %v10973_v62 = vor.u32 %v11952_v21, %v10970_v3 }
 0x70b   : > { %v11357_v60 = vor.u32 %v12048_v20, %v11354_v52  ;;  %7975 = vmatpush.bf16.msrb.mxu2 %v11229_v36  ;;  %v11984_v11 = vld [vmem:[%s13276_s11 + $0x564] sm:$0xf]  ;;  %v11194_v36 = vld [vmem:[%s13276_s11 + $0x630] sm:$0xf0] }
 0x70c   : > { %7917 = vmatpush.bf16.msrb.mxu0 %v10973_v62  ;;  %v11101_v15 = vor.u32 %v11984_v11, %v11098_v1  ;;  %v12012_v5 = vld [vmem:[%s13276_s11 + $0x644] sm:$0xf]  ;;  %v10938_v52 = vld [vmem:[%s13276_s11 + $0x430] sm:$0xf0] }
 0x70d   : > { %8004 = vmatpush.bf16.msrb.mxu3 %v11357_v60  ;;  %v11948_v28 = vld [vmem:[%s13276_s11 + $0x444] sm:$0xf]  ;;  %v11213_v58 = vor.u32 %v12012_v5, %v11210_v53  ;;  %v11322_v60 = vld [vmem:[%s13276_s11 + $0x730] sm:$0xf0] }
 0x70e   : > { %v12044_v57 = vld [vmem:[%s13276_s11 + $0x744] sm:$0xf]  ;;  %7946 = vmatpush.bf16.msrb.mxu1 %v11101_v15  ;;  %v10957_v23 = vor.u32 %v11948_v28, %v10954_v25  ;;  %v11066_v25 = vld [vmem:[%s13276_s11 + $0x530] sm:$0xf0] }
 0x70f   : > { %v11341_v63 = vor.u32 %v12044_v57, %v11338_v38  ;;  %7976 = vmatpush.bf16.msrb.mxu2 %v11213_v58  ;;  %v11980_v27 = vld [vmem:[%s13276_s11 + $0x544] sm:$0xf] }
 0x710   : > { %7918 = vmatpush.bf16.msrb.mxu0 %v10957_v23  ;;  %v11085_v43 = vor.u32 %v11980_v27, %v11082_v56  ;;  %v12008_v21 = vld [vmem:[%s13276_s11 + $0x624] sm:$0xf]  ;;  %v11178_v23 = vld [vmem:[%s13276_s11 + $0x610] sm:$0xf0] }
 0x711   : > { %8005 = vmatpush.bf16.msrb.mxu3 %v11341_v63  ;;  %v11944_v3 = vld [vmem:[%s13276_s11 + $0x424] sm:$0xf]  ;;  %v11197_v20 = vor.u32 %v12008_v21, %v11194_v36  ;;  %v10922_v56 = vld [vmem:[%s13276_s11 + $0x410] sm:$0xf0] }
 0x712   : > { %7699 = vmatmul.bf16.gmra.mxu0 %v15947_v6  ;;  %7947 = vmatpush.bf16.msrb.mxu1 %v11085_v43  ;;  %v12040_v62 = vld [vmem:[%s13276_s11 + $0x724] sm:$0xf]  ;;  %v10941_v1 = vor.u32 %v11944_v3, %v10938_v52  ;;  %v11306_v21 = vld [vmem:[%s13276_s11 + $0x710] sm:$0xf0] }
 0x713   : > { %7728 = vmatmul.bf16.gmra.mxu1 %v15949_v4  ;;  %v11325_v15 = vor.u32 %v12040_v62, %v11322_v60  ;;  %7977 = vmatpush.bf16.msrb.mxu2 %v11197_v20  ;;  %v11976_v58 = vld [vmem:[%s13276_s11 + $0x524] sm:$0xf]  ;;  %v11050_v62 = vld [vmem:[%s13276_s11 + $0x510] sm:$0xf0] }
 0x714   : > { %7757 = vmatmul.bf16.gmra.mxu2 %v15951_v55  ;;  %7919 = vmatpush.bf16.msrb.mxu0 %v10941_v1  ;;  %v11069_v57 = vor.u32 %v11976_v58, %v11066_v25  ;;  %v12004_v38 = vld [vmem:[%s13276_s11 + $0x604] sm:$0xf]  ;;  %v10784_v25 = vld [vmem:[%s13276_s11 + $0x2e8] sm:$0xf] }
 0x715   : > { %8006 = vmatpush.bf16.msrb.mxu3 %v11325_v15  ;;  %v11940_v63 = vld [vmem:[%s13276_s11 + $0x404] sm:$0xf]  ;;  %v11181_v27 = vor.u32 %v12004_v38, %v11178_v23  ;;  %v10528_v38 = vld [vmem:[%s13276_s11 + $0xe8] sm:$0xf] }
 0x716   : > { %v12036_v43 = vld [vmem:[%s13276_s11 + $0x704] sm:$0xf]  ;;  %7948 = vmatpush.bf16.msrb.mxu1 %v11069_v57  ;;  %v10925_v36 = vor.u32 %v11940_v63, %v10922_v56  ;;  %v11907_v57 = vld [vmem:[%s13276_s11 + $0x2f4] sm:$0xf0] }
 0x717   : > { %v11309_v3 = vor.u32 %v12036_v43, %v11306_v21  ;;  %7978 = vmatpush.bf16.msrb.mxu2 %v11181_v27  ;;  %v11972_v52 = vld [vmem:[%s13276_s11 + $0x504] sm:$0xf]  ;;  %v10785_v23 = vor.u32 %v11907_v57, %v10784_v25  ;;  %v11843_v63 = vld [vmem:[%s13276_s11 + $0xf4] sm:$0xf0]  ;;  %v10912_v27 = vld [vmem:[%s13276_s11 + $0x3e8] sm:$0xf] }
 0x718   : > { %7786 = vmatmul.bf16.gmra.mxu3 %v15953_v48  ;;  %7920 = vmatpush.bf16.msrb.mxu0 %v10925_v36  ;;  %v11053_v15 = vor.u32 %v11972_v52, %v11050_v62  ;;  %v11939_v56 = vld [vmem:[%s13276_s11 + $0x3f4] sm:$0xf0]  ;;  %v10529_v21 = vor.u32 %v11843_v63, %v10528_v38 }
 0x719   : > { %8007 = vmatpush.bf16.msrb.mxu3 %v11309_v3  ;;  %v10913_v36 = vor.u32 %v11939_v56, %v10912_v27  ;;  %v10656_v27 = vld [vmem:[%s13276_s11 + $0x1e8] sm:$0xf]  ;;  %v11875_v56 = vld [vmem:[%s13276_s11 + $0x1f4] sm:$0xf0] }
 0x71a   : > { %7949 = vmatpush.bf16.msrb.mxu1 %v11053_v15  ;;  %v16098_v15 = vld [vmem:[%s13282_s3] sm:$0xf] }
 0x71b   : > { %17171 = vst [vmem:[#allocation83_spill] sm:$0xff] %v16098_v15  ;;  %v16103_v57 = vperm.slane %v16098_v15, 0  ;;  %v10657_v15 = vor.u32 %v11875_v56, %v10656_v27 }
 0x722   : > { %7704 = vmatmul.bf16.gmra.mxu0 %v15973_v9 }
 0x723   : > { %7733 = vmatmul.bf16.gmra.mxu1 %v15975_v17 }
 0x724   : > { %7762 = vmatmul.bf16.gmra.mxu2 %v15977_v54 }
 0x728   : > { %7791 = vmatmul.bf16.gmra.mxu3 %v15979_v7 }
 0x72f   : > { %v16001_v14 = vpop.f32.mrf.mxu0 }
 0x730   : > { %v16003_v61 = vpop.f32.mrf.mxu1 }
 0x732   : > { %7805 = vmatmul.bf16.vlgmr.msra.gmra.mxu0 %v15754_v32 }
 0x733   : > { %7834 = vmatmul.bf16.vlgmr.msra.gmra.mxu1 %v15759_v26  ;;  %8029 = vmatpush.bf16.msra.mxu0 %v10529_v21  ;;  %v10768_v21 = vld [vmem:[%s13276_s11 + $0x2c8] sm:$0xf] }
 0x734   : > { %7863 = vmatmul.bf16.vlgmr.msra.gmra.mxu2 %v15761_v50  ;;  %8058 = vmatpush.bf16.msra.mxu1 %v10657_v15  ;;  %v11871_v15 = vld [vmem:[%s13276_s11 + $0x1d4] sm:$0xf0] }
 0x735   : > { %8087 = vmatpush.bf16.msra.mxu2 %v10785_v23 }
 0x737   : > { %v16017_v18 = vpop.f32.mrf.mxu2  ;;  %v16021_v42 = vpop.f32.mrf.mxu0 }
 0x738   : > { %7892 = vmatmul.bf16.vlgmr.msra.gmra.mxu3 %v15765_v24  ;;  %v16023_v47 = vpop.f32.mrf.mxu1 }
 0x739   : > { %8116 = vmatpush.bf16.msra.mxu3 %v10913_v36  ;;  %v7575_v36 = vadd.f32 %v16001_v14, %v16103_v57 }
 0x73a   : > { %v16019_v37 = vpop.f32.mrf.mxu3 }
 0x73b   : > { %v7604_v27 = vadd.f32 %v16003_v61, %v7575_v36  ;;  %v10880_v61 = vld [vmem:[%s13276_s11 + $0x3a8] sm:$0xf]  ;;  %v11931_v36 = vld [vmem:[%s13276_s11 + $0x3b4] sm:$0xf0] }
 0x73f   : > { %v16033_v39 = vpop.f32.mrf.mxu2  ;;  %v16037_v8 = vpop.f32.mrf.mxu0 }
 0x740   : > { %v16039_v16 = vpop.f32.mrf.mxu1 }
 0x742   : > { %v16035_v35 = vpop.f32.mrf.mxu3  ;;  %7810 = vmatmul.bf16.gmra.mxu0 %v15798_v19  ;;  %v10881_v19 = vor.u32 %v11931_v36, %v10880_v61  ;;  %v10864_v36 = vld [vmem:[%s13276_s11 + $0x388] sm:$0xf] }
 0x743   : > { %7839 = vmatmul.bf16.gmra.mxu1 %v15803_v51 }
 0x744   : > { %7868 = vmatmul.bf16.gmra.mxu2 %v15805_v41  ;;  %v11935_v41 = vld [vmem:[%s13276_s11 + $0x3d4] sm:$0xf0] }
 0x747   : > { %v16053_v11 = vpop.f32.mrf.mxu2  ;;  %v16057_v53 = vpop.f32.mrf.mxu0 }
 0x748   : > { %7897 = vmatmul.bf16.gmra.mxu3 %v15809_v45  ;;  %v16059_v28 = vpop.f32.mrf.mxu1  ;;  %v10896_v45 = vld [vmem:[%s13276_s11 + $0x3c8] sm:$0xf] }
 0x749   : > { %v10897_v14 = vor.u32 %v11935_v41, %v10896_v45  ;;  %v7633_v41 = vadd.f32 %v16017_v18, %v7604_v27 }
 0x74b   : > { %v16055_v5 = vpop.f32.mrf.mxu3  ;;  %8117 = vmatpush.bf16.msra.mxu3 %v10897_v14  ;;  %v7577_v14 = vadd.f32 %v16021_v42, %v16103_v57  ;;  %v7662_v18 = vadd.f32 %v16019_v37, %v7633_v41  ;;  %v7580_v41 = vadd.f32 %v16037_v8, %v16103_v57 }
 0x74f   : > { %v16069_v20 = vpop.f32.mrf.mxu2  ;;  %v16075_v1 = vpop.f32.mrf.mxu0  ;;  %8118 = vmatpush.bf16.msra.mxu3 %v10881_v19 }
 0x750   : > { %v16077_v58 = vpop.f32.mrf.mxu1 }
 0x752   : > { %7815 = vmatmul.bf16.gmra.mxu0 %v15835_v12 }
 0x753   : > { %v16073_v60 = vpop.f32.mrf.mxu3  ;;  %7844 = vmatmul.bf16.gmra.mxu1 %v15837_v22  ;;  %v11839_v22 = vld [vmem:[%s13276_s11 + $0xd4] sm:$0xf0] }
 0x754   : > { %7873 = vmatmul.bf16.gmra.mxu2 %v15839_v29  ;;  %v10512_v29 = vld [vmem:[%s13276_s11 + $0xc8] sm:$0xf] }
 0x757   : > { %v16089_v43 = vpop.f32.mrf.mxu2  ;;  %v16093_v52 = vpop.f32.mrf.mxu0 }
 0x758   : > { %7902 = vmatmul.bf16.gmra.mxu3 %v15841_v33  ;;  %v16095_v62 = vpop.f32.mrf.mxu1  ;;  %v11903_v33 = vld [vmem:[%s13276_s11 + $0x2d4] sm:$0xf0] }
 0x759   : > { %v10769_v12 = vor.u32 %v11903_v33, %v10768_v21  ;;  %v10752_v21 = vld [vmem:[%s13276_s11 + $0x2a8] sm:$0xf] }
 0x75b   : > { %v16091_v3 = vpop.f32.mrf.mxu3  ;;  %8088 = vmatpush.bf16.msra.mxu2 %v10769_v12  ;;  %v10496_v12 = vld [vmem:[%s13276_s11 + $0xa8] sm:$0xf] }
 0x75f   : > { %v16100_v25 = vpop.f32.mrf.mxu2  ;;  %v16107_v63 = vpop.f32.mrf.mxu0 }
 0x760   : > { %v16109_v23 = vpop.f32.mrf.mxu1 }
 0x762   : > { %7820 = vmatmul.bf16.gmra.mxu0 %v15863_v10  ;;  %v10513_v10 = vor.u32 %v11839_v22, %v10512_v29  ;;  %v10640_v29 = vld [vmem:[%s13276_s11 + $0x1c8] sm:$0xf] }
 0x763   : > { %v16105_v38 = vpop.f32.mrf.mxu3  ;;  %7849 = vmatmul.bf16.gmra.mxu1 %v15865_v0  ;;  %v10641_v45 = vor.u32 %v11871_v15, %v10640_v29  ;;  %v7606_v15 = vadd.f32 %v16023_v47, %v7577_v14  ;;  %v10480_v47 = vld [vmem:[%s13276_s11 + $0x88] sm:$0xf]  ;;  %v11927_v14 = vld [vmem:[%s13276_s11 + $0x394] sm:$0xf0] }
 0x764   : > { %7878 = vmatmul.bf16.gmra.mxu2 %v15867_v30  ;;  %8030 = vmatpush.bf16.msra.mxu0 %v10513_v10  ;;  %v11835_v10 = vld [vmem:[%s13276_s11 + $0xb4] sm:$0xf0] }
 0x765   : > { %v10497_v51 = vor.u32 %v11835_v10, %v10496_v12  ;;  %8059 = vmatpush.bf16.msra.mxu1 %v10641_v45  ;;  %v7635_v37 = vadd.f32 %v16033_v39, %v7606_v15  ;;  %v11895_v45 = vld [vmem:[%s13276_s11 + $0x294] sm:$0xf0]  ;;  %v10865_v39 = vor.u32 %v11927_v14, %v10864_v36  ;;  %v7609_v15 = vadd.f32 %v16039_v16, %v7580_v41  ;;  %v10848_v14 = vld [vmem:[%s13276_s11 + $0x368] sm:$0xf] }
 0x766   : > { %v11831_v12 = vld [vmem:[%s13276_s11 + $0x94] sm:$0xf0] }
 0x767   : > { %v16125_v0 = vpop.f32.mrf.mxu2  ;;  %v16130_v33 = vpop.f32.mrf.mxu0  ;;  %v10481_v61 = vor.u32 %v11831_v12, %v10480_v47  ;;  %8119 = vmatpush.bf16.msra.mxu3 %v10865_v39  ;;  %v11863_v47 = vld [vmem:[%s13276_s11 + $0x194] sm:$0xf0]  ;;  %v10720_v12 = vld [vmem:[%s13276_s11 + $0x268] sm:$0xf]  ;;  %v7582_v39 = vadd.f32 %v16057_v53, %v16103_v57 }
 0x768   : > { %7907 = vmatmul.bf16.gmra.mxu3 %v15869_v31  ;;  %v16132_v22 = vpop.f32.mrf.mxu1  ;;  %v11899_v31 = vld [vmem:[%s13276_s11 + $0x2b4] sm:$0xf0]  ;;  %8031 = vmatpush.bf16.msra.mxu0 %v10497_v51  ;;  %v10736_v51 = vld [vmem:[%s13276_s11 + $0x288] sm:$0xf] }
 0x769   : > { %v10753_v30 = vor.u32 %v11899_v31, %v10752_v21  ;;  %v10624_v21 = vld [vmem:[%s13276_s11 + $0x1a8] sm:$0xf]  ;;  %v10737_v10 = vor.u32 %v11895_v45, %v10736_v51  ;;  %v11827_v16 = vld [vmem:[%s13276_s11 + $0x74] sm:$0xf0]  ;;  %v7611_v53 = vadd.f32 %v16059_v28, %v7582_v39 }
 0x76a   : > { %v10608_v45 = vld [vmem:[%s13276_s11 + $0x188] sm:$0xf] }
 0x76b   : > { %v16128_v56 = vpop.f32.mrf.mxu3  ;;  %8089 = vmatpush.bf16.msra.mxu2 %v10753_v30  ;;  %v11867_v30 = vld [vmem:[%s13276_s11 + $0x1b4] sm:$0xf0] }
 0x76c   : > { %v10625_v19 = vor.u32 %v11867_v30, %v10624_v21  ;;  %8032 = vmatpush.bf16.msra.mxu0 %v10481_v61  ;;  %v10464_v61 = vld [vmem:[%s13276_s11 + $0x68] sm:$0xf] }
 0x76d   : > { %v10465_v36 = vor.u32 %v11827_v16, %v10464_v61  ;;  %v10448_v61 = vld [vmem:[%s13276_s11 + $0x48] sm:$0xf]  ;;  %v11823_v16 = vld [vmem:[%s13276_s11 + $0x54] sm:$0xf0] }
 0x76e   : > { %8060 = vmatpush.bf16.msra.mxu1 %v10625_v19 }
 0x76f   : > { %v16145_v24 = vpop.f32.mrf.mxu2  ;;  %v7690_v31 = vpop.f32.mrf.mxu0  ;;  %8090 = vmatpush.bf16.msra.mxu2 %v10737_v10  ;;  %v7638_v10 = vadd.f32 %v16053_v11, %v7609_v15 }
 0x770   : > { %v7719_v29 = vpop.f32.mrf.mxu1  ;;  %v7691_v42 = vadd.f32 %v7690_v31, %v7662_v18  ;;  %v7664_v31 = vadd.f32 %v16035_v35, %v7635_v37  ;;  %v10609_v35 = vor.u32 %v11863_v47, %v10608_v45  ;;  %v11891_v37 = vld [vmem:[%s13276_s11 + $0x274] sm:$0xf0]  ;;  %8033 = vmatpush.bf16.msra.mxu0 %v10465_v36  ;;  %v10592_v47 = vld [vmem:[%s13276_s11 + $0x168] sm:$0xf]  ;;  %v10449_v36 = vor.u32 %v11823_v16, %v10448_v61 }
 0x771   : > { %v10721_v41 = vor.u32 %v11891_v37, %v10720_v12  ;;  %v7667_v11 = vadd.f32 %v16055_v5, %v7638_v10  ;;  %v11859_v5 = vld [vmem:[%s13276_s11 + $0x174] sm:$0xf0]  ;;  %v10704_v12 = vld [vmem:[%s13276_s11 + $0x248] sm:$0xf]  ;;  %v7640_v10 = vadd.f32 %v16069_v20, %v7611_v53 }
 0x772   : > { %7921 = vmatmul.bf16.vlgmr.msrb.gmra.mxu0 %v15891_v49  ;;  %v7720_v18 = vadd.f32 %v7719_v29, %v7691_v42  ;;  %8061 = vmatpush.bf16.msra.mxu1 %v10609_v35  ;;  %v7585_v35 = vadd.f32 %v16075_v1, %v16103_v57  ;;  %v10593_v28 = vor.u32 %v11859_v5, %v10592_v47  ;;  %v11887_v37 = vld [vmem:[%s13276_s11 + $0x254] sm:$0xf0]  ;;  %v10560_v16 = vld [vmem:[%s13276_s11 + $0x128] sm:$0xf] }
 0x773   : > { %v16148_v27 = vpop.f32.mrf.mxu3  ;;  %7950 = vmatmul.bf16.vlgmr.msrb.gmra.mxu1 %v15893_v2  ;;  %8091 = vmatpush.bf16.msra.mxu2 %v10721_v41  ;;  %v10705_v41 = vor.u32 %v11887_v37, %v10704_v12  ;;  %v11919_v20 = vld [vmem:[%s13276_s11 + $0x354] sm:$0xf0]  ;;  %v10432_v12 = vld [vmem:[%s13276_s11 + $0x28] sm:$0xf] }
 0x774   : > { %7979 = vmatmul.bf16.vlgmr.msrb.gmra.mxu2 %v15895_v59  ;;  %8034 = vmatpush.bf16.msra.mxu0 %v10449_v36  ;;  %v11883_v47 = vld [vmem:[%s13276_s11 + $0x234] sm:$0xf0] }
 0x775   : > { %v11915_v61 = vld [vmem:[%s13276_s11 + $0x334] sm:$0xf0] }
 0x776   : > { %8062 = vmatpush.bf16.msra.mxu1 %v10593_v28  ;;  %v7587_v28 = vadd.f32 %v16093_v52, %v16103_v57 }
 0x777   : > { %v7748_v8 = vpop.f32.mrf.mxu2  ;;  %v7692_v51 = vpop.f32.mrf.mxu0  ;;  %8092 = vmatpush.bf16.msra.mxu2 %v10705_v41  ;;  %v11851_v41 = vld [vmem:[%s13276_s11 + $0x134] sm:$0xf0] }
 0x778   : > { %8008 = vmatmul.bf16.vlgmr.msrb.gmra.mxu3 %v15897_v40  ;;  %v7749_v21 = vadd.f32 %v7748_v8, %v7720_v18  ;;  %v7721_v29 = vpop.f32.mrf.mxu1  ;;  %v7693_v19 = vadd.f32 %v7692_v51, %v7664_v31  ;;  %v11923_v18 = vld [vmem:[%s13276_s11 + $0x374] sm:$0xf0] }
 0x779   : > { %v10849_v31 = vor.u32 %v11923_v18, %v10848_v14  ;;  %v10832_v14 = vld [vmem:[%s13276_s11 + $0x348] sm:$0xf] }
 0x77a   : > { %v7722_v8 = vadd.f32 %v7721_v29, %v7693_v19  ;;  %v10833_v1 = vor.u32 %v11919_v20, %v10832_v14  ;;  %v10561_v14 = vor.u32 %v11851_v41, %v10560_v16 }
 0x77b   : > { %v7777_v30 = vpop.f32.mrf.mxu3  ;;  %8120 = vmatpush.bf16.msra.mxu3 %v10849_v31  ;;  %v11855_v31 = vld [vmem:[%s13276_s11 + $0x154] sm:$0xf0] }
 0x77c   : > { %v7778_v42 = vadd.f32 %v7777_v30, %v7749_v21 }
 0x77e   : > { %12326 = vtanh.f32 %v7778_v42 }
 0x77f   : > { %v7750_v21 = vpop.f32.mrf.mxu2  ;;  %v7695_v51 = vpop.f32.mrf.mxu0  ;;  %8121 = vmatpush.bf16.msra.mxu3 %v10833_v1  ;;  %v11879_v1 = vld [vmem:[%s13276_s11 + $0x214] sm:$0xf0] }
 0x780   : > { %v7751_v15 = vadd.f32 %v7750_v21, %v7722_v8  ;;  %v7724_v42 = vpop.f32.mrf.mxu1  ;;  %v7696_v19 = vadd.f32 %v7695_v51, %v7667_v11  ;;  %v10576_v8 = vld [vmem:[%s13276_s11 + $0x148] sm:$0xf]  ;;  %v7669_v21 = vadd.f32 %v16073_v60, %v7640_v10  ;;  %v7614_v11 = vadd.f32 %v16077_v58, %v7585_v35  ;;  %v11819_v10 = vld [vmem:[%s13276_s11 + $0x34] sm:$0xf0] }
 0x781   : > { %v10688_v60 = vld [vmem:[%s13276_s11 + $0x228] sm:$0xf]  ;;  %v10433_v37 = vor.u32 %v11819_v10, %v10432_v12  ;;  %v7590_v10 = vadd.f32 %v16107_v63, %v16103_v57 }
 0x782   : > { %7926 = vmatmul.bf16.gmra.mxu0 %v15919_v13  ;;  %v7725_v18 = vadd.f32 %v7724_v42, %v7696_v19  ;;  %v10577_v42 = vor.u32 %v11855_v31, %v10576_v8  ;;  %v7643_v58 = vadd.f32 %v16089_v43, %v7614_v11  ;;  %v10689_v5 = vor.u32 %v11883_v47, %v10688_v60  ;;  %v10816_v35 = vld [vmem:[%s13276_s11 + $0x328] sm:$0xf] }
 0x783   : > { %v7779_v30 = vpop.f32.mrf.mxu3  ;;  %7955 = vmatmul.bf16.gmra.mxu1 %v15921_v46  ;;  %v10817_v43 = vor.u32 %v11915_v61, %v10816_v35  ;;  %8035 = vmatpush.bf16.msra.mxu0 %v10433_v37  ;;  %v7619_v63 = vadd.f32 %v16109_v23, %v7590_v10 }
 0x784   : > { %v12327_v45 = vpop.eup %12326  ;;  %v7780_v29 = vadd.f32 %v7779_v30, %v7751_v15  ;;  %7984 = vmatmul.bf16.gmra.mxu2 %v15923_v34  ;;  %8063 = vmatpush.bf16.msra.mxu1 %v10577_v42  ;;  %v7672_v52 = vadd.f32 %v16091_v3, %v7643_v58  ;;  %v7616_v42 = vadd.f32 %v16095_v62, %v7587_v28 }
 0x785   : > { %8525 = vst [vmem:[%s13284_s21] sm:$0xff] %v12327_v45  ;;  %8093 = vmatpush.bf16.msra.mxu2 %v10689_v5  ;;  %8122 = vmatpush.bf16.msra.mxu3 %v10817_v43 }
 0x786   : > { %12328 = vtanh.f32 %v7780_v29  ;;  %v7645_v12 = vadd.f32 %v16100_v25, %v7616_v42  ;;  %v12031_v42 = vld [vmem:[%s13276_s11 + $0x6d4] sm:$0xf0] }
 0x787   : > { %v7753_v39 = vpop.f32.mrf.mxu2  ;;  %v7697_v51 = vpop.f32.mrf.mxu0 }
 0x788   : > { %8013 = vmatmul.bf16.gmra.mxu3 %v15925_v44  ;;  %v7754_v15 = vadd.f32 %v7753_v39, %v7725_v18  ;;  %v7726_v45 = vpop.f32.mrf.mxu1  ;;  %v7698_v19 = vadd.f32 %v7697_v51, %v7669_v21  ;;  %v10672_v18 = vld [vmem:[%s13276_s11 + $0x208] sm:$0xf]  ;;  %8064 = vmatpush.bf16.msra.mxu1 %v10561_v14  ;;  %v11911_v51 = vld [vmem:[%s13276_s11 + $0x314] sm:$0xf0]  ;;  %v7674_v25 = vadd.f32 %v16105_v38, %v7645_v12 }
 0x789   : > { %v10416_v39 = vld [vmem:[%s13276_s11 + $0x8] sm:$0xf]  ;;  %v10673_v11 = vor.u32 %v11879_v1, %v10672_v18  ;;  %v7648_v38 = vadd.f32 %v16125_v0, %v7619_v63  ;;  %v11971_v1 = vld [vmem:[%s13276_s11 + $0x4f4] sm:$0xf0] }
 0x78a   : > { %v7727_v36 = vadd.f32 %v7726_v45, %v7698_v19  ;;  %v11847_v19 = vld [vmem:[%s13276_s11 + $0x114] sm:$0xf0]  ;;  %v11296_v14 = vld [vmem:[%s13276_s11 + $0x6e8] sm:$0xf] }
 0x78b   : > { %v7782_v30 = vpop.f32.mrf.mxu3  ;;  %8094 = vmatpush.bf16.msra.mxu2 %v10673_v11  ;;  %v11040_v18 = vld [vmem:[%s13276_s11 + $0x4e8] sm:$0xf]  ;;  %v7592_v11 = vadd.f32 %v16130_v33, %v16103_v57 }
 0x78c   : > { %v12329_v53 = vpop.eup %12328  ;;  %v7783_v29 = vadd.f32 %v7782_v30, %v7754_v15  ;;  %v11815_v15 = vld [vmem:[%s13276_s11 + $0x14] sm:$0xf0]  ;;  %v10800_v30 = vld [vmem:[%s13276_s11 + $0x308] sm:$0xf] }
 0x78d   : > { %8529 = vst [vmem:[%s13284_s21 + $0x20] sm:$0xff] %v12329_v53  ;;  %v10417_v53 = vor.u32 %v11815_v15, %v10416_v39  ;;  %v10801_v3 = vor.u32 %v11911_v51, %v10800_v30  ;;  %v11424_v39 = vld [vmem:[%s13276_s11 + $0x7e8] sm:$0xf] }
 0x78e   : > { %12330 = vtanh.f32 %v7783_v29  ;;  %v10544_v29 = vld [vmem:[%s13276_s11 + $0x108] sm:$0xf] }
 0x78f   : > { %v7755_v20 = vpop.f32.mrf.mxu2  ;;  %v7700_v21 = vpop.f32.mrf.mxu0  ;;  %v10545_v58 = vor.u32 %v11847_v19, %v10544_v29  ;;  %8036 = vmatpush.bf16.msra.mxu0 %v10417_v53  ;;  %8123 = vmatpush.bf16.msra.mxu3 %v10801_v3  ;;  %v11280_v51 = vld [vmem:[%s13276_s11 + $0x6c8] sm:$0xf]  ;;  %v11967_v19 = vld [vmem:[%s13276_s11 + $0x4d4] sm:$0xf0] }
 0x790   : > { %v7756_v8 = vadd.f32 %v7755_v20, %v7727_v36  ;;  %v7729_v45 = vpop.f32.mrf.mxu1  ;;  %v7701_v5 = vadd.f32 %v7700_v21, %v7672_v52  ;;  %v12035_v20 = vld [vmem:[%s13276_s11 + $0x6f4] sm:$0xf0]  ;;  %v11041_v52 = vor.u32 %v11971_v1, %v11040_v18  ;;  %v11281_v29 = vor.u32 %v12031_v42, %v11280_v51 }
 0x791   : > { %8065 = vmatpush.bf16.msra.mxu1 %v10545_v58  ;;  %v11297_v23 = vor.u32 %v12035_v20, %v11296_v14  ;;  %v12003_v21 = vld [vmem:[%s13276_s11 + $0x5f4] sm:$0xf0]  ;;  %v11392_v20 = vld [vmem:[%s13276_s11 + $0x7a8] sm:$0xf] }
 0x792   : > { %7931 = vmatmul.bf16.gmra.mxu0 %v15947_v6  ;;  %v7730_v62 = vadd.f32 %v7729_v45, %v7701_v5  ;;  %v11024_v45 = vld [vmem:[%s13276_s11 + $0x4c8] sm:$0xf]  ;;  %v7677_v5 = vadd.f32 %v16128_v56, %v7648_v38  ;;  %v11999_v56 = vld [vmem:[%s13276_s11 + $0x5d4] sm:$0xf0] }
 0x793   : > { %v7784_v31 = vpop.f32.mrf.mxu3  ;;  %7960 = vmatmul.bf16.gmra.mxu1 %v15949_v4  ;;  %8203 = vmatpush.bf16.msrb.mxu2 %v11297_v23  ;;  %v11025_v12 = vor.u32 %v11967_v19, %v11024_v45  ;;  %v11963_v14 = vld [vmem:[%s13276_s11 + $0x4b4] sm:$0xf0]  ;;  %v11376_v19 = vld [vmem:[%s13276_s11 + $0x788] sm:$0xf] }
 0x794   : > { %v12331_v60 = vpop.eup %12330  ;;  %v7785_v47 = vadd.f32 %v7784_v31, %v7756_v8  ;;  %7989 = vmatmul.bf16.gmra.mxu2 %v15951_v55  ;;  %v12067_v8 = vld [vmem:[%s13276_s11 + $0x7f4] sm:$0xf0]  ;;  %v11168_v31 = vld [vmem:[%s13276_s11 + $0x5e8] sm:$0xf]  ;;  %8145 = vmatpush.bf16.msrb.mxu0 %v11041_v52 }
 0x795   : > { %8533 = vst [vmem:[%s13284_s21 + $0x40] sm:$0xff] %v12331_v60  ;;  %v11425_v0 = vor.u32 %v12067_v8, %v11424_v39  ;;  %v11169_v30 = vor.u32 %v12003_v21, %v11168_v31  ;;  %v11408_v60 = vld [vmem:[%s13276_s11 + $0x7c8] sm:$0xf]  ;;  %v12059_v38 = vld [vmem:[%s13276_s11 + $0x7b4] sm:$0xf0] }
 0x796   : > { %12332 = vtanh.f32 %v7785_v47  ;;  %v12063_v47 = vld [vmem:[%s13276_s11 + $0x7d4] sm:$0xf0]  ;;  %v11393_v18 = vor.u32 %v12059_v38, %v11392_v20 }
 0x797   : > { %v7758_v35 = vpop.f32.mrf.mxu2  ;;  %v7702_v61 = vpop.f32.mrf.mxu0  ;;  %8232 = vmatpush.bf16.msrb.mxu3 %v11425_v0  ;;  %8174 = vmatpush.bf16.msrb.mxu1 %v11169_v30  ;;  %v11409_v63 = vor.u32 %v12063_v47, %v11408_v60  ;;  %v11136_v0 = vld [vmem:[%s13276_s11 + $0x5a8] sm:$0xf]  ;;  %v11995_v30 = vld [vmem:[%s13276_s11 + $0x5b4] sm:$0xf0] }
 0x798   : > { %8018 = vmatmul.bf16.gmra.mxu3 %v15953_v48  ;;  %v7759_v28 = vadd.f32 %v7758_v35, %v7730_v62  ;;  %v7731_v16 = vpop.f32.mrf.mxu1  ;;  %v7703_v43 = vadd.f32 %v7702_v61, %v7674_v25  ;;  %v7621_v62 = vadd.f32 %v16132_v22, %v7592_v11  ;;  %8204 = vmatpush.bf16.msrb.mxu2 %v11281_v29  ;;  %v11264_v22 = vld [vmem:[%s13276_s11 + $0x6a8] sm:$0xf]  ;;  %v12023_v42 = vld [vmem:[%s13276_s11 + $0x694] sm:$0xf0] }
 0x799   : > { %8146 = vmatpush.bf16.msrb.mxu0 %v11025_v12  ;;  %v11137_v51 = vor.u32 %v11995_v30, %v11136_v0  ;;  %v11959_v29 = vld [vmem:[%s13276_s11 + $0x494] sm:$0xf0]  ;;  %v11344_v30 = vld [vmem:[%s13276_s11 + $0x748] sm:$0xf] }
 0x79a   : > { %v7732_v15 = vadd.f32 %v7731_v16, %v7703_v43  ;;  %v7650_v61 = vadd.f32 %v16145_v24, %v7621_v62  ;;  %v12027_v16 = vld [vmem:[%s13276_s11 + $0x6b4] sm:$0xf0] }
 0x79b   : > { %v7787_v37 = vpop.f32.mrf.mxu3  ;;  %8233 = vmatpush.bf16.msrb.mxu3 %v11409_v63  ;;  %v11265_v43 = vor.u32 %v12027_v16, %v11264_v22  ;;  %v12055_v47 = vld [vmem:[%s13276_s11 + $0x794] sm:$0xf0]  ;;  %v10976_v22 = vld [vmem:[%s13276_s11 + $0x468] sm:$0xf] }
 0x79c   : > { %v12333_v41 = vpop.eup %12332  ;;  %v7788_v36 = vadd.f32 %v7787_v37, %v7759_v28  ;;  %v11152_v28 = vld [vmem:[%s13276_s11 + $0x5c8] sm:$0xf]  ;;  %v7679_v1 = vadd.f32 %v16148_v27, %v7650_v61  ;;  %v11991_v63 = vld [vmem:[%s13276_s11 + $0x594] sm:$0xf0] }
 0x79d   : > { %8537 = vst [vmem:[%s13284_s21 + $0x60] sm:$0xff] %v12333_v41  ;;  %v11153_v37 = vor.u32 %v11999_v56, %v11152_v28  ;;  %v11008_v41 = vld [vmem:[%s13276_s11 + $0x4a8] sm:$0xf]  ;;  %8205 = vmatpush.bf16.msrb.mxu2 %v11265_v43  ;;  %v12019_v61 = vld [vmem:[%s13276_s11 + $0x674] sm:$0xf0] }
 0x79e   : > { %12334 = vtanh.f32 %v7788_v36  ;;  %v11009_v23 = vor.u32 %v11963_v14, %v11008_v41  ;;  %v11248_v27 = vld [vmem:[%s13276_s11 + $0x688] sm:$0xf]  ;;  %v11955_v41 = vld [vmem:[%s13276_s11 + $0x474] sm:$0xf0] }
 0x79f   : > { %v7760_v53 = vpop.f32.mrf.mxu2  ;;  %v7705_v33 = vpop.f32.mrf.mxu0  ;;  %8175 = vmatpush.bf16.msrb.mxu1 %v11153_v37  ;;  %8234 = vmatpush.bf16.msrb.mxu3 %v11393_v18  ;;  %v11249_v45 = vor.u32 %v12023_v42, %v11248_v27  ;;  %v17172_v56 = vld [vmem:[#allocation70_spill] sm:$0xff]  ;;  %v12051_v43 = vld [vmem:[%s13276_s11 + $0x774] sm:$0xf0]  ;;  %v10977_v20 = vor.u32 %v11955_v41, %v10976_v22 }
 0x7a0   : > { %v7761_v3 = vadd.f32 %v7760_v53, %v7732_v15  ;;  %v7734_v58 = vpop.f32.mrf.mxu1  ;;  %v7706_v25 = vadd.f32 %v7705_v33, %v7677_v5  ;;  %8147 = vmatpush.bf16.msrb.mxu0 %v11009_v23  ;;  %v10992_v53 = vld [vmem:[%s13276_s11 + $0x488] sm:$0xf]  ;;  %v11951_v0 = vld [vmem:[%s13276_s11 + $0x454] sm:$0xf0] }
 0x7a1   : > { %v10993_v60 = vor.u32 %v11959_v29, %v10992_v53  ;;  %8206 = vmatpush.bf16.msrb.mxu2 %v11249_v45  ;;  %v11232_v37 = vld [vmem:[%s13276_s11 + $0x668] sm:$0xf]  ;;  %v12047_v27 = vld [vmem:[%s13276_s11 + $0x754] sm:$0xf0] }
 0x7a2   : > { %7936 = vmatmul.bf16.gmra.mxu0 %v15973_v9  ;;  %v7735_v36 = vadd.f32 %v7734_v58, %v7706_v25  ;;  %v11120_v25 = vld [vmem:[%s13276_s11 + $0x588] sm:$0xf]  ;;  %v11233_v16 = vor.u32 %v12019_v61, %v11232_v37  ;;  %v11345_v42 = vor.u32 %v12047_v27, %v11344_v30  ;;  %v12043_v61 = vld [vmem:[%s13276_s11 + $0x734] sm:$0xf0] }
 0x7a3   : > { %v7789_v57 = vpop.f32.mrf.mxu3  ;;  %7965 = vmatmul.bf16.gmra.mxu1 %v15975_v17  ;;  %v11121_v28 = vor.u32 %v11991_v63, %v11120_v25  ;;  %v10944_v25 = vld [vmem:[%s13276_s11 + $0x428] sm:$0xf] }
 0x7a4   : > { %v12335_v10 = vpop.eup %12334  ;;  %v7790_v35 = vadd.f32 %v7789_v57, %v7761_v3  ;;  %7994 = vmatmul.bf16.gmra.mxu2 %v15977_v54  ;;  %8176 = vmatpush.bf16.msrb.mxu1 %v11137_v51  ;;  %v11377_v3 = vor.u32 %v12055_v47, %v11376_v19  ;;  %v11983_v47 = vld [vmem:[%s13276_s11 + $0x554] sm:$0xf0]  ;;  %v11328_v37 = vld [vmem:[%s13276_s11 + $0x728] sm:$0xf] }
 0x7a5   : > { %8541 = vst [vmem:[%s13284_s21 + $0x80] sm:$0xff] %v12335_v10  ;;  %8148 = vmatpush.bf16.msrb.mxu0 %v10993_v60  ;;  %8207 = vmatpush.bf16.msrb.mxu2 %v11233_v16  ;;  %v11088_v60 = vld [vmem:[%s13276_s11 + $0x548] sm:$0xf]  ;;  %v11329_v41 = vor.u32 %v12043_v61, %v11328_v37  ;;  %v11905_v61 = vld [vmem:[%s13276_s11 + $0x2ec] sm:$0xf] }
 0x7a6   : > { %12336 = vtanh.f32 %v7790_v35  ;;  %8235 = vmatpush.bf16.msrb.mxu3 %v11377_v3  ;;  %v11089_v3 = vor.u32 %v11983_v47, %v11088_v60  ;;  %v11975_v60 = vld [vmem:[%s13276_s11 + $0x514] sm:$0xf0]  ;;  %v17180_v37 = vld [vmem:[#allocation78_spill] sm:$0xff] }
 0x7a7   : > { %v7763_v24 = vpop.f32.mrf.mxu2  ;;  %v7707_v8 = vpop.f32.mrf.mxu0 }
 0x7a8   : > { %8023 = vmatmul.bf16.gmra.mxu3 %v15979_v7  ;;  %v7764_v39 = vadd.f32 %v7763_v24, %v7735_v36  ;;  %v7736_v31 = vpop.f32.mrf.mxu1  ;;  %v7708_v15 = vadd.f32 %v7707_v8, %v7679_v1  ;;  %8177 = vmatpush.bf16.msrb.mxu1 %v11121_v28  ;;  %v11360_v36 = vld [vmem:[%s13276_s11 + $0x768] sm:$0xf]  ;;  %v11947_v28 = vld [vmem:[%s13276_s11 + $0x434] sm:$0xf0] }
 0x7a9   : > { %v11361_v38 = vor.u32 %v12051_v43, %v11360_v36  ;;  %8149 = vmatpush.bf16.msrb.mxu0 %v10977_v20  ;;  %v10945_v16 = vor.u32 %v11947_v28, %v10944_v25  ;;  %v17177_v25 = vld [vmem:[#allocation75_spill] sm:$0xff]  ;;  %v17179_v28 = vld [vmem:[#allocation77_spill] sm:$0xff] }
 0x7aa   : > { %v7737_v5 = vadd.f32 %v7736_v31, %v7708_v15  ;;  %v11216_v31 = vld [vmem:[%s13276_s11 + $0x648] sm:$0xf] }
 0x7ab   : > { %v7792_v52 = vpop.f32.mrf.mxu3  ;;  %8236 = vmatpush.bf16.msrb.mxu3 %v11361_v38  ;;  %v10960_v15 = vld [vmem:[%s13276_s11 + $0x448] sm:$0xf] }
 0x7ac   : > { %v12337_v21 = vpop.eup %12336  ;;  %v7793_v11 = vadd.f32 %v7792_v52, %v7764_v39  ;;  %v11104_v39 = vld [vmem:[%s13276_s11 + $0x568] sm:$0xf]  ;;  %v11987_v52 = vld [vmem:[%s13276_s11 + $0x574] sm:$0xf0]  ;;  %v10961_v51 = vor.u32 %v11951_v0, %v10960_v15 }
 0x7ad   : > { %8545 = vst [vmem:[%s13284_s21 + $0xa0] sm:$0xff] %v12337_v21  ;;  %v11105_v8 = vor.u32 %v11987_v52, %v11104_v39  ;;  %v12015_v21 = vld [vmem:[%s13276_s11 + $0x654] sm:$0xf0]  ;;  %v11072_v38 = vld [vmem:[%s13276_s11 + $0x528] sm:$0xf] }
 0x7ae   : > { %12338 = vtanh.f32 %v7793_v11  ;;  %v11217_v11 = vor.u32 %v12015_v21, %v11216_v31  ;;  %8150 = vmatpush.bf16.msrb.mxu0 %v10961_v51  ;;  %v11184_v52 = vld [vmem:[%s13276_s11 + $0x608] sm:$0xf]  ;;  %v12039_v0 = vld [vmem:[%s13276_s11 + $0x714] sm:$0xf0] }
 0x7af   : > { %v7765_v57 = vpop.f32.mrf.mxu2  ;;  %v16277_v12 = vpop.f32.mrf.mxu0  ;;  %8178 = vmatpush.bf16.msrb.mxu1 %v11105_v8  ;;  %8237 = vmatpush.bf16.msrb.mxu3 %v11345_v42  ;;  %v12007_v8 = vld [vmem:[%s13276_s11 + $0x614] sm:$0xf0]  ;;  %v10928_v31 = vld [vmem:[%s13276_s11 + $0x408] sm:$0xf] }
 0x7b0   : > { %v7766_v33 = vadd.f32 %v7765_v57, %v7737_v5  ;;  %v16279_v10 = vpop.f32.mrf.mxu1  ;;  %8208 = vmatpush.bf16.msrb.mxu2 %v11217_v11  ;;  %v17173_v5 = vld [vmem:[#allocation71_spill] sm:$0xff]  ;;  %v17174_v57 = vld [vmem:[#allocation72_spill] sm:$0xff]  ;;  %v11185_v21 = vor.u32 %v12007_v8, %v11184_v52  ;;  %v11312_v15 = vld [vmem:[%s13276_s11 + $0x708] sm:$0xf] }
 0x7b1   : > { %v11943_v11 = vld [vmem:[%s13276_s11 + $0x414] sm:$0xf0]  ;;  %v11313_v51 = vor.u32 %v12039_v0, %v11312_v15  ;;  %v11056_v42 = vld [vmem:[%s13276_s11 + $0x508] sm:$0xf]  ;;  %v10914_v52 = vld [vmem:[%s13276_s11 + $0x3f8] sm:$0xf0] }
 0x7b2   : > { %8037 = vmatmul.bf16.vlgmr.msra.gmra.mxu0 %v15754_v32  ;;  %v10929_v30 = vor.u32 %v11943_v11, %v10928_v31 }
 0x7b3   : > { %v7794_v58 = vpop.f32.mrf.mxu3  ;;  %8066 = vmatmul.bf16.vlgmr.msra.gmra.mxu1 %v15759_v26  ;;  %8151 = vmatpush.bf16.msrb.mxu0 %v10945_v16  ;;  %v10786_v16 = vld [vmem:[%s13276_s11 + $0x2f8] sm:$0xf0] }
 0x7b4   : > { %v12339_v62 = vpop.eup %12338  ;;  %v7795_v35 = vadd.f32 %v7794_v58, %v7766_v33  ;;  %8095 = vmatmul.bf16.vlgmr.msra.gmra.mxu2 %v15761_v50  ;;  %v17175_v33 = vld [vmem:[#allocation73_spill] sm:$0xff]  ;;  %v17176_v58 = vld [vmem:[#allocation74_spill] sm:$0xff]  ;;  %8179 = vmatpush.bf16.msrb.mxu1 %v11089_v3 }
 0x7b5   : > { %8549 = vst [vmem:[%s13284_s21 + $0xc0] sm:$0xff] %v12339_v62  ;;  %v11200_v62 = vld [vmem:[%s13276_s11 + $0x628] sm:$0xf]  ;;  %8238 = vmatpush.bf16.msrb.mxu3 %v11329_v41  ;;  %v11841_v41 = vld [vmem:[%s13276_s11 + $0xec] sm:$0xf] }
 0x7b6   : > { %12340 = vtanh.f32 %v7795_v35  ;;  %v12011_v35 = vld [vmem:[%s13276_s11 + $0x634] sm:$0xf0] }
 0x7b7   : > { %v16294_v14 = vpop.f32.mrf.mxu2  ;;  %v16298_v23 = vpop.f32.mrf.mxu0  ;;  %v11201_v63 = vor.u32 %v12011_v35, %v11200_v62  ;;  %8152 = vmatpush.bf16.msrb.mxu0 %v10929_v30  ;;  %v11057_v62 = vor.u32 %v11975_v60, %v11056_v42 }
 0x7b8   : > { %8124 = vmatmul.bf16.vlgmr.msra.gmra.mxu3 %v17172_v56  ;;  %v16300_v18 = vpop.f32.mrf.mxu1 }
 0x7b9   : > { %8209 = vmatpush.bf16.msrb.mxu2 %v11201_v63  ;;  %8239 = vmatpush.bf16.msrb.mxu3 %v11313_v51  ;;  %v17178_v63 = vld [vmem:[#allocation76_spill] sm:$0xff]  ;;  %v17181_v51 = vld [vmem:[#allocation83_spill] sm:$0xff] }
 0x7ba   : > { %v16378_v42 = vperm.slane %v17181_v51, 1  ;;  %v10770_v51 = vld [vmem:[%s13276_s11 + $0x2d8] sm:$0xf0] }
 0x7bb   : > { %v16296_v24 = vpop.f32.mrf.mxu3 }
 0x7bc   : > { %v12341_v1 = vpop.eup %12340 }
 0x7bd   : > { %8553 = vst [vmem:[%s13284_s21 + $0xe0] sm:$0xff] %v12341_v1  ;;  %v11979_v1 = vld [vmem:[%s13276_s11 + $0x534] sm:$0xf0]  ;;  %8210 = vmatpush.bf16.msrb.mxu2 %v11185_v21 }
 0x7be   : > { %v11073_v39 = vor.u32 %v11979_v1, %v11072_v38  ;;  %v10789_v38 = vor.u32 %v11905_v61, %v10786_v16  ;;  %v10530_v1 = vld [vmem:[%s13276_s11 + $0xf8] sm:$0xf0]  ;;  %v17182_v16 = vld [vmem:[#allocation79_spill] sm:$0xff] }
 0x7bf   : > { %v16311_v45 = vpop.f32.mrf.mxu2  ;;  %v16315_v29 = vpop.f32.mrf.mxu0  ;;  %v10533_v31 = vor.u32 %v11841_v41, %v10530_v1  ;;  %v11873_v41 = vld [vmem:[%s13276_s11 + $0x1ec] sm:$0xf] }
 0x7c0   : > { %v16317_v19 = vpop.f32.mrf.mxu1  ;;  %8180 = vmatpush.bf16.msrb.mxu1 %v11073_v39  ;;  %v11937_v39 = vld [vmem:[%s13276_s11 + $0x3ec] sm:$0xf] }
 0x7c1   : > { %v10917_v21 = vor.u32 %v11937_v39, %v10914_v52  ;;  %8319 = vmatpush.bf16.msra.mxu2 %v10789_v38  ;;  %8261 = vmatpush.bf16.msra.mxu0 %v10533_v31  ;;  %v10658_v38 = vld [vmem:[%s13276_s11 + $0x1f8] sm:$0xf0]  ;;  %v11901_v1 = vld [vmem:[%s13276_s11 + $0x2cc] sm:$0xf]  ;;  %v7807_v39 = vadd.f32 %v16277_v12, %v16378_v42  ;;  %v17184_v31 = vld [vmem:[#allocation81_spill] sm:$0xff] }
 0x7c2   : > { %8042 = vmatmul.bf16.gmra.mxu0 %v17173_v5  ;;  %v17183_v52 = vld [vmem:[#allocation80_spill] sm:$0xff] }
 0x7c3   : > { %v16313_v53 = vpop.f32.mrf.mxu3  ;;  %8071 = vmatmul.bf16.gmra.mxu1 %v17174_v57  ;;  %8348 = vmatpush.bf16.msra.mxu3 %v10917_v21  ;;  %v10661_v21 = vor.u32 %v11873_v41, %v10658_v38  ;;  %v7836_v41 = vadd.f32 %v16279_v10, %v7807_v39  ;;  %v11929_v10 = vld [vmem:[%s13276_s11 + $0x3ac] sm:$0xf]  ;;  %v10882_v39 = vld [vmem:[%s13276_s11 + $0x3b8] sm:$0xf0] }
 0x7c4   : > { %8100 = vmatmul.bf16.gmra.mxu2 %v17175_v33  ;;  %8181 = vmatpush.bf16.msrb.mxu1 %v11057_v62  ;;  %v10898_v33 = vld [vmem:[%s13276_s11 + $0x3d8] sm:$0xf0]  ;;  %v10885_v5 = vor.u32 %v11929_v10, %v10882_v39  ;;  %v11925_v39 = vld [vmem:[%s13276_s11 + $0x38c] sm:$0xf] }
 0x7c7   : > { %v16331_v22 = vpop.f32.mrf.mxu2  ;;  %v16335_v43 = vpop.f32.mrf.mxu0 }
 0x7c8   : > { %8129 = vmatmul.bf16.gmra.mxu3 %v17176_v58  ;;  %v16337_v20 = vpop.f32.mrf.mxu1  ;;  %v11933_v58 = vld [vmem:[%s13276_s11 + $0x3cc] sm:$0xf]  ;;  %8290 = vmatpush.bf16.msra.mxu1 %v10661_v21  ;;  %v10642_v21 = vld [vmem:[%s13276_s11 + $0x1d8] sm:$0xf0] }
 0x7c9   : > { %v10901_v12 = vor.u32 %v11933_v58, %v10898_v33  ;;  %v7865_v33 = vadd.f32 %v16294_v14, %v7836_v41 }
 0x7cb   : > { %v16333_v36 = vpop.f32.mrf.mxu3  ;;  %8349 = vmatpush.bf16.msra.mxu3 %v10901_v12  ;;  %v7809_v12 = vadd.f32 %v16298_v23, %v16378_v42  ;;  %v7894_v14 = vadd.f32 %v16296_v24, %v7865_v33  ;;  %v7812_v33 = vadd.f32 %v16315_v29, %v16378_v42 }
 0x7cf   : > { %v16347_v27 = vpop.f32.mrf.mxu2  ;;  %v16353_v3 = vpop.f32.mrf.mxu0  ;;  %8350 = vmatpush.bf16.msra.mxu3 %v10885_v5 }
 0x7d0   : > { %v16355_v35 = vpop.f32.mrf.mxu1 }
 0x7d2   : > { %8047 = vmatmul.bf16.gmra.mxu0 %v17177_v25  ;;  %v10773_v25 = vor.u32 %v11901_v1, %v10770_v51  ;;  %v11897_v51 = vld [vmem:[%s13276_s11 + $0x2ac] sm:$0xf] }
 0x7d3   : > { %v16351_v47 = vpop.f32.mrf.mxu3  ;;  %8076 = vmatmul.bf16.gmra.mxu1 %v17178_v63  ;;  %v17185_v63 = vld [vmem:[#allocation82_spill] sm:$0xff] }
 0x7d4   : > { %8105 = vmatmul.bf16.gmra.mxu2 %v17179_v28  ;;  %v10514_v28 = vld [vmem:[%s13276_s11 + $0xd8] sm:$0xf0] }
 0x7d5   : > { %8320 = vmatpush.bf16.msra.mxu2 %v10773_v25  ;;  %v11833_v25 = vld [vmem:[%s13276_s11 + $0xac] sm:$0xf] }
 0x7d7   : > { %v16367_v8 = vpop.f32.mrf.mxu2  ;;  %v16371_v15 = vpop.f32.mrf.mxu0 }
 0x7d8   : > { %8134 = vmatmul.bf16.gmra.mxu3 %v17180_v37  ;;  %v16373_v0 = vpop.f32.mrf.mxu1  ;;  %v11837_v37 = vld [vmem:[%s13276_s11 + $0xcc] sm:$0xf] }
 0x7db   : > { %v16369_v11 = vpop.f32.mrf.mxu3 }
 0x7df   : > { %v16375_v30 = vpop.f32.mrf.mxu2  ;;  %v16382_v62 = vpop.f32.mrf.mxu0 }
 0x7e0   : > { %v16384_v61 = vpop.f32.mrf.mxu1 }
 0x7e2   : > { %8052 = vmatmul.bf16.gmra.mxu0 %v17182_v16  ;;  %v10517_v16 = vor.u32 %v11837_v37, %v10514_v28  ;;  %v11869_v37 = vld [vmem:[%s13276_s11 + $0x1cc] sm:$0xf] }
 0x7e3   : > { %v16380_v60 = vpop.f32.mrf.mxu3  ;;  %8081 = vmatmul.bf16.gmra.mxu1 %v17183_v52  ;;  %v10645_v58 = vor.u32 %v11869_v37, %v10642_v21  ;;  %v7838_v21 = vadd.f32 %v16300_v18, %v7809_v12  ;;  %v11829_v18 = vld [vmem:[%s13276_s11 + $0x8c] sm:$0xf]  ;;  %v10866_v12 = vld [vmem:[%s13276_s11 + $0x398] sm:$0xf0] }
 0x7e4   : > { %8110 = vmatmul.bf16.gmra.mxu2 %v17184_v31  ;;  %8262 = vmatpush.bf16.msra.mxu0 %v10517_v16  ;;  %v10498_v16 = vld [vmem:[%s13276_s11 + $0xb8] sm:$0xf0] }
 0x7e5   : > { %v10501_v57 = vor.u32 %v11833_v25, %v10498_v16  ;;  %8291 = vmatpush.bf16.msra.mxu1 %v10645_v58  ;;  %v7867_v24 = vadd.f32 %v16311_v45, %v7838_v21  ;;  %v10738_v58 = vld [vmem:[%s13276_s11 + $0x298] sm:$0xf0]  ;;  %v10869_v45 = vor.u32 %v11925_v39, %v10866_v12  ;;  %v7841_v21 = vadd.f32 %v16317_v19, %v7812_v33 }
 0x7e6   : > { %v10482_v25 = vld [vmem:[%s13276_s11 + $0x98] sm:$0xf0]  ;;  %v7814_v33 = vadd.f32 %v16335_v43, %v16378_v42 }
 0x7e7   : > { %v16400_v52 = vpop.f32.mrf.mxu2  ;;  %v16405_v1 = vpop.f32.mrf.mxu0  ;;  %v10485_v10 = vor.u32 %v11829_v18, %v10482_v25  ;;  %8351 = vmatpush.bf16.msra.mxu3 %v10869_v45  ;;  %v10610_v18 = vld [vmem:[%s13276_s11 + $0x198] sm:$0xf0]  ;;  %v11889_v25 = vld [vmem:[%s13276_s11 + $0x26c] sm:$0xf] }
 0x7e8   : > { %8139 = vmatmul.bf16.gmra.mxu3 %v17185_v63  ;;  %v16407_v28 = vpop.f32.mrf.mxu1  ;;  %v10754_v63 = vld [vmem:[%s13276_s11 + $0x2b8] sm:$0xf0]  ;;  %8263 = vmatpush.bf16.msra.mxu0 %v10501_v57  ;;  %v11893_v57 = vld [vmem:[%s13276_s11 + $0x28c] sm:$0xf]  ;;  %v7843_v43 = vadd.f32 %v16337_v20, %v7814_v33 }
 0x7e9   : > { %v10757_v31 = vor.u32 %v11897_v51, %v10754_v63  ;;  %v11865_v51 = vld [vmem:[%s13276_s11 + $0x1ac] sm:$0xf]  ;;  %v10741_v16 = vor.u32 %v11893_v57, %v10738_v58  ;;  %v10466_v19 = vld [vmem:[%s13276_s11 + $0x78] sm:$0xf0] }
 0x7ea   : > { %v11861_v58 = vld [vmem:[%s13276_s11 + $0x18c] sm:$0xf]  ;;  %v10850_v45 = vld [vmem:[%s13276_s11 + $0x378] sm:$0xf0] }
 0x7eb   : > { %v16403_v38 = vpop.f32.mrf.mxu3  ;;  %8321 = vmatpush.bf16.msra.mxu2 %v10757_v31  ;;  %v10626_v31 = vld [vmem:[%s13276_s11 + $0x1b8] sm:$0xf0]  ;;  %v11917_v33 = vld [vmem:[%s13276_s11 + $0x34c] sm:$0xf] }
 0x7ec   : > { %v10629_v5 = vor.u32 %v11865_v51, %v10626_v31  ;;  %8264 = vmatpush.bf16.msra.mxu0 %v10485_v10  ;;  %v11825_v10 = vld [vmem:[%s13276_s11 + $0x6c] sm:$0xf] }
 0x7ed   : > { %v10469_v12 = vor.u32 %v11825_v10, %v10466_v19  ;;  %v10450_v19 = vld [vmem:[%s13276_s11 + $0x58] sm:$0xf0] }
 0x7ee   : > { %8292 = vmatpush.bf16.msra.mxu1 %v10629_v5 }
 0x7ef   : > { %v16420_v56 = vpop.f32.mrf.mxu2  ;;  %v7922_v63 = vpop.f32.mrf.mxu0  ;;  %8322 = vmatpush.bf16.msra.mxu2 %v10741_v16  ;;  %v7870_v16 = vadd.f32 %v16331_v22, %v7841_v21 }
 0x7f0   : > { %v7951_v37 = vpop.f32.mrf.mxu1  ;;  %v7923_v23 = vadd.f32 %v7922_v63, %v7894_v14  ;;  %v7896_v63 = vadd.f32 %v16313_v53, %v7867_v24  ;;  %v10613_v53 = vor.u32 %v11861_v58, %v10610_v18  ;;  %v10722_v24 = vld [vmem:[%s13276_s11 + $0x278] sm:$0xf0]  ;;  %8265 = vmatpush.bf16.msra.mxu0 %v10469_v12  ;;  %v7872_v18 = vadd.f32 %v16347_v27, %v7843_v43 }
 0x7f1   : > { %v10725_v39 = vor.u32 %v11889_v25, %v10722_v24  ;;  %v7899_v22 = vadd.f32 %v16333_v36, %v7870_v16  ;;  %v11857_v36 = vld [vmem:[%s13276_s11 + $0x16c] sm:$0xf]  ;;  %v10594_v25 = vld [vmem:[%s13276_s11 + $0x178] sm:$0xf0]  ;;  %v7817_v16 = vadd.f32 %v16353_v3, %v16378_v42 }
 0x7f2   : > { %8153 = vmatmul.bf16.vlgmr.msrb.gmra.mxu0 %v15891_v49  ;;  %v7952_v14 = vadd.f32 %v7951_v37, %v7923_v23  ;;  %8293 = vmatpush.bf16.msra.mxu1 %v10613_v53  ;;  %v10597_v20 = vor.u32 %v11857_v36, %v10594_v25  ;;  %v11885_v53 = vld [vmem:[%s13276_s11 + $0x24c] sm:$0xf]  ;;  %v10706_v27 = vld [vmem:[%s13276_s11 + $0x258] sm:$0xf0] }
 0x7f3   : > { %v16423_v41 = vpop.f32.mrf.mxu3  ;;  %8182 = vmatmul.bf16.vlgmr.msrb.gmra.mxu1 %v15893_v2  ;;  %8323 = vmatpush.bf16.msra.mxu2 %v10725_v39  ;;  %v11821_v24 = vld [vmem:[%s13276_s11 + $0x4c] sm:$0xf]  ;;  %v10709_v10 = vor.u32 %v11885_v53, %v10706_v27  ;;  %v10834_v39 = vld [vmem:[%s13276_s11 + $0x358] sm:$0xf0]  ;;  %v7819_v53 = vadd.f32 %v16371_v15, %v16378_v42 }
 0x7f4   : > { %8211 = vmatmul.bf16.vlgmr.msrb.gmra.mxu2 %v15895_v59  ;;  %v10453_v3 = vor.u32 %v11821_v24, %v10450_v19  ;;  %v11817_v25 = vld [vmem:[%s13276_s11 + $0x2c] sm:$0xf]  ;;  %v10818_v24 = vld [vmem:[%s13276_s11 + $0x338] sm:$0xf0] }
 0x7f5   : > { %v10562_v19 = vld [vmem:[%s13276_s11 + $0x138] sm:$0xf0] }
 0x7f6   : > { %8294 = vmatpush.bf16.msra.mxu1 %v10597_v20  ;;  %8266 = vmatpush.bf16.msra.mxu0 %v10453_v3  ;;  %v11913_v20 = vld [vmem:[%s13276_s11 + $0x32c] sm:$0xf] }
 0x7f7   : > { %v7980_v29 = vpop.f32.mrf.mxu2  ;;  %v7924_v57 = vpop.f32.mrf.mxu0  ;;  %8324 = vmatpush.bf16.msra.mxu2 %v10709_v10  ;;  %v11849_v10 = vld [vmem:[%s13276_s11 + $0x12c] sm:$0xf] }
 0x7f8   : > { %8240 = vmatmul.bf16.vlgmr.msrb.gmra.mxu3 %v15897_v40  ;;  %v7981_v51 = vadd.f32 %v7980_v29, %v7952_v14  ;;  %v7953_v37 = vpop.f32.mrf.mxu1  ;;  %v7925_v5 = vadd.f32 %v7924_v57, %v7896_v63  ;;  %v11921_v14 = vld [vmem:[%s13276_s11 + $0x36c] sm:$0xf] }
 0x7f9   : > { %v10853_v63 = vor.u32 %v11921_v14, %v10850_v45  ;;  %v10837_v14 = vor.u32 %v11917_v33, %v10834_v39  ;;  %v7901_v45 = vadd.f32 %v16351_v47, %v7872_v18  ;;  %v10565_v39 = vor.u32 %v11849_v10, %v10562_v19  ;;  %v11877_v3 = vld [vmem:[%s13276_s11 + $0x20c] sm:$0xf] }
 0x7fa   : > { %v7954_v29 = vadd.f32 %v7953_v37, %v7925_v5 }
 0x7fb   : > { %v8009_v31 = vpop.f32.mrf.mxu3  ;;  %8352 = vmatpush.bf16.msra.mxu3 %v10853_v63  ;;  %v11853_v63 = vld [vmem:[%s13276_s11 + $0x14c] sm:$0xf] }
 0x7fc   : > { %v8010_v23 = vadd.f32 %v8009_v31, %v7981_v51 }
 0x7fe   : > { %12342 = vtanh.f32 %v8010_v23 }
 0x7ff   : > { %v7982_v51 = vpop.f32.mrf.mxu2  ;;  %v7927_v57 = vpop.f32.mrf.mxu0  ;;  %8353 = vmatpush.bf16.msra.mxu3 %v10837_v14  ;;  %v10674_v14 = vld [vmem:[%s13276_s11 + $0x218] sm:$0xf0] }
 0x800   : > { %v7983_v21 = vadd.f32 %v7982_v51, %v7954_v29  ;;  %v7956_v23 = vpop.f32.mrf.mxu1  ;;  %v7928_v58 = vadd.f32 %v7927_v57, %v7899_v22  ;;  %v10578_v51 = vld [vmem:[%s13276_s11 + $0x158] sm:$0xf0]  ;;  %v7846_v22 = vadd.f32 %v16355_v35, %v7817_v16 }
 0x801   : > { %v10581_v43 = vor.u32 %v11853_v63, %v10578_v51  ;;  %v10690_v35 = vld [vmem:[%s13276_s11 + $0x238] sm:$0xf0] }
 0x802   : > { %8158 = vmatmul.bf16.gmra.mxu0 %v15919_v13  ;;  %v7957_v12 = vadd.f32 %v7956_v23, %v7928_v58  ;;  %v11881_v58 = vld [vmem:[%s13276_s11 + $0x22c] sm:$0xf]  ;;  %v7875_v18 = vadd.f32 %v16367_v8, %v7846_v22  ;;  %v10434_v16 = vld [vmem:[%s13276_s11 + $0x38] sm:$0xf0]  ;;  %v10821_v8 = vor.u32 %v11913_v20, %v10818_v24  ;;  %v10677_v22 = vor.u32 %v11877_v3, %v10674_v14 }
 0x803   : > { %v8011_v31 = vpop.f32.mrf.mxu3  ;;  %8187 = vmatmul.bf16.gmra.mxu1 %v15921_v46  ;;  %v10693_v36 = vor.u32 %v11881_v58, %v10690_v35  ;;  %v10437_v27 = vor.u32 %v11817_v25, %v10434_v16  ;;  %v7822_v16 = vadd.f32 %v16382_v62, %v16378_v42  ;;  %v11969_v3 = vld [vmem:[%s13276_s11 + $0x4ec] sm:$0xf]  ;;  %v11042_v14 = vld [vmem:[%s13276_s11 + $0x4f8] sm:$0xf0] }
 0x804   : > { %v12343_v37 = vpop.eup %12342  ;;  %v8012_v5 = vadd.f32 %v8011_v31, %v7983_v21  ;;  %8216 = vmatmul.bf16.gmra.mxu2 %v15923_v34  ;;  %8295 = vmatpush.bf16.msra.mxu1 %v10581_v43  ;;  %v7904_v15 = vadd.f32 %v16369_v11, %v7875_v18  ;;  %v7848_v43 = vadd.f32 %v16373_v0, %v7819_v53 }
 0x805   : > { %8526 = vst [vmem:[%s13284_s21 + $0x8] sm:$0xff] %v12343_v37  ;;  %8325 = vmatpush.bf16.msra.mxu2 %v10693_v36  ;;  %8267 = vmatpush.bf16.msra.mxu0 %v10437_v27  ;;  %v7851_v62 = vadd.f32 %v16384_v61, %v7822_v16 }
 0x806   : > { %12344 = vtanh.f32 %v8012_v5  ;;  %8354 = vmatpush.bf16.msra.mxu3 %v10821_v8  ;;  %v7877_v25 = vadd.f32 %v16375_v30, %v7848_v43  ;;  %v11282_v43 = vld [vmem:[%s13276_s11 + $0x6d8] sm:$0xf0] }
 0x807   : > { %v7985_v29 = vpop.f32.mrf.mxu2  ;;  %v7929_v57 = vpop.f32.mrf.mxu0 }
 0x808   : > { %8245 = vmatmul.bf16.gmra.mxu3 %v15925_v44  ;;  %v7986_v21 = vadd.f32 %v7985_v29, %v7957_v12  ;;  %v7958_v23 = vpop.f32.mrf.mxu1  ;;  %v7930_v5 = vadd.f32 %v7929_v57, %v7901_v45  ;;  %v11813_v45 = vld [vmem:[%s13276_s11 + $0xc] sm:$0xf]  ;;  %8296 = vmatpush.bf16.msra.mxu1 %v10565_v39  ;;  %v10802_v57 = vld [vmem:[%s13276_s11 + $0x318] sm:$0xf0]  ;;  %v7906_v30 = vadd.f32 %v16380_v60, %v7877_v25 }
 0x809   : > { %8326 = vmatpush.bf16.msra.mxu2 %v10677_v22  ;;  %v12033_v39 = vld [vmem:[%s13276_s11 + $0x6ec] sm:$0xf]  ;;  %v7880_v60 = vadd.f32 %v16400_v52, %v7851_v62  ;;  %v7824_v22 = vadd.f32 %v16405_v1, %v16378_v42 }
 0x80a   : > { %v7959_v33 = vadd.f32 %v7958_v23, %v7930_v5  ;;  %v10546_v5 = vld [vmem:[%s13276_s11 + $0x118] sm:$0xf0] }
 0x80b   : > { %v8014_v31 = vpop.f32.mrf.mxu3 }
 0x80c   : > { %v12345_v47 = vpop.eup %12344  ;;  %v8015_v37 = vadd.f32 %v8014_v31, %v7986_v21  ;;  %v10418_v21 = vld [vmem:[%s13276_s11 + $0x18] sm:$0xf0]  ;;  %v11909_v31 = vld [vmem:[%s13276_s11 + $0x30c] sm:$0xf] }
 0x80d   : > { %8530 = vst [vmem:[%s13284_s21 + $0x28] sm:$0xff] %v12345_v47  ;;  %v10421_v47 = vor.u32 %v11813_v45, %v10418_v21  ;;  %v10805_v11 = vor.u32 %v11909_v31, %v10802_v57  ;;  %v12065_v45 = vld [vmem:[%s13276_s11 + $0x7ec] sm:$0xf] }
 0x80e   : > { %12346 = vtanh.f32 %v8015_v37  ;;  %v11845_v37 = vld [vmem:[%s13276_s11 + $0x10c] sm:$0xf] }
 0x80f   : > { %v7987_v12 = vpop.f32.mrf.mxu2  ;;  %v7932_v51 = vpop.f32.mrf.mxu0  ;;  %v10549_v18 = vor.u32 %v11845_v37, %v10546_v5  ;;  %8268 = vmatpush.bf16.msra.mxu0 %v10421_v47  ;;  %8355 = vmatpush.bf16.msra.mxu3 %v10805_v11  ;;  %v12029_v57 = vld [vmem:[%s13276_s11 + $0x6cc] sm:$0xf]  ;;  %v11026_v5 = vld [vmem:[%s13276_s11 + $0x4d8] sm:$0xf0] }
 0x810   : > { %v7988_v29 = vadd.f32 %v7987_v12, %v7959_v33  ;;  %v7961_v23 = vpop.f32.mrf.mxu1  ;;  %v7933_v36 = vadd.f32 %v7932_v51, %v7904_v15  ;;  %v11298_v12 = vld [vmem:[%s13276_s11 + $0x6f8] sm:$0xf0]  ;;  %v11045_v15 = vor.u32 %v11969_v3, %v11042_v14  ;;  %v11285_v37 = vor.u32 %v12029_v57, %v11282_v43 }
 0x811   : > { %8297 = vmatpush.bf16.msra.mxu1 %v10549_v18  ;;  %v11301_v61 = vor.u32 %v12033_v39, %v11298_v12  ;;  %v11170_v51 = vld [vmem:[%s13276_s11 + $0x5f8] sm:$0xf0]  ;;  %v12057_v12 = vld [vmem:[%s13276_s11 + $0x7ac] sm:$0xf] }
 0x812   : > { %8163 = vmatmul.bf16.gmra.mxu0 %v15947_v6  ;;  %v7962_v0 = vadd.f32 %v7961_v23, %v7933_v36  ;;  %v11965_v23 = vld [vmem:[%s13276_s11 + $0x4cc] sm:$0xf]  ;;  %v7909_v36 = vadd.f32 %v16403_v38, %v7880_v60  ;;  %v11154_v38 = vld [vmem:[%s13276_s11 + $0x5d8] sm:$0xf0] }
 0x813   : > { %v8016_v63 = vpop.f32.mrf.mxu3  ;;  %8192 = vmatmul.bf16.gmra.mxu1 %v15949_v4  ;;  %8435 = vmatpush.bf16.msrb.mxu2 %v11301_v61  ;;  %v11029_v25 = vor.u32 %v11965_v23, %v11026_v5  ;;  %v11010_v39 = vld [vmem:[%s13276_s11 + $0x4b8] sm:$0xf0]  ;;  %v12053_v5 = vld [vmem:[%s13276_s11 + $0x78c] sm:$0xf] }
 0x814   : > { %v12347_v58 = vpop.eup %12346  ;;  %v8017_v35 = vadd.f32 %v8016_v63, %v7988_v29  ;;  %8221 = vmatmul.bf16.gmra.mxu2 %v15951_v55  ;;  %v11426_v29 = vld [vmem:[%s13276_s11 + $0x7f8] sm:$0xf0]  ;;  %v12001_v63 = vld [vmem:[%s13276_s11 + $0x5ec] sm:$0xf]  ;;  %8377 = vmatpush.bf16.msrb.mxu0 %v11045_v15 }
 0x815   : > { %8534 = vst [vmem:[%s13284_s21 + $0x48] sm:$0xff] %v12347_v58  ;;  %v11429_v52 = vor.u32 %v12065_v45, %v11426_v29  ;;  %v11173_v31 = vor.u32 %v12001_v63, %v11170_v51  ;;  %v12061_v58 = vld [vmem:[%s13276_s11 + $0x7cc] sm:$0xf]  ;;  %v11394_v60 = vld [vmem:[%s13276_s11 + $0x7b8] sm:$0xf0] }
 0x816   : > { %12348 = vtanh.f32 %v8017_v35  ;;  %v11410_v35 = vld [vmem:[%s13276_s11 + $0x7d8] sm:$0xf0]  ;;  %v11397_v3 = vor.u32 %v12057_v12, %v11394_v60 }
 0x817   : > { %v7990_v20 = vpop.f32.mrf.mxu2  ;;  %v7934_v24 = vpop.f32.mrf.mxu0  ;;  %8464 = vmatpush.bf16.msrb.mxu3 %v11429_v52  ;;  %8406 = vmatpush.bf16.msrb.mxu1 %v11173_v31  ;;  %v11413_v62 = vor.u32 %v12061_v58, %v11410_v35  ;;  %v11993_v52 = vld [vmem:[%s13276_s11 + $0x5ac] sm:$0xf]  ;;  %v11138_v31 = vld [vmem:[%s13276_s11 + $0x5b8] sm:$0xf0] }
 0x818   : > { %8250 = vmatmul.bf16.gmra.mxu3 %v15953_v48  ;;  %v7991_v53 = vadd.f32 %v7990_v20, %v7962_v0  ;;  %v7963_v10 = vpop.f32.mrf.mxu1  ;;  %v7935_v8 = vadd.f32 %v7934_v24, %v7906_v30  ;;  %v7853_v0 = vadd.f32 %v16407_v28, %v7824_v22  ;;  %8436 = vmatpush.bf16.msrb.mxu2 %v11285_v37  ;;  %v12025_v28 = vld [vmem:[%s13276_s11 + $0x6ac] sm:$0xf]  ;;  %v11250_v43 = vld [vmem:[%s13276_s11 + $0x698] sm:$0xf0] }
 0x819   : > { %8378 = vmatpush.bf16.msrb.mxu0 %v11029_v25  ;;  %v11141_v57 = vor.u32 %v11993_v52, %v11138_v31  ;;  %v10994_v37 = vld [vmem:[%s13276_s11 + $0x498] sm:$0xf0] }
 0x81a   : > { %v7964_v21 = vadd.f32 %v7963_v10, %v7935_v8  ;;  %v7882_v24 = vadd.f32 %v16420_v56, %v7853_v0  ;;  %v11266_v10 = vld [vmem:[%s13276_s11 + $0x6b8] sm:$0xf0] }
 0x81b   : > { %v8019_v27 = vpop.f32.mrf.mxu3  ;;  %8465 = vmatpush.bf16.msrb.mxu3 %v11413_v62  ;;  %v11269_v8 = vor.u32 %v12025_v28, %v11266_v10  ;;  %v11378_v35 = vld [vmem:[%s13276_s11 + $0x798] sm:$0xf0]  ;;  %v11953_v28 = vld [vmem:[%s13276_s11 + $0x46c] sm:$0xf] }
 0x81c   : > { %v12349_v19 = vpop.eup %12348  ;;  %v8020_v33 = vadd.f32 %v8019_v27, %v7991_v53  ;;  %v11997_v53 = vld [vmem:[%s13276_s11 + $0x5cc] sm:$0xf]  ;;  %v7911_v14 = vadd.f32 %v16423_v41, %v7882_v24  ;;  %v11122_v62 = vld [vmem:[%s13276_s11 + $0x598] sm:$0xf0] }
 0x81d   : > { %8538 = vst [vmem:[%s13284_s21 + $0x68] sm:$0xff] %v12349_v19  ;;  %v11157_v27 = vor.u32 %v11997_v53, %v11154_v38  ;;  %v11961_v19 = vld [vmem:[%s13276_s11 + $0x4ac] sm:$0xf]  ;;  %8437 = vmatpush.bf16.msrb.mxu2 %v11269_v8  ;;  %v11234_v24 = vld [vmem:[%s13276_s11 + $0x678] sm:$0xf0] }
 0x81e   : > { %12350 = vtanh.f32 %v8020_v33  ;;  %v11013_v61 = vor.u32 %v11961_v19, %v11010_v39  ;;  %v12021_v41 = vld [vmem:[%s13276_s11 + $0x68c] sm:$0xf]  ;;  %v10978_v19 = vld [vmem:[%s13276_s11 + $0x478] sm:$0xf0] }
 0x81f   : > { %v7992_v47 = vpop.f32.mrf.mxu2  ;;  %v7937_v1 = vpop.f32.mrf.mxu0  ;;  %8407 = vmatpush.bf16.msrb.mxu1 %v11157_v27  ;;  %8466 = vmatpush.bf16.msrb.mxu3 %v11397_v3  ;;  %v11253_v23 = vor.u32 %v12021_v41, %v11250_v43  ;;  %v17186_v38 = vld [vmem:[#allocation70_spill] sm:$0xff]  ;;  %v11106_v3 = vld [vmem:[%s13276_s11 + $0x578] sm:$0xf0] }
 0x820   : > { %v7993_v11 = vadd.f32 %v7992_v47, %v7964_v21  ;;  %v7966_v18 = vpop.f32.mrf.mxu1  ;;  %v7938_v30 = vadd.f32 %v7937_v1, %v7909_v36  ;;  %8379 = vmatpush.bf16.msrb.mxu0 %v11013_v61  ;;  %v11957_v47 = vld [vmem:[%s13276_s11 + $0x48c] sm:$0xf]  ;;  %v11346_v52 = vld [vmem:[%s13276_s11 + $0x758] sm:$0xf0] }
 0x821   : > { %v10997_v58 = vor.u32 %v11957_v47, %v10994_v37  ;;  %8438 = vmatpush.bf16.msrb.mxu2 %v11253_v23  ;;  %v12017_v27 = vld [vmem:[%s13276_s11 + $0x66c] sm:$0xf]  ;;  %v11090_v37 = vld [vmem:[%s13276_s11 + $0x558] sm:$0xf0] }
 0x822   : > { %8168 = vmatmul.bf16.gmra.mxu0 %v15973_v9  ;;  %v7967_v33 = vadd.f32 %v7966_v18, %v7938_v30  ;;  %v11989_v30 = vld [vmem:[%s13276_s11 + $0x58c] sm:$0xf]  ;;  %v11237_v10 = vor.u32 %v12017_v27, %v11234_v24 }
 0x823   : > { %v8021_v42 = vpop.f32.mrf.mxu3  ;;  %8197 = vmatmul.bf16.gmra.mxu1 %v15975_v17  ;;  %v11125_v53 = vor.u32 %v11989_v30, %v11122_v62  ;;  %v11985_v61 = vld [vmem:[%s13276_s11 + $0x56c] sm:$0xf]  ;;  %v11330_v62 = vld [vmem:[%s13276_s11 + $0x738] sm:$0xf0] }
 0x824   : > { %v12351_v16 = vpop.eup %12350  ;;  %v8022_v20 = vadd.f32 %v8021_v42, %v7993_v11  ;;  %8226 = vmatmul.bf16.gmra.mxu2 %v15977_v54  ;;  %8408 = vmatpush.bf16.msrb.mxu1 %v11141_v57  ;;  %v11381_v11 = vor.u32 %v12053_v5, %v11378_v35  ;;  %v11981_v47 = vld [vmem:[%s13276_s11 + $0x54c] sm:$0xf]  ;;  %v17187_v5 = vld [vmem:[#allocation71_spill] sm:$0xff]  ;;  %v17188_v35 = vld [vmem:[#allocation72_spill] sm:$0xff] }
 0x825   : > { %8542 = vst [vmem:[%s13284_s21 + $0x88] sm:$0xff] %v12351_v16  ;;  %8380 = vmatpush.bf16.msrb.mxu0 %v10997_v58  ;;  %8439 = vmatpush.bf16.msrb.mxu2 %v11237_v10  ;;  %v11093_v58 = vor.u32 %v11981_v47, %v11090_v37  ;;  %v12041_v30 = vld [vmem:[%s13276_s11 + $0x72c] sm:$0xf]  ;;  %v17191_v37 = vld [vmem:[#allocation75_spill] sm:$0xff] }
 0x826   : > { %12352 = vtanh.f32 %v8022_v20  ;;  %8467 = vmatpush.bf16.msrb.mxu3 %v11381_v11  ;;  %v17190_v11 = vld [vmem:[#allocation74_spill] sm:$0xff]  ;;  %v11333_v27 = vor.u32 %v12041_v30, %v11330_v62 }
 0x827   : > { %v7995_v56 = vpop.f32.mrf.mxu2  ;;  %v7939_v29 = vpop.f32.mrf.mxu0 }
 0x828   : > { %8255 = vmatmul.bf16.gmra.mxu3 %v15979_v7  ;;  %v7996_v45 = vadd.f32 %v7995_v56, %v7967_v33  ;;  %v7968_v63 = vpop.f32.mrf.mxu1  ;;  %v7940_v21 = vadd.f32 %v7939_v29, %v7911_v14  ;;  %8409 = vmatpush.bf16.msrb.mxu1 %v11125_v53  ;;  %v12049_v33 = vld [vmem:[%s13276_s11 + $0x76c] sm:$0xf]  ;;  %v11109_v14 = vor.u32 %v11985_v61, %v11106_v3  ;;  %v10930_v3 = vld [vmem:[%s13276_s11 + $0x418] sm:$0xf0] }
 0x82a   : > { %v7969_v36 = vadd.f32 %v7968_v63, %v7940_v21  ;;  %v11949_v63 = vld [vmem:[%s13276_s11 + $0x44c] sm:$0xf] }
 0x82b   : > { %v8024_v15 = vpop.f32.mrf.mxu3 }
 0x82c   : > { %v12353_v51 = vpop.eup %12352  ;;  %v8025_v22 = vadd.f32 %v8024_v15, %v7996_v45  ;;  %v12013_v45 = vld [vmem:[%s13276_s11 + $0x64c] sm:$0xf]  ;;  %v11218_v15 = vld [vmem:[%s13276_s11 + $0x658] sm:$0xf0]  ;;  %8410 = vmatpush.bf16.msrb.mxu1 %v11109_v14 }
 0x82d   : > { %8546 = vst [vmem:[%s13284_s21 + $0xa8] sm:$0xff] %v12353_v51  ;;  %v11221_v29 = vor.u32 %v12013_v45, %v11218_v15  ;;  %v10962_v51 = vld [vmem:[%s13276_s11 + $0x458] sm:$0xf0]  ;;  %v12037_v14 = vld [vmem:[%s13276_s11 + $0x70c] sm:$0xf] }
 0x82e   : > { %12354 = vtanh.f32 %v8025_v22  ;;  %v12045_v22 = vld [vmem:[%s13276_s11 + $0x74c] sm:$0xf]  ;;  %v10965_v21 = vor.u32 %v11949_v63, %v10962_v51  ;;  %v11314_v45 = vld [vmem:[%s13276_s11 + $0x718] sm:$0xf0] }
 0x82f   : > { %v7997_v42 = vpop.f32.mrf.mxu2  ;;  %v16552_v25 = vpop.f32.mrf.mxu0  ;;  %8440 = vmatpush.bf16.msrb.mxu2 %v11221_v29  ;;  %v11349_v31 = vor.u32 %v12045_v22, %v11346_v52  ;;  %v11317_v29 = vor.u32 %v12037_v14, %v11314_v45  ;;  %v11973_v51 = vld [vmem:[%s13276_s11 + $0x50c] sm:$0xf]  ;;  %v11058_v22 = vld [vmem:[%s13276_s11 + $0x518] sm:$0xf0] }
 0x830   : > { %v7998_v1 = vadd.f32 %v7997_v42, %v7969_v36  ;;  %v16554_v16 = vpop.f32.mrf.mxu1  ;;  %v17189_v36 = vld [vmem:[#allocation73_spill] sm:$0xff]  ;;  %8411 = vmatpush.bf16.msrb.mxu1 %v11093_v58  ;;  %v12009_v42 = vld [vmem:[%s13276_s11 + $0x62c] sm:$0xf] }
 0x831   : > { %v17193_v58 = vld [vmem:[#allocation77_spill] sm:$0xff] }
 0x832   : > { %8269 = vmatmul.bf16.vlgmr.msra.gmra.mxu0 %v15754_v32  ;;  %v11362_v32 = vld [vmem:[%s13276_s11 + $0x778] sm:$0xf0] }
 0x833   : > { %v8026_v18 = vpop.f32.mrf.mxu3  ;;  %8298 = vmatmul.bf16.vlgmr.msra.gmra.mxu1 %v15759_v26  ;;  %v10981_v26 = vor.u32 %v11953_v28, %v10978_v19  ;;  %v11977_v19 = vld [vmem:[%s13276_s11 + $0x52c] sm:$0xf] }
 0x834   : > { %v12355_v0 = vpop.eup %12354  ;;  %v8027_v20 = vadd.f32 %v8026_v18, %v7998_v1  ;;  %8327 = vmatmul.bf16.vlgmr.msra.gmra.mxu2 %v15761_v50  ;;  %v11365_v50 = vor.u32 %v12049_v33, %v11362_v32  ;;  %v11202_v1 = vld [vmem:[%s13276_s11 + $0x638] sm:$0xf0]  ;;  %v11945_v18 = vld [vmem:[%s13276_s11 + $0x42c] sm:$0xf] }
 0x835   : > { %8550 = vst [vmem:[%s13284_s21 + $0xc8] sm:$0xff] %v12355_v0  ;;  %8381 = vmatpush.bf16.msrb.mxu0 %v10981_v26  ;;  %v11205_v0 = vor.u32 %v12009_v42, %v11202_v1  ;;  %v11074_v33 = vld [vmem:[%s13276_s11 + $0x538] sm:$0xf0]  ;;  %v12005_v26 = vld [vmem:[%s13276_s11 + $0x60c] sm:$0xf] }
 0x836   : > { %12356 = vtanh.f32 %v8027_v20  ;;  %8468 = vmatpush.bf16.msrb.mxu3 %v11365_v50  ;;  %v10946_v20 = vld [vmem:[%s13276_s11 + $0x438] sm:$0xf0]  ;;  %v11077_v32 = vor.u32 %v11977_v19, %v11074_v33 }
 0x837   : > { %v16569_v8 = vpop.f32.mrf.mxu2  ;;  %v16573_v12 = vpop.f32.mrf.mxu0  ;;  %8441 = vmatpush.bf16.msrb.mxu2 %v11205_v0  ;;  %v11186_v50 = vld [vmem:[%s13276_s11 + $0x618] sm:$0xf0]  ;;  %v16647_v0 = vld [vmem:[%s13282_s3] sm:$0xf] }
 0x838   : > { %8356 = vmatmul.bf16.vlgmr.msra.gmra.mxu3 %v17186_v38  ;;  %v16575_v60 = vpop.f32.mrf.mxu1  ;;  %v10949_v38 = vor.u32 %v11945_v18, %v10946_v20  ;;  %v11189_v61 = vor.u32 %v12005_v26, %v11186_v50  ;;  %8412 = vmatpush.bf16.msrb.mxu1 %v11077_v32  ;;  %v16650_v20 = vperm.slane %v16647_v0, 2  ;;  %v17196_v33 = vld [vmem:[#allocation80_spill] sm:$0xff]  ;;  %v17197_v32 = vld [vmem:[#allocation81_spill] sm:$0xff]  ;;  %v17198_v26 = vld [vmem:[#allocation82_spill] sm:$0xff] }
 0x839   : > { %8382 = vmatpush.bf16.msrb.mxu0 %v10965_v21 }
 0x83a   : > { %8469 = vmatpush.bf16.msrb.mxu3 %v11349_v31  ;;  %v11061_v31 = vor.u32 %v11973_v51, %v11058_v22  ;;  %v8039_v19 = vadd.f32 %v16552_v25, %v16650_v20  ;;  %v8041_v25 = vadd.f32 %v16573_v12, %v16650_v20 }
 0x83b   : > { %v16571_v39 = vpop.f32.mrf.mxu3  ;;  %8442 = vmatpush.bf16.msrb.mxu2 %v11189_v61 }
 0x83c   : > { %v12357_v56 = vpop.eup %12356  ;;  %8413 = vmatpush.bf16.msrb.mxu1 %v11061_v31 }
 0x83d   : > { %8554 = vst [vmem:[%s13284_s21 + $0xe8] sm:$0xff] %v12357_v56  ;;  %8383 = vmatpush.bf16.msrb.mxu0 %v10949_v38  ;;  %v11941_v56 = vld [vmem:[%s13276_s11 + $0x40c] sm:$0xf]  ;;  %s12068_s11 = sshll.u32 (%p13153_p2), %s13077_s18, 5 }
 0x83e   : > { %8470 = vmatpush.bf16.msrb.mxu3 %v11333_v27  ;;  %v10933_v15 = vor.u32 %v11941_v56, %v10930_v3  ;;  %v17195_v27 = vld [vmem:[#allocation79_spill] sm:$0xff]  ;;  %v8068_v56 = vadd.f32 %v16554_v16, %v8039_v19  ;;  %v8070_v16 = vadd.f32 %v16575_v60, %v8041_v25  ;;  %s16807_s0 = scalar_lea.vmem (%p13153_p2), %s17199_s30, %s12068_s11 }
 0x83f   : > { %v16586_v57 = vpop.f32.mrf.mxu2  ;;  %v16590_v43 = vpop.f32.mrf.mxu0 }
 0x840   : > { %v16592_v23 = vpop.f32.mrf.mxu1  ;;  %v8097_v45 = vadd.f32 %v16569_v8, %v8068_v56  ;;  %v8044_v8 = vadd.f32 %v16590_v43, %v16650_v20 }
 0x841   : > { %8384 = vmatpush.bf16.msrb.mxu0 %v10933_v15 }
 0x842   : > { %8274 = vmatmul.bf16.gmra.mxu0 %v17187_v5  ;;  %8471 = vmatpush.bf16.msrb.mxu3 %v11317_v29  ;;  %v17192_v5 = vld [vmem:[#allocation76_spill] sm:$0xff]  ;;  %v8126_v29 = vadd.f32 %v16571_v39, %v8097_v45  ;;  %v8073_v60 = vadd.f32 %v16592_v23, %v8044_v8 }
 0x843   : > { %v16588_v41 = vpop.f32.mrf.mxu3  ;;  %8303 = vmatmul.bf16.gmra.mxu1 %v17188_v35  ;;  %v17194_v35 = vld [vmem:[#allocation78_spill] sm:$0xff] }
 0x844   : > { %8332 = vmatmul.bf16.gmra.mxu2 %v17189_v36 }
 0x847   : > { %v16606_v53 = vpop.f32.mrf.mxu2  ;;  %v16610_v28 = vpop.f32.mrf.mxu0 }
 0x848   : > { %8361 = vmatmul.bf16.gmra.mxu3 %v17190_v11  ;;  %v16612_v10 = vpop.f32.mrf.mxu1  ;;  %v8102_v43 = vadd.f32 %v16606_v53, %v8073_v60 }
 0x84b   : > { %v16608_v24 = vpop.f32.mrf.mxu3 }
 0x84f   : > { %v16622_v63 = vpop.f32.mrf.mxu2  ;;  %v16628_v52 = vpop.f32.mrf.mxu0 }
 0x850   : > { %v16630_v47 = vpop.f32.mrf.mxu1 }
 0x852   : > { %8279 = vmatmul.bf16.gmra.mxu0 %v17191_v37 }
 0x853   : > { %v16626_v21 = vpop.f32.mrf.mxu3  ;;  %8308 = vmatmul.bf16.gmra.mxu1 %v17192_v5  ;;  %v8099_v5 = vadd.f32 %v16586_v57, %v8070_v16 }
 0x854   : > { %8337 = vmatmul.bf16.gmra.mxu2 %v17193_v58 }
 0x855   : > { %v8128_v58 = vadd.f32 %v16588_v41, %v8099_v5 }
 0x857   : > { %v16636_v36 = vpop.f32.mrf.mxu2  ;;  %v16640_v42 = vpop.f32.mrf.mxu0 }
 0x858   : > { %8366 = vmatmul.bf16.gmra.mxu3 %v17194_v35  ;;  %v16642_v1 = vpop.f32.mrf.mxu1 }
 0x85b   : > { %v16638_v11 = vpop.f32.mrf.mxu3 }
 0x85f   : > { %v16644_v18 = vpop.f32.mrf.mxu2  ;;  %v16654_v62 = vpop.f32.mrf.mxu0 }
 0x860   : > { %v16656_v38 = vpop.f32.mrf.mxu1 }
 0x862   : > { %8284 = vmatmul.bf16.gmra.mxu0 %v17195_v27 }
 0x863   : > { %v16652_v30 = vpop.f32.mrf.mxu3  ;;  %8313 = vmatmul.bf16.gmra.mxu1 %v17196_v33 }
 0x864   : > { %8342 = vmatmul.bf16.gmra.mxu2 %v17197_v32  ;;  %v8131_v32 = vadd.f32 %v16608_v24, %v8102_v43 }
 0x867   : > { %v16664_v50 = vpop.f32.mrf.mxu2  ;;  %v16669_v3 = vpop.f32.mrf.mxu0 }
 0x868   : > { %8371 = vmatmul.bf16.gmra.mxu3 %v17198_v26  ;;  %v16671_v14 = vpop.f32.mrf.mxu1 }
 0x86b   : > { %v16667_v61 = vpop.f32.mrf.mxu3 }
 0x86f   : > { %v16676_v15 = vpop.f32.mrf.mxu2  ;;  %v8154_v22 = vpop.f32.mrf.mxu0 }
 0x870   : > { %v8183_v31 = vpop.f32.mrf.mxu1  ;;  %v8155_v37 = vadd.f32 %v8154_v22, %v8126_v29 }
 0x872   : > { %8385 = vmatmul.bf16.vlgmr.msrb.gmra.mxu0 %v15891_v49  ;;  %v8184_v39 = vadd.f32 %v8183_v31, %v8155_v37 }
 0x873   : > { %v16679_v51 = vpop.f32.mrf.mxu3  ;;  %8414 = vmatmul.bf16.vlgmr.msrb.gmra.mxu1 %v15893_v2  ;;  %v8046_v2 = vadd.f32 %v16610_v28, %v16650_v20  ;;  %v8049_v28 = vadd.f32 %v16628_v52, %v16650_v20 }
 0x874   : > { %8443 = vmatmul.bf16.vlgmr.msrb.gmra.mxu2 %v15895_v59 }
 0x875   : > { %v8075_v25 = vadd.f32 %v16612_v10, %v8046_v2  ;;  %v8078_v16 = vadd.f32 %v16630_v47, %v8049_v28 }
 0x877   : > { %v8212_v12 = vpop.f32.mrf.mxu2  ;;  %v8156_v49 = vpop.f32.mrf.mxu0  ;;  %v8104_v53 = vadd.f32 %v16622_v63, %v8075_v25 }
 0x878   : > { %8472 = vmatmul.bf16.vlgmr.msrb.gmra.mxu3 %v15897_v40  ;;  %v8213_v35 = vadd.f32 %v8212_v12, %v8184_v39  ;;  %v8185_v19 = vpop.f32.mrf.mxu1  ;;  %v8157_v33 = vadd.f32 %v8156_v49, %v8128_v58 }
 0x879   : > { %v8133_v31 = vadd.f32 %v16626_v21, %v8104_v53 }
 0x87a   : > { %v8186_v59 = vadd.f32 %v8185_v19, %v8157_v33 }
 0x87b   : > { %v8241_v27 = vpop.f32.mrf.mxu3 }
 0x87c   : > { %v8242_v57 = vadd.f32 %v8241_v27, %v8213_v35 }
 0x87e   : > { %12358 = vtanh.f32 %v8242_v57 }
 0x87f   : > { %v8214_v40 = vpop.f32.mrf.mxu2  ;;  %v8159_v23 = vpop.f32.mrf.mxu0 }
 0x880   : > { %v8215_v41 = vadd.f32 %v8214_v40, %v8186_v59  ;;  %v8188_v56 = vpop.f32.mrf.mxu1  ;;  %v8160_v22 = vadd.f32 %v8159_v23, %v8131_v32 }
 0x882   : > { %8390 = vmatmul.bf16.gmra.mxu0 %v15919_v13  ;;  %v8189_v24 = vadd.f32 %v8188_v56, %v8160_v22 }
 0x883   : > { %v8243_v26 = vpop.f32.mrf.mxu3  ;;  %8419 = vmatmul.bf16.gmra.mxu1 %v15921_v46  ;;  %v8107_v46 = vadd.f32 %v16636_v36, %v8078_v16 }
 0x884   : > { %v12359_v45 = vpop.eup %12358  ;;  %v8244_v29 = vadd.f32 %v8243_v26, %v8215_v41  ;;  %8448 = vmatmul.bf16.gmra.mxu2 %v15923_v34  ;;  %v8051_v34 = vadd.f32 %v16640_v42, %v16650_v20  ;;  %v8054_v42 = vadd.f32 %v16654_v62, %v16650_v20 }
 0x885   : > { %8527 = vst [vmem:[%s13284_s21 + $0x10] sm:$0xff] %v12359_v45  ;;  %v8136_v21 = vadd.f32 %v16638_v11, %v8107_v46 }
 0x886   : > { %12360 = vtanh.f32 %v8244_v29  ;;  %v8080_v49 = vadd.f32 %v16642_v1, %v8051_v34  ;;  %v8083_v43 = vadd.f32 %v16656_v38, %v8054_v42 }
 0x887   : > { %v8217_v10 = vpop.f32.mrf.mxu2  ;;  %v8161_v63 = vpop.f32.mrf.mxu0 }
 0x888   : > { %8477 = vmatmul.bf16.gmra.mxu3 %v15925_v44  ;;  %v8218_v13 = vadd.f32 %v8217_v10, %v8189_v24  ;;  %v8190_v5 = vpop.f32.mrf.mxu1  ;;  %v8162_v39 = vadd.f32 %v8161_v63, %v8133_v31  ;;  %v8109_v36 = vadd.f32 %v16644_v18, %v8080_v49 }
 0x88a   : > { %v8191_v44 = vadd.f32 %v8190_v5, %v8162_v39  ;;  %v8138_v33 = vadd.f32 %v16652_v30, %v8109_v36 }
 0x88b   : > { %v8246_v37 = vpop.f32.mrf.mxu3 }
 0x88c   : > { %v12361_v8 = vpop.eup %12360  ;;  %v8247_v52 = vadd.f32 %v8246_v37, %v8218_v13 }
 0x88d   : > { %8531 = vst [vmem:[%s13284_s21 + $0x30] sm:$0xff] %v12361_v8 }
 0x88e   : > { %12362 = vtanh.f32 %v8247_v52 }
 0x88f   : > { %v8219_v12 = vpop.f32.mrf.mxu2  ;;  %v8164_v60 = vpop.f32.mrf.mxu0 }
 0x890   : > { %v8220_v47 = vadd.f32 %v8219_v12, %v8191_v44  ;;  %v8193_v35 = vpop.f32.mrf.mxu1  ;;  %v8165_v57 = vadd.f32 %v8164_v60, %v8136_v21 }
 0x892   : > { %8395 = vmatmul.bf16.gmra.mxu0 %v15947_v6  ;;  %v8194_v11 = vadd.f32 %v8193_v35, %v8165_v57 }
 0x893   : > { %v8248_v58 = vpop.f32.mrf.mxu3  ;;  %8424 = vmatmul.bf16.gmra.mxu1 %v15949_v4  ;;  %v8112_v4 = vadd.f32 %v16664_v50, %v8083_v43 }
 0x894   : > { %v12363_v27 = vpop.eup %12362  ;;  %v8249_v19 = vadd.f32 %v8248_v58, %v8220_v47  ;;  %8453 = vmatmul.bf16.gmra.mxu2 %v15951_v55  ;;  %v8056_v55 = vadd.f32 %v16669_v3, %v16650_v20 }
 0x895   : > { %8535 = vst [vmem:[%s13284_s21 + $0x50] sm:$0xff] %v12363_v27  ;;  %v8141_v30 = vadd.f32 %v16667_v61, %v8112_v4 }
 0x896   : > { %12364 = vtanh.f32 %v8249_v19  ;;  %v8085_v25 = vadd.f32 %v16671_v14, %v8056_v55 }
 0x897   : > { %v8222_v1 = vpop.f32.mrf.mxu2  ;;  %v8166_v18 = vpop.f32.mrf.mxu0 }
 0x898   : > { %8482 = vmatmul.bf16.gmra.mxu3 %v15953_v48  ;;  %v8223_v6 = vadd.f32 %v8222_v1, %v8194_v11  ;;  %v8195_v59 = vpop.f32.mrf.mxu1  ;;  %v8167_v32 = vadd.f32 %v8166_v18, %v8138_v33  ;;  %v8114_v50 = vadd.f32 %v16676_v15, %v8085_v25  ;;  %v16749_v33 = vperm.slane %v16647_v0, 3 }
 0x89a   : > { %v8196_v48 = vadd.f32 %v8195_v59, %v8167_v32  ;;  %v8143_v3 = vadd.f32 %v16679_v51, %v8114_v50 }
 0x89b   : > { %v8251_v2 = vpop.f32.mrf.mxu3 }
 0x89c   : > { %v12365_v40 = vpop.eup %12364  ;;  %v8252_v62 = vadd.f32 %v8251_v2, %v8223_v6 }
 0x89d   : > { %8539 = vst [vmem:[%s13284_s21 + $0x70] sm:$0xff] %v12365_v40 }
 0x89e   : > { %12366 = vtanh.f32 %v8252_v62 }
 0x89f   : > { %v8224_v41 = vpop.f32.mrf.mxu2  ;;  %v8169_v23 = vpop.f32.mrf.mxu0 }
 0x8a0   : > { %v8225_v38 = vadd.f32 %v8224_v41, %v8196_v48  ;;  %v8198_v56 = vpop.f32.mrf.mxu1  ;;  %v8170_v22 = vadd.f32 %v8169_v23, %v8141_v30 }
 0x8a2   : > { %8400 = vmatmul.bf16.gmra.mxu0 %v15973_v9  ;;  %v8199_v20 = vadd.f32 %v8198_v56, %v8170_v22 }
 0x8a3   : > { %v8253_v26 = vpop.f32.mrf.mxu3  ;;  %8429 = vmatmul.bf16.gmra.mxu1 %v15975_v17 }
 0x8a4   : > { %v12367_v45 = vpop.eup %12366  ;;  %v8254_v29 = vadd.f32 %v8253_v26, %v8225_v38  ;;  %8458 = vmatmul.bf16.gmra.mxu2 %v15977_v54 }
 0x8a5   : > { %8543 = vst [vmem:[%s13284_s21 + $0x90] sm:$0xff] %v12367_v45 }
 0x8a6   : > { %12368 = vtanh.f32 %v8254_v29 }
 0x8a7   : > { %v8227_v61 = vpop.f32.mrf.mxu2  ;;  %v8171_v28 = vpop.f32.mrf.mxu0 }
 0x8a8   : > { %8487 = vmatmul.bf16.gmra.mxu3 %v15979_v7  ;;  %v8228_v14 = vadd.f32 %v8227_v61, %v8199_v20  ;;  %v8200_v24 = vpop.f32.mrf.mxu1  ;;  %v8172_v31 = vadd.f32 %v8171_v28, %v8143_v3 }
 0x8aa   : > { %v8201_v17 = vadd.f32 %v8200_v24, %v8172_v31 }
 0x8ab   : > { %v8256_v53 = vpop.f32.mrf.mxu3 }
 0x8ac   : > { %v12369_v9 = vpop.eup %12368  ;;  %v8257_v10 = vadd.f32 %v8256_v53, %v8228_v14 }
 0x8ad   : > { %8547 = vst [vmem:[%s13284_s21 + $0xb0] sm:$0xff] %v12369_v9 }
 0x8ae   : > { %12370 = vtanh.f32 %v8257_v10 }
 0x8af   : > { %v8229_v15 = vpop.f32.mrf.mxu2  ;;  %v8270_v7 = vpop.f32.mrf.mxu0 }
 0x8b0   : > { %v8230_v54 = vadd.f32 %v8229_v15, %v8201_v17  ;;  %v8299_v13 = vpop.f32.mrf.mxu1  ;;  %v8271_v18 = vadd.f32 %v8270_v7, %v16749_v33 }
 0x8b2   : > { %v8300_v40 = vadd.f32 %v8299_v13, %v8271_v18 }
 0x8b3   : > { %v8258_v16 = vpop.f32.mrf.mxu3 }
 0x8b4   : > { %v12371_v37 = vpop.eup %12370  ;;  %v8259_v63 = vadd.f32 %v8258_v16, %v8230_v54 }
 0x8b5   : > { %8551 = vst [vmem:[%s13284_s21 + $0xd0] sm:$0xff] %v12371_v37 }
 0x8b6   : > { %12372 = vtanh.f32 %v8259_v63 }
 0x8b7   : > { %v8328_v51 = vpop.f32.mrf.mxu2  ;;  %v8272_v8 = vpop.f32.mrf.mxu0 }
 0x8b8   : > { %v8301_v52 = vpop.f32.mrf.mxu1  ;;  %v8329_v55 = vadd.f32 %v8328_v51, %v8300_v40  ;;  %v8273_v0 = vadd.f32 %v8272_v8, %v16749_v33 }
 0x8ba   : > { %v8302_v23 = vadd.f32 %v8301_v52, %v8273_v0 }
 0x8bb   : > { %v8357_v5 = vpop.f32.mrf.mxu3 }
 0x8bc   : > { %v12373_v39 = vpop.eup %12372  ;;  %v8358_v41 = vadd.f32 %v8357_v5, %v8329_v55 }
 0x8bd   : > { %8555 = vst [vmem:[%s13284_s21 + $0xf0] sm:$0xff] %v12373_v39 }
 0x8bf   : > { %v8330_v46 = vpop.f32.mrf.mxu2  ;;  %v8275_v44 = vpop.f32.mrf.mxu0 }
 0x8c0   : > { %v8304_v12 = vpop.f32.mrf.mxu1  ;;  %v8331_v45 = vadd.f32 %v8330_v46, %v8302_v23  ;;  %v8276_v25 = vadd.f32 %v8275_v44, %v16749_v33 }
 0x8c2   : > { %v8305_v20 = vadd.f32 %v8304_v12, %v8276_v25 }
 0x8c3   : > { %v8359_v34 = vpop.f32.mrf.mxu3 }
 0x8c4   : > { %v8360_v50 = vadd.f32 %v8359_v34, %v8331_v45 }
 0x8c7   : > { %v8333_v21 = vpop.f32.mrf.mxu2  ;;  %v8277_v58 = vpop.f32.mrf.mxu0 }
 0x8c8   : > { %v8306_v60 = vpop.f32.mrf.mxu1  ;;  %v8334_v9 = vadd.f32 %v8333_v21, %v8305_v20  ;;  %v8278_v10 = vadd.f32 %v8277_v58, %v16749_v33 }
 0x8ca   : > { %v8307_v63 = vadd.f32 %v8306_v60, %v8278_v10 }
 0x8cb   : > { %v8362_v47 = vpop.f32.mrf.mxu3 }
 0x8cc   : > { %v8363_v15 = vadd.f32 %v8362_v47, %v8334_v9 }
 0x8cf   : > { %v8335_v35 = vpop.f32.mrf.mxu2  ;;  %v8280_v49 = vpop.f32.mrf.mxu0 }
 0x8d0   : > { %v8309_v19 = vpop.f32.mrf.mxu1  ;;  %v8336_v8 = vadd.f32 %v8335_v35, %v8307_v63  ;;  %v8281_v52 = vadd.f32 %v8280_v49, %v16749_v33 }
 0x8d2   : > { %v8310_v44 = vadd.f32 %v8309_v19, %v8281_v52 }
 0x8d3   : > { %v8364_v27 = vpop.f32.mrf.mxu3 }
 0x8d4   : > { %v8365_v34 = vadd.f32 %v8364_v27, %v8336_v8 }
 0x8d7   : > { %v16738_v57 = vpop.f32.mrf.mxu2  ;;  %v16742_v42 = vpop.f32.mrf.mxu0 }
 0x8d8   : > { %v16744_v11 = vpop.f32.mrf.mxu1  ;;  %v8339_v60 = vadd.f32 %v16738_v57, %v8310_v44  ;;  %v8283_v35 = vadd.f32 %v16742_v42, %v16749_v33 }
 0x8db   : > { %v16740_v36 = vpop.f32.mrf.mxu3 }
 0x8dc   : > { %v8368_v27 = vadd.f32 %v16740_v36, %v8339_v60 }
 0x8df   : > { %v16746_v1 = vpop.f32.mrf.mxu2  ;;  %v16753_v6 = vpop.f32.mrf.mxu0 }
 0x8e0   : > { %v16755_v2 = vpop.f32.mrf.mxu1  ;;  %v8286_v42 = vadd.f32 %v16753_v6, %v16749_v33 }
 0x8e3   : > { %v16751_v43 = vpop.f32.mrf.mxu3 }
 0x8e7   : > { %v16758_v59 = vpop.f32.mrf.mxu2  ;;  %v16762_v32 = vpop.f32.mrf.mxu0 }
 0x8e8   : > { %v16764_v4 = vpop.f32.mrf.mxu1  ;;  %v8288_v6 = vadd.f32 %v16762_v32, %v16749_v33 }
 0x8eb   : > { %v16760_v62 = vpop.f32.mrf.mxu3 }
 0x8ef   : > { %v16767_v48 = vpop.f32.mrf.mxu2  ;;  %v8386_v38 = vpop.f32.mrf.mxu0 }
 0x8f0   : > { %v8415_v26 = vpop.f32.mrf.mxu1  ;;  %v8387_v56 = vadd.f32 %v8386_v38, %v8358_v41 }
 0x8f2   : > { %v8416_v29 = vadd.f32 %v8415_v26, %v8387_v56  ;;  %v8312_v56 = vadd.f32 %v16744_v11, %v8283_v35  ;;  %v8595_v35 = vld [vmem:[%s13284_s21 + $0x40] sm:$0xff] (%p13153_p2) }
 0x8f3   : > { %v16769_v30 = vpop.f32.mrf.mxu3  ;;  %8596 = vst [vmem:[%s16807_s0 + $0x180] sm:$0xff] (%p13153_p2), %v8595_v35 }
 0x8f4   : > { %v8341_v57 = vadd.f32 %v16746_v1, %v8312_v56  ;;  %v8613_v56 = vld [vmem:[%s13284_s21 + $0x88] sm:$0xff] (%p13153_p2) }
 0x8f5   : > { %8614 = vst [vmem:[%s16807_s0 + $0x308] sm:$0xff] (%p13153_p2), %v8613_v56 }
 0x8f6   : > { %v8370_v36 = vadd.f32 %v16751_v43, %v8341_v57  ;;  %v8619_v57 = vld [vmem:[%s13284_s21 + $0xa0] sm:$0xff] (%p13153_p2) }
 0x8f7   : > { %v8444_v22 = vpop.f32.mrf.mxu2  ;;  %v8388_v14 = vpop.f32.mrf.mxu0  ;;  %8620 = vst [vmem:[%s16807_s0 + $0x3c0] sm:$0xff] (%p13153_p2), %v8619_v57 }
 0x8f8   : > { %v8445_v61 = vadd.f32 %v8444_v22, %v8416_v29  ;;  %v8417_v53 = vpop.f32.mrf.mxu1  ;;  %v8389_v24 = vadd.f32 %v8388_v14, %v8360_v50  ;;  %v8315_v50 = vadd.f32 %v16755_v2, %v8286_v42  ;;  %v8621_v42 = vld [vmem:[%s13284_s21 + $0xa8] sm:$0xff] (%p13153_p2) }
 0x8f9   : > { %8622 = vst [vmem:[%s16807_s0 + $0x3c8] sm:$0xff] (%p13153_p2), %v8621_v42 }
 0x8fa   : > { %v8418_v31 = vadd.f32 %v8417_v53, %v8389_v24  ;;  %v8344_v1 = vadd.f32 %v16758_v59, %v8315_v50  ;;  %v8629_v50 = vld [vmem:[%s13284_s21 + $0xc8] sm:$0xff] (%p13153_p2) }
 0x8fb   : > { %v8473_v3 = vpop.f32.mrf.mxu3  ;;  %8630 = vst [vmem:[%s16807_s0 + $0x488] sm:$0xff] (%p13153_p2), %v8629_v50 }
 0x8fc   : > { %v8474_v28 = vadd.f32 %v8473_v3, %v8445_v61  ;;  %v8373_v43 = vadd.f32 %v16760_v62, %v8344_v1 }
 0x8fe   : > { %12374 = vtanh.f32 %v8474_v28 }
 0x8ff   : > { %v8446_v17 = vpop.f32.mrf.mxu2  ;;  %v8391_v7 = vpop.f32.mrf.mxu0 }
 0x900   : > { %v8447_v54 = vadd.f32 %v8446_v17, %v8418_v31  ;;  %v8420_v13 = vpop.f32.mrf.mxu1  ;;  %v8392_v5 = vadd.f32 %v8391_v7, %v8363_v15  ;;  %v8317_v15 = vadd.f32 %v16764_v4, %v8288_v6 }
 0x902   : > { %v8421_v39 = vadd.f32 %v8420_v13, %v8392_v5  ;;  %v8346_v59 = vadd.f32 %v16767_v48, %v8317_v15 }
 0x903   : > { %v8475_v16 = vpop.f32.mrf.mxu3 }
 0x904   : > { %v12375_v37 = vpop.eup %12374  ;;  %v8476_v51 = vadd.f32 %v8475_v16, %v8447_v54  ;;  %v8375_v32 = vadd.f32 %v16769_v30, %v8346_v59 }
 0x905   : > { %8528 = vst [vmem:[%s13284_s21 + $0x18] sm:$0xff] %v12375_v37 }
 0x906   : > { %12376 = vtanh.f32 %v8476_v51 }
 0x907   : > { %v8449_v46 = vpop.f32.mrf.mxu2  ;;  %v8393_v47 = vpop.f32.mrf.mxu0 }
 0x908   : > { %v8450_v12 = vadd.f32 %v8449_v46, %v8421_v39  ;;  %v8422_v58 = vpop.f32.mrf.mxu1  ;;  %v8394_v55 = vadd.f32 %v8393_v47, %v8365_v34  ;;  %v8583_v47 = vld [vmem:[%s13284_s21 + $0x10] sm:$0xff] (%p13153_p2) }
 0x909   : > { %8584 = vst [vmem:[%s16807_s0 + $0x10] sm:$0xff] (%p13153_p2), %v8583_v47 }
 0x90a   : > { %v8423_v49 = vadd.f32 %v8422_v58, %v8394_v55  ;;  %v8591_v55 = vld [vmem:[%s13284_s21 + $0x30] sm:$0xff] (%p13153_p2) }
 0x90b   : > { %v8478_v21 = vpop.f32.mrf.mxu3  ;;  %8592 = vst [vmem:[%s16807_s0 + $0xd0] sm:$0xff] (%p13153_p2), %v8591_v55 }
 0x90c   : > { %v12377_v18 = vpop.eup %12376  ;;  %v8479_v40 = vadd.f32 %v8478_v21, %v8450_v12  ;;  %v8579_v12 = vld [vmem:[%s13284_s21] sm:$0xff] (%p13153_p2)  ;;  %v8581_v21 = vld [vmem:[%s13284_s21 + $0x8] sm:$0xff] (%p13153_p2)  ;;  %v8585_v58 = vld [vmem:[%s13284_s21 + $0x18] sm:$0xff] (%p13153_p2) }
 0x90d   : > { %8532 = vst [vmem:[%s13284_s21 + $0x38] sm:$0xff] %v12377_v18  ;;  %v8587_v18 = vld [vmem:[%s13284_s21 + $0x20] sm:$0xff] (%p13153_p2) }
 0x90e   : > { %12378 = vtanh.f32 %v8479_v40  ;;  %8580 = vst [vmem:[%s16807_s0] sm:$0xff] (%p13153_p2), %v8579_v12  ;;  %v8589_v40 = vld [vmem:[%s13284_s21 + $0x28] sm:$0xff] (%p13153_p2) }
 0x90f   : > { %v8451_v0 = vpop.f32.mrf.mxu2  ;;  %v8396_v38 = vpop.f32.mrf.mxu0  ;;  %8582 = vst [vmem:[%s16807_s0 + $0x8] sm:$0xff] (%p13153_p2), %v8581_v21 }
 0x910   : > { %v8452_v19 = vadd.f32 %v8451_v0, %v8423_v49  ;;  %v8425_v26 = vpop.f32.mrf.mxu1  ;;  %v8397_v25 = vadd.f32 %v8396_v38, %v8368_v27  ;;  %8586 = vst [vmem:[%s16807_s0 + $0x18] sm:$0xff] (%p13153_p2), %v8585_v58  ;;  %v8597_v49 = vld [vmem:[%s13284_s21 + $0x48] sm:$0xff] (%p13153_p2)  ;;  %v8599_v0 = vld [vmem:[%s13284_s21 + $0x50] sm:$0xff] (%p13153_p2) }
 0x911   : > { %8588 = vst [vmem:[%s16807_s0 + $0xc0] sm:$0xff] (%p13153_p2), %v8587_v18  ;;  %v8607_v38 = vld [vmem:[%s13284_s21 + $0x70] sm:$0xff] (%p13153_p2) }
 0x912   : > { %v8426_v29 = vadd.f32 %v8425_v26, %v8397_v25  ;;  %8590 = vst [vmem:[%s16807_s0 + $0xc8] sm:$0xff] (%p13153_p2), %v8589_v40 }
 0x913   : > { %v8480_v41 = vpop.f32.mrf.mxu3  ;;  %8598 = vst [vmem:[%s16807_s0 + $0x188] sm:$0xff] (%p13153_p2), %v8597_v49 }
 0x914   : > { %v12379_v23 = vpop.eup %12378  ;;  %v8481_v45 = vadd.f32 %v8480_v41, %v8452_v19  ;;  %v8593_v60 = vld [vmem:[%s13284_s21 + $0x38] sm:$0xff] (%p13153_p2)  ;;  %v8603_v19 = vld [vmem:[%s13284_s21 + $0x60] sm:$0xff] (%p13153_p2)  ;;  %8600 = vst [vmem:[%s16807_s0 + $0x190] sm:$0xff] (%p13153_p2), %v8599_v0  ;;  %v8605_v41 = vld [vmem:[%s13284_s21 + $0x68] sm:$0xff] (%p13153_p2) }
 0x915   : > { %8536 = vst [vmem:[%s13284_s21 + $0x58] sm:$0xff] %v12379_v23  ;;  %v8611_v23 = vld [vmem:[%s13284_s21 + $0x80] sm:$0xff] (%p13153_p2) }
 0x916   : > { %12380 = vtanh.f32 %v8481_v45  ;;  %8594 = vst [vmem:[%s16807_s0 + $0xd8] sm:$0xff] (%p13153_p2), %v8593_v60  ;;  %v8615_v45 = vld [vmem:[%s13284_s21 + $0x90] sm:$0xff] (%p13153_p2) }
 0x917   : > { %v8454_v22 = vpop.f32.mrf.mxu2  ;;  %v8398_v3 = vpop.f32.mrf.mxu0  ;;  %8604 = vst [vmem:[%s16807_s0 + $0x240] sm:$0xff] (%p13153_p2), %v8603_v19 }
 0x918   : > { %v8455_v20 = vadd.f32 %v8454_v22, %v8426_v29  ;;  %v8427_v11 = vpop.f32.mrf.mxu1  ;;  %v8399_v28 = vadd.f32 %v8398_v3, %v8370_v36  ;;  %8606 = vst [vmem:[%s16807_s0 + $0x248] sm:$0xff] (%p13153_p2), %v8605_v41  ;;  %v8623_v29 = vld [vmem:[%s13284_s21 + $0xb0] sm:$0xff] (%p13153_p2)  ;;  %v8627_v36 = vld [vmem:[%s13284_s21 + $0xc0] sm:$0xff] (%p13153_p2) }
 0x919   : > { %8608 = vst [vmem:[%s16807_s0 + $0x250] sm:$0xff] (%p13153_p2), %v8607_v38  ;;  %v8635_v3 = vld [vmem:[%s13284_s21 + $0xe0] sm:$0xff] (%p13153_p2) }
 0x91a   : > { %v8428_v24 = vadd.f32 %v8427_v11, %v8399_v28  ;;  %8612 = vst [vmem:[%s16807_s0 + $0x300] sm:$0xff] (%p13153_p2), %v8611_v23  ;;  %v8637_v11 = vld [vmem:[%s13284_s21 + $0xe8] sm:$0xff] (%p13153_p2) }
 0x91b   : > { %v8483_v61 = vpop.f32.mrf.mxu3  ;;  %8616 = vst [vmem:[%s16807_s0 + $0x310] sm:$0xff] (%p13153_p2), %v8615_v45 }
 0x91c   : > { %v12381_v14 = vpop.eup %12380  ;;  %v8484_v53 = vadd.f32 %v8483_v61, %v8455_v20  ;;  %v8601_v27 = vld [vmem:[%s13284_s21 + $0x58] sm:$0xff] (%p13153_p2)  ;;  %8624 = vst [vmem:[%s16807_s0 + $0x3d0] sm:$0xff] (%p13153_p2), %v8623_v29  ;;  %v8631_v20 = vld [vmem:[%s13284_s21 + $0xd0] sm:$0xff] (%p13153_p2) }
 0x91d   : > { %8540 = vst [vmem:[%s13284_s21 + $0x78] sm:$0xff] %v12381_v14  ;;  %v8639_v14 = vld [vmem:[%s13284_s21 + $0xf0] sm:$0xff] (%p13153_p2) }
 0x91e   : > { %12382 = vtanh.f32 %v8484_v53  ;;  %8602 = vst [vmem:[%s16807_s0 + $0x198] sm:$0xff] (%p13153_p2), %v8601_v27 }
 0x91f   : > { %v8456_v9 = vpop.f32.mrf.mxu2  ;;  %v8401_v31 = vpop.f32.mrf.mxu0  ;;  %8628 = vst [vmem:[%s16807_s0 + $0x480] sm:$0xff] (%p13153_p2), %v8627_v36 }
 0x920   : > { %v8457_v2 = vadd.f32 %v8456_v9, %v8428_v24  ;;  %v8402_v16 = vadd.f32 %v8401_v31, %v8373_v43  ;;  %v8430_v7 = vpop.f32.mrf.mxu1  ;;  %8632 = vst [vmem:[%s16807_s0 + $0x490] sm:$0xff] (%p13153_p2), %v8631_v20 }
 0x921   : > { %8636 = vst [vmem:[%s16807_s0 + $0x540] sm:$0xff] (%p13153_p2), %v8635_v3 }
 0x922   : > { %v8431_v13 = vadd.f32 %v8430_v7, %v8402_v16  ;;  %8638 = vst [vmem:[%s16807_s0 + $0x548] sm:$0xff] (%p13153_p2), %v8637_v11 }
 0x923   : > { %v8485_v10 = vpop.f32.mrf.mxu3  ;;  %8640 = vst [vmem:[%s16807_s0 + $0x550] sm:$0xff] (%p13153_p2), %v8639_v14 }
 0x924   : > { %v12383_v17 = vpop.eup %12382  ;;  %v8486_v54 = vadd.f32 %v8485_v10, %v8457_v2  ;;  %v8609_v26 = vld [vmem:[%s13284_s21 + $0x78] sm:$0xff] (%p13153_p2) }
 0x925   : > { %8544 = vst [vmem:[%s13284_s21 + $0x98] sm:$0xff] %v12383_v17 }
 0x926   : > { %12384 = vtanh.f32 %v8486_v54  ;;  %8610 = vst [vmem:[%s16807_s0 + $0x258] sm:$0xff] (%p13153_p2), %v8609_v26 }
 0x927   : > { %v8459_v33 = vpop.f32.mrf.mxu2  ;;  %v8403_v63 = vpop.f32.mrf.mxu0 }
 0x928   : > { %v8460_v62 = vadd.f32 %v8459_v33, %v8431_v13  ;;  %v8404_v4 = vadd.f32 %v8403_v63, %v8375_v32  ;;  %v8432_v8 = vpop.f32.mrf.mxu1 }
 0x92a   : > { %v8433_v52 = vadd.f32 %v8432_v8, %v8404_v4 }
 0x92b   : > { %v8488_v37 = vpop.f32.mrf.mxu3 }
 0x92c   : > { %v12385_v51 = vpop.eup %12384  ;;  %v8489_v5 = vadd.f32 %v8488_v37, %v8460_v62  ;;  %v8617_v25 = vld [vmem:[%s13284_s21 + $0x98] sm:$0xff] (%p13153_p2) }
 0x92d   : > { %8548 = vst [vmem:[%s13284_s21 + $0xb8] sm:$0xff] %v12385_v51 }
 0x92e   : > { %12386 = vtanh.f32 %v8489_v5  ;;  %8618 = vst [vmem:[%s16807_s0 + $0x318] sm:$0xff] (%p13153_p2), %v8617_v25 }
 0x92f   : > { %v8461_v39 = vpop.f32.mrf.mxu2 }
 0x930   : > { %v8462_v46 = vadd.f32 %v8461_v39, %v8433_v52 }
 0x933   : > { %v8490_v48 = vpop.f32.mrf.mxu3 }
 0x934   : > { %v12387_v34 = vpop.eup %12386  ;;  %v8491_v44 = vadd.f32 %v8490_v48, %v8462_v46  ;;  %v8625_v22 = vld [vmem:[%s13284_s21 + $0xb8] sm:$0xff] (%p13153_p2) }
 0x935   : > { %8552 = vst [vmem:[%s13284_s21 + $0xd8] sm:$0xff] %v12387_v34 }
 0x936   : > { %12388 = vtanh.f32 %v8491_v44  ;;  %8626 = vst [vmem:[%s16807_s0 + $0x3d8] sm:$0xff] (%p13153_p2), %v8625_v22 }
 0x939   : > { %8563 = sbr.rel (!%p13153_p2) target bundleno = 2374 (0x946), region = 160 }
 0x93c   : > { %v12389_v30 = vpop.eup %12388  ;;  %v8633_v61 = vld [vmem:[%s13284_s21 + $0xd8] sm:$0xff] (%p13153_p2) }
 0x93d   : > { %8556 = vst [vmem:[%s13284_s21 + $0xf8] sm:$0xff] %v12389_v30 }
 0x93e   : > { %8634 = vst [vmem:[%s16807_s0 + $0x498] sm:$0xff] %v8633_v61 }
 0x944   : > { %v8641_v53 = vld [vmem:[%s13284_s21 + $0xf8] sm:$0xff] }
 0x945   : > { %8642 = vst [vmem:[%s16807_s0 + $0x558] sm:$0xff] %v8641_v53 }
 0x946 PF: > { %p32_p4 = scmp.ge.s32.totalorder %s13128_s17, 8   ;;  %s17200_s24 = smov %s12929_s25 }
 0x947   : > { %s17201_s25 = smov %s12933_s26  ;;  %s17202_s26 = smov %s13139_s14 }
 0x948   : > { %s17203_s27 = smov %s13128_s17  ;;  %34 = sbr.rel (!%p32_p4) target bundleno = 25 (0x19), region = 221 }
 0x94d   :  { %8658 = vsyncpa [#allocation4], 1 }
 0x94e   :  { %8660 = vsyncpa [#allocation4 + $0x1], 1 }
 0x94f   :  { %8661 = vsyncpa [#allocation6], 1 }
 0x950   :  { %8662 = vsyncpa [#allocation9], 1 }
 0x951   :  { %8663 = vsyncpa [#allocation12], 1 }
 0x952   :  { %8664 = vsyncpa [#allocation15], 1 }
 0x953   :  { %8665 = vsyncpa [#allocation18], 1 }
 0x954   :  { %8666 = vsyncpa [#allocation21], 1 }
 0x955   :  { %8667 = vsyncpa [#allocation24], 1 }

</bundles_post_ra>
